<compile_context>
chip_gen: v7x
topology: tpu7x:2x2x1
jax: 0.10.0
libtpu: 0.0.40
codegen_flags: <defaults>
</compile_context>

<pallas_src>
import functools
import math

import jax
import jax.numpy as jnp
from jax.experimental import pallas as pl
from jax.experimental.pallas import tpu as pltpu


_VMEM_LIMIT = 32 * 1024 * 1024
_EB_FILTERS = (1, 3, 3, 3, 3, 1)  # compressai EntropyBottleneck default filters=(3,3,3,3)


def _ceil_to(x, m):
    return (x + m - 1) // m * m


def _k_tiling(k):
    """Padded K and K-tile size shared by weight packing and the matmul wrapper."""
    kp = _ceil_to(k, 128)
    if kp <= 1024:
        return kp, kp
    return _ceil_to(kp, 512), 512


def _pick_tm(m):
    m8 = _ceil_to(max(m, 1), 8)
    if m8 >= 1024:
        tm = 512            # >=2 M blocks -> megacore-shardable
    elif m8 >= 512:
        tm = 256
    else:
        tm = m8
    return tm, _ceil_to(m, tm)


# ----------------------------------------------------------------------------
# Pallas kernels
# ----------------------------------------------------------------------------

def _mm_bias_act_kernel(a_ref, b_ref, bias_ref, o_ref, acc_ref, *, act):
    """(tm, tk) bf16 @ (tk, Np) bf16 accumulated in f32; bias+act epilogue at last k."""
    @pl.when(pl.program_id(1) == 0)
    def _():
        acc_ref[...] = jnp.zeros_like(acc_ref)

    acc_ref[...] += jnp.dot(a_ref[...], b_ref[...],
                            preferred_element_type=jnp.float32)

    @pl.when(pl.program_id(1) == pl.num_programs(1) - 1)
    def _():
        r = acc_ref[...] + bias_ref[0:1, :]
        if act == "relu":
            r = jnp.maximum(r, 0.0)
        elif act == "leaky_relu":
            r = jnp.where(r >= 0.0, r, 0.01 * r)
        o_ref[...] = r


def pallas_matmul_bias_act(a, layer, act=None):
    """a: (M, K) (cast to bf16) against packed layer weights; returns f32 (M, N_real)."""
    wq, bq = layer["w"], layer["b"]
    kp, np_ = wq.shape
    tk = layer["tk"]
    m_rows, k_in = a.shape
    tm, mp = _pick_tm(m_rows)
    a = a.astype(jnp.bfloat16)
    if k_in < kp or mp > m_rows:
        a = jnp.pad(a, ((0, mp - m_rows), (0, kp - k_in)))
    nk = kp // tk
    out = pl.pallas_call(
        functools.partial(_mm_bias_act_kernel, act=act),
        out_shape=jax.ShapeDtypeStruct((mp, np_), jnp.float32),
        grid=(mp // tm, nk),
        in_specs=[
            pl.BlockSpec((tm, tk), lambda i, k: (i, k)),
            pl.BlockSpec((tk, np_), lambda i, k: (k, 0)),
            pl.BlockSpec((8, np_), lambda i, k: (0, 0)),
        ],
        out_specs=pl.BlockSpec((tm, np_), lambda i, k: (i, 0)),
        scratch_shapes=[pltpu.VMEM((tm, np_), jnp.float32)],
        compiler_params=pltpu.CompilerParams(
            dimension_semantics=("parallel", "arbitrary"),
            vmem_limit_bytes=_VMEM_LIMIT),
    )(a, wq, bq)
    return out[:m_rows, :layer["N"]]


def _gdn_kernel(x_ref, g_ref, beta_ref, o_ref, *, inverse):
    x = x_ref[...]
    xsq = (x * x).astype(jnp.bfloat16)
    norm = jnp.dot(xsq, g_ref[...], preferred_element_type=jnp.float32) + beta_ref[0:1, :]
    nf = jnp.sqrt(norm) if inverse else jax.lax.rsqrt(norm)
    o_ref[...] = x * nf


def pallas_gdn(x, gp, inverse=False):
    """GDN / IGDN on an NHWC tensor: y = x * rsqrt(x^2 @ gamma^T + beta) (sqrt if inverse)."""
    B, H, W, C = x.shape
    cp = gp["g"].shape[0]
    xm = x.reshape(-1, C)
    m_rows = xm.shape[0]
    tm, mp = _pick_tm(m_rows)
    x_p = jnp.pad(xm, ((0, mp - m_rows), (0, cp - C)))
    out = pl.pallas_call(
        functools.partial(_gdn_kernel, inverse=inverse),
        out_shape=jax.ShapeDtypeStruct((mp, cp), jnp.float32),
        grid=(mp // tm,),
        in_specs=[
            pl.BlockSpec((tm, cp), lambda i: (i, 0)),
            pl.BlockSpec((cp, cp), lambda i: (0, 0)),
            pl.BlockSpec((8, cp), lambda i: (0, 0)),
        ],
        out_specs=pl.BlockSpec((tm, cp), lambda i: (i, 0)),
        compiler_params=pltpu.CompilerParams(
            dimension_semantics=("parallel",),
            vmem_limit_bytes=_VMEM_LIMIT),
    )(x_p, gp["g"], gp["beta"])
    return out[:m_rows, :C].reshape(B, H, W, C)


def _sumsq_kernel(x_ref, o_ref):
    @pl.when(pl.program_id(0) == 0)
    def _():
        o_ref[...] = jnp.zeros_like(o_ref)
    x = x_ref[...]
    o_ref[...] += jnp.sum(x * x, axis=0, keepdims=True)


def pallas_l2_norm(x):
    """||x||_2 over all elements (torch.norm(x, 2)) via a tiled sum-of-squares reduction."""
    flat = x.reshape(-1).astype(jnp.float32)
    n = flat.shape[0]
    cols = 512
    rows = max(-(-n // cols), 1)
    tm = 256 if rows >= 256 else _ceil_to(rows, 8)
    rows_p = _ceil_to(rows, tm)
    buf = jnp.pad(flat, (0, rows_p * cols - n)).reshape(rows_p, cols)
    out = pl.pallas_call(
        _sumsq_kernel,
        out_shape=jax.ShapeDtypeStruct((1, cols), jnp.float32),
        grid=(rows_p // tm,),
        in_specs=[pl.BlockSpec((tm, cols), lambda i: (i, 0))],
        out_specs=pl.BlockSpec((1, cols), lambda i: (0, 0)),
        compiler_params=pltpu.CompilerParams(dimension_semantics=("arbitrary",)),
    )(buf)
    return jnp.sqrt(jnp.sum(out))


def _eb_likelihood_kernel(x_ref, p_ref, lik_ref):
    """Factorized-prior likelihood; x_ref stacks (v-0.5 ; v+0.5) along the sublane axis."""
    x = x_ref[...]
    p = p_ref[...]
    F = _EB_FILTERS

    cur = [x]
    r = 0
    for i in range(len(F) - 1):
        din, dout = F[i], F[i + 1]
        new = []
        for k in range(dout):
            acc = jnp.zeros_like(x)
            for j in range(din):
                acc = acc + p[r + k * din + j][None, :] * cur[j]
            acc = acc + p[r + din * dout + k][None, :]      # bias
            new.append(acc)
        r += din * dout + dout
        if i < len(F) - 2:
            for k in range(dout):
                f = p[r + k][None, :]                       # tanh(factor), precomputed
                new[k] = new[k] + f * jnp.tanh(new[k])
            r += dout
        cur = new
    logits = cur[0]

    L = lik_ref.shape[0]
    lower = logits[:L]
    upper = logits[L:]
    s = lower + upper
    sign = jnp.where(s > 0.0, -1.0, jnp.where(s < 0.0, 1.0, 0.0))   # == -sign(lower+upper)
    sigmoid = lambda t: 1.0 / (1.0 + jnp.exp(-t))
    lik = jnp.abs(sigmoid(sign * upper) - sigmoid(sign * lower))
    lik_ref[...] = jnp.maximum(lik, 1e-9)                   # likelihood lower bound


def entropy_bottleneck(z, eb):
    """z: NHWC. Eval-mode quantization around per-channel medians + factorized likelihood."""
    B, H, W, C = z.shape
    med = eb["medians"]                                      # (C,)
    z_hat = jnp.round(z - med) + med
    vm = z_hat.reshape(-1, C)
    L = vm.shape[0]
    Lp = _ceil_to(L, 8)
    Cp = eb["packed"].shape[1]
    x_p = jnp.zeros((2 * Lp, Cp), jnp.float32)
    x_p = x_p.at[:L, :C].set(vm - 0.5).at[Lp:Lp + L, :C].set(vm + 0.5)
    lik = pl.pallas_call(
        _eb_likelihood_kernel,
        out_shape=jax.ShapeDtypeStruct((Lp, Cp), jnp.float32),
        in_specs=[pl.BlockSpec(memory_space=pltpu.MemorySpace.VMEM),
                  pl.BlockSpec(memory_space=pltpu.MemorySpace.VMEM)],
        out_specs=pl.BlockSpec(memory_space=pltpu.MemorySpace.VMEM),
    )(x_p, eb["packed"])
    z_lik = lik[:L, :C].reshape(B, H, W, C)
    return z_hat, z_lik


# ----------------------------------------------------------------------------
# Conv / deconv glue (NHWC, bf16 im2col emitted directly in matmul layout)
# ----------------------------------------------------------------------------

def _conv_matmul(x, lp, K, stride, pad, OH, OW, act):
    B, H, W, C = x.shape
    Kp = lp["w"].shape[0]
    xb = jnp.pad(x.astype(jnp.bfloat16), ((0, 0), (pad, pad), (pad, pad), (0, 0)))
    taps = []
    for kh in range(K):
        for kw in range(K):
            taps.append(xb[:, kh:kh + stride * OH:stride, kw:kw + stride * OW:stride, :])
    extra = Kp - K * K * C
    if extra:
        taps.append(jnp.zeros((B, OH, OW, extra), jnp.bfloat16))
    a = jnp.concatenate(taps, axis=-1).reshape(B * OH * OW, Kp)
    return pallas_matmul_bias_act(a, lp, act=act)


def conv_nhwc(x, lp, stride, act=None):
    """nn.Conv2d(k, stride, padding=k//2) in NHWC layout."""
    B, H, W, C = x.shape
    K = lp["ksize"]
    pad = K // 2
    OH = (H + 2 * pad - K) // stride + 1
    OW = (W + 2 * pad - K) // stride + 1
    out = _conv_matmul(x, lp, K, stride, pad, OH, OW, act)
    return out.reshape(B, OH, OW, lp["N"])


def deconv_nhwc(x, lp, act=None):
    """nn.ConvTranspose2d(5, 2, padding=2, output_padding=1) via sub-pixel decomposition:
    one stride-1 3x3 matmul producing all 4 output phases, then interleave."""
    B, H, W, C = x.shape
    out = _conv_matmul(x, lp, 3, 1, 1, H, W, act)            # (B*H*W, 4*Cout)
    cout = lp["cout"]
    out = out.reshape(B, H, W, 2, 2, cout)
    out = out.transpose(0, 1, 3, 2, 4, 5).reshape(B, 2 * H, 2 * W, cout)
    return out


def gaussian_likelihood(y, scales_hat, means_hat):
    # TODO(synk): erf-based normal CDF stays in plain JAX (no guaranteed Mosaic erf lowering);
    # quantization / lower bounds follow compressai eval semantics exactly.
    scales = jnp.maximum(scales_hat, 0.11)
    values = jnp.abs(jnp.round(y - means_hat))
    const = -(2.0 ** -0.5)
    std_cum = lambda t: 0.5 * jax.scipy.special.erfc(const * t)
    upper = std_cum((0.5 - values) / scales)
    lower = std_cum((-0.5 - values) / scales)
    return jnp.maximum(upper - lower, 1e-9)


# ----------------------------------------------------------------------------
# Parameter packing (done once, outside the jitted forward)
# ----------------------------------------------------------------------------

def _pack_conv(w, b):
    cout, cin, K, _ = w.shape
    wm = jnp.transpose(w, (2, 3, 1, 0)).reshape(K * K * cin, cout)
    kdim = K * K * cin
    kp, tk = _k_tiling(kdim)
    np_ = _ceil_to(cout, 128)
    wq = jnp.zeros((kp, np_), jnp.bfloat16).at[:kdim, :cout].set(wm.astype(jnp.bfloat16))
    bq = jnp.zeros((8, np_), jnp.float32).at[0, :cout].set(b)
    return {"w": wq, "b": bq, "N": cout, "tk": tk, "ksize": K}


def _pack_deconv(w, b):
    """ConvTranspose2d(5, stride=2, pad=2, out_pad=1) -> 4-phase 3x3 weight matrix."""
    cin, cout, K, _ = w.shape
    wph = jnp.zeros((3, 3, cin, 4, cout), jnp.float32)
    for ry in range(2):
        for rx in range(2):
            ph = ry * 2 + rx
            for oy in range(3):
                ky = (4 + ry) - 2 * oy
                if not (0 <= ky < K):
                    continue
                for ox in range(3):
                    kx = (4 + rx) - 2 * ox
                    if not (0 <= kx < K):
                        continue
                    wph = wph.at[oy, ox, :, ph, :].set(w[:, :, ky, kx])
    wm = wph.reshape(9 * cin, 4 * cout)
    kdim = 9 * cin
    kp, tk = _k_tiling(kdim)
    n4 = 4 * cout
    np_ = _ceil_to(n4, 128)
    wq = jnp.zeros((kp, np_), jnp.bfloat16).at[:kdim, :n4].set(wm.astype(jnp.bfloat16))
    bq = jnp.zeros((8, np_), jnp.float32).at[0, :n4].set(jnp.tile(b, 4))
    return {"w": wq, "b": bq, "N": n4, "cout": cout, "tk": tk}


def _pack_gdn(g):
    C = g["gamma"].shape[0]
    cp = _ceil_to(C, 128)
    gq = jnp.zeros((cp, cp), jnp.bfloat16).at[:C, :C].set(g["gamma"].T.astype(jnp.bfloat16))
    bq = jnp.ones((8, cp), jnp.float32).at[0, :C].set(g["beta"])  # ones pad -> rsqrt safe
    return {"g": gq, "beta": bq, "C": C}


def _pack_eb_params(eb):
    F = _EB_FILTERS
    C = eb["matrices"][0].shape[0]
    rows = []
    for i in range(len(F) - 1):
        din, dout = F[i], F[i + 1]
        m_sp = jnp.logaddexp(eb["matrices"][i], 0.0)     # softplus reparam
        rows.append(m_sp.reshape(C, dout * din).T)       # row index = k*din + j
        rows.append(eb["biases"][i].reshape(C, dout).T)
        if i < len(F) - 2:
            rows.append(jnp.tanh(eb["factors"][i]).reshape(C, dout).T)
    return jnp.concatenate(rows, axis=0)                 # (58, C)


def _pack_eb(eb):
    packed = _pack_eb_params(eb)
    R, C = packed.shape
    cp = _ceil_to(C, 128)
    rp = _ceil_to(R, 8)
    p_p = jnp.zeros((rp, cp), jnp.float32).at[:R, :C].set(packed)
    return {"packed": p_p, "medians": eb["quantiles"][:, 0, 1], "C": C}


def pack_params(p):
    pk = {}
    pk["g_a"] = [
        _pack_conv(p["g_a"][0]["w"], p["g_a"][0]["b"]), _pack_gdn(p["g_a"][1]),
        _pack_conv(p["g_a"][2]["w"], p["g_a"][2]["b"]), _pack_gdn(p["g_a"][3]),
        _pack_conv(p["g_a"][4]["w"], p["g_a"][4]["b"]), _pack_gdn(p["g_a"][5]),
        _pack_conv(p["g_a"][6]["w"], p["g_a"][6]["b"]),
    ]
    pk["g_s"] = [
        _pack_deconv(p["g_s"][0]["w"], p["g_s"][0]["b"]), _pack_gdn(p["g_s"][1]),
        _pack_deconv(p["g_s"][2]["w"], p["g_s"][2]["b"]), _pack_gdn(p["g_s"][3]),
        _pack_deconv(p["g_s"][4]["w"], p["g_s"][4]["b"]), _pack_gdn(p["g_s"][5]),
        _pack_deconv(p["g_s"][6]["w"], p["g_s"][6]["b"]),
    ]
    pk["h_a"] = [_pack_conv(l["w"], l["b"]) for l in p["h_a"]]
    pk["h_s"] = [
        _pack_deconv(p["h_s"][0]["w"], p["h_s"][0]["b"]),
        _pack_deconv(p["h_s"][1]["w"], p["h_s"][1]["b"]),
        _pack_conv(p["h_s"][2]["w"], p["h_s"][2]["b"]),
    ]
    pk["entropy_bottleneck"] = _pack_eb(p["entropy_bottleneck"])
    pk["y_predictor"] = [
        _pack_conv(p["y_predictor"]["w1"], p["y_predictor"]["b1"]),
        _pack_conv(p["y_predictor"]["w2"], p["y_predictor"]["b2"]),
    ]
    return pk


# ----------------------------------------------------------------------------
# Sub-networks (all NHWC)
# ----------------------------------------------------------------------------

def g_a(p, x):
    x = conv_nhwc(x, p[0], 2)
    x = pallas_gdn(x, p[1], inverse=False)
    x = conv_nhwc(x, p[2], 2)
    x = pallas_gdn(x, p[3], inverse=False)
    x = conv_nhwc(x, p[4], 2)
    x = pallas_gdn(x, p[5], inverse=False)
    return conv_nhwc(x, p[6], 2)


def g_s(p, x):
    x = deconv_nhwc(x, p[0])
    x = pallas_gdn(x, p[1], inverse=True)
    x = deconv_nhwc(x, p[2])
    x = pallas_gdn(x, p[3], inverse=True)
    x = deconv_nhwc(x, p[4])
    x = pallas_gdn(x, p[5], inverse=True)
    return deconv_nhwc(x, p[6])


def h_a(p, x):
    x = conv_nhwc(x, p[0], 1, act="leaky_relu")
    x = conv_nhwc(x, p[1], 2, act="leaky_relu")
    return conv_nhwc(x, p[2], 2)


def h_s(p, x):
    x = deconv_nhwc(x, p[0], act="leaky_relu")
    x = deconv_nhwc(x, p[1], act="leaky_relu")
    return conv_nhwc(x, p[2], 1)


def y_predictor(p, y_in):
    # TODO(synk): Unet(M, M) definition is not provided in the source; a 2-layer conv
    # stand-in is used and the (all-zero) time conditioning is ignored.
    h = conv_nhwc(y_in, p[0], 1, act="leaky_relu")
    return conv_nhwc(h, p[1], 1)


# ----------------------------------------------------------------------------
# Full forward (MeanScaleHyperprior.forward, eval-mode quantization)
# ----------------------------------------------------------------------------

def forward(pp, x_nchw):
    x = jnp.transpose(x_nchw.astype(jnp.float32), (0, 2, 3, 1))   # NCHW -> NHWC once

    y = g_a(pp["g_a"], x)
    z = h_a(pp["h_a"], y)

    y_round = jnp.round(y)
    q_norm = pallas_l2_norm(y - y_round)

    norm_list = []
    y_cur = y_round
    y_predict = y_cur
    for _i in range(0, 2):
        # TODO(synk): source indexes y_predictor_list[i] but the ModuleList holds a single
        # Unet (i=1 would raise IndexError); the single predictor is reused here.
        y_predict = y_predictor(pp["y_predictor"], y_cur) + y_cur
        norm_list.append(pallas_l2_norm(y_predict - y))   # y.detach() == y in value terms
        y_cur = y_predict                                 # .detach() is a value no-op

    z_hat, z_likelihoods = entropy_bottleneck(z, pp["entropy_bottleneck"])
    gaussian_params = h_s(pp["h_s"], z_hat)
    M = y.shape[-1]
    scales_hat = gaussian_params[..., :M]                 # chunk(2, channel dim)
    means_hat = gaussian_params[..., M:]
    y_likelihoods = gaussian_likelihood(y, scales_hat, means_hat)

    x_hat = g_s(pp["g_s"], y_predict)                     # y_hat = y_predict.detach()

    to_nchw = lambda t: jnp.transpose(t, (0, 3, 1, 2))
    return {
        "x_hat": to_nchw(x_hat),
        "likelihoods": {"y": to_nchw(y_likelihoods), "z": to_nchw(z_likelihoods)},
        "y_norm1": norm_list[0],
        "norm_sum": norm_list[0] + norm_list[1],
        "q_norm": q_norm,
    }


# ----------------------------------------------------------------------------
# Deterministic parameter initialization (shapes per module __init__)
# ----------------------------------------------------------------------------

def init_params(key, N, M):
    keys = iter(jax.random.split(key, 64))

    def conv_w(cout, cin, k):
        return 0.05 * jax.random.normal(next(keys), (cout, cin, k, k), jnp.float32)

    def deconv_w(cin, cout, k):
        return 0.05 * jax.random.normal(next(keys), (cin, cout, k, k), jnp.float32)

    def bias(c):
        return 0.01 * jax.random.normal(next(keys), (c,), jnp.float32)

    def gdn_p(c):
        return {"gamma": 0.1 * jnp.eye(c, dtype=jnp.float32),
                "beta": jnp.ones((c,), jnp.float32)}

    p = {}
    p["g_a"] = [
        {"w": conv_w(N, 3, 5), "b": bias(N)}, gdn_p(N),
        {"w": conv_w(N, N, 5), "b": bias(N)}, gdn_p(N),
        {"w": conv_w(N, N, 5), "b": bias(N)}, gdn_p(N),
        {"w": conv_w(M, N, 5), "b": bias(M)},
    ]
    p["g_s"] = [
        {"w": deconv_w(M, N, 5), "b": bias(N)}, gdn_p(N),
        {"w": deconv_w(N, N, 5), "b": bias(N)}, gdn_p(N),
        {"w": deconv_w(N, N, 5), "b": bias(N)}, gdn_p(N),
        {"w": deconv_w(N, 3, 5), "b": bias(3)},
    ]
    p["h_a"] = [
        {"w": conv_w(N, M, 3), "b": bias(N)},
        {"w": conv_w(N, N, 5), "b": bias(N)},
        {"w": conv_w(N, N, 5), "b": bias(N)},
    ]
    M32 = M * 3 // 2
    p["h_s"] = [
        {"w": deconv_w(N, M, 5), "b": bias(M)},
        {"w": deconv_w(M, M32, 5), "b": bias(M32)},
        {"w": conv_w(2 * M, M32, 3), "b": bias(2 * M)},
    ]
    # EntropyBottleneck(N): filters=(3,3,3,3), init_scale=10 (compressai defaults)
    F = _EB_FILTERS
    scale = 10.0 ** (1.0 / (len(F) - 1))
    eb = {"matrices": [], "biases": [], "factors": []}
    for i in range(len(F) - 1):
        init = math.log(math.expm1(1.0 / scale / F[i + 1]))
        eb["matrices"].append(jnp.full((N, F[i + 1], F[i]), init, jnp.float32))
        eb["biases"].append(jax.random.uniform(next(keys), (N, F[i + 1], 1),
                                               jnp.float32, -0.5, 0.5))
        if i < len(F) - 2:
            eb["factors"].append(jnp.zeros((N, F[i + 1], 1), jnp.float32))
    eb["quantiles"] = jnp.tile(jnp.array([[[-10.0, 0.0, 10.0]]], jnp.float32), (N, 1, 1))
    p["entropy_bottleneck"] = eb
    p["y_predictor"] = {"w1": conv_w(M, M, 3), "b1": bias(M),
                        "w2": conv_w(M, M, 3), "b2": bias(M)}
    return p


if __name__ == "__main__":
    N, M = 8, 12
    key = jax.random.PRNGKey(0)
    pkey, xkey = jax.random.split(key)
    raw_params = init_params(pkey, N, M)
    packed = pack_params(raw_params)          # one-time weight packing, outside jit

    # spatial must be a multiple of the model's downsampling factor (64)
    x = jax.random.uniform(xkey, (1, 3, 64, 64), jnp.float32)

    fwd = jax.jit(functools.partial(forward, packed))
    out = jax.block_until_ready(fwd(x))

    assert out["x_hat"].shape == (1, 3, 64, 64)
    assert out["likelihoods"]["y"].shape == (1, M, 4, 4)
    assert out["likelihoods"]["z"].shape == (1, N, 1, 1)
    assert out["q_norm"].shape == () and out["norm_sum"].shape == ()
    print("KERNEL_OK")
</pallas_src>

<mosaic_0001>
module attributes {stable_mosaic.version = 11 : i64} {
  func.func @_mm_bias_act_kernel(%arg0: i32, %arg1: i32, %arg2: memref<512x128xbf16, #tpu.memory_space<vmem>>, %arg3: memref<128x128xbf16, #tpu.memory_space<vmem>>, %arg4: memref<8x128xf32, #tpu.memory_space<vmem>>, %arg5: memref<512x128xf32, #tpu.memory_space<vmem>>, %arg6: memref<512x128xf32, #tpu.memory_space<vmem>>) attributes {dimension_semantics = [#tpu.dimension_semantics<parallel>, #tpu.dimension_semantics<arbitrary>], iteration_bounds = array<i64: 2, 1>, scalar_prefetch = 0 : i64, scratch_operands = 1 : i64, tpu.core_type = #tpu.core_type<tc>, window_params = [{transform_indices = @transform_0, window_bounds = array<i64: 512, 128>}, {transform_indices = @transform_1, window_bounds = array<i64: 128, 128>}, {pipeline_mode = #tpu.pipeline_mode<synchronous>, transform_indices = @transform_2, window_bounds = array<i64: 8, 128>}, {transform_indices = @transform_3, window_bounds = array<i64: 512, 128>}]} {
    %c0_i32 = arith.constant 0 : i32
    %0 = arith.cmpi eq, %arg1, %c0_i32 : i32
    %1 = arith.extui %0 : i1 to i32
    %c0_i32_0 = arith.constant 0 : i32
    %2 = arith.cmpi ne, %1, %c0_i32_0 : i32
    scf.if %2 {
      %cst_10 = arith.constant 0.000000e+00 : f32
      %12 = vector.broadcast %cst_10 : f32 to vector<512x128xf32>
      %c0_11 = arith.constant 0 : index
      %c0_12 = arith.constant 0 : index
      %13 = vector.load %arg6[%c0_11, %c0_12] : memref<512x128xf32, #tpu.memory_space<vmem>>, vector<512x128xf32>
      tpu.vector_store %arg6[%c0_11, %c0_12], %12 {strides = array<i32>} : memref<512x128xf32, #tpu.memory_space<vmem>>, vector<512x128xf32>,
    } else {
    }
    %c0 = arith.constant 0 : index
    %c0_1 = arith.constant 0 : index
    %3 = vector.load %arg6[%c0, %c0_1] : memref<512x128xf32, #tpu.memory_space<vmem>>, vector<512x128xf32>
    %c0_2 = arith.constant 0 : index
    %c0_3 = arith.constant 0 : index
    %4 = vector.load %arg2[%c0_2, %c0_3] : memref<512x128xbf16, #tpu.memory_space<vmem>>, vector<512x128xbf16>
    %c0_4 = arith.constant 0 : index
    %c0_5 = arith.constant 0 : index
    %5 = vector.load %arg3[%c0_4, %c0_5] : memref<128x128xbf16, #tpu.memory_space<vmem>>, vector<128x128xbf16>
    %cst = arith.constant dense<0.000000e+00> : vector<512x128xf32>
    %6 = tpu.matmul %4, %5, %cst {dimension_numbers = #tpu.dot_dimension_numbers<[1], [0], [0], [1], [0, 0, 1, 1], [], []>} : vector<512x128xbf16>, vector<128x128xbf16>, vector<512x128xf32> -> vector<512x128xf32>
    %7 = arith.addf %3, %6 : vector<512x128xf32>
    %c0_6 = arith.constant 0 : index
    %c0_7 = arith.constant 0 : index
    %8 = vector.load %arg6[%c0_6, %c0_7] : memref<512x128xf32, #tpu.memory_space<vmem>>, vector<512x128xf32>
    tpu.vector_store %arg6[%c0_6, %c0_7], %7 {strides = array<i32>} : memref<512x128xf32, #tpu.memory_space<vmem>>, vector<512x128xf32>,
    %c0_i32_8 = arith.constant 0 : i32
    %9 = arith.cmpi eq, %arg1, %c0_i32_8 : i32
    %10 = arith.extui %9 : i1 to i32
    %c0_i32_9 = arith.constant 0 : i32
    %11 = arith.cmpi ne, %10, %c0_i32_9 : i32
    scf.if %11 {
      %c0_10 = arith.constant 0 : index
      %c0_11 = arith.constant 0 : index
      %12 = vector.load %arg6[%c0_10, %c0_11] : memref<512x128xf32, #tpu.memory_space<vmem>>, vector<512x128xf32>
      %c0_12 = arith.constant 0 : index
      %c0_13 = arith.constant 0 : index
      %13 = vector.load %arg4[%c0_12, %c0_13] : memref<8x128xf32, #tpu.memory_space<vmem>>, vector<1x128xf32>
      %14 = vector.broadcast %13 : vector<1x128xf32> to vector<512x128xf32>
      %15 = arith.addf %12, %14 : vector<512x128xf32>
      %c0_14 = arith.constant 0 : index
      %c0_15 = arith.constant 0 : index
      %16 = vector.load %arg5[%c0_14, %c0_15] : memref<512x128xf32, #tpu.memory_space<vmem>>, vector<512x128xf32>
      tpu.vector_store %arg5[%c0_14, %c0_15], %15 {strides = array<i32>} : memref<512x128xf32, #tpu.memory_space<vmem>>, vector<512x128xf32>,
    } else {
    }
    return
  }
  func.func @transform_0(%arg0: i32, %arg1: i32) -> (i32, i32) {
    %c0_i32 = arith.constant 0 : i32
    return %arg0, %arg1 : i32, i32
  }
  func.func @transform_1(%arg0: i32, %arg1: i32) -> (i32, i32) {
    %c0_i32 = arith.constant 0 : i32
    %c0_i32_0 = arith.constant 0 : i32
    return %arg1, %c0_i32 : i32, i32
  }
  func.func @transform_2(%arg0: i32, %arg1: i32) -> (i32, i32) {
    %c0_i32 = arith.constant 0 : i32
    %c0_i32_0 = arith.constant 0 : i32
    %c0_i32_1 = arith.constant 0 : i32
    return %c0_i32, %c0_i32_0 : i32, i32
  }
  func.func @transform_3(%arg0: i32, %arg1: i32) -> (i32, i32) {
    %c0_i32 = arith.constant 0 : i32
    %c0_i32_0 = arith.constant 0 : i32
    return %arg0, %c0_i32 : i32, i32
  }
}

module attributes {stable_mosaic.version = 11 : i64} {
  func.func @_gdn_kernel(%arg0: i32, %arg1: memref<512x128xf32, #tpu.memory_space<vmem>>, %arg2: memref<128x128xbf16, #tpu.memory_space<vmem>>, %arg3: memref<8x128xf32, #tpu.memory_space<vmem>>, %arg4: memref<512x128xf32, #tpu.memory_space<vmem>>) attributes {dimension_semantics = [#tpu.dimension_semantics<parallel>], iteration_bounds = array<i64: 2>, scalar_prefetch = 0 : i64, scratch_operands = 0 : i64, tpu.core_type = #tpu.core_type<tc>, window_params = [{transform_indices = @transform_0, window_bounds = array<i64: 512, 128>}, {pipeline_mode = #tpu.pipeline_mode<synchronous>, transform_indices = @transform_1, window_bounds = array<i64: 128, 128>}, {pipeline_mode = #tpu.pipeline_mode<synchronous>, transform_indices = @transform_2, window_bounds = array<i64: 8, 128>}, {transform_indices = @transform_3, window_bounds = array<i64: 512, 128>}]} {
    %c0 = arith.constant 0 : index
    %c0_0 = arith.constant 0 : index
    %0 = vector.load %arg1[%c0, %c0_0] : memref<512x128xf32, #tpu.memory_space<vmem>>, vector<512x128xf32>
    %1 = arith.mulf %0, %0 : vector<512x128xf32>
    %2 = arith.truncf %1 : vector<512x128xf32> to vector<512x128xbf16>
    %c0_1 = arith.constant 0 : index
    %c0_2 = arith.constant 0 : index
    %3 = vector.load %arg2[%c0_1, %c0_2] : memref<128x128xbf16, #tpu.memory_space<vmem>>, vector<128x128xbf16>
    %cst = arith.constant dense<0.000000e+00> : vector<512x128xf32>
    %4 = tpu.matmul %2, %3, %cst {dimension_numbers = #tpu.dot_dimension_numbers<[1], [0], [0], [1], [0, 0, 1, 1], [], []>} : vector<512x128xbf16>, vector<128x128xbf16>, vector<512x128xf32> -> vector<512x128xf32>
    %c0_3 = arith.constant 0 : index
    %c0_4 = arith.constant 0 : index
    %5 = vector.load %arg3[%c0_3, %c0_4] : memref<8x128xf32, #tpu.memory_space<vmem>>, vector<1x128xf32>
    %6 = vector.broadcast %5 : vector<1x128xf32> to vector<512x128xf32>
    %7 = arith.addf %4, %6 : vector<512x128xf32>
    %8 = math.rsqrt %7 : vector<512x128xf32>
    %9 = arith.mulf %0, %8 : vector<512x128xf32>
    %c0_5 = arith.constant 0 : index
    %c0_6 = arith.constant 0 : index
    %10 = vector.load %arg4[%c0_5, %c0_6] : memref<512x128xf32, #tpu.memory_space<vmem>>, vector<512x128xf32>
    tpu.vector_store %arg4[%c0_5, %c0_6], %9 {strides = array<i32>} : memref<512x128xf32, #tpu.memory_space<vmem>>, vector<512x128xf32>,
    return
  }
  func.func @transform_0(%arg0: i32) -> (i32, i32) {
    %c0_i32 = arith.constant 0 : i32
    %c0_i32_0 = arith.constant 0 : i32
    return %arg0, %c0_i32 : i32, i32
  }
  func.func @transform_1(%arg0: i32) -> (i32, i32) {
    %c0_i32 = arith.constant 0 : i32
    %c0_i32_0 = arith.constant 0 : i32
    %c0_i32_1 = arith.constant 0 : i32
    return %c0_i32, %c0_i32_0 : i32, i32
  }
  func.func @transform_2(%arg0: i32) -> (i32, i32) {
    %c0_i32 = arith.constant 0 : i32
    %c0_i32_0 = arith.constant 0 : i32
    %c0_i32_1 = arith.constant 0 : i32
    return %c0_i32, %c0_i32_0 : i32, i32
  }
  func.func @transform_3(%arg0: i32) -> (i32, i32) {
    %c0_i32 = arith.constant 0 : i32
    %c0_i32_0 = arith.constant 0 : i32
    return %arg0, %c0_i32 : i32, i32
  }
}

module attributes {stable_mosaic.version = 11 : i64} {
  func.func @_gdn_kernel(%arg0: i32, %arg1: memref<256x128xf32, #tpu.memory_space<vmem>>, %arg2: memref<128x128xbf16, #tpu.memory_space<vmem>>, %arg3: memref<8x128xf32, #tpu.memory_space<vmem>>, %arg4: memref<256x128xf32, #tpu.memory_space<vmem>>) attributes {dimension_semantics = [#tpu.dimension_semantics<parallel>], iteration_bounds = array<i64: 1>, scalar_prefetch = 0 : i64, scratch_operands = 0 : i64, tpu.core_type = #tpu.core_type<tc>, window_params = [{transform_indices = @transform_0, window_bounds = array<i64: 256, 128>}, {pipeline_mode = #tpu.pipeline_mode<synchronous>, transform_indices = @transform_1, window_bounds = array<i64: 128, 128>}, {pipeline_mode = #tpu.pipeline_mode<synchronous>, transform_indices = @transform_2, window_bounds = array<i64: 8, 128>}, {transform_indices = @transform_3, window_bounds = array<i64: 256, 128>}]} {
    %c0 = arith.constant 0 : index
    %c0_0 = arith.constant 0 : index
    %0 = vector.load %arg1[%c0, %c0_0] : memref<256x128xf32, #tpu.memory_space<vmem>>, vector<256x128xf32>
    %1 = arith.mulf %0, %0 : vector<256x128xf32>
    %2 = arith.truncf %1 : vector<256x128xf32> to vector<256x128xbf16>
    %c0_1 = arith.constant 0 : index
    %c0_2 = arith.constant 0 : index
    %3 = vector.load %arg2[%c0_1, %c0_2] : memref<128x128xbf16, #tpu.memory_space<vmem>>, vector<128x128xbf16>
    %cst = arith.constant dense<0.000000e+00> : vector<256x128xf32>
    %4 = tpu.matmul %2, %3, %cst {dimension_numbers = #tpu.dot_dimension_numbers<[1], [0], [0], [1], [0, 0, 1, 1], [], []>} : vector<256x128xbf16>, vector<128x128xbf16>, vector<256x128xf32> -> vector<256x128xf32>
    %c0_3 = arith.constant 0 : index
    %c0_4 = arith.constant 0 : index
    %5 = vector.load %arg3[%c0_3, %c0_4] : memref<8x128xf32, #tpu.memory_space<vmem>>, vector<1x128xf32>
    %6 = vector.broadcast %5 : vector<1x128xf32> to vector<256x128xf32>
    %7 = arith.addf %4, %6 : vector<256x128xf32>
    %8 = math.rsqrt %7 : vector<256x128xf32>
    %9 = arith.mulf %0, %8 : vector<256x128xf32>
    %c0_5 = arith.constant 0 : index
    %c0_6 = arith.constant 0 : index
    %10 = vector.load %arg4[%c0_5, %c0_6] : memref<256x128xf32, #tpu.memory_space<vmem>>, vector<256x128xf32>
    tpu.vector_store %arg4[%c0_5, %c0_6], %9 {strides = array<i32>} : memref<256x128xf32, #tpu.memory_space<vmem>>, vector<256x128xf32>,
    return
  }
  func.func @transform_0(%arg0: i32) -> (i32, i32) {
    %c0_i32 = arith.constant 0 : i32
    %c0_i32_0 = arith.constant 0 : i32
    return %arg0, %c0_i32 : i32, i32
  }
  func.func @transform_1(%arg0: i32) -> (i32, i32) {
    %c0_i32 = arith.constant 0 : i32
    %c0_i32_0 = arith.constant 0 : i32
    %c0_i32_1 = arith.constant 0 : i32
    return %c0_i32, %c0_i32_0 : i32, i32
  }
  func.func @transform_2(%arg0: i32) -> (i32, i32) {
    %c0_i32 = arith.constant 0 : i32
    %c0_i32_0 = arith.constant 0 : i32
    %c0_i32_1 = arith.constant 0 : i32
    return %c0_i32, %c0_i32_0 : i32, i32
  }
  func.func @transform_3(%arg0: i32) -> (i32, i32) {
    %c0_i32 = arith.constant 0 : i32
    %c0_i32_0 = arith.constant 0 : i32
    return %arg0, %c0_i32 : i32, i32
  }
}

module attributes {stable_mosaic.version = 11 : i64} {
  func.func @_mm_bias_act_kernel(%arg0: i32, %arg1: i32, %arg2: memref<256x256xbf16, #tpu.memory_space<vmem>>, %arg3: memref<256x128xbf16, #tpu.memory_space<vmem>>, %arg4: memref<8x128xf32, #tpu.memory_space<vmem>>, %arg5: memref<256x128xf32, #tpu.memory_space<vmem>>, %arg6: memref<256x128xf32, #tpu.memory_space<vmem>>) attributes {dimension_semantics = [#tpu.dimension_semantics<parallel>, #tpu.dimension_semantics<arbitrary>], iteration_bounds = array<i64: 1, 1>, scalar_prefetch = 0 : i64, scratch_operands = 1 : i64, tpu.core_type = #tpu.core_type<tc>, window_params = [{transform_indices = @transform_0, window_bounds = array<i64: 256, 256>}, {transform_indices = @transform_1, window_bounds = array<i64: 256, 128>}, {pipeline_mode = #tpu.pipeline_mode<synchronous>, transform_indices = @transform_2, window_bounds = array<i64: 8, 128>}, {transform_indices = @transform_3, window_bounds = array<i64: 256, 128>}]} {
    %c0_i32 = arith.constant 0 : i32
    %0 = arith.cmpi eq, %arg1, %c0_i32 : i32
    %1 = arith.extui %0 : i1 to i32
    %c0_i32_0 = arith.constant 0 : i32
    %2 = arith.cmpi ne, %1, %c0_i32_0 : i32
    scf.if %2 {
      %cst_10 = arith.constant 0.000000e+00 : f32
      %12 = vector.broadcast %cst_10 : f32 to vector<256x128xf32>
      %c0_11 = arith.constant 0 : index
      %c0_12 = arith.constant 0 : index
      %13 = vector.load %arg6[%c0_11, %c0_12] : memref<256x128xf32, #tpu.memory_space<vmem>>, vector<256x128xf32>
      tpu.vector_store %arg6[%c0_11, %c0_12], %12 {strides = array<i32>} : memref<256x128xf32, #tpu.memory_space<vmem>>, vector<256x128xf32>,
    } else {
    }
    %c0 = arith.constant 0 : index
    %c0_1 = arith.constant 0 : index
    %3 = vector.load %arg6[%c0, %c0_1] : memref<256x128xf32, #tpu.memory_space<vmem>>, vector<256x128xf32>
    %c0_2 = arith.constant 0 : index
    %c0_3 = arith.constant 0 : index
    %4 = vector.load %arg2[%c0_2, %c0_3] : memref<256x256xbf16, #tpu.memory_space<vmem>>, vector<256x256xbf16>
    %c0_4 = arith.constant 0 : index
    %c0_5 = arith.constant 0 : index
    %5 = vector.load %arg3[%c0_4, %c0_5] : memref<256x128xbf16, #tpu.memory_space<vmem>>, vector<256x128xbf16>
    %cst = arith.constant dense<0.000000e+00> : vector<256x128xf32>
    %6 = tpu.matmul %4, %5, %cst {dimension_numbers = #tpu.dot_dimension_numbers<[1], [0], [0], [1], [0, 0, 1, 1], [], []>} : vector<256x256xbf16>, vector<256x128xbf16>, vector<256x128xf32> -> vector<256x128xf32>
    %7 = arith.addf %3, %6 : vector<256x128xf32>
    %c0_6 = arith.constant 0 : index
    %c0_7 = arith.constant 0 : index
    %8 = vector.load %arg6[%c0_6, %c0_7] : memref<256x128xf32, #tpu.memory_space<vmem>>, vector<256x128xf32>
    tpu.vector_store %arg6[%c0_6, %c0_7], %7 {strides = array<i32>} : memref<256x128xf32, #tpu.memory_space<vmem>>, vector<256x128xf32>,
    %c0_i32_8 = arith.constant 0 : i32
    %9 = arith.cmpi eq, %arg1, %c0_i32_8 : i32
    %10 = arith.extui %9 : i1 to i32
    %c0_i32_9 = arith.constant 0 : i32
    %11 = arith.cmpi ne, %10, %c0_i32_9 : i32
    scf.if %11 {
      %c0_10 = arith.constant 0 : index
      %c0_11 = arith.constant 0 : index
      %12 = vector.load %arg6[%c0_10, %c0_11] : memref<256x128xf32, #tpu.memory_space<vmem>>, vector<256x128xf32>
      %c0_12 = arith.constant 0 : index
      %c0_13 = arith.constant 0 : index
      %13 = vector.load %arg4[%c0_12, %c0_13] : memref<8x128xf32, #tpu.memory_space<vmem>>, vector<1x128xf32>
      %14 = vector.broadcast %13 : vector<1x128xf32> to vector<256x128xf32>
      %15 = arith.addf %12, %14 : vector<256x128xf32>
      %c0_14 = arith.constant 0 : index
      %c0_15 = arith.constant 0 : index
      %16 = vector.load %arg5[%c0_14, %c0_15] : memref<256x128xf32, #tpu.memory_space<vmem>>, vector<256x128xf32>
      tpu.vector_store %arg5[%c0_14, %c0_15], %15 {strides = array<i32>} : memref<256x128xf32, #tpu.memory_space<vmem>>, vector<256x128xf32>,
    } else {
    }
    return
  }
  func.func @transform_0(%arg0: i32, %arg1: i32) -> (i32, i32) {
    %c0_i32 = arith.constant 0 : i32
    return %arg0, %arg1 : i32, i32
  }
  func.func @transform_1(%arg0: i32, %arg1: i32) -> (i32, i32) {
    %c0_i32 = arith.constant 0 : i32
    %c0_i32_0 = arith.constant 0 : i32
    return %arg1, %c0_i32 : i32, i32
  }
  func.func @transform_2(%arg0: i32, %arg1: i32) -> (i32, i32) {
    %c0_i32 = arith.constant 0 : i32
    %c0_i32_0 = arith.constant 0 : i32
    %c0_i32_1 = arith.constant 0 : i32
    return %c0_i32, %c0_i32_0 : i32, i32
  }
  func.func @transform_3(%arg0: i32, %arg1: i32) -> (i32, i32) {
    %c0_i32 = arith.constant 0 : i32
    %c0_i32_0 = arith.constant 0 : i32
    return %arg0, %c0_i32 : i32, i32
  }
}

module attributes {stable_mosaic.version = 11 : i64} {
  func.func @_mm_bias_act_kernel(%arg0: i32, %arg1: i32, %arg2: memref<64x256xbf16, #tpu.memory_space<vmem>>, %arg3: memref<256x128xbf16, #tpu.memory_space<vmem>>, %arg4: memref<8x128xf32, #tpu.memory_space<vmem>>, %arg5: memref<64x128xf32, #tpu.memory_space<vmem>>, %arg6: memref<64x128xf32, #tpu.memory_space<vmem>>) attributes {dimension_semantics = [#tpu.dimension_semantics<parallel>, #tpu.dimension_semantics<arbitrary>], iteration_bounds = array<i64: 1, 1>, scalar_prefetch = 0 : i64, scratch_operands = 1 : i64, tpu.core_type = #tpu.core_type<tc>, window_params = [{transform_indices = @transform_0, window_bounds = array<i64: 64, 256>}, {transform_indices = @transform_1, window_bounds = array<i64: 256, 128>}, {pipeline_mode = #tpu.pipeline_mode<synchronous>, transform_indices = @transform_2, window_bounds = array<i64: 8, 128>}, {transform_indices = @transform_3, window_bounds = array<i64: 64, 128>}]} {
    %c0_i32 = arith.constant 0 : i32
    %0 = arith.cmpi eq, %arg1, %c0_i32 : i32
    %1 = arith.extui %0 : i1 to i32
    %c0_i32_0 = arith.constant 0 : i32
    %2 = arith.cmpi ne, %1, %c0_i32_0 : i32
    scf.if %2 {
      %cst_10 = arith.constant 0.000000e+00 : f32
      %12 = vector.broadcast %cst_10 : f32 to vector<64x128xf32>
      %c0_11 = arith.constant 0 : index
      %c0_12 = arith.constant 0 : index
      %13 = vector.load %arg6[%c0_11, %c0_12] : memref<64x128xf32, #tpu.memory_space<vmem>>, vector<64x128xf32>
      tpu.vector_store %arg6[%c0_11, %c0_12], %12 {strides = array<i32>} : memref<64x128xf32, #tpu.memory_space<vmem>>, vector<64x128xf32>,
    } else {
    }
    %c0 = arith.constant 0 : index
    %c0_1 = arith.constant 0 : index
    %3 = vector.load %arg6[%c0, %c0_1] : memref<64x128xf32, #tpu.memory_space<vmem>>, vector<64x128xf32>
    %c0_2 = arith.constant 0 : index
    %c0_3 = arith.constant 0 : index
    %4 = vector.load %arg2[%c0_2, %c0_3] : memref<64x256xbf16, #tpu.memory_space<vmem>>, vector<64x256xbf16>
    %c0_4 = arith.constant 0 : index
    %c0_5 = arith.constant 0 : index
    %5 = vector.load %arg3[%c0_4, %c0_5] : memref<256x128xbf16, #tpu.memory_space<vmem>>, vector<256x128xbf16>
    %cst = arith.constant dense<0.000000e+00> : vector<64x128xf32>
    %6 = tpu.matmul %4, %5, %cst {dimension_numbers = #tpu.dot_dimension_numbers<[1], [0], [0], [1], [0, 0, 1, 1], [], []>} : vector<64x256xbf16>, vector<256x128xbf16>, vector<64x128xf32> -> vector<64x128xf32>
    %7 = arith.addf %3, %6 : vector<64x128xf32>
    %c0_6 = arith.constant 0 : index
    %c0_7 = arith.constant 0 : index
    %8 = vector.load %arg6[%c0_6, %c0_7] : memref<64x128xf32, #tpu.memory_space<vmem>>, vector<64x128xf32>
    tpu.vector_store %arg6[%c0_6, %c0_7], %7 {strides = array<i32>} : memref<64x128xf32, #tpu.memory_space<vmem>>, vector<64x128xf32>,
    %c0_i32_8 = arith.constant 0 : i32
    %9 = arith.cmpi eq, %arg1, %c0_i32_8 : i32
    %10 = arith.extui %9 : i1 to i32
    %c0_i32_9 = arith.constant 0 : i32
    %11 = arith.cmpi ne, %10, %c0_i32_9 : i32
    scf.if %11 {
      %c0_10 = arith.constant 0 : index
      %c0_11 = arith.constant 0 : index
      %12 = vector.load %arg6[%c0_10, %c0_11] : memref<64x128xf32, #tpu.memory_space<vmem>>, vector<64x128xf32>
      %c0_12 = arith.constant 0 : index
      %c0_13 = arith.constant 0 : index
      %13 = vector.load %arg4[%c0_12, %c0_13] : memref<8x128xf32, #tpu.memory_space<vmem>>, vector<1x128xf32>
      %14 = vector.broadcast %13 : vector<1x128xf32> to vector<64x128xf32>
      %15 = arith.addf %12, %14 : vector<64x128xf32>
      %c0_14 = arith.constant 0 : index
      %c0_15 = arith.constant 0 : index
      %16 = vector.load %arg5[%c0_14, %c0_15] : memref<64x128xf32, #tpu.memory_space<vmem>>, vector<64x128xf32>
      tpu.vector_store %arg5[%c0_14, %c0_15], %15 {strides = array<i32>} : memref<64x128xf32, #tpu.memory_space<vmem>>, vector<64x128xf32>,
    } else {
    }
    return
  }
  func.func @transform_0(%arg0: i32, %arg1: i32) -> (i32, i32) {
    %c0_i32 = arith.constant 0 : i32
    return %arg0, %arg1 : i32, i32
  }
  func.func @transform_1(%arg0: i32, %arg1: i32) -> (i32, i32) {
    %c0_i32 = arith.constant 0 : i32
    %c0_i32_0 = arith.constant 0 : i32
    return %arg1, %c0_i32 : i32, i32
  }
  func.func @transform_2(%arg0: i32, %arg1: i32) -> (i32, i32) {
    %c0_i32 = arith.constant 0 : i32
    %c0_i32_0 = arith.constant 0 : i32
    %c0_i32_1 = arith.constant 0 : i32
    return %c0_i32, %c0_i32_0 : i32, i32
  }
  func.func @transform_3(%arg0: i32, %arg1: i32) -> (i32, i32) {
    %c0_i32 = arith.constant 0 : i32
    %c0_i32_0 = arith.constant 0 : i32
    return %arg0, %c0_i32 : i32, i32
  }
}

module attributes {stable_mosaic.version = 11 : i64} {
  func.func @_gdn_kernel(%arg0: i32, %arg1: memref<64x128xf32, #tpu.memory_space<vmem>>, %arg2: memref<128x128xbf16, #tpu.memory_space<vmem>>, %arg3: memref<8x128xf32, #tpu.memory_space<vmem>>, %arg4: memref<64x128xf32, #tpu.memory_space<vmem>>) attributes {dimension_semantics = [#tpu.dimension_semantics<parallel>], iteration_bounds = array<i64: 1>, scalar_prefetch = 0 : i64, scratch_operands = 0 : i64, tpu.core_type = #tpu.core_type<tc>, window_params = [{transform_indices = @transform_0, window_bounds = array<i64: 64, 128>}, {pipeline_mode = #tpu.pipeline_mode<synchronous>, transform_indices = @transform_1, window_bounds = array<i64: 128, 128>}, {pipeline_mode = #tpu.pipeline_mode<synchronous>, transform_indices = @transform_2, window_bounds = array<i64: 8, 128>}, {transform_indices = @transform_3, window_bounds = array<i64: 64, 128>}]} {
    %c0 = arith.constant 0 : index
    %c0_0 = arith.constant 0 : index
    %0 = vector.load %arg1[%c0, %c0_0] : memref<64x128xf32, #tpu.memory_space<vmem>>, vector<64x128xf32>
    %1 = arith.mulf %0, %0 : vector<64x128xf32>
    %2 = arith.truncf %1 : vector<64x128xf32> to vector<64x128xbf16>
    %c0_1 = arith.constant 0 : index
    %c0_2 = arith.constant 0 : index
    %3 = vector.load %arg2[%c0_1, %c0_2] : memref<128x128xbf16, #tpu.memory_space<vmem>>, vector<128x128xbf16>
    %cst = arith.constant dense<0.000000e+00> : vector<64x128xf32>
    %4 = tpu.matmul %2, %3, %cst {dimension_numbers = #tpu.dot_dimension_numbers<[1], [0], [0], [1], [0, 0, 1, 1], [], []>} : vector<64x128xbf16>, vector<128x128xbf16>, vector<64x128xf32> -> vector<64x128xf32>
    %c0_3 = arith.constant 0 : index
    %c0_4 = arith.constant 0 : index
    %5 = vector.load %arg3[%c0_3, %c0_4] : memref<8x128xf32, #tpu.memory_space<vmem>>, vector<1x128xf32>
    %6 = vector.broadcast %5 : vector<1x128xf32> to vector<64x128xf32>
    %7 = arith.addf %4, %6 : vector<64x128xf32>
    %8 = math.rsqrt %7 : vector<64x128xf32>
    %9 = arith.mulf %0, %8 : vector<64x128xf32>
    %c0_5 = arith.constant 0 : index
    %c0_6 = arith.constant 0 : index
    %10 = vector.load %arg4[%c0_5, %c0_6] : memref<64x128xf32, #tpu.memory_space<vmem>>, vector<64x128xf32>
    tpu.vector_store %arg4[%c0_5, %c0_6], %9 {strides = array<i32>} : memref<64x128xf32, #tpu.memory_space<vmem>>, vector<64x128xf32>,
    return
  }
  func.func @transform_0(%arg0: i32) -> (i32, i32) {
    %c0_i32 = arith.constant 0 : i32
    %c0_i32_0 = arith.constant 0 : i32
    return %arg0, %c0_i32 : i32, i32
  }
  func.func @transform_1(%arg0: i32) -> (i32, i32) {
    %c0_i32 = arith.constant 0 : i32
    %c0_i32_0 = arith.constant 0 : i32
    %c0_i32_1 = arith.constant 0 : i32
    return %c0_i32, %c0_i32_0 : i32, i32
  }
  func.func @transform_2(%arg0: i32) -> (i32, i32) {
    %c0_i32 = arith.constant 0 : i32
    %c0_i32_0 = arith.constant 0 : i32
    %c0_i32_1 = arith.constant 0 : i32
    return %c0_i32, %c0_i32_0 : i32, i32
  }
  func.func @transform_3(%arg0: i32) -> (i32, i32) {
    %c0_i32 = arith.constant 0 : i32
    %c0_i32_0 = arith.constant 0 : i32
    return %arg0, %c0_i32 : i32, i32
  }
}

module attributes {stable_mosaic.version = 11 : i64} {
  func.func @_mm_bias_act_kernel(%arg0: i32, %arg1: i32, %arg2: memref<16x256xbf16, #tpu.memory_space<vmem>>, %arg3: memref<256x128xbf16, #tpu.memory_space<vmem>>, %arg4: memref<8x128xf32, #tpu.memory_space<vmem>>, %arg5: memref<16x128xf32, #tpu.memory_space<vmem>>, %arg6: memref<16x128xf32, #tpu.memory_space<vmem>>) attributes {dimension_semantics = [#tpu.dimension_semantics<parallel>, #tpu.dimension_semantics<arbitrary>], iteration_bounds = array<i64: 1, 1>, scalar_prefetch = 0 : i64, scratch_operands = 1 : i64, tpu.core_type = #tpu.core_type<tc>, window_params = [{transform_indices = @transform_0, window_bounds = array<i64: 16, 256>}, {transform_indices = @transform_1, window_bounds = array<i64: 256, 128>}, {pipeline_mode = #tpu.pipeline_mode<synchronous>, transform_indices = @transform_2, window_bounds = array<i64: 8, 128>}, {transform_indices = @transform_3, window_bounds = array<i64: 16, 128>}]} {
    %c0_i32 = arith.constant 0 : i32
    %0 = arith.cmpi eq, %arg1, %c0_i32 : i32
    %1 = arith.extui %0 : i1 to i32
    %c0_i32_0 = arith.constant 0 : i32
    %2 = arith.cmpi ne, %1, %c0_i32_0 : i32
    scf.if %2 {
      %cst_10 = arith.constant 0.000000e+00 : f32
      %12 = vector.broadcast %cst_10 : f32 to vector<16x128xf32>
      %c0_11 = arith.constant 0 : index
      %c0_12 = arith.constant 0 : index
      %13 = vector.load %arg6[%c0_11, %c0_12] : memref<16x128xf32, #tpu.memory_space<vmem>>, vector<16x128xf32>
      tpu.vector_store %arg6[%c0_11, %c0_12], %12 {strides = array<i32>} : memref<16x128xf32, #tpu.memory_space<vmem>>, vector<16x128xf32>,
    } else {
    }
    %c0 = arith.constant 0 : index
    %c0_1 = arith.constant 0 : index
    %3 = vector.load %arg6[%c0, %c0_1] : memref<16x128xf32, #tpu.memory_space<vmem>>, vector<16x128xf32>
    %c0_2 = arith.constant 0 : index
    %c0_3 = arith.constant 0 : index
    %4 = vector.load %arg2[%c0_2, %c0_3] : memref<16x256xbf16, #tpu.memory_space<vmem>>, vector<16x256xbf16>
    %c0_4 = arith.constant 0 : index
    %c0_5 = arith.constant 0 : index
    %5 = vector.load %arg3[%c0_4, %c0_5] : memref<256x128xbf16, #tpu.memory_space<vmem>>, vector<256x128xbf16>
    %cst = arith.constant dense<0.000000e+00> : vector<16x128xf32>
    %6 = tpu.matmul %4, %5, %cst {dimension_numbers = #tpu.dot_dimension_numbers<[1], [0], [0], [1], [0, 0, 1, 1], [], []>} : vector<16x256xbf16>, vector<256x128xbf16>, vector<16x128xf32> -> vector<16x128xf32>
    %7 = arith.addf %3, %6 : vector<16x128xf32>
    %c0_6 = arith.constant 0 : index
    %c0_7 = arith.constant 0 : index
    %8 = vector.load %arg6[%c0_6, %c0_7] : memref<16x128xf32, #tpu.memory_space<vmem>>, vector<16x128xf32>
    tpu.vector_store %arg6[%c0_6, %c0_7], %7 {strides = array<i32>} : memref<16x128xf32, #tpu.memory_space<vmem>>, vector<16x128xf32>,
    %c0_i32_8 = arith.constant 0 : i32
    %9 = arith.cmpi eq, %arg1, %c0_i32_8 : i32
    %10 = arith.extui %9 : i1 to i32
    %c0_i32_9 = arith.constant 0 : i32
    %11 = arith.cmpi ne, %10, %c0_i32_9 : i32
    scf.if %11 {
      %c0_10 = arith.constant 0 : index
      %c0_11 = arith.constant 0 : index
      %12 = vector.load %arg6[%c0_10, %c0_11] : memref<16x128xf32, #tpu.memory_space<vmem>>, vector<16x128xf32>
      %c0_12 = arith.constant 0 : index
      %c0_13 = arith.constant 0 : index
      %13 = vector.load %arg4[%c0_12, %c0_13] : memref<8x128xf32, #tpu.memory_space<vmem>>, vector<1x128xf32>
      %14 = vector.broadcast %13 : vector<1x128xf32> to vector<16x128xf32>
      %15 = arith.addf %12, %14 : vector<16x128xf32>
      %c0_14 = arith.constant 0 : index
      %c0_15 = arith.constant 0 : index
      %16 = vector.load %arg5[%c0_14, %c0_15] : memref<16x128xf32, #tpu.memory_space<vmem>>, vector<16x128xf32>
      tpu.vector_store %arg5[%c0_14, %c0_15], %15 {strides = array<i32>} : memref<16x128xf32, #tpu.memory_space<vmem>>, vector<16x128xf32>,
    } else {
    }
    return
  }
  func.func @transform_0(%arg0: i32, %arg1: i32) -> (i32, i32) {
    %c0_i32 = arith.constant 0 : i32
    return %arg0, %arg1 : i32, i32
  }
  func.func @transform_1(%arg0: i32, %arg1: i32) -> (i32, i32) {
    %c0_i32 = arith.constant 0 : i32
    %c0_i32_0 = arith.constant 0 : i32
    return %arg1, %c0_i32 : i32, i32
  }
  func.func @transform_2(%arg0: i32, %arg1: i32) -> (i32, i32) {
    %c0_i32 = arith.constant 0 : i32
    %c0_i32_0 = arith.constant 0 : i32
    %c0_i32_1 = arith.constant 0 : i32
    return %c0_i32, %c0_i32_0 : i32, i32
  }
  func.func @transform_3(%arg0: i32, %arg1: i32) -> (i32, i32) {
    %c0_i32 = arith.constant 0 : i32
    %c0_i32_0 = arith.constant 0 : i32
    return %arg0, %c0_i32 : i32, i32
  }
}

module attributes {stable_mosaic.version = 11 : i64} {
  func.func @_mm_bias_act_kernel(%arg0: i32, %arg1: i32, %arg2: memref<16x128xbf16, #tpu.memory_space<vmem>>, %arg3: memref<128x128xbf16, #tpu.memory_space<vmem>>, %arg4: memref<8x128xf32, #tpu.memory_space<vmem>>, %arg5: memref<16x128xf32, #tpu.memory_space<vmem>>, %arg6: memref<16x128xf32, #tpu.memory_space<vmem>>) attributes {dimension_semantics = [#tpu.dimension_semantics<parallel>, #tpu.dimension_semantics<arbitrary>], iteration_bounds = array<i64: 1, 1>, scalar_prefetch = 0 : i64, scratch_operands = 1 : i64, tpu.core_type = #tpu.core_type<tc>, window_params = [{transform_indices = @transform_0, window_bounds = array<i64: 16, 128>}, {transform_indices = @transform_1, window_bounds = array<i64: 128, 128>}, {pipeline_mode = #tpu.pipeline_mode<synchronous>, transform_indices = @transform_2, window_bounds = array<i64: 8, 128>}, {transform_indices = @transform_3, window_bounds = array<i64: 16, 128>}]} {
    %c0_i32 = arith.constant 0 : i32
    %0 = arith.cmpi eq, %arg1, %c0_i32 : i32
    %1 = arith.extui %0 : i1 to i32
    %c0_i32_0 = arith.constant 0 : i32
    %2 = arith.cmpi ne, %1, %c0_i32_0 : i32
    scf.if %2 {
      %cst_10 = arith.constant 0.000000e+00 : f32
      %12 = vector.broadcast %cst_10 : f32 to vector<16x128xf32>
      %c0_11 = arith.constant 0 : index
      %c0_12 = arith.constant 0 : index
      %13 = vector.load %arg6[%c0_11, %c0_12] : memref<16x128xf32, #tpu.memory_space<vmem>>, vector<16x128xf32>
      tpu.vector_store %arg6[%c0_11, %c0_12], %12 {strides = array<i32>} : memref<16x128xf32, #tpu.memory_space<vmem>>, vector<16x128xf32>,
    } else {
    }
    %c0 = arith.constant 0 : index
    %c0_1 = arith.constant 0 : index
    %3 = vector.load %arg6[%c0, %c0_1] : memref<16x128xf32, #tpu.memory_space<vmem>>, vector<16x128xf32>
    %c0_2 = arith.constant 0 : index
    %c0_3 = arith.constant 0 : index
    %4 = vector.load %arg2[%c0_2, %c0_3] : memref<16x128xbf16, #tpu.memory_space<vmem>>, vector<16x128xbf16>
    %c0_4 = arith.constant 0 : index
    %c0_5 = arith.constant 0 : index
    %5 = vector.load %arg3[%c0_4, %c0_5] : memref<128x128xbf16, #tpu.memory_space<vmem>>, vector<128x128xbf16>
    %cst = arith.constant dense<0.000000e+00> : vector<16x128xf32>
    %6 = tpu.matmul %4, %5, %cst {dimension_numbers = #tpu.dot_dimension_numbers<[1], [0], [0], [1], [0, 0, 1, 1], [], []>} : vector<16x128xbf16>, vector<128x128xbf16>, vector<16x128xf32> -> vector<16x128xf32>
    %7 = arith.addf %3, %6 : vector<16x128xf32>
    %c0_6 = arith.constant 0 : index
    %c0_7 = arith.constant 0 : index
    %8 = vector.load %arg6[%c0_6, %c0_7] : memref<16x128xf32, #tpu.memory_space<vmem>>, vector<16x128xf32>
    tpu.vector_store %arg6[%c0_6, %c0_7], %7 {strides = array<i32>} : memref<16x128xf32, #tpu.memory_space<vmem>>, vector<16x128xf32>,
    %c0_i32_8 = arith.constant 0 : i32
    %9 = arith.cmpi eq, %arg1, %c0_i32_8 : i32
    %10 = arith.extui %9 : i1 to i32
    %c0_i32_9 = arith.constant 0 : i32
    %11 = arith.cmpi ne, %10, %c0_i32_9 : i32
    scf.if %11 {
      %c0_10 = arith.constant 0 : index
      %c0_11 = arith.constant 0 : index
      %12 = vector.load %arg6[%c0_10, %c0_11] : memref<16x128xf32, #tpu.memory_space<vmem>>, vector<16x128xf32>
      %c0_12 = arith.constant 0 : index
      %c0_13 = arith.constant 0 : index
      %13 = vector.load %arg4[%c0_12, %c0_13] : memref<8x128xf32, #tpu.memory_space<vmem>>, vector<1x128xf32>
      %14 = vector.broadcast %13 : vector<1x128xf32> to vector<16x128xf32>
      %15 = arith.addf %12, %14 : vector<16x128xf32>
      %cst_14 = arith.constant 0.000000e+00 : f32
      %16 = vector.broadcast %cst_14 : f32 to vector<16x128xf32>
      %17 = arith.cmpf oge, %15, %16 : vector<16x128xf32>
      %cst_15 = arith.constant 0.00999999977 : f32
      %18 = vector.broadcast %cst_15 : f32 to vector<16x128xf32>
      %19 = arith.mulf %18, %15 : vector<16x128xf32>
      %20 = arith.select %17, %15, %19 : vector<16x128xi1>, vector<16x128xf32>
      %c0_16 = arith.constant 0 : index
      %c0_17 = arith.constant 0 : index
      %21 = vector.load %arg5[%c0_16, %c0_17] : memref<16x128xf32, #tpu.memory_space<vmem>>, vector<16x128xf32>
      tpu.vector_store %arg5[%c0_16, %c0_17], %20 {strides = array<i32>} : memref<16x128xf32, #tpu.memory_space<vmem>>, vector<16x128xf32>,
    } else {
    }
    return
  }
  func.func @transform_0(%arg0: i32, %arg1: i32) -> (i32, i32) {
    %c0_i32 = arith.constant 0 : i32
    return %arg0, %arg1 : i32, i32
  }
  func.func @transform_1(%arg0: i32, %arg1: i32) -> (i32, i32) {
    %c0_i32 = arith.constant 0 : i32
    %c0_i32_0 = arith.constant 0 : i32
    return %arg1, %c0_i32 : i32, i32
  }
  func.func @transform_2(%arg0: i32, %arg1: i32) -> (i32, i32) {
    %c0_i32 = arith.constant 0 : i32
    %c0_i32_0 = arith.constant 0 : i32
    %c0_i32_1 = arith.constant 0 : i32
    return %c0_i32, %c0_i32_0 : i32, i32
  }
  func.func @transform_3(%arg0: i32, %arg1: i32) -> (i32, i32) {
    %c0_i32 = arith.constant 0 : i32
    %c0_i32_0 = arith.constant 0 : i32
    return %arg0, %c0_i32 : i32, i32
  }
}

module attributes {stable_mosaic.version = 11 : i64} {
  func.func @_mm_bias_act_kernel(%arg0: i32, %arg1: i32, %arg2: memref<8x256xbf16, #tpu.memory_space<vmem>>, %arg3: memref<256x128xbf16, #tpu.memory_space<vmem>>, %arg4: memref<8x128xf32, #tpu.memory_space<vmem>>, %arg5: memref<8x128xf32, #tpu.memory_space<vmem>>, %arg6: memref<8x128xf32, #tpu.memory_space<vmem>>) attributes {dimension_semantics = [#tpu.dimension_semantics<parallel>, #tpu.dimension_semantics<arbitrary>], iteration_bounds = array<i64: 1, 1>, scalar_prefetch = 0 : i64, scratch_operands = 1 : i64, tpu.core_type = #tpu.core_type<tc>, window_params = [{transform_indices = @transform_0, window_bounds = array<i64: 8, 256>}, {transform_indices = @transform_1, window_bounds = array<i64: 256, 128>}, {pipeline_mode = #tpu.pipeline_mode<synchronous>, transform_indices = @transform_2, window_bounds = array<i64: 8, 128>}, {transform_indices = @transform_3, window_bounds = array<i64: 8, 128>}]} {
    %c0_i32 = arith.constant 0 : i32
    %0 = arith.cmpi eq, %arg1, %c0_i32 : i32
    %1 = arith.extui %0 : i1 to i32
    %c0_i32_0 = arith.constant 0 : i32
    %2 = arith.cmpi ne, %1, %c0_i32_0 : i32
    scf.if %2 {
      %cst_10 = arith.constant 0.000000e+00 : f32
      %12 = vector.broadcast %cst_10 : f32 to vector<8x128xf32>
      %c0_11 = arith.constant 0 : index
      %c0_12 = arith.constant 0 : index
      %13 = vector.load %arg6[%c0_11, %c0_12] : memref<8x128xf32, #tpu.memory_space<vmem>>, vector<8x128xf32>
      tpu.vector_store %arg6[%c0_11, %c0_12], %12 {strides = array<i32>} : memref<8x128xf32, #tpu.memory_space<vmem>>, vector<8x128xf32>,
    } else {
    }
    %c0 = arith.constant 0 : index
    %c0_1 = arith.constant 0 : index
    %3 = vector.load %arg6[%c0, %c0_1] : memref<8x128xf32, #tpu.memory_space<vmem>>, vector<8x128xf32>
    %c0_2 = arith.constant 0 : index
    %c0_3 = arith.constant 0 : index
    %4 = vector.load %arg2[%c0_2, %c0_3] : memref<8x256xbf16, #tpu.memory_space<vmem>>, vector<8x256xbf16>
    %c0_4 = arith.constant 0 : index
    %c0_5 = arith.constant 0 : index
    %5 = vector.load %arg3[%c0_4, %c0_5] : memref<256x128xbf16, #tpu.memory_space<vmem>>, vector<256x128xbf16>
    %cst = arith.constant dense<0.000000e+00> : vector<8x128xf32>
    %6 = tpu.matmul %4, %5, %cst {dimension_numbers = #tpu.dot_dimension_numbers<[1], [0], [0], [1], [0, 0, 1, 1], [], []>} : vector<8x256xbf16>, vector<256x128xbf16>, vector<8x128xf32> -> vector<8x128xf32>
    %7 = arith.addf %3, %6 : vector<8x128xf32>
    %c0_6 = arith.constant 0 : index
    %c0_7 = arith.constant 0 : index
    %8 = vector.load %arg6[%c0_6, %c0_7] : memref<8x128xf32, #tpu.memory_space<vmem>>, vector<8x128xf32>
    tpu.vector_store %arg6[%c0_6, %c0_7], %7 {strides = array<i32>} : memref<8x128xf32, #tpu.memory_space<vmem>>, vector<8x128xf32>,
    %c0_i32_8 = arith.constant 0 : i32
    %9 = arith.cmpi eq, %arg1, %c0_i32_8 : i32
    %10 = arith.extui %9 : i1 to i32
    %c0_i32_9 = arith.constant 0 : i32
    %11 = arith.cmpi ne, %10, %c0_i32_9 : i32
    scf.if %11 {
      %c0_10 = arith.constant 0 : index
      %c0_11 = arith.constant 0 : index
      %12 = vector.load %arg6[%c0_10, %c0_11] : memref<8x128xf32, #tpu.memory_space<vmem>>, vector<8x128xf32>
      %c0_12 = arith.constant 0 : index
      %c0_13 = arith.constant 0 : index
      %13 = vector.load %arg4[%c0_12, %c0_13] : memref<8x128xf32, #tpu.memory_space<vmem>>, vector<1x128xf32>
      %14 = vector.broadcast %13 : vector<1x128xf32> to vector<8x128xf32>
      %15 = arith.addf %12, %14 : vector<8x128xf32>
      %cst_14 = arith.constant 0.000000e+00 : f32
      %16 = vector.broadcast %cst_14 : f32 to vector<8x128xf32>
      %17 = arith.cmpf oge, %15, %16 : vector<8x128xf32>
      %cst_15 = arith.constant 0.00999999977 : f32
      %18 = vector.broadcast %cst_15 : f32 to vector<8x128xf32>
      %19 = arith.mulf %18, %15 : vector<8x128xf32>
      %20 = arith.select %17, %15, %19 : vector<8x128xi1>, vector<8x128xf32>
      %c0_16 = arith.constant 0 : index
      %c0_17 = arith.constant 0 : index
      %21 = vector.load %arg5[%c0_16, %c0_17] : memref<8x128xf32, #tpu.memory_space<vmem>>, vector<8x128xf32>
      tpu.vector_store %arg5[%c0_16, %c0_17], %20 {strides = array<i32>} : memref<8x128xf32, #tpu.memory_space<vmem>>, vector<8x128xf32>,
    } else {
    }
    return
  }
  func.func @transform_0(%arg0: i32, %arg1: i32) -> (i32, i32) {
    %c0_i32 = arith.constant 0 : i32
    return %arg0, %arg1 : i32, i32
  }
  func.func @transform_1(%arg0: i32, %arg1: i32) -> (i32, i32) {
    %c0_i32 = arith.constant 0 : i32
    %c0_i32_0 = arith.constant 0 : i32
    return %arg1, %c0_i32 : i32, i32
  }
  func.func @transform_2(%arg0: i32, %arg1: i32) -> (i32, i32) {
    %c0_i32 = arith.constant 0 : i32
    %c0_i32_0 = arith.constant 0 : i32
    %c0_i32_1 = arith.constant 0 : i32
    return %c0_i32, %c0_i32_0 : i32, i32
  }
  func.func @transform_3(%arg0: i32, %arg1: i32) -> (i32, i32) {
    %c0_i32 = arith.constant 0 : i32
    %c0_i32_0 = arith.constant 0 : i32
    return %arg0, %c0_i32 : i32, i32
  }
}

module attributes {stable_mosaic.version = 11 : i64} {
  func.func @_mm_bias_act_kernel(%arg0: i32, %arg1: i32, %arg2: memref<8x256xbf16, #tpu.memory_space<vmem>>, %arg3: memref<256x128xbf16, #tpu.memory_space<vmem>>, %arg4: memref<8x128xf32, #tpu.memory_space<vmem>>, %arg5: memref<8x128xf32, #tpu.memory_space<vmem>>, %arg6: memref<8x128xf32, #tpu.memory_space<vmem>>) attributes {dimension_semantics = [#tpu.dimension_semantics<parallel>, #tpu.dimension_semantics<arbitrary>], iteration_bounds = array<i64: 1, 1>, scalar_prefetch = 0 : i64, scratch_operands = 1 : i64, tpu.core_type = #tpu.core_type<tc>, window_params = [{transform_indices = @transform_0, window_bounds = array<i64: 8, 256>}, {transform_indices = @transform_1, window_bounds = array<i64: 256, 128>}, {pipeline_mode = #tpu.pipeline_mode<synchronous>, transform_indices = @transform_2, window_bounds = array<i64: 8, 128>}, {transform_indices = @transform_3, window_bounds = array<i64: 8, 128>}]} {
    %c0_i32 = arith.constant 0 : i32
    %0 = arith.cmpi eq, %arg1, %c0_i32 : i32
    %1 = arith.extui %0 : i1 to i32
    %c0_i32_0 = arith.constant 0 : i32
    %2 = arith.cmpi ne, %1, %c0_i32_0 : i32
    scf.if %2 {
      %cst_10 = arith.constant 0.000000e+00 : f32
      %12 = vector.broadcast %cst_10 : f32 to vector<8x128xf32>
      %c0_11 = arith.constant 0 : index
      %c0_12 = arith.constant 0 : index
      %13 = vector.load %arg6[%c0_11, %c0_12] : memref<8x128xf32, #tpu.memory_space<vmem>>, vector<8x128xf32>
      tpu.vector_store %arg6[%c0_11, %c0_12], %12 {strides = array<i32>} : memref<8x128xf32, #tpu.memory_space<vmem>>, vector<8x128xf32>,
    } else {
    }
    %c0 = arith.constant 0 : index
    %c0_1 = arith.constant 0 : index
    %3 = vector.load %arg6[%c0, %c0_1] : memref<8x128xf32, #tpu.memory_space<vmem>>, vector<8x128xf32>
    %c0_2 = arith.constant 0 : index
    %c0_3 = arith.constant 0 : index
    %4 = vector.load %arg2[%c0_2, %c0_3] : memref<8x256xbf16, #tpu.memory_space<vmem>>, vector<8x256xbf16>
    %c0_4 = arith.constant 0 : index
    %c0_5 = arith.constant 0 : index
    %5 = vector.load %arg3[%c0_4, %c0_5] : memref<256x128xbf16, #tpu.memory_space<vmem>>, vector<256x128xbf16>
    %cst = arith.constant dense<0.000000e+00> : vector<8x128xf32>
    %6 = tpu.matmul %4, %5, %cst {dimension_numbers = #tpu.dot_dimension_numbers<[1], [0], [0], [1], [0, 0, 1, 1], [], []>} : vector<8x256xbf16>, vector<256x128xbf16>, vector<8x128xf32> -> vector<8x128xf32>
    %7 = arith.addf %3, %6 : vector<8x128xf32>
    %c0_6 = arith.constant 0 : index
    %c0_7 = arith.constant 0 : index
    %8 = vector.load %arg6[%c0_6, %c0_7] : memref<8x128xf32, #tpu.memory_space<vmem>>, vector<8x128xf32>
    tpu.vector_store %arg6[%c0_6, %c0_7], %7 {strides = array<i32>} : memref<8x128xf32, #tpu.memory_space<vmem>>, vector<8x128xf32>,
    %c0_i32_8 = arith.constant 0 : i32
    %9 = arith.cmpi eq, %arg1, %c0_i32_8 : i32
    %10 = arith.extui %9 : i1 to i32
    %c0_i32_9 = arith.constant 0 : i32
    %11 = arith.cmpi ne, %10, %c0_i32_9 : i32
    scf.if %11 {
      %c0_10 = arith.constant 0 : index
      %c0_11 = arith.constant 0 : index
      %12 = vector.load %arg6[%c0_10, %c0_11] : memref<8x128xf32, #tpu.memory_space<vmem>>, vector<8x128xf32>
      %c0_12 = arith.constant 0 : index
      %c0_13 = arith.constant 0 : index
      %13 = vector.load %arg4[%c0_12, %c0_13] : memref<8x128xf32, #tpu.memory_space<vmem>>, vector<1x128xf32>
      %14 = vector.broadcast %13 : vector<1x128xf32> to vector<8x128xf32>
      %15 = arith.addf %12, %14 : vector<8x128xf32>
      %c0_14 = arith.constant 0 : index
      %c0_15 = arith.constant 0 : index
      %16 = vector.load %arg5[%c0_14, %c0_15] : memref<8x128xf32, #tpu.memory_space<vmem>>, vector<8x128xf32>
      tpu.vector_store %arg5[%c0_14, %c0_15], %15 {strides = array<i32>} : memref<8x128xf32, #tpu.memory_space<vmem>>, vector<8x128xf32>,
    } else {
    }
    return
  }
  func.func @transform_0(%arg0: i32, %arg1: i32) -> (i32, i32) {
    %c0_i32 = arith.constant 0 : i32
    return %arg0, %arg1 : i32, i32
  }
  func.func @transform_1(%arg0: i32, %arg1: i32) -> (i32, i32) {
    %c0_i32 = arith.constant 0 : i32
    %c0_i32_0 = arith.constant 0 : i32
    return %arg1, %c0_i32 : i32, i32
  }
  func.func @transform_2(%arg0: i32, %arg1: i32) -> (i32, i32) {
    %c0_i32 = arith.constant 0 : i32
    %c0_i32_0 = arith.constant 0 : i32
    %c0_i32_1 = arith.constant 0 : i32
    return %c0_i32, %c0_i32_0 : i32, i32
  }
  func.func @transform_3(%arg0: i32, %arg1: i32) -> (i32, i32) {
    %c0_i32 = arith.constant 0 : i32
    %c0_i32_0 = arith.constant 0 : i32
    return %arg0, %c0_i32 : i32, i32
  }
}

module attributes {stable_mosaic.version = 11 : i64} {
  func.func @_mm_bias_act_kernel(%arg0: i32, %arg1: i32, %arg2: memref<8x128xbf16, #tpu.memory_space<vmem>>, %arg3: memref<128x128xbf16, #tpu.memory_space<vmem>>, %arg4: memref<8x128xf32, #tpu.memory_space<vmem>>, %arg5: memref<8x128xf32, #tpu.memory_space<vmem>>, %arg6: memref<8x128xf32, #tpu.memory_space<vmem>>) attributes {dimension_semantics = [#tpu.dimension_semantics<parallel>, #tpu.dimension_semantics<arbitrary>], iteration_bounds = array<i64: 1, 1>, scalar_prefetch = 0 : i64, scratch_operands = 1 : i64, tpu.core_type = #tpu.core_type<tc>, window_params = [{transform_indices = @transform_0, window_bounds = array<i64: 8, 128>}, {transform_indices = @transform_1, window_bounds = array<i64: 128, 128>}, {pipeline_mode = #tpu.pipeline_mode<synchronous>, transform_indices = @transform_2, window_bounds = array<i64: 8, 128>}, {transform_indices = @transform_3, window_bounds = array<i64: 8, 128>}]} {
    %c0_i32 = arith.constant 0 : i32
    %0 = arith.cmpi eq, %arg1, %c0_i32 : i32
    %1 = arith.extui %0 : i1 to i32
    %c0_i32_0 = arith.constant 0 : i32
    %2 = arith.cmpi ne, %1, %c0_i32_0 : i32
    scf.if %2 {
      %cst_10 = arith.constant 0.000000e+00 : f32
      %12 = vector.broadcast %cst_10 : f32 to vector<8x128xf32>
      %c0_11 = arith.constant 0 : index
      %c0_12 = arith.constant 0 : index
      %13 = vector.load %arg6[%c0_11, %c0_12] : memref<8x128xf32, #tpu.memory_space<vmem>>, vector<8x128xf32>
      tpu.vector_store %arg6[%c0_11, %c0_12], %12 {strides = array<i32>} : memref<8x128xf32, #tpu.memory_space<vmem>>, vector<8x128xf32>,
    } else {
    }
    %c0 = arith.constant 0 : index
    %c0_1 = arith.constant 0 : index
    %3 = vector.load %arg6[%c0, %c0_1] : memref<8x128xf32, #tpu.memory_space<vmem>>, vector<8x128xf32>
    %c0_2 = arith.constant 0 : index
    %c0_3 = arith.constant 0 : index
    %4 = vector.load %arg2[%c0_2, %c0_3] : memref<8x128xbf16, #tpu.memory_space<vmem>>, vector<8x128xbf16>
    %c0_4 = arith.constant 0 : index
    %c0_5 = arith.constant 0 : index
    %5 = vector.load %arg3[%c0_4, %c0_5] : memref<128x128xbf16, #tpu.memory_space<vmem>>, vector<128x128xbf16>
    %cst = arith.constant dense<0.000000e+00> : vector<8x128xf32>
    %6 = tpu.matmul %4, %5, %cst {dimension_numbers = #tpu.dot_dimension_numbers<[1], [0], [0], [1], [0, 0, 1, 1], [], []>} : vector<8x128xbf16>, vector<128x128xbf16>, vector<8x128xf32> -> vector<8x128xf32>
    %7 = arith.addf %3, %6 : vector<8x128xf32>
    %c0_6 = arith.constant 0 : index
    %c0_7 = arith.constant 0 : index
    %8 = vector.load %arg6[%c0_6, %c0_7] : memref<8x128xf32, #tpu.memory_space<vmem>>, vector<8x128xf32>
    tpu.vector_store %arg6[%c0_6, %c0_7], %7 {strides = array<i32>} : memref<8x128xf32, #tpu.memory_space<vmem>>, vector<8x128xf32>,
    %c0_i32_8 = arith.constant 0 : i32
    %9 = arith.cmpi eq, %arg1, %c0_i32_8 : i32
    %10 = arith.extui %9 : i1 to i32
    %c0_i32_9 = arith.constant 0 : i32
    %11 = arith.cmpi ne, %10, %c0_i32_9 : i32
    scf.if %11 {
      %c0_10 = arith.constant 0 : index
      %c0_11 = arith.constant 0 : index
      %12 = vector.load %arg6[%c0_10, %c0_11] : memref<8x128xf32, #tpu.memory_space<vmem>>, vector<8x128xf32>
      %c0_12 = arith.constant 0 : index
      %c0_13 = arith.constant 0 : index
      %13 = vector.load %arg4[%c0_12, %c0_13] : memref<8x128xf32, #tpu.memory_space<vmem>>, vector<1x128xf32>
      %14 = vector.broadcast %13 : vector<1x128xf32> to vector<8x128xf32>
      %15 = arith.addf %12, %14 : vector<8x128xf32>
      %cst_14 = arith.constant 0.000000e+00 : f32
      %16 = vector.broadcast %cst_14 : f32 to vector<8x128xf32>
      %17 = arith.cmpf oge, %15, %16 : vector<8x128xf32>
      %cst_15 = arith.constant 0.00999999977 : f32
      %18 = vector.broadcast %cst_15 : f32 to vector<8x128xf32>
      %19 = arith.mulf %18, %15 : vector<8x128xf32>
      %20 = arith.select %17, %15, %19 : vector<8x128xi1>, vector<8x128xf32>
      %c0_16 = arith.constant 0 : index
      %c0_17 = arith.constant 0 : index
      %21 = vector.load %arg5[%c0_16, %c0_17] : memref<8x128xf32, #tpu.memory_space<vmem>>, vector<8x128xf32>
      tpu.vector_store %arg5[%c0_16, %c0_17], %20 {strides = array<i32>} : memref<8x128xf32, #tpu.memory_space<vmem>>, vector<8x128xf32>,
    } else {
    }
    return
  }
  func.func @transform_0(%arg0: i32, %arg1: i32) -> (i32, i32) {
    %c0_i32 = arith.constant 0 : i32
    return %arg0, %arg1 : i32, i32
  }
  func.func @transform_1(%arg0: i32, %arg1: i32) -> (i32, i32) {
    %c0_i32 = arith.constant 0 : i32
    %c0_i32_0 = arith.constant 0 : i32
    return %arg1, %c0_i32 : i32, i32
  }
  func.func @transform_2(%arg0: i32, %arg1: i32) -> (i32, i32) {
    %c0_i32 = arith.constant 0 : i32
    %c0_i32_0 = arith.constant 0 : i32
    %c0_i32_1 = arith.constant 0 : i32
    return %c0_i32, %c0_i32_0 : i32, i32
  }
  func.func @transform_3(%arg0: i32, %arg1: i32) -> (i32, i32) {
    %c0_i32 = arith.constant 0 : i32
    %c0_i32_0 = arith.constant 0 : i32
    return %arg0, %c0_i32 : i32, i32
  }
}

module attributes {stable_mosaic.version = 11 : i64} {
  func.func @_mm_bias_act_kernel(%arg0: i32, %arg1: i32, %arg2: memref<16x128xbf16, #tpu.memory_space<vmem>>, %arg3: memref<128x128xbf16, #tpu.memory_space<vmem>>, %arg4: memref<8x128xf32, #tpu.memory_space<vmem>>, %arg5: memref<16x128xf32, #tpu.memory_space<vmem>>, %arg6: memref<16x128xf32, #tpu.memory_space<vmem>>) attributes {dimension_semantics = [#tpu.dimension_semantics<parallel>, #tpu.dimension_semantics<arbitrary>], iteration_bounds = array<i64: 1, 1>, scalar_prefetch = 0 : i64, scratch_operands = 1 : i64, tpu.core_type = #tpu.core_type<tc>, window_params = [{transform_indices = @transform_0, window_bounds = array<i64: 16, 128>}, {transform_indices = @transform_1, window_bounds = array<i64: 128, 128>}, {pipeline_mode = #tpu.pipeline_mode<synchronous>, transform_indices = @transform_2, window_bounds = array<i64: 8, 128>}, {transform_indices = @transform_3, window_bounds = array<i64: 16, 128>}]} {
    %c0_i32 = arith.constant 0 : i32
    %0 = arith.cmpi eq, %arg1, %c0_i32 : i32
    %1 = arith.extui %0 : i1 to i32
    %c0_i32_0 = arith.constant 0 : i32
    %2 = arith.cmpi ne, %1, %c0_i32_0 : i32
    scf.if %2 {
      %cst_10 = arith.constant 0.000000e+00 : f32
      %12 = vector.broadcast %cst_10 : f32 to vector<16x128xf32>
      %c0_11 = arith.constant 0 : index
      %c0_12 = arith.constant 0 : index
      %13 = vector.load %arg6[%c0_11, %c0_12] : memref<16x128xf32, #tpu.memory_space<vmem>>, vector<16x128xf32>
      tpu.vector_store %arg6[%c0_11, %c0_12], %12 {strides = array<i32>} : memref<16x128xf32, #tpu.memory_space<vmem>>, vector<16x128xf32>,
    } else {
    }
    %c0 = arith.constant 0 : index
    %c0_1 = arith.constant 0 : index
    %3 = vector.load %arg6[%c0, %c0_1] : memref<16x128xf32, #tpu.memory_space<vmem>>, vector<16x128xf32>
    %c0_2 = arith.constant 0 : index
    %c0_3 = arith.constant 0 : index
    %4 = vector.load %arg2[%c0_2, %c0_3] : memref<16x128xbf16, #tpu.memory_space<vmem>>, vector<16x128xbf16>
    %c0_4 = arith.constant 0 : index
    %c0_5 = arith.constant 0 : index
    %5 = vector.load %arg3[%c0_4, %c0_5] : memref<128x128xbf16, #tpu.memory_space<vmem>>, vector<128x128xbf16>
    %cst = arith.constant dense<0.000000e+00> : vector<16x128xf32>
    %6 = tpu.matmul %4, %5, %cst {dimension_numbers = #tpu.dot_dimension_numbers<[1], [0], [0], [1], [0, 0, 1, 1], [], []>} : vector<16x128xbf16>, vector<128x128xbf16>, vector<16x128xf32> -> vector<16x128xf32>
    %7 = arith.addf %3, %6 : vector<16x128xf32>
    %c0_6 = arith.constant 0 : index
    %c0_7 = arith.constant 0 : index
    %8 = vector.load %arg6[%c0_6, %c0_7] : memref<16x128xf32, #tpu.memory_space<vmem>>, vector<16x128xf32>
    tpu.vector_store %arg6[%c0_6, %c0_7], %7 {strides = array<i32>} : memref<16x128xf32, #tpu.memory_space<vmem>>, vector<16x128xf32>,
    %c0_i32_8 = arith.constant 0 : i32
    %9 = arith.cmpi eq, %arg1, %c0_i32_8 : i32
    %10 = arith.extui %9 : i1 to i32
    %c0_i32_9 = arith.constant 0 : i32
    %11 = arith.cmpi ne, %10, %c0_i32_9 : i32
    scf.if %11 {
      %c0_10 = arith.constant 0 : index
      %c0_11 = arith.constant 0 : index
      %12 = vector.load %arg6[%c0_10, %c0_11] : memref<16x128xf32, #tpu.memory_space<vmem>>, vector<16x128xf32>
      %c0_12 = arith.constant 0 : index
      %c0_13 = arith.constant 0 : index
      %13 = vector.load %arg4[%c0_12, %c0_13] : memref<8x128xf32, #tpu.memory_space<vmem>>, vector<1x128xf32>
      %14 = vector.broadcast %13 : vector<1x128xf32> to vector<16x128xf32>
      %15 = arith.addf %12, %14 : vector<16x128xf32>
      %c0_14 = arith.constant 0 : index
      %c0_15 = arith.constant 0 : index
      %16 = vector.load %arg5[%c0_14, %c0_15] : memref<16x128xf32, #tpu.memory_space<vmem>>, vector<16x128xf32>
      tpu.vector_store %arg5[%c0_14, %c0_15], %15 {strides = array<i32>} : memref<16x128xf32, #tpu.memory_space<vmem>>, vector<16x128xf32>,
    } else {
    }
    return
  }
  func.func @transform_0(%arg0: i32, %arg1: i32) -> (i32, i32) {
    %c0_i32 = arith.constant 0 : i32
    return %arg0, %arg1 : i32, i32
  }
  func.func @transform_1(%arg0: i32, %arg1: i32) -> (i32, i32) {
    %c0_i32 = arith.constant 0 : i32
    %c0_i32_0 = arith.constant 0 : i32
    return %arg1, %c0_i32 : i32, i32
  }
  func.func @transform_2(%arg0: i32, %arg1: i32) -> (i32, i32) {
    %c0_i32 = arith.constant 0 : i32
    %c0_i32_0 = arith.constant 0 : i32
    %c0_i32_1 = arith.constant 0 : i32
    return %c0_i32, %c0_i32_0 : i32, i32
  }
  func.func @transform_3(%arg0: i32, %arg1: i32) -> (i32, i32) {
    %c0_i32 = arith.constant 0 : i32
    %c0_i32_0 = arith.constant 0 : i32
    return %arg0, %c0_i32 : i32, i32
  }
}

module attributes {stable_mosaic.version = 11 : i64} {
  func.func @_gdn_kernel(%arg0: i32, %arg1: memref<64x128xf32, #tpu.memory_space<vmem>>, %arg2: memref<128x128xbf16, #tpu.memory_space<vmem>>, %arg3: memref<8x128xf32, #tpu.memory_space<vmem>>, %arg4: memref<64x128xf32, #tpu.memory_space<vmem>>) attributes {dimension_semantics = [#tpu.dimension_semantics<parallel>], iteration_bounds = array<i64: 1>, scalar_prefetch = 0 : i64, scratch_operands = 0 : i64, tpu.core_type = #tpu.core_type<tc>, window_params = [{transform_indices = @transform_0, window_bounds = array<i64: 64, 128>}, {pipeline_mode = #tpu.pipeline_mode<synchronous>, transform_indices = @transform_1, window_bounds = array<i64: 128, 128>}, {pipeline_mode = #tpu.pipeline_mode<synchronous>, transform_indices = @transform_2, window_bounds = array<i64: 8, 128>}, {transform_indices = @transform_3, window_bounds = array<i64: 64, 128>}]} {
    %c0 = arith.constant 0 : index
    %c0_0 = arith.constant 0 : index
    %0 = vector.load %arg1[%c0, %c0_0] : memref<64x128xf32, #tpu.memory_space<vmem>>, vector<64x128xf32>
    %1 = arith.mulf %0, %0 : vector<64x128xf32>
    %2 = arith.truncf %1 : vector<64x128xf32> to vector<64x128xbf16>
    %c0_1 = arith.constant 0 : index
    %c0_2 = arith.constant 0 : index
    %3 = vector.load %arg2[%c0_1, %c0_2] : memref<128x128xbf16, #tpu.memory_space<vmem>>, vector<128x128xbf16>
    %cst = arith.constant dense<0.000000e+00> : vector<64x128xf32>
    %4 = tpu.matmul %2, %3, %cst {dimension_numbers = #tpu.dot_dimension_numbers<[1], [0], [0], [1], [0, 0, 1, 1], [], []>} : vector<64x128xbf16>, vector<128x128xbf16>, vector<64x128xf32> -> vector<64x128xf32>
    %c0_3 = arith.constant 0 : index
    %c0_4 = arith.constant 0 : index
    %5 = vector.load %arg3[%c0_3, %c0_4] : memref<8x128xf32, #tpu.memory_space<vmem>>, vector<1x128xf32>
    %6 = vector.broadcast %5 : vector<1x128xf32> to vector<64x128xf32>
    %7 = arith.addf %4, %6 : vector<64x128xf32>
    %8 = math.sqrt %7 : vector<64x128xf32>
    %9 = arith.mulf %0, %8 : vector<64x128xf32>
    %c0_5 = arith.constant 0 : index
    %c0_6 = arith.constant 0 : index
    %10 = vector.load %arg4[%c0_5, %c0_6] : memref<64x128xf32, #tpu.memory_space<vmem>>, vector<64x128xf32>
    tpu.vector_store %arg4[%c0_5, %c0_6], %9 {strides = array<i32>} : memref<64x128xf32, #tpu.memory_space<vmem>>, vector<64x128xf32>,
    return
  }
  func.func @transform_0(%arg0: i32) -> (i32, i32) {
    %c0_i32 = arith.constant 0 : i32
    %c0_i32_0 = arith.constant 0 : i32
    return %arg0, %c0_i32 : i32, i32
  }
  func.func @transform_1(%arg0: i32) -> (i32, i32) {
    %c0_i32 = arith.constant 0 : i32
    %c0_i32_0 = arith.constant 0 : i32
    %c0_i32_1 = arith.constant 0 : i32
    return %c0_i32, %c0_i32_0 : i32, i32
  }
  func.func @transform_2(%arg0: i32) -> (i32, i32) {
    %c0_i32 = arith.constant 0 : i32
    %c0_i32_0 = arith.constant 0 : i32
    %c0_i32_1 = arith.constant 0 : i32
    return %c0_i32, %c0_i32_0 : i32, i32
  }
  func.func @transform_3(%arg0: i32) -> (i32, i32) {
    %c0_i32 = arith.constant 0 : i32
    %c0_i32_0 = arith.constant 0 : i32
    return %arg0, %c0_i32 : i32, i32
  }
}

module attributes {stable_mosaic.version = 11 : i64} {
  func.func @_mm_bias_act_kernel(%arg0: i32, %arg1: i32, %arg2: memref<64x128xbf16, #tpu.memory_space<vmem>>, %arg3: memref<128x128xbf16, #tpu.memory_space<vmem>>, %arg4: memref<8x128xf32, #tpu.memory_space<vmem>>, %arg5: memref<64x128xf32, #tpu.memory_space<vmem>>, %arg6: memref<64x128xf32, #tpu.memory_space<vmem>>) attributes {dimension_semantics = [#tpu.dimension_semantics<parallel>, #tpu.dimension_semantics<arbitrary>], iteration_bounds = array<i64: 1, 1>, scalar_prefetch = 0 : i64, scratch_operands = 1 : i64, tpu.core_type = #tpu.core_type<tc>, window_params = [{transform_indices = @transform_0, window_bounds = array<i64: 64, 128>}, {transform_indices = @transform_1, window_bounds = array<i64: 128, 128>}, {pipeline_mode = #tpu.pipeline_mode<synchronous>, transform_indices = @transform_2, window_bounds = array<i64: 8, 128>}, {transform_indices = @transform_3, window_bounds = array<i64: 64, 128>}]} {
    %c0_i32 = arith.constant 0 : i32
    %0 = arith.cmpi eq, %arg1, %c0_i32 : i32
    %1 = arith.extui %0 : i1 to i32
    %c0_i32_0 = arith.constant 0 : i32
    %2 = arith.cmpi ne, %1, %c0_i32_0 : i32
    scf.if %2 {
      %cst_10 = arith.constant 0.000000e+00 : f32
      %12 = vector.broadcast %cst_10 : f32 to vector<64x128xf32>
      %c0_11 = arith.constant 0 : index
      %c0_12 = arith.constant 0 : index
      %13 = vector.load %arg6[%c0_11, %c0_12] : memref<64x128xf32, #tpu.memory_space<vmem>>, vector<64x128xf32>
      tpu.vector_store %arg6[%c0_11, %c0_12], %12 {strides = array<i32>} : memref<64x128xf32, #tpu.memory_space<vmem>>, vector<64x128xf32>,
    } else {
    }
    %c0 = arith.constant 0 : index
    %c0_1 = arith.constant 0 : index
    %3 = vector.load %arg6[%c0, %c0_1] : memref<64x128xf32, #tpu.memory_space<vmem>>, vector<64x128xf32>
    %c0_2 = arith.constant 0 : index
    %c0_3 = arith.constant 0 : index
    %4 = vector.load %arg2[%c0_2, %c0_3] : memref<64x128xbf16, #tpu.memory_space<vmem>>, vector<64x128xbf16>
    %c0_4 = arith.constant 0 : index
    %c0_5 = arith.constant 0 : index
    %5 = vector.load %arg3[%c0_4, %c0_5] : memref<128x128xbf16, #tpu.memory_space<vmem>>, vector<128x128xbf16>
    %cst = arith.constant dense<0.000000e+00> : vector<64x128xf32>
    %6 = tpu.matmul %4, %5, %cst {dimension_numbers = #tpu.dot_dimension_numbers<[1], [0], [0], [1], [0, 0, 1, 1], [], []>} : vector<64x128xbf16>, vector<128x128xbf16>, vector<64x128xf32> -> vector<64x128xf32>
    %7 = arith.addf %3, %6 : vector<64x128xf32>
    %c0_6 = arith.constant 0 : index
    %c0_7 = arith.constant 0 : index
    %8 = vector.load %arg6[%c0_6, %c0_7] : memref<64x128xf32, #tpu.memory_space<vmem>>, vector<64x128xf32>
    tpu.vector_store %arg6[%c0_6, %c0_7], %7 {strides = array<i32>} : memref<64x128xf32, #tpu.memory_space<vmem>>, vector<64x128xf32>,
    %c0_i32_8 = arith.constant 0 : i32
    %9 = arith.cmpi eq, %arg1, %c0_i32_8 : i32
    %10 = arith.extui %9 : i1 to i32
    %c0_i32_9 = arith.constant 0 : i32
    %11 = arith.cmpi ne, %10, %c0_i32_9 : i32
    scf.if %11 {
      %c0_10 = arith.constant 0 : index
      %c0_11 = arith.constant 0 : index
      %12 = vector.load %arg6[%c0_10, %c0_11] : memref<64x128xf32, #tpu.memory_space<vmem>>, vector<64x128xf32>
      %c0_12 = arith.constant 0 : index
      %c0_13 = arith.constant 0 : index
      %13 = vector.load %arg4[%c0_12, %c0_13] : memref<8x128xf32, #tpu.memory_space<vmem>>, vector<1x128xf32>
      %14 = vector.broadcast %13 : vector<1x128xf32> to vector<64x128xf32>
      %15 = arith.addf %12, %14 : vector<64x128xf32>
      %c0_14 = arith.constant 0 : index
      %c0_15 = arith.constant 0 : index
      %16 = vector.load %arg5[%c0_14, %c0_15] : memref<64x128xf32, #tpu.memory_space<vmem>>, vector<64x128xf32>
      tpu.vector_store %arg5[%c0_14, %c0_15], %15 {strides = array<i32>} : memref<64x128xf32, #tpu.memory_space<vmem>>, vector<64x128xf32>,
    } else {
    }
    return
  }
  func.func @transform_0(%arg0: i32, %arg1: i32) -> (i32, i32) {
    %c0_i32 = arith.constant 0 : i32
    return %arg0, %arg1 : i32, i32
  }
  func.func @transform_1(%arg0: i32, %arg1: i32) -> (i32, i32) {
    %c0_i32 = arith.constant 0 : i32
    %c0_i32_0 = arith.constant 0 : i32
    return %arg1, %c0_i32 : i32, i32
  }
  func.func @transform_2(%arg0: i32, %arg1: i32) -> (i32, i32) {
    %c0_i32 = arith.constant 0 : i32
    %c0_i32_0 = arith.constant 0 : i32
    %c0_i32_1 = arith.constant 0 : i32
    return %c0_i32, %c0_i32_0 : i32, i32
  }
  func.func @transform_3(%arg0: i32, %arg1: i32) -> (i32, i32) {
    %c0_i32 = arith.constant 0 : i32
    %c0_i32_0 = arith.constant 0 : i32
    return %arg0, %c0_i32 : i32, i32
  }
}

module attributes {stable_mosaic.version = 11 : i64} {
  func.func @_gdn_kernel(%arg0: i32, %arg1: memref<256x128xf32, #tpu.memory_space<vmem>>, %arg2: memref<128x128xbf16, #tpu.memory_space<vmem>>, %arg3: memref<8x128xf32, #tpu.memory_space<vmem>>, %arg4: memref<256x128xf32, #tpu.memory_space<vmem>>) attributes {dimension_semantics = [#tpu.dimension_semantics<parallel>], iteration_bounds = array<i64: 1>, scalar_prefetch = 0 : i64, scratch_operands = 0 : i64, tpu.core_type = #tpu.core_type<tc>, window_params = [{transform_indices = @transform_0, window_bounds = array<i64: 256, 128>}, {pipeline_mode = #tpu.pipeline_mode<synchronous>, transform_indices = @transform_1, window_bounds = array<i64: 128, 128>}, {pipeline_mode = #tpu.pipeline_mode<synchronous>, transform_indices = @transform_2, window_bounds = array<i64: 8, 128>}, {transform_indices = @transform_3, window_bounds = array<i64: 256, 128>}]} {
    %c0 = arith.constant 0 : index
    %c0_0 = arith.constant 0 : index
    %0 = vector.load %arg1[%c0, %c0_0] : memref<256x128xf32, #tpu.memory_space<vmem>>, vector<256x128xf32>
    %1 = arith.mulf %0, %0 : vector<256x128xf32>
    %2 = arith.truncf %1 : vector<256x128xf32> to vector<256x128xbf16>
    %c0_1 = arith.constant 0 : index
    %c0_2 = arith.constant 0 : index
    %3 = vector.load %arg2[%c0_1, %c0_2] : memref<128x128xbf16, #tpu.memory_space<vmem>>, vector<128x128xbf16>
    %cst = arith.constant dense<0.000000e+00> : vector<256x128xf32>
    %4 = tpu.matmul %2, %3, %cst {dimension_numbers = #tpu.dot_dimension_numbers<[1], [0], [0], [1], [0, 0, 1, 1], [], []>} : vector<256x128xbf16>, vector<128x128xbf16>, vector<256x128xf32> -> vector<256x128xf32>
    %c0_3 = arith.constant 0 : index
    %c0_4 = arith.constant 0 : index
    %5 = vector.load %arg3[%c0_3, %c0_4] : memref<8x128xf32, #tpu.memory_space<vmem>>, vector<1x128xf32>
    %6 = vector.broadcast %5 : vector<1x128xf32> to vector<256x128xf32>
    %7 = arith.addf %4, %6 : vector<256x128xf32>
    %8 = math.sqrt %7 : vector<256x128xf32>
    %9 = arith.mulf %0, %8 : vector<256x128xf32>
    %c0_5 = arith.constant 0 : index
    %c0_6 = arith.constant 0 : index
    %10 = vector.load %arg4[%c0_5, %c0_6] : memref<256x128xf32, #tpu.memory_space<vmem>>, vector<256x128xf32>
    tpu.vector_store %arg4[%c0_5, %c0_6], %9 {strides = array<i32>} : memref<256x128xf32, #tpu.memory_space<vmem>>, vector<256x128xf32>,
    return
  }
  func.func @transform_0(%arg0: i32) -> (i32, i32) {
    %c0_i32 = arith.constant 0 : i32
    %c0_i32_0 = arith.constant 0 : i32
    return %arg0, %c0_i32 : i32, i32
  }
  func.func @transform_1(%arg0: i32) -> (i32, i32) {
    %c0_i32 = arith.constant 0 : i32
    %c0_i32_0 = arith.constant 0 : i32
    %c0_i32_1 = arith.constant 0 : i32
    return %c0_i32, %c0_i32_0 : i32, i32
  }
  func.func @transform_2(%arg0: i32) -> (i32, i32) {
    %c0_i32 = arith.constant 0 : i32
    %c0_i32_0 = arith.constant 0 : i32
    %c0_i32_1 = arith.constant 0 : i32
    return %c0_i32, %c0_i32_0 : i32, i32
  }
  func.func @transform_3(%arg0: i32) -> (i32, i32) {
    %c0_i32 = arith.constant 0 : i32
    %c0_i32_0 = arith.constant 0 : i32
    return %arg0, %c0_i32 : i32, i32
  }
}

module attributes {stable_mosaic.version = 11 : i64} {
  func.func @_mm_bias_act_kernel(%arg0: i32, %arg1: i32, %arg2: memref<256x128xbf16, #tpu.memory_space<vmem>>, %arg3: memref<128x128xbf16, #tpu.memory_space<vmem>>, %arg4: memref<8x128xf32, #tpu.memory_space<vmem>>, %arg5: memref<256x128xf32, #tpu.memory_space<vmem>>, %arg6: memref<256x128xf32, #tpu.memory_space<vmem>>) attributes {dimension_semantics = [#tpu.dimension_semantics<parallel>, #tpu.dimension_semantics<arbitrary>], iteration_bounds = array<i64: 1, 1>, scalar_prefetch = 0 : i64, scratch_operands = 1 : i64, tpu.core_type = #tpu.core_type<tc>, window_params = [{transform_indices = @transform_0, window_bounds = array<i64: 256, 128>}, {transform_indices = @transform_1, window_bounds = array<i64: 128, 128>}, {pipeline_mode = #tpu.pipeline_mode<synchronous>, transform_indices = @transform_2, window_bounds = array<i64: 8, 128>}, {transform_indices = @transform_3, window_bounds = array<i64: 256, 128>}]} {
    %c0_i32 = arith.constant 0 : i32
    %0 = arith.cmpi eq, %arg1, %c0_i32 : i32
    %1 = arith.extui %0 : i1 to i32
    %c0_i32_0 = arith.constant 0 : i32
    %2 = arith.cmpi ne, %1, %c0_i32_0 : i32
    scf.if %2 {
      %cst_10 = arith.constant 0.000000e+00 : f32
      %12 = vector.broadcast %cst_10 : f32 to vector<256x128xf32>
      %c0_11 = arith.constant 0 : index
      %c0_12 = arith.constant 0 : index
      %13 = vector.load %arg6[%c0_11, %c0_12] : memref<256x128xf32, #tpu.memory_space<vmem>>, vector<256x128xf32>
      tpu.vector_store %arg6[%c0_11, %c0_12], %12 {strides = array<i32>} : memref<256x128xf32, #tpu.memory_space<vmem>>, vector<256x128xf32>,
    } else {
    }
    %c0 = arith.constant 0 : index
    %c0_1 = arith.constant 0 : index
    %3 = vector.load %arg6[%c0, %c0_1] : memref<256x128xf32, #tpu.memory_space<vmem>>, vector<256x128xf32>
    %c0_2 = arith.constant 0 : index
    %c0_3 = arith.constant 0 : index
    %4 = vector.load %arg2[%c0_2, %c0_3] : memref<256x128xbf16, #tpu.memory_space<vmem>>, vector<256x128xbf16>
    %c0_4 = arith.constant 0 : index
    %c0_5 = arith.constant 0 : index
    %5 = vector.load %arg3[%c0_4, %c0_5] : memref<128x128xbf16, #tpu.memory_space<vmem>>, vector<128x128xbf16>
    %cst = arith.constant dense<0.000000e+00> : vector<256x128xf32>
    %6 = tpu.matmul %4, %5, %cst {dimension_numbers = #tpu.dot_dimension_numbers<[1], [0], [0], [1], [0, 0, 1, 1], [], []>} : vector<256x128xbf16>, vector<128x128xbf16>, vector<256x128xf32> -> vector<256x128xf32>
    %7 = arith.addf %3, %6 : vector<256x128xf32>
    %c0_6 = arith.constant 0 : index
    %c0_7 = arith.constant 0 : index
    %8 = vector.load %arg6[%c0_6, %c0_7] : memref<256x128xf32, #tpu.memory_space<vmem>>, vector<256x128xf32>
    tpu.vector_store %arg6[%c0_6, %c0_7], %7 {strides = array<i32>} : memref<256x128xf32, #tpu.memory_space<vmem>>, vector<256x128xf32>,
    %c0_i32_8 = arith.constant 0 : i32
    %9 = arith.cmpi eq, %arg1, %c0_i32_8 : i32
    %10 = arith.extui %9 : i1 to i32
    %c0_i32_9 = arith.constant 0 : i32
    %11 = arith.cmpi ne, %10, %c0_i32_9 : i32
    scf.if %11 {
      %c0_10 = arith.constant 0 : index
      %c0_11 = arith.constant 0 : index
      %12 = vector.load %arg6[%c0_10, %c0_11] : memref<256x128xf32, #tpu.memory_space<vmem>>, vector<256x128xf32>
      %c0_12 = arith.constant 0 : index
      %c0_13 = arith.constant 0 : index
      %13 = vector.load %arg4[%c0_12, %c0_13] : memref<8x128xf32, #tpu.memory_space<vmem>>, vector<1x128xf32>
      %14 = vector.broadcast %13 : vector<1x128xf32> to vector<256x128xf32>
      %15 = arith.addf %12, %14 : vector<256x128xf32>
      %c0_14 = arith.constant 0 : index
      %c0_15 = arith.constant 0 : index
      %16 = vector.load %arg5[%c0_14, %c0_15] : memref<256x128xf32, #tpu.memory_space<vmem>>, vector<256x128xf32>
      tpu.vector_store %arg5[%c0_14, %c0_15], %15 {strides = array<i32>} : memref<256x128xf32, #tpu.memory_space<vmem>>, vector<256x128xf32>,
    } else {
    }
    return
  }
  func.func @transform_0(%arg0: i32, %arg1: i32) -> (i32, i32) {
    %c0_i32 = arith.constant 0 : i32
    return %arg0, %arg1 : i32, i32
  }
  func.func @transform_1(%arg0: i32, %arg1: i32) -> (i32, i32) {
    %c0_i32 = arith.constant 0 : i32
    %c0_i32_0 = arith.constant 0 : i32
    return %arg1, %c0_i32 : i32, i32
  }
  func.func @transform_2(%arg0: i32, %arg1: i32) -> (i32, i32) {
    %c0_i32 = arith.constant 0 : i32
    %c0_i32_0 = arith.constant 0 : i32
    %c0_i32_1 = arith.constant 0 : i32
    return %c0_i32, %c0_i32_0 : i32, i32
  }
  func.func @transform_3(%arg0: i32, %arg1: i32) -> (i32, i32) {
    %c0_i32 = arith.constant 0 : i32
    %c0_i32_0 = arith.constant 0 : i32
    return %arg0, %c0_i32 : i32, i32
  }
}

module attributes {stable_mosaic.version = 11 : i64} {
  func.func @_gdn_kernel(%arg0: i32, %arg1: memref<512x128xf32, #tpu.memory_space<vmem>>, %arg2: memref<128x128xbf16, #tpu.memory_space<vmem>>, %arg3: memref<8x128xf32, #tpu.memory_space<vmem>>, %arg4: memref<512x128xf32, #tpu.memory_space<vmem>>) attributes {dimension_semantics = [#tpu.dimension_semantics<parallel>], iteration_bounds = array<i64: 2>, scalar_prefetch = 0 : i64, scratch_operands = 0 : i64, tpu.core_type = #tpu.core_type<tc>, window_params = [{transform_indices = @transform_0, window_bounds = array<i64: 512, 128>}, {pipeline_mode = #tpu.pipeline_mode<synchronous>, transform_indices = @transform_1, window_bounds = array<i64: 128, 128>}, {pipeline_mode = #tpu.pipeline_mode<synchronous>, transform_indices = @transform_2, window_bounds = array<i64: 8, 128>}, {transform_indices = @transform_3, window_bounds = array<i64: 512, 128>}]} {
    %c0 = arith.constant 0 : index
    %c0_0 = arith.constant 0 : index
    %0 = vector.load %arg1[%c0, %c0_0] : memref<512x128xf32, #tpu.memory_space<vmem>>, vector<512x128xf32>
    %1 = arith.mulf %0, %0 : vector<512x128xf32>
    %2 = arith.truncf %1 : vector<512x128xf32> to vector<512x128xbf16>
    %c0_1 = arith.constant 0 : index
    %c0_2 = arith.constant 0 : index
    %3 = vector.load %arg2[%c0_1, %c0_2] : memref<128x128xbf16, #tpu.memory_space<vmem>>, vector<128x128xbf16>
    %cst = arith.constant dense<0.000000e+00> : vector<512x128xf32>
    %4 = tpu.matmul %2, %3, %cst {dimension_numbers = #tpu.dot_dimension_numbers<[1], [0], [0], [1], [0, 0, 1, 1], [], []>} : vector<512x128xbf16>, vector<128x128xbf16>, vector<512x128xf32> -> vector<512x128xf32>
    %c0_3 = arith.constant 0 : index
    %c0_4 = arith.constant 0 : index
    %5 = vector.load %arg3[%c0_3, %c0_4] : memref<8x128xf32, #tpu.memory_space<vmem>>, vector<1x128xf32>
    %6 = vector.broadcast %5 : vector<1x128xf32> to vector<512x128xf32>
    %7 = arith.addf %4, %6 : vector<512x128xf32>
    %8 = math.sqrt %7 : vector<512x128xf32>
    %9 = arith.mulf %0, %8 : vector<512x128xf32>
    %c0_5 = arith.constant 0 : index
    %c0_6 = arith.constant 0 : index
    %10 = vector.load %arg4[%c0_5, %c0_6] : memref<512x128xf32, #tpu.memory_space<vmem>>, vector<512x128xf32>
    tpu.vector_store %arg4[%c0_5, %c0_6], %9 {strides = array<i32>} : memref<512x128xf32, #tpu.memory_space<vmem>>, vector<512x128xf32>,
    return
  }
  func.func @transform_0(%arg0: i32) -> (i32, i32) {
    %c0_i32 = arith.constant 0 : i32
    %c0_i32_0 = arith.constant 0 : i32
    return %arg0, %c0_i32 : i32, i32
  }
  func.func @transform_1(%arg0: i32) -> (i32, i32) {
    %c0_i32 = arith.constant 0 : i32
    %c0_i32_0 = arith.constant 0 : i32
    %c0_i32_1 = arith.constant 0 : i32
    return %c0_i32, %c0_i32_0 : i32, i32
  }
  func.func @transform_2(%arg0: i32) -> (i32, i32) {
    %c0_i32 = arith.constant 0 : i32
    %c0_i32_0 = arith.constant 0 : i32
    %c0_i32_1 = arith.constant 0 : i32
    return %c0_i32, %c0_i32_0 : i32, i32
  }
  func.func @transform_3(%arg0: i32) -> (i32, i32) {
    %c0_i32 = arith.constant 0 : i32
    %c0_i32_0 = arith.constant 0 : i32
    return %arg0, %c0_i32 : i32, i32
  }
}

module attributes {stable_mosaic.version = 11 : i64} {
  func.func @_sumsq_kernel(%arg0: i32, %arg1: memref<8x512xf32, #tpu.memory_space<vmem>>, %arg2: memref<1x512xf32, #tpu.memory_space<vmem>>) attributes {dimension_semantics = [#tpu.dimension_semantics<arbitrary>], iteration_bounds = array<i64: 1>, scalar_prefetch = 0 : i64, scratch_operands = 0 : i64, tpu.core_type = #tpu.core_type<tc>, window_params = [{transform_indices = @transform_0, window_bounds = array<i64: 8, 512>}, {pipeline_mode = #tpu.pipeline_mode<synchronous>, transform_indices = @transform_1, window_bounds = array<i64: 1, 512>}]} {
    %c0_i32 = arith.constant 0 : i32
    %0 = arith.cmpi eq, %arg0, %c0_i32 : i32
    %1 = arith.extui %0 : i1 to i32
    %c0_i32_0 = arith.constant 0 : i32
    %2 = arith.cmpi ne, %1, %c0_i32_0 : i32
    scf.if %2 {
      %cst_6 = arith.constant 0.000000e+00 : f32
      %10 = vector.broadcast %cst_6 : f32 to vector<1x512xf32>
      %c0_7 = arith.constant 0 : index
      %c0_8 = arith.constant 0 : index
      %11 = vector.load %arg2[%c0_7, %c0_8] : memref<1x512xf32, #tpu.memory_space<vmem>>, vector<1x512xf32>
      tpu.vector_store %arg2[%c0_7, %c0_8], %10 {strides = array<i32>} : memref<1x512xf32, #tpu.memory_space<vmem>>, vector<1x512xf32>,
    } else {
    }
    %c0 = arith.constant 0 : index
    %c0_1 = arith.constant 0 : index
    %3 = vector.load %arg1[%c0, %c0_1] : memref<8x512xf32, #tpu.memory_space<vmem>>, vector<8x512xf32>
    %c0_2 = arith.constant 0 : index
    %c0_3 = arith.constant 0 : index
    %4 = vector.load %arg2[%c0_2, %c0_3] : memref<1x512xf32, #tpu.memory_space<vmem>>, vector<1x512xf32>
    %5 = arith.mulf %3, %3 : vector<8x512xf32>
    %cst = arith.constant dense<0.000000e+00> : vector<512xf32>
    %6 = vector.multi_reduction <add>, %5, %cst [0] : vector<8x512xf32> to vector<512xf32>
    %7 = vector.shape_cast %6 : vector<512xf32> to vector<1x512xf32>
    %8 = arith.addf %4, %7 : vector<1x512xf32>
    %c0_4 = arith.constant 0 : index
    %c0_5 = arith.constant 0 : index
    %9 = vector.load %arg2[%c0_4, %c0_5] : memref<1x512xf32, #tpu.memory_space<vmem>>, vector<1x512xf32>
    tpu.vector_store %arg2[%c0_4, %c0_5], %8 {strides = array<i32>} : memref<1x512xf32, #tpu.memory_space<vmem>>, vector<1x512xf32>,
    return
  }
  func.func @transform_0(%arg0: i32) -> (i32, i32) {
    %c0_i32 = arith.constant 0 : i32
    %c0_i32_0 = arith.constant 0 : i32
    return %arg0, %c0_i32 : i32, i32
  }
  func.func @transform_1(%arg0: i32) -> (i32, i32) {
    %c0_i32 = arith.constant 0 : i32
    %c0_i32_0 = arith.constant 0 : i32
    %c0_i32_1 = arith.constant 0 : i32
    return %c0_i32, %c0_i32_0 : i32, i32
  }
}

module attributes {stable_mosaic.version = 11 : i64} {
  func.func @_eb_likelihood_kernel(%arg0: memref<16x128xf32, #tpu.memory_space<vmem>>, %arg1: memref<64x128xf32, #tpu.memory_space<vmem>>, %arg2: memref<8x128xf32, #tpu.memory_space<vmem>>) attributes {dimension_semantics = [], scalar_prefetch = 0 : i64, scratch_operands = 0 : i64, tpu.core_type = #tpu.core_type<tc>} {
    %c0 = arith.constant 0 : index
    %c0_0 = arith.constant 0 : index
    %0 = vector.load %arg0[%c0, %c0_0] : memref<16x128xf32, #tpu.memory_space<vmem>>, vector<16x128xf32>
    %c0_1 = arith.constant 0 : index
    %c0_2 = arith.constant 0 : index
    %1 = vector.load %arg1[%c0_1, %c0_2] : memref<64x128xf32, #tpu.memory_space<vmem>>, vector<64x128xf32>
    %cst = arith.constant 0.000000e+00 : f32
    %2 = vector.broadcast %cst : f32 to vector<16x128xf32>
    %3 = vector.extract_strided_slice %1 {offsets = [0, 0], sizes = [1, 128], strides = [1, 1]} : vector<64x128xf32> to vector<1x128xf32>
    %4 = vector.shape_cast %3 : vector<1x128xf32> to vector<128xf32>
    %5 = vector.shape_cast %4 : vector<128xf32> to vector<1x128xf32>
    %6 = vector.broadcast %5 : vector<1x128xf32> to vector<16x128xf32>
    %7 = arith.mulf %6, %0 : vector<16x128xf32>
    %8 = arith.addf %2, %7 : vector<16x128xf32>
    %9 = vector.extract_strided_slice %1 {offsets = [3, 0], sizes = [1, 128], strides = [1, 1]} : vector<64x128xf32> to vector<1x128xf32>
    %10 = vector.shape_cast %9 : vector<1x128xf32> to vector<128xf32>
    %11 = vector.shape_cast %10 : vector<128xf32> to vector<1x128xf32>
    %12 = vector.broadcast %11 : vector<1x128xf32> to vector<16x128xf32>
    %13 = arith.addf %8, %12 : vector<16x128xf32>
    %cst_3 = arith.constant 0.000000e+00 : f32
    %14 = vector.broadcast %cst_3 : f32 to vector<16x128xf32>
    %15 = vector.extract_strided_slice %1 {offsets = [1, 0], sizes = [1, 128], strides = [1, 1]} : vector<64x128xf32> to vector<1x128xf32>
    %16 = vector.shape_cast %15 : vector<1x128xf32> to vector<128xf32>
    %17 = vector.shape_cast %16 : vector<128xf32> to vector<1x128xf32>
    %18 = vector.broadcast %17 : vector<1x128xf32> to vector<16x128xf32>
    %19 = arith.mulf %18, %0 : vector<16x128xf32>
    %20 = arith.addf %14, %19 : vector<16x128xf32>
    %21 = vector.extract_strided_slice %1 {offsets = [4, 0], sizes = [1, 128], strides = [1, 1]} : vector<64x128xf32> to vector<1x128xf32>
    %22 = vector.shape_cast %21 : vector<1x128xf32> to vector<128xf32>
    %23 = vector.shape_cast %22 : vector<128xf32> to vector<1x128xf32>
    %24 = vector.broadcast %23 : vector<1x128xf32> to vector<16x128xf32>
    %25 = arith.addf %20, %24 : vector<16x128xf32>
    %cst_4 = arith.constant 0.000000e+00 : f32
    %26 = vector.broadcast %cst_4 : f32 to vector<16x128xf32>
    %27 = vector.extract_strided_slice %1 {offsets = [2, 0], sizes = [1, 128], strides = [1, 1]} : vector<64x128xf32> to vector<1x128xf32>
    %28 = vector.shape_cast %27 : vector<1x128xf32> to vector<128xf32>
    %29 = vector.shape_cast %28 : vector<128xf32> to vector<1x128xf32>
    %30 = vector.broadcast %29 : vector<1x128xf32> to vector<16x128xf32>
    %31 = arith.mulf %30, %0 : vector<16x128xf32>
    %32 = arith.addf %26, %31 : vector<16x128xf32>
    %33 = vector.extract_strided_slice %1 {offsets = [5, 0], sizes = [1, 128], strides = [1, 1]} : vector<64x128xf32> to vector<1x128xf32>
    %34 = vector.shape_cast %33 : vector<1x128xf32> to vector<128xf32>
    %35 = vector.shape_cast %34 : vector<128xf32> to vector<1x128xf32>
    %36 = vector.broadcast %35 : vector<1x128xf32> to vector<16x128xf32>
    %37 = arith.addf %32, %36 : vector<16x128xf32>
    %38 = vector.extract_strided_slice %1 {offsets = [6, 0], sizes = [1, 128], strides = [1, 1]} : vector<64x128xf32> to vector<1x128xf32>
    %39 = vector.shape_cast %38 : vector<1x128xf32> to vector<128xf32>
    %40 = vector.shape_cast %39 : vector<128xf32> to vector<1x128xf32>
    %41 = math.tanh %13 : vector<16x128xf32>
    %42 = vector.broadcast %40 : vector<1x128xf32> to vector<16x128xf32>
    %43 = arith.mulf %42, %41 : vector<16x128xf32>
    %44 = arith.addf %13, %43 : vector<16x128xf32>
    %45 = vector.extract_strided_slice %1 {offsets = [7, 0], sizes = [1, 128], strides = [1, 1]} : vector<64x128xf32> to vector<1x128xf32>
    %46 = vector.shape_cast %45 : vector<1x128xf32> to vector<128xf32>
    %47 = vector.shape_cast %46 : vector<128xf32> to vector<1x128xf32>
    %48 = math.tanh %25 : vector<16x128xf32>
    %49 = vector.broadcast %47 : vector<1x128xf32> to vector<16x128xf32>
    %50 = arith.mulf %49, %48 : vector<16x128xf32>
    %51 = arith.addf %25, %50 : vector<16x128xf32>
    %52 = vector.extract_strided_slice %1 {offsets = [8, 0], sizes = [1, 128], strides = [1, 1]} : vector<64x128xf32> to vector<1x128xf32>
    %53 = vector.shape_cast %52 : vector<1x128xf32> to vector<128xf32>
    %54 = vector.shape_cast %53 : vector<128xf32> to vector<1x128xf32>
    %55 = math.tanh %37 : vector<16x128xf32>
    %56 = vector.broadcast %54 : vector<1x128xf32> to vector<16x128xf32>
    %57 = arith.mulf %56, %55 : vector<16x128xf32>
    %58 = arith.addf %37, %57 : vector<16x128xf32>
    %cst_5 = arith.constant 0.000000e+00 : f32
    %59 = vector.broadcast %cst_5 : f32 to vector<16x128xf32>
    %60 = vector.extract_strided_slice %1 {offsets = [9, 0], sizes = [1, 128], strides = [1, 1]} : vector<64x128xf32> to vector<1x128xf32>
    %61 = vector.shape_cast %60 : vector<1x128xf32> to vector<128xf32>
    %62 = vector.shape_cast %61 : vector<128xf32> to vector<1x128xf32>
    %63 = vector.broadcast %62 : vector<1x128xf32> to vector<16x128xf32>
    %64 = arith.mulf %63, %44 : vector<16x128xf32>
    %65 = arith.addf %59, %64 : vector<16x128xf32>
    %66 = vector.extract_strided_slice %1 {offsets = [10, 0], sizes = [1, 128], strides = [1, 1]} : vector<64x128xf32> to vector<1x128xf32>
    %67 = vector.shape_cast %66 : vector<1x128xf32> to vector<128xf32>
    %68 = vector.shape_cast %67 : vector<128xf32> to vector<1x128xf32>
    %69 = vector.broadcast %68 : vector<1x128xf32> to vector<16x128xf32>
    %70 = arith.mulf %69, %51 : vector<16x128xf32>
    %71 = arith.addf %65, %70 : vector<16x128xf32>
    %72 = vector.extract_strided_slice %1 {offsets = [11, 0], sizes = [1, 128], strides = [1, 1]} : vector<64x128xf32> to vector<1x128xf32>
    %73 = vector.shape_cast %72 : vector<1x128xf32> to vector<128xf32>
    %74 = vector.shape_cast %73 : vector<128xf32> to vector<1x128xf32>
    %75 = vector.broadcast %74 : vector<1x128xf32> to vector<16x128xf32>
    %76 = arith.mulf %75, %58 : vector<16x128xf32>
    %77 = arith.addf %71, %76 : vector<16x128xf32>
    %78 = vector.extract_strided_slice %1 {offsets = [18, 0], sizes = [1, 128], strides = [1, 1]} : vector<64x128xf32> to vector<1x128xf32>
    %79 = vector.shape_cast %78 : vector<1x128xf32> to vector<128xf32>
    %80 = vector.shape_cast %79 : vector<128xf32> to vector<1x128xf32>
    %81 = vector.broadcast %80 : vector<1x128xf32> to vector<16x128xf32>
    %82 = arith.addf %77, %81 : vector<16x128xf32>
    %cst_6 = arith.constant 0.000000e+00 : f32
    %83 = vector.broadcast %cst_6 : f32 to vector<16x128xf32>
    %84 = vector.extract_strided_slice %1 {offsets = [12, 0], sizes = [1, 128], strides = [1, 1]} : vector<64x128xf32> to vector<1x128xf32>
    %85 = vector.shape_cast %84 : vector<1x128xf32> to vector<128xf32>
    %86 = vector.shape_cast %85 : vector<128xf32> to vector<1x128xf32>
    %87 = vector.broadcast %86 : vector<1x128xf32> to vector<16x128xf32>
    %88 = arith.mulf %87, %44 : vector<16x128xf32>
    %89 = arith.addf %83, %88 : vector<16x128xf32>
    %90 = vector.extract_strided_slice %1 {offsets = [13, 0], sizes = [1, 128], strides = [1, 1]} : vector<64x128xf32> to vector<1x128xf32>
    %91 = vector.shape_cast %90 : vector<1x128xf32> to vector<128xf32>
    %92 = vector.shape_cast %91 : vector<128xf32> to vector<1x128xf32>
    %93 = vector.broadcast %92 : vector<1x128xf32> to vector<16x128xf32>
    %94 = arith.mulf %93, %51 : vector<16x128xf32>
    %95 = arith.addf %89, %94 : vector<16x128xf32>
    %96 = vector.extract_strided_slice %1 {offsets = [14, 0], sizes = [1, 128], strides = [1, 1]} : vector<64x128xf32> to vector<1x128xf32>
    %97 = vector.shape_cast %96 : vector<1x128xf32> to vector<128xf32>
    %98 = vector.shape_cast %97 : vector<128xf32> to vector<1x128xf32>
    %99 = vector.broadcast %98 : vector<1x128xf32> to vector<16x128xf32>
    %100 = arith.mulf %99, %58 : vector<16x128xf32>
    %101 = arith.addf %95, %100 : vector<16x128xf32>
    %102 = vector.extract_strided_slice %1 {offsets = [19, 0], sizes = [1, 128], strides = [1, 1]} : vector<64x128xf32> to vector<1x128xf32>
    %103 = vector.shape_cast %102 : vector<1x128xf32> to vector<128xf32>
    %104 = vector.shape_cast %103 : vector<128xf32> to vector<1x128xf32>
    %105 = vector.broadcast %104 : vector<1x128xf32> to vector<16x128xf32>
    %106 = arith.addf %101, %105 : vector<16x128xf32>
    %cst_7 = arith.constant 0.000000e+00 : f32
    %107 = vector.broadcast %cst_7 : f32 to vector<16x128xf32>
    %108 = vector.extract_strided_slice %1 {offsets = [15, 0], sizes = [1, 128], strides = [1, 1]} : vector<64x128xf32> to vector<1x128xf32>
    %109 = vector.shape_cast %108 : vector<1x128xf32> to vector<128xf32>
    %110 = vector.shape_cast %109 : vector<128xf32> to vector<1x128xf32>
    %111 = vector.broadcast %110 : vector<1x128xf32> to vector<16x128xf32>
    %112 = arith.mulf %111, %44 : vector<16x128xf32>
    %113 = arith.addf %107, %112 : vector<16x128xf32>
    %114 = vector.extract_strided_slice %1 {offsets = [16, 0], sizes = [1, 128], strides = [1, 1]} : vector<64x128xf32> to vector<1x128xf32>
    %115 = vector.shape_cast %114 : vector<1x128xf32> to vector<128xf32>
    %116 = vector.shape_cast %115 : vector<128xf32> to vector<1x128xf32>
    %117 = vector.broadcast %116 : vector<1x128xf32> to vector<16x128xf32>
    %118 = arith.mulf %117, %51 : vector<16x128xf32>
    %119 = arith.addf %113, %118 : vector<16x128xf32>
    %120 = vector.extract_strided_slice %1 {offsets = [17, 0], sizes = [1, 128], strides = [1, 1]} : vector<64x128xf32> to vector<1x128xf32>
    %121 = vector.shape_cast %120 : vector<1x128xf32> to vector<128xf32>
    %122 = vector.shape_cast %121 : vector<128xf32> to vector<1x128xf32>
    %123 = vector.broadcast %122 : vector<1x128xf32> to vector<16x128xf32>
    %124 = arith.mulf %123, %58 : vector<16x128xf32>
    %125 = arith.addf %119, %124 : vector<16x128xf32>
    %126 = vector.extract_strided_slice %1 {offsets = [20, 0], sizes = [1, 128], strides = [1, 1]} : vector<64x128xf32> to vector<1x128xf32>
    %127 = vector.shape_cast %126 : vector<1x128xf32> to vector<128xf32>
    %128 = vector.shape_cast %127 : vector<128xf32> to vector<1x128xf32>
    %129 = vector.broadcast %128 : vector<1x128xf32> to vector<16x128xf32>
    %130 = arith.addf %125, %129 : vector<16x128xf32>
    %131 = vector.extract_strided_slice %1 {offsets = [21, 0], sizes = [1, 128], strides = [1, 1]} : vector<64x128xf32> to vector<1x128xf32>
    %132 = vector.shape_cast %131 : vector<1x128xf32> to vector<128xf32>
    %133 = vector.shape_cast %132 : vector<128xf32> to vector<1x128xf32>
    %134 = math.tanh %82 : vector<16x128xf32>
    %135 = vector.broadcast %133 : vector<1x128xf32> to vector<16x128xf32>
    %136 = arith.mulf %135, %134 : vector<16x128xf32>
    %137 = arith.addf %82, %136 : vector<16x128xf32>
    %138 = vector.extract_strided_slice %1 {offsets = [22, 0], sizes = [1, 128], strides = [1, 1]} : vector<64x128xf32> to vector<1x128xf32>
    %139 = vector.shape_cast %138 : vector<1x128xf32> to vector<128xf32>
    %140 = vector.shape_cast %139 : vector<128xf32> to vector<1x128xf32>
    %141 = math.tanh %106 : vector<16x128xf32>
    %142 = vector.broadcast %140 : vector<1x128xf32> to vector<16x128xf32>
    %143 = arith.mulf %142, %141 : vector<16x128xf32>
    %144 = arith.addf %106, %143 : vector<16x128xf32>
    %145 = vector.extract_strided_slice %1 {offsets = [23, 0], sizes = [1, 128], strides = [1, 1]} : vector<64x128xf32> to vector<1x128xf32>
    %146 = vector.shape_cast %145 : vector<1x128xf32> to vector<128xf32>
    %147 = vector.shape_cast %146 : vector<128xf32> to vector<1x128xf32>
    %148 = math.tanh %130 : vector<16x128xf32>
    %149 = vector.broadcast %147 : vector<1x128xf32> to vector<16x128xf32>
    %150 = arith.mulf %149, %148 : vector<16x128xf32>
    %151 = arith.addf %130, %150 : vector<16x128xf32>
    %cst_8 = arith.constant 0.000000e+00 : f32
    %152 = vector.broadcast %cst_8 : f32 to vector<16x128xf32>
    %153 = vector.extract_strided_slice %1 {offsets = [24, 0], sizes = [1, 128], strides = [1, 1]} : vector<64x128xf32> to vector<1x128xf32>
    %154 = vector.shape_cast %153 : vector<1x128xf32> to vector<128xf32>
    %155 = vector.shape_cast %154 : vector<128xf32> to vector<1x128xf32>
    %156 = vector.broadcast %155 : vector<1x128xf32> to vector<16x128xf32>
    %157 = arith.mulf %156, %137 : vector<16x128xf32>
    %158 = arith.addf %152, %157 : vector<16x128xf32>
    %159 = vector.extract_strided_slice %1 {offsets = [25, 0], sizes = [1, 128], strides = [1, 1]} : vector<64x128xf32> to vector<1x128xf32>
    %160 = vector.shape_cast %159 : vector<1x128xf32> to vector<128xf32>
    %161 = vector.shape_cast %160 : vector<128xf32> to vector<1x128xf32>
    %162 = vector.broadcast %161 : vector<1x128xf32> to vector<16x128xf32>
    %163 = arith.mulf %162, %144 : vector<16x128xf32>
    %164 = arith.addf %158, %163 : vector<16x128xf32>
    %165 = vector.extract_strided_slice %1 {offsets = [26, 0], sizes = [1, 128], strides = [1, 1]} : vector<64x128xf32> to vector<1x128xf32>
    %166 = vector.shape_cast %165 : vector<1x128xf32> to vector<128xf32>
    %167 = vector.shape_cast %166 : vector<128xf32> to vector<1x128xf32>
    %168 = vector.broadcast %167 : vector<1x128xf32> to vector<16x128xf32>
    %169 = arith.mulf %168, %151 : vector<16x128xf32>
    %170 = arith.addf %164, %169 : vector<16x128xf32>
    %171 = vector.extract_strided_slice %1 {offsets = [33, 0], sizes = [1, 128], strides = [1, 1]} : vector<64x128xf32> to vector<1x128xf32>
    %172 = vector.shape_cast %171 : vector<1x128xf32> to vector<128xf32>
    %173 = vector.shape_cast %172 : vector<128xf32> to vector<1x128xf32>
    %174 = vector.broadcast %173 : vector<1x128xf32> to vector<16x128xf32>
    %175 = arith.addf %170, %174 : vector<16x128xf32>
    %cst_9 = arith.constant 0.000000e+00 : f32
    %176 = vector.broadcast %cst_9 : f32 to vector<16x128xf32>
    %177 = vector.extract_strided_slice %1 {offsets = [27, 0], sizes = [1, 128], strides = [1, 1]} : vector<64x128xf32> to vector<1x128xf32>
    %178 = vector.shape_cast %177 : vector<1x128xf32> to vector<128xf32>
    %179 = vector.shape_cast %178 : vector<128xf32> to vector<1x128xf32>
    %180 = vector.broadcast %179 : vector<1x128xf32> to vector<16x128xf32>
    %181 = arith.mulf %180, %137 : vector<16x128xf32>
    %182 = arith.addf %176, %181 : vector<16x128xf32>
    %183 = vector.extract_strided_slice %1 {offsets = [28, 0], sizes = [1, 128], strides = [1, 1]} : vector<64x128xf32> to vector<1x128xf32>
    %184 = vector.shape_cast %183 : vector<1x128xf32> to vector<128xf32>
    %185 = vector.shape_cast %184 : vector<128xf32> to vector<1x128xf32>
    %186 = vector.broadcast %185 : vector<1x128xf32> to vector<16x128xf32>
    %187 = arith.mulf %186, %144 : vector<16x128xf32>
    %188 = arith.addf %182, %187 : vector<16x128xf32>
    %189 = vector.extract_strided_slice %1 {offsets = [29, 0], sizes = [1, 128], strides = [1, 1]} : vector<64x128xf32> to vector<1x128xf32>
    %190 = vector.shape_cast %189 : vector<1x128xf32> to vector<128xf32>
    %191 = vector.shape_cast %190 : vector<128xf32> to vector<1x128xf32>
    %192 = vector.broadcast %191 : vector<1x128xf32> to vector<16x128xf32>
    %193 = arith.mulf %192, %151 : vector<16x128xf32>
    %194 = arith.addf %188, %193 : vector<16x128xf32>
    %195 = vector.extract_strided_slice %1 {offsets = [34, 0], sizes = [1, 128], strides = [1, 1]} : vector<64x128xf32> to vector<1x128xf32>
    %196 = vector.shape_cast %195 : vector<1x128xf32> to vector<128xf32>
    %197 = vector.shape_cast %196 : vector<128xf32> to vector<1x128xf32>
    %198 = vector.broadcast %197 : vector<1x128xf32> to vector<16x128xf32>
    %199 = arith.addf %194, %198 : vector<16x128xf32>
    %cst_10 = arith.constant 0.000000e+00 : f32
    %200 = vector.broadcast %cst_10 : f32 to vector<16x128xf32>
    %201 = vector.extract_strided_slice %1 {offsets = [30, 0], sizes = [1, 128], strides = [1, 1]} : vector<64x128xf32> to vector<1x128xf32>
    %202 = vector.shape_cast %201 : vector<1x128xf32> to vector<128xf32>
    %203 = vector.shape_cast %202 : vector<128xf32> to vector<1x128xf32>
    %204 = vector.broadcast %203 : vector<1x128xf32> to vector<16x128xf32>
    %205 = arith.mulf %204, %137 : vector<16x128xf32>
    %206 = arith.addf %200, %205 : vector<16x128xf32>
    %207 = vector.extract_strided_slice %1 {offsets = [31, 0], sizes = [1, 128], strides = [1, 1]} : vector<64x128xf32> to vector<1x128xf32>
    %208 = vector.shape_cast %207 : vector<1x128xf32> to vector<128xf32>
    %209 = vector.shape_cast %208 : vector<128xf32> to vector<1x128xf32>
    %210 = vector.broadcast %209 : vector<1x128xf32> to vector<16x128xf32>
    %211 = arith.mulf %210, %144 : vector<16x128xf32>
    %212 = arith.addf %206, %211 : vector<16x128xf32>
    %213 = vector.extract_strided_slice %1 {offsets = [32, 0], sizes = [1, 128], strides = [1, 1]} : vector<64x128xf32> to vector<1x128xf32>
    %214 = vector.shape_cast %213 : vector<1x128xf32> to vector<128xf32>
    %215 = vector.shape_cast %214 : vector<128xf32> to vector<1x128xf32>
    %216 = vector.broadcast %215 : vector<1x128xf32> to vector<16x128xf32>
    %217 = arith.mulf %216, %151 : vector<16x128xf32>
    %218 = arith.addf %212, %217 : vector<16x128xf32>
    %219 = vector.extract_strided_slice %1 {offsets = [35, 0], sizes = [1, 128], strides = [1, 1]} : vector<64x128xf32> to vector<1x128xf32>
    %220 = vector.shape_cast %219 : vector<1x128xf32> to vector<128xf32>
    %221 = vector.shape_cast %220 : vector<128xf32> to vector<1x128xf32>
    %222 = vector.broadcast %221 : vector<1x128xf32> to vector<16x128xf32>
    %223 = arith.addf %218, %222 : vector<16x128xf32>
    %224 = vector.extract_strided_slice %1 {offsets = [36, 0], sizes = [1, 128], strides = [1, 1]} : vector<64x128xf32> to vector<1x128xf32>
    %225 = vector.shape_cast %224 : vector<1x128xf32> to vector<128xf32>
    %226 = vector.shape_cast %225 : vector<128xf32> to vector<1x128xf32>
    %227 = math.tanh %175 : vector<16x128xf32>
    %228 = vector.broadcast %226 : vector<1x128xf32> to vector<16x128xf32>
    %229 = arith.mulf %228, %227 : vector<16x128xf32>
    %230 = arith.addf %175, %229 : vector<16x128xf32>
    %231 = vector.extract_strided_slice %1 {offsets = [37, 0], sizes = [1, 128], strides = [1, 1]} : vector<64x128xf32> to vector<1x128xf32>
    %232 = vector.shape_cast %231 : vector<1x128xf32> to vector<128xf32>
    %233 = vector.shape_cast %232 : vector<128xf32> to vector<1x128xf32>
    %234 = math.tanh %199 : vector<16x128xf32>
    %235 = vector.broadcast %233 : vector<1x128xf32> to vector<16x128xf32>
    %236 = arith.mulf %235, %234 : vector<16x128xf32>
    %237 = arith.addf %199, %236 : vector<16x128xf32>
    %238 = vector.extract_strided_slice %1 {offsets = [38, 0], sizes = [1, 128], strides = [1, 1]} : vector<64x128xf32> to vector<1x128xf32>
    %239 = vector.shape_cast %238 : vector<1x128xf32> to vector<128xf32>
    %240 = vector.shape_cast %239 : vector<128xf32> to vector<1x128xf32>
    %241 = math.tanh %223 : vector<16x128xf32>
    %242 = vector.broadcast %240 : vector<1x128xf32> to vector<16x128xf32>
    %243 = arith.mulf %242, %241 : vector<16x128xf32>
    %244 = arith.addf %223, %243 : vector<16x128xf32>
    %cst_11 = arith.constant 0.000000e+00 : f32
    %245 = vector.broadcast %cst_11 : f32 to vector<16x128xf32>
    %246 = vector.extract_strided_slice %1 {offsets = [39, 0], sizes = [1, 128], strides = [1, 1]} : vector<64x128xf32> to vector<1x128xf32>
    %247 = vector.shape_cast %246 : vector<1x128xf32> to vector<128xf32>
    %248 = vector.shape_cast %247 : vector<128xf32> to vector<1x128xf32>
    %249 = vector.broadcast %248 : vector<1x128xf32> to vector<16x128xf32>
    %250 = arith.mulf %249, %230 : vector<16x128xf32>
    %251 = arith.addf %245, %250 : vector<16x128xf32>
    %252 = vector.extract_strided_slice %1 {offsets = [40, 0], sizes = [1, 128], strides = [1, 1]} : vector<64x128xf32> to vector<1x128xf32>
    %253 = vector.shape_cast %252 : vector<1x128xf32> to vector<128xf32>
    %254 = vector.shape_cast %253 : vector<128xf32> to vector<1x128xf32>
    %255 = vector.broadcast %254 : vector<1x128xf32> to vector<16x128xf32>
    %256 = arith.mulf %255, %237 : vector<16x128xf32>
    %257 = arith.addf %251, %256 : vector<16x128xf32>
    %258 = vector.extract_strided_slice %1 {offsets = [41, 0], sizes = [1, 128], strides = [1, 1]} : vector<64x128xf32> to vector<1x128xf32>
    %259 = vector.shape_cast %258 : vector<1x128xf32> to vector<128xf32>
    %260 = vector.shape_cast %259 : vector<128xf32> to vector<1x128xf32>
    %261 = vector.broadcast %260 : vector<1x128xf32> to vector<16x128xf32>
    %262 = arith.mulf %261, %244 : vector<16x128xf32>
    %263 = arith.addf %257, %262 : vector<16x128xf32>
    %264 = vector.extract_strided_slice %1 {offsets = [48, 0], sizes = [1, 128], strides = [1, 1]} : vector<64x128xf32> to vector<1x128xf32>
    %265 = vector.shape_cast %264 : vector<1x128xf32> to vector<128xf32>
    %266 = vector.shape_cast %265 : vector<128xf32> to vector<1x128xf32>
    %267 = vector.broadcast %266 : vector<1x128xf32> to vector<16x128xf32>
    %268 = arith.addf %263, %267 : vector<16x128xf32>
    %cst_12 = arith.constant 0.000000e+00 : f32
    %269 = vector.broadcast %cst_12 : f32 to vector<16x128xf32>
    %270 = vector.extract_strided_slice %1 {offsets = [42, 0], sizes = [1, 128], strides = [1, 1]} : vector<64x128xf32> to vector<1x128xf32>
    %271 = vector.shape_cast %270 : vector<1x128xf32> to vector<128xf32>
    %272 = vector.shape_cast %271 : vector<128xf32> to vector<1x128xf32>
    %273 = vector.broadcast %272 : vector<1x128xf32> to vector<16x128xf32>
    %274 = arith.mulf %273, %230 : vector<16x128xf32>
    %275 = arith.addf %269, %274 : vector<16x128xf32>
    %276 = vector.extract_strided_slice %1 {offsets = [43, 0], sizes = [1, 128], strides = [1, 1]} : vector<64x128xf32> to vector<1x128xf32>
    %277 = vector.shape_cast %276 : vector<1x128xf32> to vector<128xf32>
    %278 = vector.shape_cast %277 : vector<128xf32> to vector<1x128xf32>
    %279 = vector.broadcast %278 : vector<1x128xf32> to vector<16x128xf32>
    %280 = arith.mulf %279, %237 : vector<16x128xf32>
    %281 = arith.addf %275, %280 : vector<16x128xf32>
    %282 = vector.extract_strided_slice %1 {offsets = [44, 0], sizes = [1, 128], strides = [1, 1]} : vector<64x128xf32> to vector<1x128xf32>
    %283 = vector.shape_cast %282 : vector<1x128xf32> to vector<128xf32>
    %284 = vector.shape_cast %283 : vector<128xf32> to vector<1x128xf32>
    %285 = vector.broadcast %284 : vector<1x128xf32> to vector<16x128xf32>
    %286 = arith.mulf %285, %244 : vector<16x128xf32>
    %287 = arith.addf %281, %286 : vector<16x128xf32>
    %288 = vector.extract_strided_slice %1 {offsets = [49, 0], sizes = [1, 128], strides = [1, 1]} : vector<64x128xf32> to vector<1x128xf32>
    %289 = vector.shape_cast %288 : vector<1x128xf32> to vector<128xf32>
    %290 = vector.shape_cast %289 : vector<128xf32> to vector<1x128xf32>
    %291 = vector.broadcast %290 : vector<1x128xf32> to vector<16x128xf32>
    %292 = arith.addf %287, %291 : vector<16x128xf32>
    %cst_13 = arith.constant 0.000000e+00 : f32
    %293 = vector.broadcast %cst_13 : f32 to vector<16x128xf32>
    %294 = vector.extract_strided_slice %1 {offsets = [45, 0], sizes = [1, 128], strides = [1, 1]} : vector<64x128xf32> to vector<1x128xf32>
    %295 = vector.shape_cast %294 : vector<1x128xf32> to vector<128xf32>
    %296 = vector.shape_cast %295 : vector<128xf32> to vector<1x128xf32>
    %297 = vector.broadcast %296 : vector<1x128xf32> to vector<16x128xf32>
    %298 = arith.mulf %297, %230 : vector<16x128xf32>
    %299 = arith.addf %293, %298 : vector<16x128xf32>
    %300 = vector.extract_strided_slice %1 {offsets = [46, 0], sizes = [1, 128], strides = [1, 1]} : vector<64x128xf32> to vector<1x128xf32>
    %301 = vector.shape_cast %300 : vector<1x128xf32> to vector<128xf32>
    %302 = vector.shape_cast %301 : vector<128xf32> to vector<1x128xf32>
    %303 = vector.broadcast %302 : vector<1x128xf32> to vector<16x128xf32>
    %304 = arith.mulf %303, %237 : vector<16x128xf32>
    %305 = arith.addf %299, %304 : vector<16x128xf32>
    %306 = vector.extract_strided_slice %1 {offsets = [47, 0], sizes = [1, 128], strides = [1, 1]} : vector<64x128xf32> to vector<1x128xf32>
    %307 = vector.shape_cast %306 : vector<1x128xf32> to vector<128xf32>
    %308 = vector.shape_cast %307 : vector<128xf32> to vector<1x128xf32>
    %309 = vector.broadcast %308 : vector<1x128xf32> to vector<16x128xf32>
    %310 = arith.mulf %309, %244 : vector<16x128xf32>
    %311 = arith.addf %305, %310 : vector<16x128xf32>
    %312 = vector.extract_strided_slice %1 {offsets = [50, 0], sizes = [1, 128], strides = [1, 1]} : vector<64x128xf32> to vector<1x128xf32>
    %313 = vector.shape_cast %312 : vector<1x128xf32> to vector<128xf32>
    %314 = vector.shape_cast %313 : vector<128xf32> to vector<1x128xf32>
    %315 = vector.broadcast %314 : vector<1x128xf32> to vector<16x128xf32>
    %316 = arith.addf %311, %315 : vector<16x128xf32>
    %317 = vector.extract_strided_slice %1 {offsets = [51, 0], sizes = [1, 128], strides = [1, 1]} : vector<64x128xf32> to vector<1x128xf32>
    %318 = vector.shape_cast %317 : vector<1x128xf32> to vector<128xf32>
    %319 = vector.shape_cast %318 : vector<128xf32> to vector<1x128xf32>
    %320 = math.tanh %268 : vector<16x128xf32>
    %321 = vector.broadcast %319 : vector<1x128xf32> to vector<16x128xf32>
    %322 = arith.mulf %321, %320 : vector<16x128xf32>
    %323 = arith.addf %268, %322 : vector<16x128xf32>
    %324 = vector.extract_strided_slice %1 {offsets = [52, 0], sizes = [1, 128], strides = [1, 1]} : vector<64x128xf32> to vector<1x128xf32>
    %325 = vector.shape_cast %324 : vector<1x128xf32> to vector<128xf32>
    %326 = vector.shape_cast %325 : vector<128xf32> to vector<1x128xf32>
    %327 = math.tanh %292 : vector<16x128xf32>
    %328 = vector.broadcast %326 : vector<1x128xf32> to vector<16x128xf32>
    %329 = arith.mulf %328, %327 : vector<16x128xf32>
    %330 = arith.addf %292, %329 : vector<16x128xf32>
    %331 = vector.extract_strided_slice %1 {offsets = [53, 0], sizes = [1, 128], strides = [1, 1]} : vector<64x128xf32> to vector<1x128xf32>
    %332 = vector.shape_cast %331 : vector<1x128xf32> to vector<128xf32>
    %333 = vector.shape_cast %332 : vector<128xf32> to vector<1x128xf32>
    %334 = math.tanh %316 : vector<16x128xf32>
    %335 = vector.broadcast %333 : vector<1x128xf32> to vector<16x128xf32>
    %336 = arith.mulf %335, %334 : vector<16x128xf32>
    %337 = arith.addf %316, %336 : vector<16x128xf32>
    %cst_14 = arith.constant 0.000000e+00 : f32
    %338 = vector.broadcast %cst_14 : f32 to vector<16x128xf32>
    %339 = vector.extract_strided_slice %1 {offsets = [54, 0], sizes = [1, 128], strides = [1, 1]} : vector<64x128xf32> to vector<1x128xf32>
    %340 = vector.shape_cast %339 : vector<1x128xf32> to vector<128xf32>
    %341 = vector.shape_cast %340 : vector<128xf32> to vector<1x128xf32>
    %342 = vector.broadcast %341 : vector<1x128xf32> to vector<16x128xf32>
    %343 = arith.mulf %342, %323 : vector<16x128xf32>
    %344 = arith.addf %338, %343 : vector<16x128xf32>
    %345 = vector.extract_strided_slice %1 {offsets = [55, 0], sizes = [1, 128], strides = [1, 1]} : vector<64x128xf32> to vector<1x128xf32>
    %346 = vector.shape_cast %345 : vector<1x128xf32> to vector<128xf32>
    %347 = vector.shape_cast %346 : vector<128xf32> to vector<1x128xf32>
    %348 = vector.broadcast %347 : vector<1x128xf32> to vector<16x128xf32>
    %349 = arith.mulf %348, %330 : vector<16x128xf32>
    %350 = arith.addf %344, %349 : vector<16x128xf32>
    %351 = vector.extract_strided_slice %1 {offsets = [56, 0], sizes = [1, 128], strides = [1, 1]} : vector<64x128xf32> to vector<1x128xf32>
    %352 = vector.shape_cast %351 : vector<1x128xf32> to vector<128xf32>
    %353 = vector.shape_cast %352 : vector<128xf32> to vector<1x128xf32>
    %354 = vector.broadcast %353 : vector<1x128xf32> to vector<16x128xf32>
    %355 = arith.mulf %354, %337 : vector<16x128xf32>
    %356 = arith.addf %350, %355 : vector<16x128xf32>
    %357 = vector.extract_strided_slice %1 {offsets = [57, 0], sizes = [1, 128], strides = [1, 1]} : vector<64x128xf32> to vector<1x128xf32>
    %358 = vector.shape_cast %357 : vector<1x128xf32> to vector<128xf32>
    %359 = vector.shape_cast %358 : vector<128xf32> to vector<1x128xf32>
    %360 = vector.broadcast %359 : vector<1x128xf32> to vector<16x128xf32>
    %361 = arith.addf %356, %360 : vector<16x128xf32>
    %362 = vector.extract_strided_slice %361 {offsets = [0, 0], sizes = [8, 128], strides = [1, 1]} : vector<16x128xf32> to vector<8x128xf32>
    %363 = vector.extract_strided_slice %361 {offsets = [8, 0], sizes = [8, 128], strides = [1, 1]} : vector<16x128xf32> to vector<8x128xf32>
    %364 = arith.addf %362, %363 : vector<8x128xf32>
    %cst_15 = arith.constant 0.000000e+00 : f32
    %365 = vector.broadcast %cst_15 : f32 to vector<8x128xf32>
    %366 = arith.cmpf ogt, %364, %365 : vector<8x128xf32>
    %cst_16 = arith.constant 0.000000e+00 : f32
    %367 = vector.broadcast %cst_16 : f32 to vector<8x128xf32>
    %368 = arith.cmpf olt, %364, %367 : vector<8x128xf32>
    %cst_17 = arith.constant 1.000000e+00 : f32
    %cst_18 = arith.constant 0.000000e+00 : f32
    %369 = vector.broadcast %cst_17 : f32 to vector<8x128xf32>
    %370 = vector.broadcast %cst_18 : f32 to vector<8x128xf32>
    %371 = arith.select %368, %369, %370 : vector<8x128xi1>, vector<8x128xf32>
    %cst_19 = arith.constant -1.000000e+00 : f32
    %372 = vector.broadcast %cst_19 : f32 to vector<8x128xf32>
    %373 = arith.select %366, %372, %371 : vector<8x128xi1>, vector<8x128xf32>
    %374 = arith.mulf %373, %363 : vector<8x128xf32>
    %cst_20 = arith.constant 0.000000e+00 : f32
    %375 = vector.broadcast %cst_20 : f32 to vector<8x128xf32>
    %376 = arith.subf %375, %374 : vector<8x128xf32>
    %377 = math.exp %376 : vector<8x128xf32>
    %cst_21 = arith.constant 1.000000e+00 : f32
    %378 = vector.broadcast %cst_21 : f32 to vector<8x128xf32>
    %379 = arith.addf %378, %377 : vector<8x128xf32>
    %cst_22 = arith.constant 1.000000e+00 : f32
    %380 = vector.broadcast %cst_22 : f32 to vector<8x128xf32>
    %381 = arith.divf %380, %379 : vector<8x128xf32>
    %382 = arith.mulf %373, %362 : vector<8x128xf32>
    %cst_23 = arith.constant 0.000000e+00 : f32
    %383 = vector.broadcast %cst_23 : f32 to vector<8x128xf32>
    %384 = arith.subf %383, %382 : vector<8x128xf32>
    %385 = math.exp %384 : vector<8x128xf32>
    %cst_24 = arith.constant 1.000000e+00 : f32
    %386 = vector.broadcast %cst_24 : f32 to vector<8x128xf32>
    %387 = arith.addf %386, %385 : vector<8x128xf32>
    %cst_25 = arith.constant 1.000000e+00 : f32
    %388 = vector.broadcast %cst_25 : f32 to vector<8x128xf32>
    %389 = arith.divf %388, %387 : vector<8x128xf32>
    %390 = arith.subf %381, %389 : vector<8x128xf32>
    %391 = math.absf %390 : vector<8x128xf32>
    %cst_26 = arith.constant 9.99999971E-10 : f32
    %392 = vector.broadcast %cst_26 : f32 to vector<8x128xf32>
    %393 = arith.maximumf %391, %392 : vector<8x128xf32>
    %c0_27 = arith.constant 0 : index
    %c0_28 = arith.constant 0 : index
    %394 = vector.load %arg2[%c0_27, %c0_28] : memref<8x128xf32, #tpu.memory_space<vmem>>, vector<8x128xf32>
    tpu.vector_store %arg2[%c0_27, %c0_28], %393 {strides = array<i32>} : memref<8x128xf32, #tpu.memory_space<vmem>>, vector<8x128xf32>,
    return
  }
}

</mosaic_0001>

<bundles_post_ra>
// kernel: forward.28
= control target key start
LH: loop header
LB: loop body
LE: loop exit
PB: predicated region body
PF: predicated region fallthrough
CT: control target
= control target key end

     0   :  { %s1669_s12 = smov 0   ;;  %s1671_s13 = smov 0   ;;  %s1899_s0 = inlined_call_operand.vmem [shape: bf16[1024,128], index: 0, kind: input, shape index: {}]   ;;  %s1900_s1 = inlined_call_operand.vmem [shape: bf16[128,128], index: 1, kind: input, shape index: {}]   ;;  %s1901_s2 = inlined_call_operand.vmem [shape: f32[8,128], index: 2, kind: input, shape index: {}]   ;;  %s1902_s3 = inlined_call_operand.vmem [shape: f32[1024,128], index: 3, kind: output, shape index: {}]  }
   0x1   :  { %s1673_s14 = smov 0  }
   0x2 LB: > { %s25_s15 = sadd.s32 1, %s1643_s13  ;;  %p1377_p0 = scmp.ge.s32.totalorder %s1647_s14, 1  ;;  %s1647_s14 = sphi %s1673_s14, %s13_s14   ;;  %s1643_s13 = sphi %s1671_s13, %s1904_s13   ;;  %s1639_s12 = sphi %s1669_s12, %s1903_s12  }
   0x3   : > { %p27_p1 = scmp.ge.s32.totalorder %s25_s15, 2  ;;  %p166_p2 = scmp.lt.s32.totalorder %s1647_s14, 3 }
   0x5   : > { %s1906_s15 = smov (%p27_p1, %s25_s15), 0  ;;  %p167_p3 = pnand %p1377_p0, %p166_p2 }
   0x6   : > { %v1585_v0 = vld [vmem:[%s1900_s1] sm:$0xff] (!%p167_p3)   ;;  %s1378_s18 = sshll.u32 (!%p167_p3), %s1639_s12, 6  ;;  %v1586_v1 = vld [vmem:[%s1900_s1 + $0x8] sm:$0xff] (!%p167_p3)   ;;  %v1587_v2 = vld [vmem:[%s1900_s1 + $0x10] sm:$0xff] (!%p167_p3)  }
   0x7   : > { %170 = sbr.rel (%p167_p3) target bundleno = 313 (0x139), region = 32  ;;  %p199_p4 = scmp.lt.s32.totalorder (!%p167_p3), %s1378_s18, 127  ;;  %1465 = vmatprep.subr.bf16.mxu0 (!%p167_p3), %v1585_v0  ;;  %1545 = vmatprep.subr.bf16.mxu1 (!%p167_p3), %v1585_v0  ;;  %v1588_v3 = vld [vmem:[%s1900_s1 + $0x18] sm:$0xff] (!%p167_p3)   ;;  %v1589_v6 = vld [vmem:[%s1900_s1 + $0x20] sm:$0xff] (!%p167_p3)   ;;  %v1590_v7 = vld [vmem:[%s1900_s1 + $0x28] sm:$0xff] (!%p167_p3)  }
   0x8   : > { %1466 = vmatpush3.bf16.msra.mxu0 (!%p167_p3), %v1585_v0  ;;  %1553 = vmatpush3.bf16.msra.mxu1 (!%p167_p3), %v1585_v0  ;;  %v1591_v8 = vld [vmem:[%s1900_s1 + $0x30] sm:$0xff] (!%p167_p3)   ;;  %v1592_v9 = vld [vmem:[%s1900_s1 + $0x38] sm:$0xff] (!%p167_p3)   ;;  %v1755_v40 = vld [vmem:[%s1901_s2] ss:$0 sm:$0xff] (!%p167_p3) }
   0x9   : > { %1467 = vmatprep.subr.bf16.mxu0 (!%p167_p3), %v1586_v1  ;;  %1546 = vmatprep.subr.bf16.mxu1 (!%p167_p3), %v1586_v1 }
   0xc   : > { %1468 = vmatpush3.bf16.msra.mxu0 (!%p167_p3), %v1586_v1  ;;  %1554 = vmatpush3.bf16.msra.mxu1 (!%p167_p3), %v1586_v1 }
   0xd   : > { %1469 = vmatprep.subr.bf16.mxu0 (!%p167_p3), %v1587_v2  ;;  %1547 = vmatprep.subr.bf16.mxu1 (!%p167_p3), %v1587_v2 }
   0xe   : > { %s1908_s18 = smov (!%p199_p4, %s1378_s18), 127 }
   0xf   : > { %s1379_s23 = sshll.u32 %s1908_s18, 2  ;;  %s1381_s10 = sshll.u32 %s1908_s18, 3 }
  0x10   : > { %s1702_s26 = scalar_lea.vmem %s1899_s0, %s1379_s23  ;;  %1470 = vmatpush3.bf16.msra.mxu0 %v1587_v2  ;;  %1555 = vmatpush3.bf16.msra.mxu1 %v1587_v2  ;;  %s1760_s19 = scalar_lea.vmem %s1902_s3, %s1381_s10 }
  0x11   : > { %v1593_v4 = vld [vmem:[%s1702_s26] sm:$0xff]   ;;  %1471 = vmatprep.subr.bf16.mxu0 %v1588_v3  ;;  %1548 = vmatprep.subr.bf16.mxu1 %v1588_v3  ;;  %v1595_v10 = vld [vmem:[%s1702_s26 + $0x8] sm:$0xff]   ;;  %v1597_v12 = vld [vmem:[%s1702_s26 + $0x10] sm:$0xff]  }
  0x12   : > { %v1594_v5 = vld [vmem:[%s1702_s26 + $0x80] sm:$0xff]   ;;  %1481 = vmatprep.mubr.bf16.mxu0 %v1593_v4  ;;  %v1596_v11 = vld [vmem:[%s1702_s26 + $0x88] sm:$0xff]   ;;  %v1598_v13 = vld [vmem:[%s1702_s26 + $0x90] sm:$0xff]  }
  0x13   : > { %1513 = vmatprep.mubr.bf16.mxu1 %v1594_v5  ;;  %v1599_v14 = vld [vmem:[%s1702_s26 + $0x18] sm:$0xff]   ;;  %v1601_v16 = vld [vmem:[%s1702_s26 + $0x20] sm:$0xff]   ;;  %v1603_v18 = vld [vmem:[%s1702_s26 + $0x28] sm:$0xff]  }
  0x14   : > { %1472 = vmatpush3.bf16.msra.mxu0 %v1588_v3  ;;  %1556 = vmatpush3.bf16.msra.mxu1 %v1588_v3  ;;  %v1600_v15 = vld [vmem:[%s1702_s26 + $0x98] sm:$0xff]   ;;  %v1602_v17 = vld [vmem:[%s1702_s26 + $0xa0] sm:$0xff]   ;;  %v1604_v19 = vld [vmem:[%s1702_s26 + $0xa8] sm:$0xff]  }
  0x15   : > { %1473 = vmatprep.subr.bf16.mxu0 %v1589_v6  ;;  %1549 = vmatprep.subr.bf16.mxu1 %v1589_v6  ;;  %v1605_v20 = vld [vmem:[%s1702_s26 + $0x30] sm:$0xff]   ;;  %v1607_v22 = vld [vmem:[%s1702_s26 + $0x38] sm:$0xff]   ;;  %v1609_v24 = vld [vmem:[%s1702_s26 + $0x40] sm:$0xff]  }
  0x16   : > { %v1606_v21 = vld [vmem:[%s1702_s26 + $0xb0] sm:$0xff]   ;;  %v1608_v23 = vld [vmem:[%s1702_s26 + $0xb8] sm:$0xff]   ;;  %v1610_v25 = vld [vmem:[%s1702_s26 + $0xc0] sm:$0xff]  }
  0x17   : > { %v1611_v26 = vld [vmem:[%s1702_s26 + $0x48] sm:$0xff]   ;;  %v1613_v28 = vld [vmem:[%s1702_s26 + $0x50] sm:$0xff]   ;;  %v1615_v30 = vld [vmem:[%s1702_s26 + $0x58] sm:$0xff]  }
  0x18   : > { %1474 = vmatpush3.bf16.msra.mxu0 %v1589_v6  ;;  %1557 = vmatpush3.bf16.msra.mxu1 %v1589_v6  ;;  %v1612_v27 = vld [vmem:[%s1702_s26 + $0xc8] sm:$0xff]   ;;  %v1614_v29 = vld [vmem:[%s1702_s26 + $0xd0] sm:$0xff]   ;;  %v1616_v31 = vld [vmem:[%s1702_s26 + $0xd8] sm:$0xff]  }
  0x19   : > { %1475 = vmatprep.subr.bf16.mxu0 %v1590_v7  ;;  %1550 = vmatprep.subr.bf16.mxu1 %v1590_v7  ;;  %v1617_v32 = vld [vmem:[%s1702_s26 + $0x60] sm:$0xff]   ;;  %v1619_v34 = vld [vmem:[%s1702_s26 + $0x68] sm:$0xff]   ;;  %v1621_v36 = vld [vmem:[%s1702_s26 + $0x70] sm:$0xff]  }
  0x1a   : > { %v1618_v33 = vld [vmem:[%s1702_s26 + $0xe0] sm:$0xff]   ;;  %v1620_v35 = vld [vmem:[%s1702_s26 + $0xe8] sm:$0xff]   ;;  %v1622_v37 = vld [vmem:[%s1702_s26 + $0xf0] sm:$0xff]  }
  0x1b   : > { %v1623_v38 = vld [vmem:[%s1702_s26 + $0x78] sm:$0xff]  }
  0x1c   : > { %1476 = vmatpush3.bf16.msra.mxu0 %v1590_v7  ;;  %1558 = vmatpush3.bf16.msra.mxu1 %v1590_v7  ;;  %v1624_v39 = vld [vmem:[%s1702_s26 + $0xf8] sm:$0xff]  }
  0x1d   : > { %1477 = vmatprep.subr.bf16.mxu0 %v1591_v8  ;;  %1551 = vmatprep.subr.bf16.mxu1 %v1591_v8 }
  0x20   : > { %1478 = vmatpush3.bf16.msra.mxu0 %v1591_v8  ;;  %1559 = vmatpush3.bf16.msra.mxu1 %v1591_v8 }
  0x21   : > { %1479 = vmatprep.subr.bf16.mxu0 %v1592_v9  ;;  %1552 = vmatprep.subr.bf16.mxu1 %v1592_v9 }
  0x24   : > { %1480 = vmatpush3.bf16.msra.mxu0 %v1592_v9  ;;  %1560 = vmatpush3.bf16.msra.mxu1 %v1592_v9 }
  0x27   : > { %1482 = vmatmul.mubr.bf16.vlgmr.msra.gmra.mrb[0].mxu0 %v1595_v10  ;;  %1514 = vmatmul.mubr.bf16.vlgmr.msra.gmra.mrb[0].mxu1 %v1596_v11 }
  0x28   : > { %1485 = vmatprep.mubr.bf16.mxu0 %v1597_v12  ;;  %1517 = vmatprep.mubr.bf16.mxu1 %v1598_v13 }
  0x2f   : > { %1486 = vmatmul.mubr.bf16.gmra.mrb[4].mxu0 %v1599_v14  ;;  %1518 = vmatmul.mubr.bf16.gmra.mrb[4].mxu1 %v1600_v15 }
  0x30   : > { %1489 = vmatprep.mubr.bf16.mxu0 %v1601_v16  ;;  %1521 = vmatprep.mubr.bf16.mxu1 %v1602_v17 }
  0x37   : > { %1490 = vmatmul.mubr.bf16.gmra.mrb[8].mxu0 %v1603_v18  ;;  %1522 = vmatmul.mubr.bf16.gmra.mrb[8].mxu1 %v1604_v19 }
  0x38   : > { %1493 = vmatprep.mubr.bf16.mxu0 %v1605_v20  ;;  %1525 = vmatprep.mubr.bf16.mxu1 %v1606_v21 }
  0x3f   : > { %1494 = vmatmul.mubr.bf16.gmra.mrb[12].mxu0 %v1607_v22  ;;  %1526 = vmatmul.mubr.bf16.gmra.mrb[12].mxu1 %v1608_v23 }
  0x40   : > { %1497 = vmatprep.mubr.bf16.mxu0 %v1609_v24  ;;  %1529 = vmatprep.mubr.bf16.mxu1 %v1610_v25 }
  0x47   : > { %1498 = vmatmul.mubr.bf16.gmra.mrb[16].mxu0 %v1611_v26  ;;  %1530 = vmatmul.mubr.bf16.gmra.mrb[16].mxu1 %v1612_v27 }
  0x48   : > { %1501 = vmatprep.mubr.bf16.mxu0 %v1613_v28  ;;  %1533 = vmatprep.mubr.bf16.mxu1 %v1614_v29 }
  0x4f   : > { %1502 = vmatmul.mubr.bf16.gmra.mrb[20].mxu0 %v1615_v30  ;;  %1534 = vmatmul.mubr.bf16.gmra.mrb[20].mxu1 %v1616_v31 }
  0x50   : > { %1505 = vmatprep.mubr.bf16.mxu0 %v1617_v32  ;;  %1537 = vmatprep.mubr.bf16.mxu1 %v1618_v33 }
  0x57   : > { %1506 = vmatmul.mubr.bf16.gmra.mrb[24].mxu0 %v1619_v34  ;;  %1538 = vmatmul.mubr.bf16.gmra.mrb[24].mxu1 %v1620_v35 }
  0x58   : > { %1509 = vmatprep.mubr.bf16.mxu0 %v1621_v36  ;;  %1541 = vmatprep.mubr.bf16.mxu1 %v1622_v37 }
  0x5f   : > { %1510 = vmatmul.mubr.bf16.gmra.mrb[28].mxu0 %v1623_v38  ;;  %1542 = vmatmul.mubr.bf16.gmra.mrb[28].mxu1 %v1624_v39 }
  0xfa   : > { %v1483_v41 = vpop.f32.mrb[0].mxu0  ;;  %v1515_v42 = vpop.f32.mrb[0].mxu1 }
  0xfb   : > { %v1163_v43 = vadd.f32 %v1483_v41, %v1755_v40  ;;  %v1195_v44 = vadd.f32 %v1515_v42, %v1755_v40  ;;  %v706_v45 = vpop.f32.mrb[1].mxu0  ;;  %v834_v46 = vpop.f32.mrb[1].mxu1 }
  0xfc   : > { %v1161_v47 = vadd.f32 %v1755_v40, %v706_v45  ;;  %v1193_v48 = vadd.f32 %v1755_v40, %v834_v46  ;;  %v1484_v49 = vpop.f32.mrb[2].mxu0  ;;  %v1516_v50 = vpop.f32.mrb[2].mxu1 }
  0xfd   : > { %1227 = vst [vmem:[%s1760_s19 + $0x10] sm:$0xff] %v1163_v43  ;;  %1259 = vst [vmem:[%s1760_s19 + $0x110] sm:$0xff] %v1195_v44  ;;  %v1164_v51 = vadd.f32 %v1484_v49, %v1755_v40  ;;  %v1196_v52 = vadd.f32 %v1516_v50, %v1755_v40  ;;  %v709_v53 = vpop.f32.mrb[3].mxu0  ;;  %v837_v54 = vpop.f32.mrb[3].mxu1 }
  0xfe   : > { %1225 = vst [vmem:[%s1760_s19] sm:$0xff] %v1161_v47  ;;  %1257 = vst [vmem:[%s1760_s19 + $0x100] sm:$0xff] %v1193_v48  ;;  %v1162_v55 = vadd.f32 %v1755_v40, %v709_v53  ;;  %v1194_v56 = vadd.f32 %v1755_v40, %v837_v54 }
  0xff   : > { %1228 = vst [vmem:[%s1760_s19 + $0x18] sm:$0xff] %v1164_v51  ;;  %1260 = vst [vmem:[%s1760_s19 + $0x118] sm:$0xff] %v1196_v52 }
 0x100   : > { %1226 = vst [vmem:[%s1760_s19 + $0x8] sm:$0xff] %v1162_v55  ;;  %1258 = vst [vmem:[%s1760_s19 + $0x108] sm:$0xff] %v1194_v56 }
 0x102   : > { %v1487_v57 = vpop.f32.mrb[4].mxu0  ;;  %v1519_v58 = vpop.f32.mrb[4].mxu1 }
 0x103   : > { %v1167_v59 = vadd.f32 %v1487_v57, %v1755_v40  ;;  %v1199_v60 = vadd.f32 %v1519_v58, %v1755_v40  ;;  %v722_v61 = vpop.f32.mrb[5].mxu0  ;;  %v850_v62 = vpop.f32.mrb[5].mxu1 }
 0x104   : > { %v1165_v63 = vadd.f32 %v1755_v40, %v722_v61  ;;  %v1197_v0 = vadd.f32 %v1755_v40, %v850_v62  ;;  %v1488_v1 = vpop.f32.mrb[6].mxu0  ;;  %v1520_v2 = vpop.f32.mrb[6].mxu1 }
 0x105   : > { %1231 = vst [vmem:[%s1760_s19 + $0x30] sm:$0xff] %v1167_v59  ;;  %1263 = vst [vmem:[%s1760_s19 + $0x130] sm:$0xff] %v1199_v60  ;;  %v1168_v3 = vadd.f32 %v1488_v1, %v1755_v40  ;;  %v1200_v4 = vadd.f32 %v1520_v2, %v1755_v40  ;;  %v725_v5 = vpop.f32.mrb[7].mxu0  ;;  %v853_v6 = vpop.f32.mrb[7].mxu1 }
 0x106   : > { %1229 = vst [vmem:[%s1760_s19 + $0x20] sm:$0xff] %v1165_v63  ;;  %1261 = vst [vmem:[%s1760_s19 + $0x120] sm:$0xff] %v1197_v0  ;;  %v1166_v7 = vadd.f32 %v1755_v40, %v725_v5  ;;  %v1198_v8 = vadd.f32 %v1755_v40, %v853_v6 }
 0x107   : > { %1232 = vst [vmem:[%s1760_s19 + $0x38] sm:$0xff] %v1168_v3  ;;  %1264 = vst [vmem:[%s1760_s19 + $0x138] sm:$0xff] %v1200_v4 }
 0x108   : > { %1230 = vst [vmem:[%s1760_s19 + $0x28] sm:$0xff] %v1166_v7  ;;  %1262 = vst [vmem:[%s1760_s19 + $0x128] sm:$0xff] %v1198_v8 }
 0x10a   : > { %v1491_v9 = vpop.f32.mrb[8].mxu0  ;;  %v1523_v10 = vpop.f32.mrb[8].mxu1 }
 0x10b   : > { %v1171_v11 = vadd.f32 %v1491_v9, %v1755_v40  ;;  %v1203_v12 = vadd.f32 %v1523_v10, %v1755_v40  ;;  %v738_v13 = vpop.f32.mrb[9].mxu0  ;;  %v866_v14 = vpop.f32.mrb[9].mxu1 }
 0x10c   : > { %v1169_v15 = vadd.f32 %v1755_v40, %v738_v13  ;;  %v1201_v16 = vadd.f32 %v1755_v40, %v866_v14  ;;  %v1492_v17 = vpop.f32.mrb[10].mxu0  ;;  %v1524_v18 = vpop.f32.mrb[10].mxu1 }
 0x10d   : > { %1235 = vst [vmem:[%s1760_s19 + $0x50] sm:$0xff] %v1171_v11  ;;  %1267 = vst [vmem:[%s1760_s19 + $0x150] sm:$0xff] %v1203_v12  ;;  %v1172_v19 = vadd.f32 %v1492_v17, %v1755_v40  ;;  %v1204_v20 = vadd.f32 %v1524_v18, %v1755_v40  ;;  %v741_v21 = vpop.f32.mrb[11].mxu0  ;;  %v869_v22 = vpop.f32.mrb[11].mxu1 }
 0x10e   : > { %1233 = vst [vmem:[%s1760_s19 + $0x40] sm:$0xff] %v1169_v15  ;;  %1265 = vst [vmem:[%s1760_s19 + $0x140] sm:$0xff] %v1201_v16  ;;  %v1170_v23 = vadd.f32 %v1755_v40, %v741_v21  ;;  %v1202_v24 = vadd.f32 %v1755_v40, %v869_v22 }
 0x10f   : > { %1236 = vst [vmem:[%s1760_s19 + $0x58] sm:$0xff] %v1172_v19  ;;  %1268 = vst [vmem:[%s1760_s19 + $0x158] sm:$0xff] %v1204_v20 }
 0x110   : > { %1234 = vst [vmem:[%s1760_s19 + $0x48] sm:$0xff] %v1170_v23  ;;  %1266 = vst [vmem:[%s1760_s19 + $0x148] sm:$0xff] %v1202_v24 }
 0x112   : > { %v1495_v25 = vpop.f32.mrb[12].mxu0  ;;  %v1527_v26 = vpop.f32.mrb[12].mxu1 }
 0x113   : > { %v1175_v27 = vadd.f32 %v1495_v25, %v1755_v40  ;;  %v1207_v28 = vadd.f32 %v1527_v26, %v1755_v40  ;;  %v754_v29 = vpop.f32.mrb[13].mxu0  ;;  %v882_v30 = vpop.f32.mrb[13].mxu1 }
 0x114   : > { %v1173_v31 = vadd.f32 %v1755_v40, %v754_v29  ;;  %v1205_v32 = vadd.f32 %v1755_v40, %v882_v30  ;;  %v1496_v33 = vpop.f32.mrb[14].mxu0  ;;  %v1528_v34 = vpop.f32.mrb[14].mxu1 }
 0x115   : > { %1239 = vst [vmem:[%s1760_s19 + $0x70] sm:$0xff] %v1175_v27  ;;  %1271 = vst [vmem:[%s1760_s19 + $0x170] sm:$0xff] %v1207_v28  ;;  %v1176_v35 = vadd.f32 %v1496_v33, %v1755_v40  ;;  %v1208_v36 = vadd.f32 %v1528_v34, %v1755_v40  ;;  %v757_v37 = vpop.f32.mrb[15].mxu0  ;;  %v885_v38 = vpop.f32.mrb[15].mxu1 }
 0x116   : > { %1237 = vst [vmem:[%s1760_s19 + $0x60] sm:$0xff] %v1173_v31  ;;  %1269 = vst [vmem:[%s1760_s19 + $0x160] sm:$0xff] %v1205_v32  ;;  %v1174_v39 = vadd.f32 %v1755_v40, %v757_v37  ;;  %v1206_v41 = vadd.f32 %v1755_v40, %v885_v38 }
 0x117   : > { %1240 = vst [vmem:[%s1760_s19 + $0x78] sm:$0xff] %v1176_v35  ;;  %1272 = vst [vmem:[%s1760_s19 + $0x178] sm:$0xff] %v1208_v36 }
 0x118   : > { %1238 = vst [vmem:[%s1760_s19 + $0x68] sm:$0xff] %v1174_v39  ;;  %1270 = vst [vmem:[%s1760_s19 + $0x168] sm:$0xff] %v1206_v41 }
 0x11a   : > { %v1499_v42 = vpop.f32.mrb[16].mxu0  ;;  %v1531_v43 = vpop.f32.mrb[16].mxu1 }
 0x11b   : > { %v1179_v44 = vadd.f32 %v1499_v42, %v1755_v40  ;;  %v1211_v45 = vadd.f32 %v1531_v43, %v1755_v40  ;;  %v770_v46 = vpop.f32.mrb[17].mxu0  ;;  %v898_v47 = vpop.f32.mrb[17].mxu1 }
 0x11c   : > { %v1177_v48 = vadd.f32 %v1755_v40, %v770_v46  ;;  %v1209_v49 = vadd.f32 %v1755_v40, %v898_v47  ;;  %v1500_v50 = vpop.f32.mrb[18].mxu0  ;;  %v1532_v51 = vpop.f32.mrb[18].mxu1 }
 0x11d   : > { %1243 = vst [vmem:[%s1760_s19 + $0x90] sm:$0xff] %v1179_v44  ;;  %1275 = vst [vmem:[%s1760_s19 + $0x190] sm:$0xff] %v1211_v45  ;;  %v1180_v52 = vadd.f32 %v1500_v50, %v1755_v40  ;;  %v1212_v53 = vadd.f32 %v1532_v51, %v1755_v40  ;;  %v773_v54 = vpop.f32.mrb[19].mxu0  ;;  %v901_v55 = vpop.f32.mrb[19].mxu1 }
 0x11e   : > { %1241 = vst [vmem:[%s1760_s19 + $0x80] sm:$0xff] %v1177_v48  ;;  %1273 = vst [vmem:[%s1760_s19 + $0x180] sm:$0xff] %v1209_v49  ;;  %v1178_v56 = vadd.f32 %v1755_v40, %v773_v54  ;;  %v1210_v57 = vadd.f32 %v1755_v40, %v901_v55 }
 0x11f   : > { %1244 = vst [vmem:[%s1760_s19 + $0x98] sm:$0xff] %v1180_v52  ;;  %1276 = vst [vmem:[%s1760_s19 + $0x198] sm:$0xff] %v1212_v53 }
 0x120   : > { %1242 = vst [vmem:[%s1760_s19 + $0x88] sm:$0xff] %v1178_v56  ;;  %1274 = vst [vmem:[%s1760_s19 + $0x188] sm:$0xff] %v1210_v57 }
 0x122   : > { %v1503_v58 = vpop.f32.mrb[20].mxu0  ;;  %v1535_v59 = vpop.f32.mrb[20].mxu1 }
 0x123   : > { %v1183_v60 = vadd.f32 %v1503_v58, %v1755_v40  ;;  %v1215_v61 = vadd.f32 %v1535_v59, %v1755_v40  ;;  %v786_v62 = vpop.f32.mrb[21].mxu0  ;;  %v914_v63 = vpop.f32.mrb[21].mxu1 }
 0x124   : > { %v1181_v0 = vadd.f32 %v1755_v40, %v786_v62  ;;  %v1213_v1 = vadd.f32 %v1755_v40, %v914_v63  ;;  %v1504_v2 = vpop.f32.mrb[22].mxu0  ;;  %v1536_v3 = vpop.f32.mrb[22].mxu1 }
 0x125   : > { %1247 = vst [vmem:[%s1760_s19 + $0xb0] sm:$0xff] %v1183_v60  ;;  %1279 = vst [vmem:[%s1760_s19 + $0x1b0] sm:$0xff] %v1215_v61  ;;  %v1184_v4 = vadd.f32 %v1504_v2, %v1755_v40  ;;  %v1216_v5 = vadd.f32 %v1536_v3, %v1755_v40  ;;  %v789_v6 = vpop.f32.mrb[23].mxu0  ;;  %v917_v7 = vpop.f32.mrb[23].mxu1 }
 0x126   : > { %1245 = vst [vmem:[%s1760_s19 + $0xa0] sm:$0xff] %v1181_v0  ;;  %1277 = vst [vmem:[%s1760_s19 + $0x1a0] sm:$0xff] %v1213_v1  ;;  %v1182_v8 = vadd.f32 %v1755_v40, %v789_v6  ;;  %v1214_v9 = vadd.f32 %v1755_v40, %v917_v7 }
 0x127   : > { %1248 = vst [vmem:[%s1760_s19 + $0xb8] sm:$0xff] %v1184_v4  ;;  %1280 = vst [vmem:[%s1760_s19 + $0x1b8] sm:$0xff] %v1216_v5 }
 0x128   : > { %1246 = vst [vmem:[%s1760_s19 + $0xa8] sm:$0xff] %v1182_v8  ;;  %1278 = vst [vmem:[%s1760_s19 + $0x1a8] sm:$0xff] %v1214_v9 }
 0x12a   : > { %v1507_v10 = vpop.f32.mrb[24].mxu0  ;;  %v1539_v11 = vpop.f32.mrb[24].mxu1 }
 0x12b   : > { %v1187_v12 = vadd.f32 %v1507_v10, %v1755_v40  ;;  %v1219_v13 = vadd.f32 %v1539_v11, %v1755_v40  ;;  %v802_v14 = vpop.f32.mrb[25].mxu0  ;;  %v930_v15 = vpop.f32.mrb[25].mxu1 }
 0x12c   : > { %v1185_v16 = vadd.f32 %v1755_v40, %v802_v14  ;;  %v1217_v17 = vadd.f32 %v1755_v40, %v930_v15  ;;  %v1508_v18 = vpop.f32.mrb[26].mxu0  ;;  %v1540_v19 = vpop.f32.mrb[26].mxu1 }
 0x12d   : > { %1251 = vst [vmem:[%s1760_s19 + $0xd0] sm:$0xff] %v1187_v12  ;;  %1283 = vst [vmem:[%s1760_s19 + $0x1d0] sm:$0xff] %v1219_v13  ;;  %v1188_v20 = vadd.f32 %v1508_v18, %v1755_v40  ;;  %v1220_v21 = vadd.f32 %v1540_v19, %v1755_v40  ;;  %v805_v22 = vpop.f32.mrb[27].mxu0  ;;  %v933_v23 = vpop.f32.mrb[27].mxu1 }
 0x12e   : > { %1249 = vst [vmem:[%s1760_s19 + $0xc0] sm:$0xff] %v1185_v16  ;;  %1281 = vst [vmem:[%s1760_s19 + $0x1c0] sm:$0xff] %v1217_v17  ;;  %v1186_v24 = vadd.f32 %v1755_v40, %v805_v22  ;;  %v1218_v25 = vadd.f32 %v1755_v40, %v933_v23 }
 0x12f   : > { %1252 = vst [vmem:[%s1760_s19 + $0xd8] sm:$0xff] %v1188_v20  ;;  %1284 = vst [vmem:[%s1760_s19 + $0x1d8] sm:$0xff] %v1220_v21 }
 0x130   : > { %1250 = vst [vmem:[%s1760_s19 + $0xc8] sm:$0xff] %v1186_v24  ;;  %1282 = vst [vmem:[%s1760_s19 + $0x1c8] sm:$0xff] %v1218_v25 }
 0x132   : > { %v1511_v26 = vpop.f32.mrb[28].mxu0  ;;  %v1543_v27 = vpop.f32.mrb[28].mxu1 }
 0x133   : > { %v1191_v28 = vadd.f32 %v1511_v26, %v1755_v40  ;;  %v1223_v29 = vadd.f32 %v1543_v27, %v1755_v40  ;;  %v818_v30 = vpop.f32.mrb[29].mxu0  ;;  %v946_v31 = vpop.f32.mrb[29].mxu1 }
 0x134   : > { %v1189_v32 = vadd.f32 %v1755_v40, %v818_v30  ;;  %v1221_v33 = vadd.f32 %v1755_v40, %v946_v31  ;;  %v1512_v34 = vpop.f32.mrb[30].mxu0  ;;  %v1544_v35 = vpop.f32.mrb[30].mxu1 }
 0x135   : > { %1255 = vst [vmem:[%s1760_s19 + $0xf0] sm:$0xff] %v1191_v28  ;;  %1287 = vst [vmem:[%s1760_s19 + $0x1f0] sm:$0xff] %v1223_v29  ;;  %v1192_v36 = vadd.f32 %v1512_v34, %v1755_v40  ;;  %v1224_v37 = vadd.f32 %v1544_v35, %v1755_v40  ;;  %v821_v38 = vpop.f32.mrb[31].mxu0  ;;  %v949_v39 = vpop.f32.mrb[31].mxu1 }
 0x136   : > { %1253 = vst [vmem:[%s1760_s19 + $0xe0] sm:$0xff] %v1189_v32  ;;  %1285 = vst [vmem:[%s1760_s19 + $0x1e0] sm:$0xff] %v1221_v33  ;;  %v1190_v41 = vadd.f32 %v1755_v40, %v821_v38  ;;  %v1222_v42 = vadd.f32 %v1755_v40, %v949_v39 }
 0x137   : > { %1256 = vst [vmem:[%s1760_s19 + $0xf8] sm:$0xff] %v1192_v36  ;;  %1288 = vst [vmem:[%s1760_s19 + $0x1f8] sm:$0xff] %v1224_v37 }
 0x138   : > { %1254 = vst [vmem:[%s1760_s19 + $0xe8] sm:$0xff] %v1190_v41  ;;  %1286 = vst [vmem:[%s1760_s19 + $0x1e8] sm:$0xff] %v1222_v42 }
 0x139 PF: > { %s13_s14 = sadd.s32 1, %s1647_s14   ;;  %s1903_s12 = smov %s1643_s13 }
 0x13a   : > { %p10_p5 = scmp.ge.s32.totalorder %s13_s14, 4   ;;  %s1904_s13 = smov %s1906_s15 }
 0x13c   :  { %12 = sbr.rel (!%p10_p5) target bundleno = 2 (0x2), region = 73 }

// kernel: forward.29
= control target key start
LH: loop header
LB: loop body
LE: loop exit
PB: predicated region body
PF: predicated region fallthrough
CT: control target
= control target key end

     0   :  { %s1269_s12 = smov 0   ;;  %s1838_s0 = inlined_call_operand.vmem [shape: f32[1024,128], index: 0, kind: input, shape index: {}]   ;;  %s1839_s1 = inlined_call_operand.vmem [shape: bf16[128,128], index: 1, kind: input, shape index: {}]   ;;  %s1840_s2 = inlined_call_operand.vmem [shape: f32[8,128], index: 2, kind: input, shape index: {}]   ;;  %s1841_s3 = inlined_call_operand.vmem [shape: f32[1024,128], index: 3, kind: output, shape index: {}]  }
   0x1 LB: > { %s941_s13 = sadd.s32 4294967295, %s1247_s12   ;;  %p945_p0 = scmp.ge.s32.totalorder %s1247_s12, 1  ;;  %s1247_s12 = sphi %s1269_s12, %s13_s12  }
   0x2   : > { %p138_p1 = scmp.lt.s32.totalorder %s1247_s12, 3 }
   0x4   : > { %p139_p2 = pnand %p945_p0, %p138_p1 }
   0x6   : > { %142 = sbr.rel (%p139_p2) target bundleno = 340 (0x154), region = 32 }
   0xd   : > { %v1105_v0 = vld [vmem:[%s1839_s1] sm:$0xff]   ;;  %s946_s16 = sshll.u32 %s941_s13, 6  ;;  %v1106_v1 = vld [vmem:[%s1839_s1 + $0x8] sm:$0xff]   ;;  %v1107_v2 = vld [vmem:[%s1839_s1 + $0x10] sm:$0xff]  }
   0xe   : > { %p163_p3 = scmp.lt.s32.totalorder %s946_s16, 127  ;;  %1001 = vmatprep.subr.bf16.mxu0 %v1105_v0  ;;  %1081 = vmatprep.subr.bf16.mxu1 %v1105_v0  ;;  %v1108_v3 = vld [vmem:[%s1839_s1 + $0x18] sm:$0xff]   ;;  %v1109_v13 = vld [vmem:[%s1839_s1 + $0x20] sm:$0xff]   ;;  %v1110_v15 = vld [vmem:[%s1839_s1 + $0x28] sm:$0xff]  }
   0xf   : > { %1002 = vmatpush3.bf16.msra.mxu0 %v1105_v0  ;;  %1089 = vmatpush3.bf16.msra.mxu1 %v1105_v0  ;;  %v1111_v16 = vld [vmem:[%s1839_s1 + $0x30] sm:$0xff]   ;;  %v1112_v17 = vld [vmem:[%s1839_s1 + $0x38] sm:$0xff]  }
  0x10   : > { %s1897_s16 = smov (!%p163_p3, %s946_s16), 127  ;;  %1003 = vmatprep.subr.bf16.mxu0 %v1106_v1  ;;  %1082 = vmatprep.subr.bf16.mxu1 %v1106_v1 }
  0x11   : > { %s947_s21 = sshll.u32 %s1897_s16, 3 }
  0x12   : > { %s1294_s24 = scalar_lea.vmem %s1838_s0, %s947_s21  ;;  %s1655_s13 = scalar_lea.vmem %s1841_s3, %s947_s21 }
  0x13   : > { %1004 = vmatpush3.bf16.msra.mxu0 %v1106_v1  ;;  %1090 = vmatpush3.bf16.msra.mxu1 %v1106_v1  ;;  %v1300_v4 = vld [vmem:[%s1294_s24] sm:$0xff]  ;;  %v1303_v5 = vld [vmem:[%s1294_s24 + $0x8] sm:$0xff]  ;;  %v1332_v18 = vld [vmem:[%s1294_s24 + $0x10] sm:$0xff] }
  0x14   : > { %1005 = vmatprep.subr.bf16.mxu0 %v1107_v2  ;;  %1083 = vmatprep.subr.bf16.mxu1 %v1107_v2  ;;  %v1306_v6 = vld [vmem:[%s1294_s24 + $0x100] sm:$0xff]  ;;  %v239_v7 = vmul.f32 %v1300_v4, %v1300_v4  ;;  %v240_v8 = vmul.f32 %v1303_v5, %v1303_v5  ;;  %v1313_v9 = vld [vmem:[%s1294_s24 + $0x108] sm:$0xff]  ;;  %v1335_v19 = vld [vmem:[%s1294_s24 + $0x18] sm:$0xff]  ;;  %v241_v26 = vmul.f32 %v1332_v18, %v1332_v18 }
  0x15   : > { %v271_v10 = vmul.f32 %v1306_v6, %v1306_v6  ;;  %v272_v11 = vmul.f32 %v1313_v9, %v1313_v9  ;;  %v1338_v20 = vld [vmem:[%s1294_s24 + $0x110] sm:$0xff]  ;;  %v1341_v21 = vld [vmem:[%s1294_s24 + $0x118] sm:$0xff]  ;;  %v1344_v22 = vld [vmem:[%s1294_s24 + $0x20] sm:$0xff]  ;;  %v242_v27 = vmul.f32 %v1335_v19, %v1335_v19 }
  0x16   : > { %v303_v12 = vpack.c.bf16 %v240_v8, %v239_v7  ;;  %v1347_v23 = vld [vmem:[%s1294_s24 + $0x28] sm:$0xff]  ;;  %v1350_v24 = vld [vmem:[%s1294_s24 + $0x120] sm:$0xff]  ;;  %v273_v28 = vmul.f32 %v1338_v20, %v1338_v20  ;;  %v274_v29 = vmul.f32 %v1341_v21, %v1341_v21  ;;  %v243_v30 = vmul.f32 %v1344_v22, %v1344_v22  ;;  %v1372_v36 = vld [vmem:[%s1294_s24 + $0x30] sm:$0xff] }
  0x17   : > { %1006 = vmatpush3.bf16.msra.mxu0 %v1107_v2  ;;  %1091 = vmatpush3.bf16.msra.mxu1 %v1107_v2  ;;  %v319_v14 = vpack.c.bf16 %v272_v11, %v271_v10  ;;  %v1353_v25 = vld [vmem:[%s1294_s24 + $0x128] sm:$0xff]  ;;  %v244_v31 = vmul.f32 %v1347_v23, %v1347_v23  ;;  %v275_v32 = vmul.f32 %v1350_v24, %v1350_v24  ;;  %v1375_v37 = vld [vmem:[%s1294_s24 + $0x38] sm:$0xff]  ;;  %v1378_v40 = vld [vmem:[%s1294_s24 + $0x130] sm:$0xff] }
  0x18   : > { %1007 = vmatprep.subr.bf16.mxu0 %v1108_v3  ;;  %1084 = vmatprep.subr.bf16.mxu1 %v1108_v3  ;;  %v276_v33 = vmul.f32 %v1353_v25, %v1353_v25  ;;  %v304_v34 = vpack.c.bf16 %v242_v27, %v241_v26  ;;  %v320_v35 = vpack.c.bf16 %v274_v29, %v273_v28  ;;  %v1381_v41 = vld [vmem:[%s1294_s24 + $0x138] sm:$0xff]  ;;  %v1384_v42 = vld [vmem:[%s1294_s24 + $0x40] sm:$0xff]  ;;  %v1387_v43 = vld [vmem:[%s1294_s24 + $0x48] sm:$0xff] }
  0x19   : > { %1017 = vmatprep.mubr.bf16.mxu0 %v303_v12  ;;  %1049 = vmatprep.mubr.bf16.mxu1 %v319_v14  ;;  %v305_v38 = vpack.c.bf16 %v244_v31, %v243_v30  ;;  %v1390_v44 = vld [vmem:[%s1294_s24 + $0x140] sm:$0xff]  ;;  %v1393_v45 = vld [vmem:[%s1294_s24 + $0x148] sm:$0xff]  ;;  %v245_v46 = vmul.f32 %v1372_v36, %v1372_v36  ;;  %v246_v47 = vmul.f32 %v1375_v37, %v1375_v37  ;;  %v1412_v56 = vld [vmem:[%s1294_s24 + $0x50] sm:$0xff] }
  0x1a   : > { %v321_v39 = vpack.c.bf16 %v276_v33, %v275_v32  ;;  %v277_v48 = vmul.f32 %v1378_v40, %v1378_v40  ;;  %v278_v49 = vmul.f32 %v1381_v41, %v1381_v41  ;;  %v247_v50 = vmul.f32 %v1384_v42, %v1384_v42  ;;  %v1415_v57 = vld [vmem:[%s1294_s24 + $0x58] sm:$0xff]  ;;  %v1418_v60 = vld [vmem:[%s1294_s24 + $0x150] sm:$0xff]  ;;  %v1424_v62 = vld [vmem:[%s1294_s24 + $0x60] sm:$0xff] }
  0x1b   : > { %1008 = vmatpush3.bf16.msra.mxu0 %v1108_v3  ;;  %1092 = vmatpush3.bf16.msra.mxu1 %v1108_v3  ;;  %v248_v51 = vmul.f32 %v1387_v43, %v1387_v43  ;;  %v279_v52 = vmul.f32 %v1390_v44, %v1390_v44  ;;  %v280_v53 = vmul.f32 %v1393_v45, %v1393_v45  ;;  %v1421_v61 = vld [vmem:[%s1294_s24 + $0x158] sm:$0xff]  ;;  %v1427_v63 = vld [vmem:[%s1294_s24 + $0x68] sm:$0xff]  ;;  %v1430_v0 = vld [vmem:[%s1294_s24 + $0x160] sm:$0xff] }
  0x1c   : > { %1009 = vmatprep.subr.bf16.mxu0 %v1109_v13  ;;  %1085 = vmatprep.subr.bf16.mxu1 %v1109_v13  ;;  %v306_v54 = vpack.c.bf16 %v246_v47, %v245_v46  ;;  %v322_v55 = vpack.c.bf16 %v278_v49, %v277_v48  ;;  %v1433_v1 = vld [vmem:[%s1294_s24 + $0x168] sm:$0xff]  ;;  %v249_v2 = vmul.f32 %v1412_v56, %v1412_v56  ;;  %v1458_v28 = vld [vmem:[%s1294_s24 + $0x170] sm:$0xff]  ;;  %v1461_v29 = vld [vmem:[%s1294_s24 + $0x178] sm:$0xff] }
  0x1d   : > { %v307_v58 = vpack.c.bf16 %v248_v51, %v247_v50  ;;  %v323_v59 = vpack.c.bf16 %v280_v53, %v279_v52  ;;  %v250_v3 = vmul.f32 %v1415_v57, %v1415_v57  ;;  %v281_v7 = vmul.f32 %v1418_v60, %v1418_v60  ;;  %v1464_v30 = vld [vmem:[%s1294_s24 + $0x80] sm:$0xff]  ;;  %v1467_v31 = vld [vmem:[%s1294_s24 + $0x88] sm:$0xff]  ;;  %v1492_v52 = vld [vmem:[%s1294_s24 + $0x90] sm:$0xff] }
  0x1e   : > { %v282_v8 = vmul.f32 %v1421_v61, %v1421_v61  ;;  %v251_v10 = vmul.f32 %v1424_v62, %v1424_v62  ;;  %v252_v11 = vmul.f32 %v1427_v63, %v1427_v63  ;;  %v283_v12 = vmul.f32 %v1430_v0, %v1430_v0  ;;  %v1470_v32 = vld [vmem:[%s1294_s24 + $0x180] sm:$0xff]  ;;  %v1473_v33 = vld [vmem:[%s1294_s24 + $0x188] sm:$0xff]  ;;  %v1495_v53 = vld [vmem:[%s1294_s24 + $0x98] sm:$0xff] }
  0x1f   : > { %1010 = vmatpush3.bf16.msra.mxu0 %v1109_v13  ;;  %1093 = vmatpush3.bf16.msra.mxu1 %v1109_v13  ;;  %v284_v13 = vmul.f32 %v1433_v1, %v1433_v1  ;;  %v308_v14 = vpack.c.bf16 %v250_v3, %v249_v2  ;;  %v255_v46 = vmul.f32 %v1464_v30, %v1464_v30  ;;  %v1504_v2 = vld [vmem:[%s1294_s24 + $0xa0] sm:$0xff]  ;;  %v1507_v3 = vld [vmem:[%s1294_s24 + $0xa8] sm:$0xff] }
  0x20   : > { %1011 = vmatprep.subr.bf16.mxu0 %v1110_v15  ;;  %1086 = vmatprep.subr.bf16.mxu1 %v1110_v15  ;;  %v309_v26 = vpack.c.bf16 %v252_v11, %v251_v10  ;;  %v256_v47 = vmul.f32 %v1467_v31, %v1467_v31  ;;  %v287_v48 = vmul.f32 %v1470_v32, %v1470_v32 }
  0x21   : > { %v325_v27 = vpack.c.bf16 %v284_v13, %v283_v12  ;;  %v288_v49 = vmul.f32 %v1473_v33, %v1473_v33  ;;  %1860 = vst [vmem:[#allocation2_spill] sm:$0xff] %v1507_v3  ;;  %v257_v10 = vmul.f32 %v1492_v52, %v1492_v52  ;;  %v258_v11 = vmul.f32 %v1495_v53, %v1495_v53 }
  0x23   : > { %1012 = vmatpush3.bf16.msra.mxu0 %v1110_v15  ;;  %1094 = vmatpush3.bf16.msra.mxu1 %v1110_v15  ;;  %v324_v15 = vpack.c.bf16 %v282_v8, %v281_v7  ;;  %v1510_v7 = vld [vmem:[%s1294_s24 + $0x1a0] sm:$0xff]  ;;  %v1513_v8 = vld [vmem:[%s1294_s24 + $0x1a8] sm:$0xff] }
  0x24   : > { %1013 = vmatprep.subr.bf16.mxu0 %v1111_v16  ;;  %1087 = vmatprep.subr.bf16.mxu1 %v1111_v16  ;;  %1861 = vst [vmem:[#allocation3_spill] sm:$0xff] %v1513_v8 }
  0x27   : > { %1014 = vmatpush3.bf16.msra.mxu0 %v1111_v16  ;;  %1095 = vmatpush3.bf16.msra.mxu1 %v1111_v16  ;;  %v1452_v16 = vld [vmem:[%s1294_s24 + $0x70] sm:$0xff] }
  0x28   : > { %1015 = vmatprep.subr.bf16.mxu0 %v1112_v17  ;;  %1088 = vmatprep.subr.bf16.mxu1 %v1112_v17 }
  0x2b   : > { %1016 = vmatpush3.bf16.msra.mxu0 %v1112_v17  ;;  %1096 = vmatpush3.bf16.msra.mxu1 %v1112_v17  ;;  %v1455_v17 = vld [vmem:[%s1294_s24 + $0x78] sm:$0xff] }
  0x2e   : > { %1018 = vmatmul.mubr.bf16.vlgmr.msra.gmra.mrb[0].mxu0 %v304_v34  ;;  %1050 = vmatmul.mubr.bf16.vlgmr.msra.gmra.mrb[0].mxu1 %v320_v35  ;;  %v253_v34 = vmul.f32 %v1452_v16, %v1452_v16  ;;  %v254_v35 = vmul.f32 %v1455_v17, %v1455_v17 }
  0x2f   : > { %1021 = vmatprep.mubr.bf16.mxu0 %v305_v38  ;;  %1053 = vmatprep.mubr.bf16.mxu1 %v321_v39  ;;  %v285_v38 = vmul.f32 %v1458_v28, %v1458_v28  ;;  %v286_v39 = vmul.f32 %v1461_v29, %v1461_v29 }
  0x30   : > { %v310_v50 = vpack.c.bf16 %v254_v35, %v253_v34  ;;  %v312_v34 = vpack.c.bf16 %v258_v11, %v257_v10 }
  0x31   : > { %v326_v51 = vpack.c.bf16 %v286_v39, %v285_v38  ;;  %v1532_v38 = vld [vmem:[%s1294_s24 + $0xb0] sm:$0xff]  ;;  %v1535_v39 = vld [vmem:[%s1294_s24 + $0xb8] sm:$0xff] }
  0x32   : > { %1862 = vst [vmem:[#allocation4_spill] sm:$0xff] %v1535_v39  ;;  %v261_v10 = vmul.f32 %v1532_v38, %v1532_v38  ;;  %v262_v11 = vmul.f32 %v1535_v39, %v1535_v39  ;;  %v1584_v39 = vld [vmem:[%s1294_s24 + $0xe0] sm:$0xff] }
  0x33   : > { %1872 = vst [vmem:[#allocation14_spill] sm:$0xff] %v1584_v39 }
  0x36   : > { %1022 = vmatmul.mubr.bf16.gmra.mrb[4].mxu0 %v306_v54  ;;  %1054 = vmatmul.mubr.bf16.gmra.mrb[4].mxu1 %v322_v55  ;;  %v311_v54 = vpack.c.bf16 %v256_v47, %v255_v46  ;;  %v327_v55 = vpack.c.bf16 %v288_v49, %v287_v48  ;;  %v1538_v48 = vld [vmem:[%s1294_s24 + $0x1b0] sm:$0xff]  ;;  %v1541_v49 = vld [vmem:[%s1294_s24 + $0x1b8] sm:$0xff] }
  0x37   : > { %1025 = vmatprep.mubr.bf16.mxu0 %v307_v58  ;;  %1057 = vmatprep.mubr.bf16.mxu1 %v323_v59  ;;  %v1498_v58 = vld [vmem:[%s1294_s24 + $0x190] sm:$0xff]  ;;  %v1501_v59 = vld [vmem:[%s1294_s24 + $0x198] sm:$0xff]  ;;  %1863 = vst [vmem:[#allocation5_spill] sm:$0xff] %v1541_v49 }
  0x38   : > { %v289_v12 = vmul.f32 %v1498_v58, %v1498_v58  ;;  %v290_v13 = vmul.f32 %v1501_v59, %v1501_v59 }
  0x3a   : > { %v328_v35 = vpack.c.bf16 %v290_v13, %v289_v12  ;;  %v293_v12 = vmul.f32 %v1538_v48, %v1538_v48  ;;  %v294_v13 = vmul.f32 %v1541_v49, %v1541_v49 }
  0x3e   : > { %1026 = vmatmul.mubr.bf16.gmra.mrb[8].mxu0 %v308_v14  ;;  %1058 = vmatmul.mubr.bf16.gmra.mrb[8].mxu1 %v324_v15  ;;  %v259_v14 = vmul.f32 %v1504_v2, %v1504_v2  ;;  %v260_v15 = vmul.f32 %v1507_v3, %v1507_v3  ;;  %v1575_v3 = vld [vmem:[%s1294_s24 + $0xd8] sm:$0xff] }
  0x3f   : > { %1029 = vmatprep.mubr.bf16.mxu0 %v309_v26  ;;  %1061 = vmatprep.mubr.bf16.mxu1 %v325_v27  ;;  %v291_v26 = vmul.f32 %v1510_v7, %v1510_v7  ;;  %v292_v27 = vmul.f32 %v1513_v8, %v1513_v8  ;;  %v1572_v8 = vld [vmem:[%s1294_s24 + $0xd0] sm:$0xff]  ;;  %1869 = vst [vmem:[#allocation11_spill] sm:$0xff] %v1575_v3 }
  0x40   : > { %v313_v46 = vpack.c.bf16 %v260_v15, %v259_v14  ;;  %1868 = vst [vmem:[#allocation10_spill] sm:$0xff] %v1572_v8 }
  0x41   : > { %v329_v47 = vpack.c.bf16 %v292_v27, %v291_v26 }
  0x46   : > { %1030 = vmatmul.mubr.bf16.gmra.mrb[12].mxu0 %v310_v50  ;;  %1062 = vmatmul.mubr.bf16.gmra.mrb[12].mxu1 %v326_v51  ;;  %v1544_v50 = vld [vmem:[%s1294_s24 + $0xc0] sm:$0xff]  ;;  %v1547_v51 = vld [vmem:[%s1294_s24 + $0xc8] sm:$0xff] }
  0x47   : > { %1033 = vmatprep.mubr.bf16.mxu0 %v311_v54  ;;  %1065 = vmatprep.mubr.bf16.mxu1 %v327_v55  ;;  %1864 = vst [vmem:[#allocation6_spill] sm:$0xff] %v1544_v50  ;;  %1865 = vst [vmem:[#allocation7_spill] sm:$0xff] %v1547_v51  ;;  %v1550_v54 = vld [vmem:[%s1294_s24 + $0x1c0] sm:$0xff]  ;;  %v1553_v55 = vld [vmem:[%s1294_s24 + $0x1c8] sm:$0xff]  ;;  %v263_v14 = vmul.f32 %v1544_v50, %v1544_v50  ;;  %v264_v15 = vmul.f32 %v1547_v51, %v1547_v51 }
  0x48   : > { %1866 = vst [vmem:[#allocation8_spill] sm:$0xff] %v1550_v54  ;;  %1867 = vst [vmem:[#allocation9_spill] sm:$0xff] %v1553_v55  ;;  %v295_v26 = vmul.f32 %v1550_v54, %v1550_v54  ;;  %v296_v27 = vmul.f32 %v1553_v55, %v1553_v55  ;;  %v1587_v51 = vld [vmem:[%s1294_s24 + $0xe8] sm:$0xff]  ;;  %v1590_v54 = vld [vmem:[%s1294_s24 + $0x1e0] sm:$0xff] }
  0x49   : > { %v315_v50 = vpack.c.bf16 %v264_v15, %v263_v14  ;;  %1873 = vst [vmem:[#allocation15_spill] sm:$0xff] %v1587_v51  ;;  %1874 = vst [vmem:[#allocation16_spill] sm:$0xff] %v1590_v54  ;;  %v1593_v55 = vld [vmem:[%s1294_s24 + $0x1e8] sm:$0xff]  ;;  %v267_v14 = vmul.f32 %v1584_v39, %v1584_v39  ;;  %v268_v15 = vmul.f32 %v1587_v51, %v1587_v51  ;;  %v1618_v39 = vld [vmem:[%s1294_s24 + $0x1f0] sm:$0xff] }
  0x4a   : > { %v331_v49 = vpack.c.bf16 %v296_v27, %v295_v26  ;;  %1875 = vst [vmem:[#allocation17_spill] sm:$0xff] %v1593_v55  ;;  %v299_v26 = vmul.f32 %v1590_v54, %v1590_v54  ;;  %v300_v27 = vmul.f32 %v1593_v55, %v1593_v55 }
  0x4e   : > { %1034 = vmatmul.mubr.bf16.gmra.mrb[16].mxu0 %v312_v34  ;;  %1066 = vmatmul.mubr.bf16.gmra.mrb[16].mxu1 %v328_v35  ;;  %v314_v34 = vpack.c.bf16 %v262_v11, %v261_v10  ;;  %v330_v35 = vpack.c.bf16 %v294_v13, %v293_v12  ;;  %v265_v10 = vmul.f32 %v1572_v8, %v1572_v8  ;;  %v1615_v8 = vld [vmem:[%s1294_s24 + $0xf8] sm:$0xff] }
  0x4f   : > { %1037 = vmatprep.mubr.bf16.mxu0 %v313_v46  ;;  %1069 = vmatprep.mubr.bf16.mxu1 %v329_v47  ;;  %v1578_v46 = vld [vmem:[%s1294_s24 + $0x1d0] sm:$0xff]  ;;  %v1581_v47 = vld [vmem:[%s1294_s24 + $0x1d8] sm:$0xff]  ;;  %v266_v11 = vmul.f32 %v1575_v3, %v1575_v3  ;;  %1876 = vst [vmem:[#allocation18_spill] sm:$0xff] %v1615_v8  ;;  %v270_v55 = vmul.f32 %v1615_v8, %v1615_v8 }
  0x50   : > { %1870 = vst [vmem:[#allocation12_spill] sm:$0xff] %v1578_v46  ;;  %1871 = vst [vmem:[#allocation13_spill] sm:$0xff] %v1581_v47  ;;  %v297_v12 = vmul.f32 %v1578_v46, %v1578_v46  ;;  %v298_v13 = vmul.f32 %v1581_v47, %v1581_v47  ;;  %v1612_v3 = vld [vmem:[%s1294_s24 + $0xf0] sm:$0xff]  ;;  %v317_v46 = vpack.c.bf16 %v268_v15, %v267_v14  ;;  %v1634_v14 = vld [vmem:[%s1840_s2] ss:$0 sm:$0xff] }
  0x51   : > { %v333_v47 = vpack.c.bf16 %v300_v27, %v299_v26 }
  0x56   : > { %1038 = vmatmul.mubr.bf16.gmra.mrb[20].mxu0 %v314_v34  ;;  %1070 = vmatmul.mubr.bf16.gmra.mrb[20].mxu1 %v330_v35  ;;  %v316_v34 = vpack.c.bf16 %v266_v11, %v265_v10  ;;  %v332_v35 = vpack.c.bf16 %v298_v13, %v297_v12  ;;  %v301_v10 = vmul.f32 %v1618_v39, %v1618_v39 }
  0x57   : > { %1041 = vmatprep.mubr.bf16.mxu0 %v315_v50  ;;  %1073 = vmatprep.mubr.bf16.mxu1 %v331_v49  ;;  %v1621_v49 = vld [vmem:[%s1294_s24 + $0x1f8] sm:$0xff]  ;;  %v269_v50 = vmul.f32 %v1612_v3, %v1612_v3 }
  0x58   : > { %1877 = vst [vmem:[#allocation19_spill] sm:$0xff] %v1621_v49  ;;  %v302_v11 = vmul.f32 %v1621_v49, %v1621_v49 }
  0x59   : > { %v318_v12 = vpack.c.bf16 %v270_v55, %v269_v50 }
  0x5a   : > { %v334_v13 = vpack.c.bf16 %v302_v11, %v301_v10 }
  0x5e   : > { %1042 = vmatmul.mubr.bf16.gmra.mrb[24].mxu0 %v316_v34  ;;  %1074 = vmatmul.mubr.bf16.gmra.mrb[24].mxu1 %v332_v35 }
  0x5f   : > { %1045 = vmatprep.mubr.bf16.mxu0 %v317_v46  ;;  %1077 = vmatprep.mubr.bf16.mxu1 %v333_v47 }
  0x66   : > { %1046 = vmatmul.mubr.bf16.gmra.mrb[28].mxu0 %v318_v12  ;;  %1078 = vmatmul.mubr.bf16.gmra.mrb[28].mxu1 %v334_v13 }
 0x101   : > { %v1019_v15 = vpop.f32.mrb[0].mxu0  ;;  %v1051_v26 = vpop.f32.mrb[0].mxu1 }
 0x102   : > { %v447_v27 = vadd.f32 %v1019_v15, %v1634_v14  ;;  %v575_v34 = vadd.f32 %v1051_v26, %v1634_v14  ;;  %v438_v35 = vpop.f32.mrb[1].mxu0  ;;  %v566_v51 = vpop.f32.mrb[1].mxu1 }
 0x103   : > { %v439_v46 = vadd.f32 %v1634_v14, %v438_v35  ;;  %v567_v55 = vadd.f32 %v1634_v14, %v566_v51  ;;  %v1020_v47 = vpop.f32.mrb[2].mxu0  ;;  %v1052_v50 = vpop.f32.mrb[2].mxu1 }
 0x104   : > { %1113 = vrsqrt.f32 %v447_v27  ;;  %v450_v10 = vadd.f32 %v1020_v47, %v1634_v14  ;;  %v441_v11 = vpop.f32.mrb[3].mxu0  ;;  %v569_v12 = vpop.f32.mrb[3].mxu1  ;;  %v578_v13 = vadd.f32 %v1052_v50, %v1634_v14 }
 0x105   : > { %1115 = vrsqrt.f32 %v575_v34  ;;  %v442_v15 = vadd.f32 %v1634_v14, %v441_v11  ;;  %v570_v26 = vadd.f32 %v1634_v14, %v569_v12 }
 0x106   : > { %1117 = vrsqrt.f32 %v439_v46 }
 0x107   : > { %1119 = vrsqrt.f32 %v567_v55 }
 0x108   : > { %1121 = vrsqrt.f32 %v450_v10 }
 0x109   : > { %1123 = vrsqrt.f32 %v578_v13  ;;  %v1023_v35 = vpop.f32.mrb[4].mxu0  ;;  %v1055_v51 = vpop.f32.mrb[4].mxu1 }
 0x10a   : > { %1125 = vrsqrt.f32 %v442_v15  ;;  %v463_v27 = vadd.f32 %v1023_v35, %v1634_v14  ;;  %v591_v47 = vadd.f32 %v1055_v51, %v1634_v14  ;;  %v454_v49 = vpop.f32.mrb[5].mxu0  ;;  %v582_v34 = vpop.f32.mrb[5].mxu1 }
 0x10b   : > { %1127 = vrsqrt.f32 %v570_v26  ;;  %v455_v46 = vadd.f32 %v1634_v14, %v454_v49  ;;  %v583_v50 = vadd.f32 %v1634_v14, %v582_v34  ;;  %v1024_v55 = vpop.f32.mrb[6].mxu0  ;;  %v1056_v11 = vpop.f32.mrb[6].mxu1 }
 0x10c   : > { %1129 = vrsqrt.f32 %v463_v27  ;;  %v466_v10 = vadd.f32 %v1024_v55, %v1634_v14  ;;  %v457_v12 = vpop.f32.mrb[7].mxu0  ;;  %v585_v13 = vpop.f32.mrb[7].mxu1  ;;  %v594_v15 = vadd.f32 %v1056_v11, %v1634_v14 }
 0x10d   : > { %1131 = vrsqrt.f32 %v591_v47  ;;  %v458_v49 = vadd.f32 %v1634_v14, %v457_v12  ;;  %v586_v27 = vadd.f32 %v1634_v14, %v585_v13 }
 0x10e   : > { %v1114_v35 = vpop.eup %1113  ;;  %1133 = vrsqrt.f32 %v455_v46 }
 0x10f   : > { %v1116_v26 = vpop.eup %1115  ;;  %v759_v51 = vmul.f32 %v1114_v35, %v1332_v18  ;;  %1135 = vrsqrt.f32 %v583_v50 }
 0x110   : > { %v1118_v47 = vpop.eup %1117  ;;  %v791_v34 = vmul.f32 %v1116_v26, %v1338_v20  ;;  %1137 = vrsqrt.f32 %v466_v10 }
 0x111   : > { %v1120_v55 = vpop.eup %1119  ;;  %823 = vst [vmem:[%s1655_s13 + $0x10] sm:$0xff] %v759_v51  ;;  %v757_v11 = vmul.f32 %v1118_v47, %v1300_v4  ;;  %1139 = vrsqrt.f32 %v594_v15  ;;  %v1027_v46 = vpop.f32.mrb[8].mxu0 }
 0x112   : > { %v1059_v8 = vpop.f32.mrb[8].mxu1  ;;  %v1122_v54 = vpop.eup %1121  ;;  %855 = vst [vmem:[%s1655_s13 + $0x110] sm:$0xff] %v791_v34  ;;  %v789_v18 = vmul.f32 %v1120_v55, %v1306_v6  ;;  %1141 = vrsqrt.f32 %v458_v49  ;;  %v479_v50 = vadd.f32 %v1027_v46, %v1634_v14 }
 0x113   : > { %v607_v12 = vadd.f32 %v1059_v8, %v1634_v14  ;;  %v470_v20 = vpop.f32.mrb[9].mxu0  ;;  %v598_v10 = vpop.f32.mrb[9].mxu1  ;;  %821 = vst [vmem:[%s1655_s13] sm:$0xff] %v757_v11  ;;  %v760_v4 = vmul.f32 %v1122_v54, %v1335_v19  ;;  %1143 = vrsqrt.f32 %v586_v27 }
 0x114   : > { %v1124_v13 = vpop.eup %1123  ;;  %v471_v15 = vadd.f32 %v1634_v14, %v470_v20  ;;  %v599_v35 = vadd.f32 %v1634_v14, %v598_v10  ;;  %v1028_v26 = vpop.f32.mrb[10].mxu0  ;;  %853 = vst [vmem:[%s1655_s13 + $0x100] sm:$0xff] %v789_v18  ;;  %1145 = vrsqrt.f32 %v479_v50 }
 0x115   : > { %v1060_v6 = vpop.f32.mrb[10].mxu1  ;;  %v1126_v49 = vpop.eup %1125  ;;  %v792_v51 = vmul.f32 %v1124_v13, %v1341_v21  ;;  %v482_v8 = vadd.f32 %v1028_v26, %v1634_v14  ;;  %824 = vst [vmem:[%s1655_s13 + $0x18] sm:$0xff] %v760_v4  ;;  %1147 = vrsqrt.f32 %v607_v12 }
 0x116   : > { %v473_v47 = vpop.f32.mrb[11].mxu0  ;;  %v601_v34 = vpop.f32.mrb[11].mxu1  ;;  %v758_v19 = vmul.f32 %v1126_v49, %v1303_v5  ;;  %v610_v54 = vadd.f32 %v1060_v6, %v1634_v14  ;;  %1149 = vrsqrt.f32 %v471_v15 }
 0x117   : > { %v1128_v55 = vpop.eup %1127  ;;  %856 = vst [vmem:[%s1655_s13 + $0x118] sm:$0xff] %v792_v51  ;;  %v474_v21 = vadd.f32 %v1634_v14, %v473_v47  ;;  %1151 = vrsqrt.f32 %v599_v35  ;;  %v602_v50 = vadd.f32 %v1634_v14, %v601_v34 }
 0x118   : > { %v1130_v27 = vpop.eup %1129  ;;  %v790_v11 = vmul.f32 %v1128_v55, %v1313_v9  ;;  %822 = vst [vmem:[%s1655_s13 + $0x8] sm:$0xff] %v758_v19  ;;  %1153 = vrsqrt.f32 %v482_v8 }
 0x119   : > { %v1132_v46 = vpop.eup %1131  ;;  %v763_v18 = vmul.f32 %v1130_v27, %v1372_v36  ;;  %1155 = vrsqrt.f32 %v610_v54  ;;  %v1031_v10 = vpop.f32.mrb[12].mxu0 }
 0x11a   : > { %v1134_v5 = vpop.eup %1133  ;;  %854 = vst [vmem:[%s1655_s13 + $0x108] sm:$0xff] %v790_v11  ;;  %v795_v12 = vmul.f32 %v1132_v46, %v1378_v40  ;;  %v1063_v13 = vpop.f32.mrb[12].mxu1  ;;  %1157 = vrsqrt.f32 %v474_v21  ;;  %v495_v15 = vadd.f32 %v1031_v10, %v1634_v14 }
 0x11b   : > { %v1136_v20 = vpop.eup %1135  ;;  %827 = vst [vmem:[%s1655_s13 + $0x30] sm:$0xff] %v763_v18  ;;  %v761_v9 = vmul.f32 %v1134_v5, %v1344_v22  ;;  %v623_v35 = vadd.f32 %v1063_v13, %v1634_v14  ;;  %v486_v40 = vpop.f32.mrb[13].mxu0  ;;  %1159 = vrsqrt.f32 %v602_v50 }
 0x11c   : > { %v1138_v4 = vpop.eup %1137  ;;  %859 = vst [vmem:[%s1655_s13 + $0x130] sm:$0xff] %v795_v12  ;;  %v793_v36 = vmul.f32 %v1136_v20, %v1350_v24  ;;  %v614_v26 = vpop.f32.mrb[13].mxu1  ;;  %v487_v49 = vadd.f32 %v1634_v14, %v486_v40  ;;  %1161 = vrsqrt.f32 %v495_v15 }
 0x11d   : > { %v1140_v6 = vpop.eup %1139  ;;  %825 = vst [vmem:[%s1655_s13 + $0x20] sm:$0xff] %v761_v9  ;;  %v764_v22 = vmul.f32 %v1138_v4, %v1375_v37  ;;  %v615_v51 = vadd.f32 %v1634_v14, %v614_v26  ;;  %v1032_v8 = vpop.f32.mrb[14].mxu0  ;;  %1163 = vrsqrt.f32 %v623_v35 }
 0x11e   : > { %v1064_v24 = vpop.f32.mrb[14].mxu1  ;;  %v1142_v47 = vpop.eup %1141  ;;  %857 = vst [vmem:[%s1655_s13 + $0x120] sm:$0xff] %v793_v36  ;;  %v796_v34 = vmul.f32 %v1140_v6, %v1381_v41  ;;  %v498_v55 = vadd.f32 %v1032_v8, %v1634_v14  ;;  %1165 = vrsqrt.f32 %v487_v49 }
 0x11f   : > { %v489_v19 = vpop.f32.mrb[15].mxu0  ;;  %v617_v54 = vpop.f32.mrb[15].mxu1  ;;  %828 = vst [vmem:[%s1655_s13 + $0x38] sm:$0xff] %v764_v22  ;;  %v762_v37 = vmul.f32 %v1142_v47, %v1347_v23  ;;  %v626_v11 = vadd.f32 %v1064_v24, %v1634_v14  ;;  %1167 = vrsqrt.f32 %v615_v51 }
 0x120   : > { %v1144_v27 = vpop.eup %1143  ;;  %860 = vst [vmem:[%s1655_s13 + $0x138] sm:$0xff] %v796_v34  ;;  %v490_v41 = vadd.f32 %v1634_v14, %v489_v19  ;;  %v618_v5 = vadd.f32 %v1634_v14, %v617_v54  ;;  %1169 = vrsqrt.f32 %v498_v55 }
 0x121   : > { %v1146_v21 = vpop.eup %1145  ;;  %v794_v46 = vmul.f32 %v1144_v27, %v1353_v25  ;;  %826 = vst [vmem:[%s1655_s13 + $0x28] sm:$0xff] %v762_v37  ;;  %1171 = vrsqrt.f32 %v626_v11  ;;  %v1035_v9 = vpop.f32.mrb[16].mxu0 }
 0x122   : > { %v1148_v18 = vpop.eup %1147  ;;  %v767_v50 = vmul.f32 %v1146_v21, %v1412_v56  ;;  %v1067_v10 = vpop.f32.mrb[16].mxu1  ;;  %1173 = vrsqrt.f32 %v490_v41  ;;  %v511_v4 = vadd.f32 %v1035_v9, %v1634_v14 }
 0x123   : > { %v1150_v23 = vpop.eup %1149  ;;  %858 = vst [vmem:[%s1655_s13 + $0x128] sm:$0xff] %v794_v46  ;;  %v799_v12 = vmul.f32 %v1148_v18, %v1418_v60  ;;  %v639_v36 = vadd.f32 %v1067_v10, %v1634_v14  ;;  %v502_v60 = vpop.f32.mrb[17].mxu0  ;;  %1175 = vrsqrt.f32 %v618_v5 }
 0x124   : > { %v1152_v20 = vpop.eup %1151  ;;  %831 = vst [vmem:[%s1655_s13 + $0x50] sm:$0xff] %v767_v50  ;;  %v765_v25 = vmul.f32 %v1150_v23, %v1384_v42  ;;  %v630_v15 = vpop.f32.mrb[17].mxu1  ;;  %v503_v40 = vadd.f32 %v1634_v14, %v502_v60  ;;  %1177 = vrsqrt.f32 %v511_v4 }
 0x125   : > { %v1154_v13 = vpop.eup %1153  ;;  %863 = vst [vmem:[%s1655_s13 + $0x150] sm:$0xff] %v799_v12  ;;  %v797_v56 = vmul.f32 %v1152_v20, %v1390_v44  ;;  %v631_v26 = vadd.f32 %v1634_v14, %v630_v15  ;;  %v1036_v6 = vpop.f32.mrb[18].mxu0  ;;  %1179 = vrsqrt.f32 %v639_v36 }
 0x126   : > { %v1156_v35 = vpop.eup %1155  ;;  %829 = vst [vmem:[%s1655_s13 + $0x40] sm:$0xff] %v765_v25  ;;  %v768_v42 = vmul.f32 %v1154_v13, %v1415_v57  ;;  %v1068_v44 = vpop.f32.mrb[18].mxu1  ;;  %v514_v51 = vadd.f32 %v1036_v6, %v1634_v14  ;;  %1181 = vrsqrt.f32 %v503_v40 }
 0x127   : > { %v1158_v22 = vpop.eup %1157  ;;  %861 = vst [vmem:[%s1655_s13 + $0x140] sm:$0xff] %v797_v56  ;;  %v800_v49 = vmul.f32 %v1156_v35, %v1421_v61  ;;  %v505_v8 = vpop.f32.mrb[19].mxu0  ;;  %v642_v34 = vadd.f32 %v1068_v44, %v1634_v14  ;;  %1183 = vrsqrt.f32 %v631_v26 }
 0x128   : > { %v633_v24 = vpop.f32.mrb[19].mxu1  ;;  %v1160_v47 = vpop.eup %1159  ;;  %832 = vst [vmem:[%s1655_s13 + $0x58] sm:$0xff] %v768_v42  ;;  %v766_v57 = vmul.f32 %v1158_v22, %v1387_v43  ;;  %v506_v61 = vadd.f32 %v1634_v14, %v505_v8  ;;  %1185 = vrsqrt.f32 %v514_v51 }
 0x129   : > { %v1162_v55 = vpop.eup %1161  ;;  %864 = vst [vmem:[%s1655_s13 + $0x158] sm:$0xff] %v800_v49  ;;  %v798_v19 = vmul.f32 %v1160_v47, %v1393_v45  ;;  %v634_v37 = vadd.f32 %v1634_v14, %v633_v24  ;;  %1187 = vrsqrt.f32 %v642_v34  ;;  %v1039_v46 = vpop.f32.mrb[20].mxu0 }
 0x12a   : > { %v1164_v54 = vpop.eup %1163  ;;  %830 = vst [vmem:[%s1655_s13 + $0x48] sm:$0xff] %v766_v57  ;;  %v771_v27 = vmul.f32 %v1162_v55, %v1452_v16  ;;  %v1071_v41 = vpop.f32.mrb[20].mxu1  ;;  %1189 = vrsqrt.f32 %v506_v61  ;;  %v527_v50 = vadd.f32 %v1039_v46, %v1634_v14 }
 0x12b   : > { %v1166_v43 = vpop.eup %1165  ;;  %862 = vst [vmem:[%s1655_s13 + $0x148] sm:$0xff] %v798_v19  ;;  %v803_v11 = vmul.f32 %v1164_v54, %v1458_v28  ;;  %v655_v5 = vadd.f32 %v1071_v41, %v1634_v14  ;;  %v518_v28 = vpop.f32.mrb[21].mxu0  ;;  %1191 = vrsqrt.f32 %v634_v37 }
 0x12c   : > { %v1168_v21 = vpop.eup %1167  ;;  %835 = vst [vmem:[%s1655_s13 + $0x70] sm:$0xff] %v771_v27  ;;  %v769_v45 = vmul.f32 %v1166_v43, %v1424_v62  ;;  %v646_v23 = vpop.f32.mrb[21].mxu1  ;;  %v519_v20 = vadd.f32 %v1634_v14, %v518_v28  ;;  %1193 = vrsqrt.f32 %v527_v50 }
 0x12d   : > { %v1170_v18 = vpop.eup %1169  ;;  %867 = vst [vmem:[%s1655_s13 + $0x170] sm:$0xff] %v803_v11  ;;  %v801_v16 = vmul.f32 %v1168_v21, %v1430_v0  ;;  %v647_v25 = vadd.f32 %v1634_v14, %v646_v23  ;;  %v1040_v9 = vpop.f32.mrb[22].mxu0  ;;  %1195 = vrsqrt.f32 %v655_v5 }
 0x12e   : > { %v1172_v12 = vpop.eup %1171  ;;  %833 = vst [vmem:[%s1655_s13 + $0x60] sm:$0xff] %v769_v45  ;;  %v772_v62 = vmul.f32 %v1170_v18, %v1455_v17  ;;  %v1072_v0 = vpop.f32.mrb[22].mxu1  ;;  %v530_v56 = vadd.f32 %v1040_v9, %v1634_v14  ;;  %1197 = vrsqrt.f32 %v519_v20 }
 0x12f   : > { %v1174_v10 = vpop.eup %1173  ;;  %865 = vst [vmem:[%s1655_s13 + $0x160] sm:$0xff] %v801_v16  ;;  %v804_v13 = vmul.f32 %v1172_v12, %v1461_v29  ;;  %v521_v4 = vpop.f32.mrb[23].mxu0  ;;  %v658_v15 = vadd.f32 %v1072_v0, %v1634_v14  ;;  %1199 = vrsqrt.f32 %v647_v25 }
 0x130   : > { %v649_v36 = vpop.f32.mrb[23].mxu1  ;;  %v1176_v60 = vpop.eup %1175  ;;  %836 = vst [vmem:[%s1655_s13 + $0x78] sm:$0xff] %v772_v62  ;;  %v770_v17 = vmul.f32 %v1174_v10, %v1427_v63  ;;  %v522_v29 = vadd.f32 %v1634_v14, %v521_v4  ;;  %1201 = vrsqrt.f32 %v530_v56  ;;  %v1878_v10 = vld [vmem:[#allocation4_spill] sm:$0xff] }
 0x131   : > { %v1178_v35 = vpop.eup %1177  ;;  %868 = vst [vmem:[%s1655_s13 + $0x178] sm:$0xff] %v804_v13  ;;  %v802_v42 = vmul.f32 %v1176_v60, %v1433_v1  ;;  %v650_v6 = vadd.f32 %v1634_v14, %v649_v36  ;;  %1203 = vrsqrt.f32 %v658_v15  ;;  %v1043_v49 = vpop.f32.mrb[24].mxu0  ;;  %v1879_v60 = vld [vmem:[#allocation5_spill] sm:$0xff] }
 0x132   : > { %v1180_v40 = vpop.eup %1179  ;;  %834 = vst [vmem:[%s1655_s13 + $0x68] sm:$0xff] %v770_v17  ;;  %v775_v26 = vmul.f32 %v1178_v35, %v1492_v52  ;;  %v1075_v51 = vpop.f32.mrb[24].mxu1  ;;  %1205 = vrsqrt.f32 %v522_v29  ;;  %v543_v24 = vadd.f32 %v1043_v49, %v1634_v14 }
 0x133   : > { %v1182_v63 = vpop.eup %1181  ;;  %866 = vst [vmem:[%s1655_s13 + $0x168] sm:$0xff] %v802_v42  ;;  %v807_v44 = vmul.f32 %v1180_v40, %v1498_v58  ;;  %v671_v47 = vadd.f32 %v1075_v51, %v1634_v14  ;;  %v534_v58 = vpop.f32.mrb[25].mxu0  ;;  %1207 = vrsqrt.f32 %v650_v6  ;;  %v1880_v40 = vld [vmem:[#allocation2_spill] sm:$0xff] }
 0x134   : > { %v1184_v22 = vpop.eup %1183  ;;  %839 = vst [vmem:[%s1655_s13 + $0x90] sm:$0xff] %v775_v26  ;;  %v773_v1 = vmul.f32 %v1182_v63, %v1464_v30  ;;  %v662_v57 = vpop.f32.mrb[25].mxu1  ;;  %v535_v55 = vadd.f32 %v1634_v14, %v534_v58  ;;  %1209 = vrsqrt.f32 %v543_v24  ;;  %v1882_v51 = vld [vmem:[#allocation10_spill] sm:$0xff] }
 0x135   : > { %v1186_v8 = vpop.eup %1185  ;;  %871 = vst [vmem:[%s1655_s13 + $0x190] sm:$0xff] %v807_v44  ;;  %v805_v52 = vmul.f32 %v1184_v22, %v1470_v32  ;;  %v663_v19 = vadd.f32 %v1634_v14, %v662_v57  ;;  %v1044_v61 = vpop.f32.mrb[26].mxu0  ;;  %1211 = vrsqrt.f32 %v671_v47  ;;  %v1881_v44 = vld [vmem:[#allocation3_spill] sm:$0xff]  ;;  %v1883_v47 = vld [vmem:[#allocation12_spill] sm:$0xff] }
 0x136   : > { %v1188_v34 = vpop.eup %1187  ;;  %837 = vst [vmem:[%s1655_s13 + $0x80] sm:$0xff] %v773_v1  ;;  %v776_v30 = vmul.f32 %v1186_v8, %v1495_v53  ;;  %v1076_v32 = vpop.f32.mrb[26].mxu1  ;;  %v546_v37 = vadd.f32 %v1044_v61, %v1634_v14  ;;  %1213 = vrsqrt.f32 %v535_v55 }
 0x137   : > { %v1190_v54 = vpop.eup %1189  ;;  %869 = vst [vmem:[%s1655_s13 + $0x180] sm:$0xff] %v805_v52  ;;  %v808_v27 = vmul.f32 %v1188_v34, %v1501_v59  ;;  %v537_v43 = vpop.f32.mrb[27].mxu0  ;;  %v674_v45 = vadd.f32 %v1076_v32, %v1634_v14  ;;  %1215 = vrsqrt.f32 %v663_v19  ;;  %v1884_v34 = vld [vmem:[#allocation6_spill] sm:$0xff]  ;;  %v1885_v19 = vld [vmem:[#allocation8_spill] sm:$0xff]  ;;  %v1886_v32 = vld [vmem:[#allocation11_spill] sm:$0xff] }
 0x138   : > { %v665_v11 = vpop.f32.mrb[27].mxu1  ;;  %v1192_v21 = vpop.eup %1191  ;;  %840 = vst [vmem:[%s1655_s13 + $0x98] sm:$0xff] %v776_v30  ;;  %v774_v53 = vmul.f32 %v1190_v54, %v1467_v31  ;;  %v538_v59 = vadd.f32 %v1634_v14, %v537_v43  ;;  %1217 = vrsqrt.f32 %v546_v37  ;;  %v1887_v37 = vld [vmem:[#allocation13_spill] sm:$0xff] }
 0x139   : > { %v1194_v46 = vpop.eup %1193  ;;  %872 = vst [vmem:[%s1655_s13 + $0x198] sm:$0xff] %v808_v27  ;;  %v806_v41 = vmul.f32 %v1192_v21, %v1473_v33  ;;  %v666_v50 = vadd.f32 %v1634_v14, %v665_v11  ;;  %1219 = vrsqrt.f32 %v674_v45  ;;  %v1047_v23 = vpop.f32.mrb[28].mxu0  ;;  %v1888_v21 = vld [vmem:[#allocation7_spill] sm:$0xff] }
 0x13a   : > { %v1196_v18 = vpop.eup %1195  ;;  %838 = vst [vmem:[%s1655_s13 + $0x88] sm:$0xff] %v774_v53  ;;  %v779_v16 = vmul.f32 %v1194_v46, %v1532_v38  ;;  %v1079_v12 = vpop.f32.mrb[28].mxu1  ;;  %1221 = vrsqrt.f32 %v538_v59  ;;  %v559_v20 = vadd.f32 %v1047_v23, %v1634_v14  ;;  %v1889_v46 = vld [vmem:[#allocation9_spill] sm:$0xff]  ;;  %v1891_v23 = vld [vmem:[#allocation16_spill] sm:$0xff] }
 0x13b   : > { %v1198_v31 = vpop.eup %1197  ;;  %870 = vst [vmem:[%s1655_s13 + $0x188] sm:$0xff] %v806_v41  ;;  %v811_v5 = vmul.f32 %v1196_v18, %v1538_v48  ;;  %v687_v25 = vadd.f32 %v1079_v12, %v1634_v14  ;;  %v550_v48 = vpop.f32.mrb[29].mxu0  ;;  %1223 = vrsqrt.f32 %v666_v50 }
 0x13c   : > { %v1200_v28 = vpop.eup %1199  ;;  %843 = vst [vmem:[%s1655_s13 + $0xb0] sm:$0xff] %v779_v16  ;;  %v777_v33 = vmul.f32 %v1198_v31, %v1504_v2  ;;  %v678_v9 = vpop.f32.mrb[29].mxu1  ;;  %v551_v13 = vadd.f32 %v1634_v14, %v550_v48  ;;  %1225 = vrsqrt.f32 %v559_v20 }
 0x13d   : > { %v1202_v62 = vpop.eup %1201  ;;  %875 = vst [vmem:[%s1655_s13 + $0x1b0] sm:$0xff] %v811_v5  ;;  %v809_v38 = vmul.f32 %v1200_v28, %v1510_v7  ;;  %v679_v56 = vadd.f32 %v1634_v14, %v678_v9  ;;  %v1048_v4 = vpop.f32.mrb[30].mxu0  ;;  %1227 = vrsqrt.f32 %v687_v25  ;;  %v1890_v5 = vld [vmem:[#allocation14_spill] sm:$0xff]  ;;  %v1893_v25 = vld [vmem:[#allocation19_spill] sm:$0xff] }
 0x13e   : > { %v1204_v0 = vpop.eup %1203  ;;  %841 = vst [vmem:[%s1655_s13 + $0xa0] sm:$0xff] %v777_v33  ;;  %v780_v2 = vmul.f32 %v1202_v62, %v1878_v10  ;;  %v1080_v7 = vpop.f32.mrb[30].mxu1  ;;  %v562_v15 = vadd.f32 %v1048_v4, %v1634_v14  ;;  %1229 = vrsqrt.f32 %v551_v13  ;;  %v1894_v9 = vld [vmem:[#allocation15_spill] sm:$0xff]  ;;  %v1895_v10 = vld [vmem:[#allocation17_spill] sm:$0xff] }
 0x13f   : > { %v1206_v36 = vpop.eup %1205  ;;  %873 = vst [vmem:[%s1655_s13 + $0x1a0] sm:$0xff] %v809_v38  ;;  %v812_v17 = vmul.f32 %v1204_v0, %v1879_v60  ;;  %v553_v35 = vpop.f32.mrb[31].mxu0  ;;  %v690_v6 = vadd.f32 %v1080_v7, %v1634_v14  ;;  %1231 = vrsqrt.f32 %v679_v56  ;;  %v1892_v38 = vld [vmem:[#allocation18_spill] sm:$0xff] }
 0x140   : > { %v681_v42 = vpop.f32.mrb[31].mxu1  ;;  %v1208_v29 = vpop.eup %1207  ;;  %844 = vst [vmem:[%s1655_s13 + $0xb8] sm:$0xff] %v780_v2  ;;  %v778_v26 = vmul.f32 %v1206_v36, %v1880_v40  ;;  %v554_v1 = vadd.f32 %v1634_v14, %v553_v35  ;;  %1233 = vrsqrt.f32 %v562_v15 }
 0x141   : > { %v1210_v63 = vpop.eup %1209  ;;  %876 = vst [vmem:[%s1655_s13 + $0x1b8] sm:$0xff] %v812_v17  ;;  %v810_v22 = vmul.f32 %v1208_v29, %v1881_v44  ;;  %v682_v52 = vadd.f32 %v1634_v14, %v681_v42  ;;  %1235 = vrsqrt.f32 %v690_v6 }
 0x142   : > { %v1212_v49 = vpop.eup %1211  ;;  %842 = vst [vmem:[%s1655_s13 + $0xa8] sm:$0xff] %v778_v26  ;;  %v783_v8 = vmul.f32 %v1210_v63, %v1882_v51  ;;  %1237 = vrsqrt.f32 %v554_v1 }
 0x143   : > { %v1214_v24 = vpop.eup %1213  ;;  %874 = vst [vmem:[%s1655_s13 + $0x1a8] sm:$0xff] %v810_v22  ;;  %v815_v58 = vmul.f32 %v1212_v49, %v1883_v47  ;;  %1239 = vrsqrt.f32 %v682_v52 }
 0x144   : > { %v1216_v57 = vpop.eup %1215  ;;  %847 = vst [vmem:[%s1655_s13 + $0xd0] sm:$0xff] %v783_v8  ;;  %v781_v30 = vmul.f32 %v1214_v24, %v1884_v34 }
 0x145   : > { %v1218_v55 = vpop.eup %1217  ;;  %879 = vst [vmem:[%s1655_s13 + $0x1d0] sm:$0xff] %v815_v58  ;;  %v813_v61 = vmul.f32 %v1216_v57, %v1885_v19 }
 0x146   : > { %v1220_v14 = vpop.eup %1219  ;;  %845 = vst [vmem:[%s1655_s13 + $0xc0] sm:$0xff] %v781_v30  ;;  %v784_v54 = vmul.f32 %v1218_v55, %v1886_v32 }
 0x147   : > { %v1222_v27 = vpop.eup %1221  ;;  %877 = vst [vmem:[%s1655_s13 + $0x1c0] sm:$0xff] %v813_v61  ;;  %v816_v43 = vmul.f32 %v1220_v14, %v1887_v37 }
 0x148   : > { %v1224_v11 = vpop.eup %1223  ;;  %848 = vst [vmem:[%s1655_s13 + $0xd8] sm:$0xff] %v784_v54  ;;  %v782_v53 = vmul.f32 %v1222_v27, %v1888_v21 }
 0x149   : > { %v1226_v45 = vpop.eup %1225  ;;  %880 = vst [vmem:[%s1655_s13 + $0x1d8] sm:$0xff] %v816_v43  ;;  %v814_v41 = vmul.f32 %v1224_v11, %v1889_v46 }
 0x14a   : > { %v1228_v59 = vpop.eup %1227  ;;  %846 = vst [vmem:[%s1655_s13 + $0xc8] sm:$0xff] %v782_v53  ;;  %v787_v18 = vmul.f32 %v1226_v45, %v1612_v3 }
 0x14b   : > { %v1230_v16 = vpop.eup %1229  ;;  %878 = vst [vmem:[%s1655_s13 + $0x1c8] sm:$0xff] %v814_v41  ;;  %v819_v50 = vmul.f32 %v1228_v59, %v1618_v39 }
 0x14c   : > { %v1232_v31 = vpop.eup %1231  ;;  %851 = vst [vmem:[%s1655_s13 + $0xf0] sm:$0xff] %v787_v18  ;;  %v785_v28 = vmul.f32 %v1230_v16, %v1890_v5 }
 0x14d   : > { %v1234_v33 = vpop.eup %1233  ;;  %883 = vst [vmem:[%s1655_s13 + $0x1f0] sm:$0xff] %v819_v50  ;;  %v817_v12 = vmul.f32 %v1232_v31, %v1891_v23 }
 0x14e   : > { %v1236_v62 = vpop.eup %1235  ;;  %849 = vst [vmem:[%s1655_s13 + $0xe0] sm:$0xff] %v785_v28  ;;  %v788_v3 = vmul.f32 %v1234_v33, %v1892_v38 }
 0x14f   : > { %v1238_v20 = vpop.eup %1237  ;;  %881 = vst [vmem:[%s1655_s13 + $0x1e0] sm:$0xff] %v817_v12  ;;  %v820_v48 = vmul.f32 %v1236_v62, %v1893_v25 }
 0x150   : > { %v1240_v39 = vpop.eup %1239  ;;  %852 = vst [vmem:[%s1655_s13 + $0xf8] sm:$0xff] %v788_v3  ;;  %v786_v0 = vmul.f32 %v1238_v20, %v1894_v9 }
 0x151   : > { %884 = vst [vmem:[%s1655_s13 + $0x1f8] sm:$0xff] %v820_v48  ;;  %v818_v2 = vmul.f32 %v1240_v39, %v1895_v10 }
 0x152   : > { %850 = vst [vmem:[%s1655_s13 + $0xe8] sm:$0xff] %v786_v0 }
 0x153   : > { %882 = vst [vmem:[%s1655_s13 + $0x1e8] sm:$0xff] %v818_v2 }
 0x154 PF: > { %s13_s12 = sadd.s32 1, %s1247_s12  }
 0x155   : > { %p10_p4 = scmp.ge.s32.totalorder %s13_s12, 4  }
 0x157   :  { %12 = sbr.rel (!%p10_p4) target bundleno = 1 (0x1), region = 62 }

// kernel: forward.31
= control target key start
LH: loop header
LB: loop body
LE: loop exit
PB: predicated region body
PF: predicated region fallthrough
CT: control target
= control target key end

     0   :  { %s1027_s1 = inlined_call_operand.vmem [shape: bf16[128,128], index: 1, kind: input, shape index: {}]   ;;  %s1028_s0 = inlined_call_operand.vmem [shape: f32[256,128], index: 0, kind: input, shape index: {}]   ;;  %s1029_s2 = inlined_call_operand.vmem [shape: f32[8,128], index: 2, kind: input, shape index: {}]   ;;  %s1030_s3 = inlined_call_operand.vmem [shape: f32[256,128], index: 3, kind: output, shape index: {}]  }
   0x1   :  { %v522_v0 = vld [vmem:[%s1027_s1] sm:$0xff]   ;;  %v523_v1 = vld [vmem:[%s1027_s1 + $0x8] sm:$0xff]   ;;  %v524_v2 = vld [vmem:[%s1027_s1 + $0x10] sm:$0xff]  }
   0x2   :  { %458 = vmatprep.subr.bf16.mxu0 %v522_v0  ;;  %506 = vmatprep.subr.bf16.mxu1 %v522_v0  ;;  %v525_v3 = vld [vmem:[%s1027_s1 + $0x18] sm:$0xff]   ;;  %v629_v4 = vld [vmem:[%s1028_s0] sm:$0xff]  ;;  %v634_v5 = vld [vmem:[%s1028_s0 + $0x8] sm:$0xff] }
   0x3   :  { %459 = vmatpush3.bf16.msra.mxu0 %v522_v0  ;;  %514 = vmatpush3.bf16.msra.mxu1 %v522_v0  ;;  %v639_v6 = vld [vmem:[%s1028_s0 + $0x80] sm:$0xff]  ;;  %v47_v7 = vmul.f32 %v629_v4, %v629_v4  ;;  %v48_v8 = vmul.f32 %v634_v5, %v634_v5  ;;  %v648_v9 = vld [vmem:[%s1028_s0 + $0x88] sm:$0xff]  ;;  %v528_v16 = vld [vmem:[%s1027_s1 + $0x30] sm:$0xff]  }
   0x4   :  { %460 = vmatprep.subr.bf16.mxu0 %v523_v1  ;;  %507 = vmatprep.subr.bf16.mxu1 %v523_v1  ;;  %v63_v10 = vmul.f32 %v639_v6, %v639_v6  ;;  %v64_v11 = vmul.f32 %v648_v9, %v648_v9  ;;  %v526_v13 = vld [vmem:[%s1027_s1 + $0x20] sm:$0xff]   ;;  %v527_v15 = vld [vmem:[%s1027_s1 + $0x28] sm:$0xff]   ;;  %v529_v17 = vld [vmem:[%s1027_s1 + $0x38] sm:$0xff]  }
   0x5   :  { %v79_v12 = vpack.c.bf16 %v48_v8, %v47_v7  ;;  %v669_v18 = vld [vmem:[%s1028_s0 + $0x10] sm:$0xff]  ;;  %v674_v19 = vld [vmem:[%s1028_s0 + $0x18] sm:$0xff]  ;;  %v689_v22 = vld [vmem:[%s1028_s0 + $0x20] sm:$0xff] }
   0x6   :  { %v87_v14 = vpack.c.bf16 %v64_v11, %v63_v10  ;;  %v679_v20 = vld [vmem:[%s1028_s0 + $0x90] sm:$0xff]  ;;  %v684_v21 = vld [vmem:[%s1028_s0 + $0x98] sm:$0xff]  ;;  %v694_v23 = vld [vmem:[%s1028_s0 + $0x28] sm:$0xff]  ;;  %v49_v26 = vmul.f32 %v669_v18, %v669_v18  ;;  %v50_v27 = vmul.f32 %v674_v19, %v674_v19  ;;  %v51_v30 = vmul.f32 %v689_v22, %v689_v22 }
   0x7   :  { %461 = vmatpush3.bf16.msra.mxu0 %v523_v1  ;;  %515 = vmatpush3.bf16.msra.mxu1 %v523_v1  ;;  %v699_v24 = vld [vmem:[%s1028_s0 + $0xa0] sm:$0xff]  ;;  %v704_v25 = vld [vmem:[%s1028_s0 + $0xa8] sm:$0xff]  ;;  %v65_v28 = vmul.f32 %v679_v20, %v679_v20  ;;  %v66_v29 = vmul.f32 %v684_v21, %v684_v21  ;;  %v52_v31 = vmul.f32 %v694_v23, %v694_v23  ;;  %v725_v36 = vld [vmem:[%s1028_s0 + $0x30] sm:$0xff] }
   0x8   :  { %462 = vmatprep.subr.bf16.mxu0 %v524_v2  ;;  %508 = vmatprep.subr.bf16.mxu1 %v524_v2  ;;  %v67_v32 = vmul.f32 %v699_v24, %v699_v24  ;;  %v68_v33 = vmul.f32 %v704_v25, %v704_v25  ;;  %v80_v34 = vpack.c.bf16 %v50_v27, %v49_v26  ;;  %v730_v37 = vld [vmem:[%s1028_s0 + $0x38] sm:$0xff]  ;;  %v735_v40 = vld [vmem:[%s1028_s0 + $0xb0] sm:$0xff]  ;;  %v745_v42 = vld [vmem:[%s1028_s0 + $0x40] sm:$0xff] }
   0x9   :  { %474 = vmatprep.mubr.bf16.mxu0 %v79_v12  ;;  %490 = vmatprep.mubr.bf16.mxu1 %v87_v14  ;;  %v88_v35 = vpack.c.bf16 %v66_v29, %v65_v28  ;;  %v81_v38 = vpack.c.bf16 %v52_v31, %v51_v30  ;;  %v740_v41 = vld [vmem:[%s1028_s0 + $0xb8] sm:$0xff]  ;;  %v750_v43 = vld [vmem:[%s1028_s0 + $0x48] sm:$0xff]  ;;  %v755_v44 = vld [vmem:[%s1028_s0 + $0xc0] sm:$0xff]  ;;  %v53_v46 = vmul.f32 %v725_v36, %v725_v36 }
   0xa   :  { %v89_v39 = vpack.c.bf16 %v68_v33, %v67_v32  ;;  %v760_v45 = vld [vmem:[%s1028_s0 + $0xc8] sm:$0xff]  ;;  %v54_v47 = vmul.f32 %v730_v37, %v730_v37  ;;  %v69_v48 = vmul.f32 %v735_v40, %v735_v40  ;;  %v70_v49 = vmul.f32 %v740_v41, %v740_v41  ;;  %v781_v56 = vld [vmem:[%s1028_s0 + $0x50] sm:$0xff]  ;;  %v786_v57 = vld [vmem:[%s1028_s0 + $0x58] sm:$0xff] }
   0xb   :  { %463 = vmatpush3.bf16.msra.mxu0 %v524_v2  ;;  %516 = vmatpush3.bf16.msra.mxu1 %v524_v2  ;;  %v55_v50 = vmul.f32 %v745_v42, %v745_v42  ;;  %v56_v51 = vmul.f32 %v750_v43, %v750_v43  ;;  %v71_v52 = vmul.f32 %v755_v44, %v755_v44  ;;  %v791_v60 = vld [vmem:[%s1028_s0 + $0xd0] sm:$0xff]  ;;  %v796_v61 = vld [vmem:[%s1028_s0 + $0xd8] sm:$0xff]  ;;  %v801_v62 = vld [vmem:[%s1028_s0 + $0x60] sm:$0xff] }
   0xc   :  { %464 = vmatprep.subr.bf16.mxu0 %v525_v3  ;;  %509 = vmatprep.subr.bf16.mxu1 %v525_v3  ;;  %v72_v53 = vmul.f32 %v760_v45, %v760_v45  ;;  %v82_v54 = vpack.c.bf16 %v54_v47, %v53_v46  ;;  %v90_v55 = vpack.c.bf16 %v70_v49, %v69_v48  ;;  %v806_v63 = vld [vmem:[%s1028_s0 + $0x68] sm:$0xff]  ;;  %v811_v0 = vld [vmem:[%s1028_s0 + $0xe0] sm:$0xff]  ;;  %v842_v27 = vld [vmem:[%s1028_s0 + $0x78] sm:$0xff] }
   0xd   :  { %v83_v58 = vpack.c.bf16 %v56_v51, %v55_v50  ;;  %v816_v1 = vld [vmem:[%s1028_s0 + $0xe8] sm:$0xff]  ;;  %v57_v2 = vmul.f32 %v781_v56, %v781_v56  ;;  %v73_v7 = vmul.f32 %v791_v60, %v791_v60  ;;  %v74_v8 = vmul.f32 %v796_v61, %v796_v61  ;;  %v847_v28 = vld [vmem:[%s1028_s0 + $0xf0] sm:$0xff]  ;;  %v852_v29 = vld [vmem:[%s1028_s0 + $0xf8] sm:$0xff] }
   0xe   :  { %v91_v59 = vpack.c.bf16 %v72_v53, %v71_v52  ;;  %v59_v10 = vmul.f32 %v801_v62, %v801_v62  ;;  %v60_v11 = vmul.f32 %v806_v63, %v806_v63  ;;  %v75_v12 = vmul.f32 %v811_v0, %v811_v0 }
   0xf   :  { %465 = vmatpush3.bf16.msra.mxu0 %v525_v3  ;;  %517 = vmatpush3.bf16.msra.mxu1 %v525_v3  ;;  %v58_v3 = vmul.f32 %v786_v57, %v786_v57  ;;  %v62_v31 = vmul.f32 %v842_v27, %v842_v27  ;;  %v77_v32 = vmul.f32 %v847_v28, %v847_v28 }
  0x10   :  { %466 = vmatprep.subr.bf16.mxu0 %v526_v13  ;;  %510 = vmatprep.subr.bf16.mxu1 %v526_v13  ;;  %v78_v33 = vmul.f32 %v852_v29, %v852_v29 }
  0x11   :  { %v84_v14 = vpack.c.bf16 %v58_v3, %v57_v2 }
  0x13   :  { %467 = vmatpush3.bf16.msra.mxu0 %v526_v13  ;;  %518 = vmatpush3.bf16.msra.mxu1 %v526_v13  ;;  %v76_v13 = vmul.f32 %v816_v1, %v816_v1 }
  0x14   :  { %468 = vmatprep.subr.bf16.mxu0 %v527_v15  ;;  %511 = vmatprep.subr.bf16.mxu1 %v527_v15 }
  0x15   :  { %v93_v26 = vpack.c.bf16 %v76_v13, %v75_v12 }
  0x17   :  { %469 = vmatpush3.bf16.msra.mxu0 %v527_v15  ;;  %519 = vmatpush3.bf16.msra.mxu1 %v527_v15  ;;  %v92_v15 = vpack.c.bf16 %v74_v8, %v73_v7 }
  0x18   :  { %470 = vmatprep.subr.bf16.mxu0 %v528_v16  ;;  %512 = vmatprep.subr.bf16.mxu1 %v528_v16 }
  0x1b   :  { %471 = vmatpush3.bf16.msra.mxu0 %v528_v16  ;;  %520 = vmatpush3.bf16.msra.mxu1 %v528_v16  ;;  %v837_v16 = vld [vmem:[%s1028_s0 + $0x70] sm:$0xff] }
  0x1c   :  { %472 = vmatprep.subr.bf16.mxu0 %v529_v17  ;;  %513 = vmatprep.subr.bf16.mxu1 %v529_v17  ;;  %v61_v30 = vmul.f32 %v837_v16, %v837_v16 }
  0x1f   :  { %473 = vmatpush3.bf16.msra.mxu0 %v529_v17  ;;  %521 = vmatpush3.bf16.msra.mxu1 %v529_v17  ;;  %v85_v17 = vpack.c.bf16 %v60_v11, %v59_v10 }
  0x22   :  { %475 = vmatmul.mubr.bf16.vlgmr.msra.gmra.mrb[0].mxu0 %v80_v34  ;;  %491 = vmatmul.mubr.bf16.vlgmr.msra.gmra.mrb[0].mxu1 %v88_v35  ;;  %v86_v34 = vpack.c.bf16 %v62_v31, %v61_v30  ;;  %v94_v35 = vpack.c.bf16 %v78_v33, %v77_v32 }
  0x23   :  { %478 = vmatprep.mubr.bf16.mxu0 %v81_v38  ;;  %494 = vmatprep.mubr.bf16.mxu1 %v89_v39  ;;  %v865_v38 = vld [vmem:[%s1029_s2] ss:$0 sm:$0xff] }
  0x2a   :  { %479 = vmatmul.mubr.bf16.gmra.mrb[4].mxu0 %v82_v54  ;;  %495 = vmatmul.mubr.bf16.gmra.mrb[4].mxu1 %v90_v55 }
  0x2b   :  { %482 = vmatprep.mubr.bf16.mxu0 %v83_v58  ;;  %498 = vmatprep.mubr.bf16.mxu1 %v91_v59 }
  0x32   :  { %483 = vmatmul.mubr.bf16.gmra.mrb[8].mxu0 %v84_v14  ;;  %499 = vmatmul.mubr.bf16.gmra.mrb[8].mxu1 %v92_v15 }
  0x33   :  { %486 = vmatprep.mubr.bf16.mxu0 %v85_v17  ;;  %502 = vmatprep.mubr.bf16.mxu1 %v93_v26 }
  0x3a   :  { %487 = vmatmul.mubr.bf16.gmra.mrb[12].mxu0 %v86_v34  ;;  %503 = vmatmul.mubr.bf16.gmra.mrb[12].mxu1 %v94_v35 }
  0xf5   :  { %v476_v39 = vpop.f32.mrb[0].mxu0  ;;  %v492_v46 = vpop.f32.mrb[0].mxu1 }
  0xf6   :  { %v207_v47 = vadd.f32 %v476_v39, %v865_v38  ;;  %v271_v48 = vadd.f32 %v492_v46, %v865_v38  ;;  %v198_v49 = vpop.f32.mrb[1].mxu0  ;;  %v262_v50 = vpop.f32.mrb[1].mxu1 }
  0xf7   :  { %v199_v51 = vadd.f32 %v865_v38, %v198_v49  ;;  %v263_v52 = vadd.f32 %v865_v38, %v262_v50  ;;  %v477_v53 = vpop.f32.mrb[2].mxu0  ;;  %v493_v54 = vpop.f32.mrb[2].mxu1 }
  0xf8   :  { %530 = vrsqrt.f32 %v207_v47  ;;  %v210_v55 = vadd.f32 %v477_v53, %v865_v38  ;;  %v201_v58 = vpop.f32.mrb[3].mxu0  ;;  %v265_v59 = vpop.f32.mrb[3].mxu1  ;;  %v274_v2 = vadd.f32 %v493_v54, %v865_v38 }
  0xf9   :  { %532 = vrsqrt.f32 %v271_v48  ;;  %v202_v3 = vadd.f32 %v865_v38, %v201_v58  ;;  %v266_v7 = vadd.f32 %v865_v38, %v265_v59 }
  0xfa   :  { %534 = vrsqrt.f32 %v199_v51 }
  0xfb   :  { %536 = vrsqrt.f32 %v263_v52 }
  0xfc   :  { %538 = vrsqrt.f32 %v210_v55 }
  0xfd   :  { %540 = vrsqrt.f32 %v274_v2  ;;  %v480_v8 = vpop.f32.mrb[4].mxu0  ;;  %v496_v10 = vpop.f32.mrb[4].mxu1 }
  0xfe   :  { %542 = vrsqrt.f32 %v202_v3  ;;  %v223_v11 = vadd.f32 %v480_v8, %v865_v38  ;;  %v287_v12 = vadd.f32 %v496_v10, %v865_v38  ;;  %v214_v13 = vpop.f32.mrb[5].mxu0  ;;  %v278_v14 = vpop.f32.mrb[5].mxu1 }
  0xff   :  { %544 = vrsqrt.f32 %v266_v7  ;;  %v215_v15 = vadd.f32 %v865_v38, %v214_v13  ;;  %v279_v17 = vadd.f32 %v865_v38, %v278_v14  ;;  %v481_v26 = vpop.f32.mrb[6].mxu0  ;;  %v497_v30 = vpop.f32.mrb[6].mxu1 }
 0x100   :  { %546 = vrsqrt.f32 %v223_v11  ;;  %v226_v31 = vadd.f32 %v481_v26, %v865_v38  ;;  %v217_v32 = vpop.f32.mrb[7].mxu0  ;;  %v281_v33 = vpop.f32.mrb[7].mxu1  ;;  %v290_v34 = vadd.f32 %v497_v30, %v865_v38 }
 0x101   :  { %548 = vrsqrt.f32 %v287_v12  ;;  %v218_v39 = vadd.f32 %v865_v38, %v217_v32  ;;  %v282_v48 = vadd.f32 %v865_v38, %v281_v33 }
 0x102   :  { %v531_v35 = vpop.eup %530  ;;  %550 = vrsqrt.f32 %v215_v15 }
 0x103   :  { %v533_v46 = vpop.eup %532  ;;  %v359_v47 = vmul.f32 %v531_v35, %v669_v18  ;;  %552 = vrsqrt.f32 %v279_v17 }
 0x104   :  { %v535_v49 = vpop.eup %534  ;;  %v375_v50 = vmul.f32 %v533_v46, %v679_v20  ;;  %554 = vrsqrt.f32 %v226_v31 }
 0x105   :  { %v537_v51 = vpop.eup %536  ;;  %391 = vst [vmem:[%s1030_s3 + $0x10] sm:$0xff] %v359_v47  ;;  %v357_v52 = vmul.f32 %v535_v49, %v629_v4  ;;  %556 = vrsqrt.f32 %v290_v34  ;;  %v484_v53 = vpop.f32.mrb[8].mxu0 }
 0x106   :  { %v500_v54 = vpop.f32.mrb[8].mxu1  ;;  %v539_v55 = vpop.eup %538  ;;  %407 = vst [vmem:[%s1030_s3 + $0x90] sm:$0xff] %v375_v50  ;;  %v373_v18 = vmul.f32 %v537_v51, %v639_v6  ;;  %558 = vrsqrt.f32 %v218_v39  ;;  %v239_v20 = vadd.f32 %v484_v53, %v865_v38 }
 0x107   :  { %v303_v58 = vadd.f32 %v500_v54, %v865_v38  ;;  %v230_v59 = vpop.f32.mrb[9].mxu0  ;;  %v294_v2 = vpop.f32.mrb[9].mxu1  ;;  %389 = vst [vmem:[%s1030_s3] sm:$0xff] %v357_v52  ;;  %v360_v4 = vmul.f32 %v539_v55, %v674_v19  ;;  %560 = vrsqrt.f32 %v282_v48 }
 0x108   :  { %v541_v3 = vpop.eup %540  ;;  %v231_v7 = vadd.f32 %v865_v38, %v230_v59  ;;  %v295_v8 = vadd.f32 %v865_v38, %v294_v2  ;;  %v485_v6 = vpop.f32.mrb[10].mxu0  ;;  %405 = vst [vmem:[%s1030_s3 + $0x80] sm:$0xff] %v373_v18  ;;  %562 = vrsqrt.f32 %v239_v20 }
 0x109   :  { %v501_v10 = vpop.f32.mrb[10].mxu1  ;;  %v543_v11 = vpop.eup %542  ;;  %v376_v12 = vmul.f32 %v541_v3, %v684_v21  ;;  %v242_v13 = vadd.f32 %v485_v6, %v865_v38  ;;  %392 = vst [vmem:[%s1030_s3 + $0x18] sm:$0xff] %v360_v4  ;;  %564 = vrsqrt.f32 %v303_v58 }
 0x10a   :  { %v233_v14 = vpop.f32.mrb[11].mxu0  ;;  %v297_v15 = vpop.f32.mrb[11].mxu1  ;;  %v358_v17 = vmul.f32 %v543_v11, %v634_v5  ;;  %v306_v26 = vadd.f32 %v501_v10, %v865_v38  ;;  %566 = vrsqrt.f32 %v231_v7 }
 0x10b   :  { %v545_v19 = vpop.eup %544  ;;  %408 = vst [vmem:[%s1030_s3 + $0x98] sm:$0xff] %v376_v12  ;;  %v234_v31 = vadd.f32 %v865_v38, %v233_v14  ;;  %568 = vrsqrt.f32 %v295_v8  ;;  %v298_v33 = vadd.f32 %v865_v38, %v297_v15 }
 0x10c   :  { %v547_v30 = vpop.eup %546  ;;  %v374_v21 = vmul.f32 %v545_v19, %v648_v9  ;;  %390 = vst [vmem:[%s1030_s3 + $0x8] sm:$0xff] %v358_v17  ;;  %570 = vrsqrt.f32 %v242_v13 }
 0x10d   :  { %v549_v32 = vpop.eup %548  ;;  %v363_v5 = vmul.f32 %v547_v30, %v725_v36  ;;  %572 = vrsqrt.f32 %v306_v26  ;;  %v488_v36 = vpop.f32.mrb[12].mxu0 }
 0x10e   :  { %v551_v34 = vpop.eup %550  ;;  %406 = vst [vmem:[%s1030_s3 + $0x88] sm:$0xff] %v374_v21  ;;  %v379_v9 = vmul.f32 %v549_v32, %v735_v40  ;;  %v504_v46 = vpop.f32.mrb[12].mxu1  ;;  %574 = vrsqrt.f32 %v234_v31  ;;  %v255_v40 = vadd.f32 %v488_v36, %v865_v38 }
 0x10f   :  { %v553_v35 = vpop.eup %552  ;;  %395 = vst [vmem:[%s1030_s3 + $0x30] sm:$0xff] %v363_v5  ;;  %v361_v39 = vmul.f32 %v551_v34, %v689_v22  ;;  %v319_v49 = vadd.f32 %v504_v46, %v865_v38  ;;  %v246_v50 = vpop.f32.mrb[13].mxu0  ;;  %576 = vrsqrt.f32 %v298_v33 }
 0x110   :  { %v555_v47 = vpop.eup %554  ;;  %411 = vst [vmem:[%s1030_s3 + $0xb0] sm:$0xff] %v379_v9  ;;  %v377_v48 = vmul.f32 %v553_v35, %v699_v24  ;;  %v310_v51 = vpop.f32.mrb[13].mxu1  ;;  %v247_v53 = vadd.f32 %v865_v38, %v246_v50  ;;  %578 = vrsqrt.f32 %v255_v40 }
 0x111   :  { %v557_v52 = vpop.eup %556  ;;  %393 = vst [vmem:[%s1030_s3 + $0x20] sm:$0xff] %v361_v39  ;;  %v364_v22 = vmul.f32 %v555_v47, %v730_v37  ;;  %v311_v54 = vadd.f32 %v865_v38, %v310_v51  ;;  %v489_v24 = vpop.f32.mrb[14].mxu0  ;;  %580 = vrsqrt.f32 %v319_v49 }
 0x112   :  { %v505_v55 = vpop.f32.mrb[14].mxu1  ;;  %v559_v18 = vpop.eup %558  ;;  %409 = vst [vmem:[%s1030_s3 + $0xa0] sm:$0xff] %v377_v48  ;;  %v380_v20 = vmul.f32 %v557_v52, %v740_v41  ;;  %v258_v58 = vadd.f32 %v489_v24, %v865_v38  ;;  %582 = vrsqrt.f32 %v247_v53 }
 0x113   :  { %v249_v59 = vpop.f32.mrb[15].mxu0  ;;  %v313_v2 = vpop.f32.mrb[15].mxu1  ;;  %396 = vst [vmem:[%s1030_s3 + $0x38] sm:$0xff] %v364_v22  ;;  %v362_v3 = vmul.f32 %v559_v18, %v694_v23  ;;  %v322_v4 = vadd.f32 %v505_v55, %v865_v38  ;;  %584 = vrsqrt.f32 %v311_v54 }
 0x114   :  { %v561_v37 = vpop.eup %560  ;;  %412 = vst [vmem:[%s1030_s3 + $0xb8] sm:$0xff] %v380_v20  ;;  %v250_v8 = vadd.f32 %v865_v38, %v249_v59  ;;  %v314_v10 = vadd.f32 %v865_v38, %v313_v2  ;;  %586 = vrsqrt.f32 %v258_v58 }
 0x115   :  { %v563_v7 = vpop.eup %562  ;;  %v378_v41 = vmul.f32 %v561_v37, %v704_v25  ;;  %394 = vst [vmem:[%s1030_s3 + $0x28] sm:$0xff] %v362_v3  ;;  %588 = vrsqrt.f32 %v322_v4 }
 0x116   :  { %v565_v6 = vpop.eup %564  ;;  %v367_v23 = vmul.f32 %v563_v7, %v781_v56  ;;  %590 = vrsqrt.f32 %v250_v8 }
 0x117   :  { %v567_v11 = vpop.eup %566  ;;  %410 = vst [vmem:[%s1030_s3 + $0xa8] sm:$0xff] %v378_v41  ;;  %v383_v25 = vmul.f32 %v565_v6, %v791_v60  ;;  %592 = vrsqrt.f32 %v314_v10 }
 0x118   :  { %v569_v12 = vpop.eup %568  ;;  %399 = vst [vmem:[%s1030_s3 + $0x50] sm:$0xff] %v367_v23  ;;  %v365_v13 = vmul.f32 %v567_v11, %v745_v42 }
 0x119   :  { %v571_v56 = vpop.eup %570  ;;  %415 = vst [vmem:[%s1030_s3 + $0xd0] sm:$0xff] %v383_v25  ;;  %v381_v38 = vmul.f32 %v569_v12, %v755_v44 }
 0x11a   :  { %v573_v14 = vpop.eup %572  ;;  %397 = vst [vmem:[%s1030_s3 + $0x40] sm:$0xff] %v365_v13  ;;  %v368_v60 = vmul.f32 %v571_v56, %v786_v57 }
 0x11b   :  { %v575_v15 = vpop.eup %574  ;;  %413 = vst [vmem:[%s1030_s3 + $0xc0] sm:$0xff] %v381_v38  ;;  %v384_v42 = vmul.f32 %v573_v14, %v796_v61 }
 0x11c   :  { %v577_v19 = vpop.eup %576  ;;  %400 = vst [vmem:[%s1030_s3 + $0x58] sm:$0xff] %v368_v60  ;;  %v366_v44 = vmul.f32 %v575_v15, %v750_v43 }
 0x11d   :  { %v579_v17 = vpop.eup %578  ;;  %416 = vst [vmem:[%s1030_s3 + $0xd8] sm:$0xff] %v384_v42  ;;  %v382_v57 = vmul.f32 %v577_v19, %v760_v45 }
 0x11e   :  { %v581_v26 = vpop.eup %580  ;;  %398 = vst [vmem:[%s1030_s3 + $0x48] sm:$0xff] %v366_v44  ;;  %v371_v61 = vmul.f32 %v579_v17, %v837_v16 }
 0x11f   :  { %v583_v30 = vpop.eup %582  ;;  %414 = vst [vmem:[%s1030_s3 + $0xc8] sm:$0xff] %v382_v57  ;;  %v387_v43 = vmul.f32 %v581_v26, %v847_v28 }
 0x120   :  { %v585_v21 = vpop.eup %584  ;;  %403 = vst [vmem:[%s1030_s3 + $0x70] sm:$0xff] %v371_v61  ;;  %v369_v45 = vmul.f32 %v583_v30, %v801_v62 }
 0x121   :  { %v587_v31 = vpop.eup %586  ;;  %419 = vst [vmem:[%s1030_s3 + $0xf0] sm:$0xff] %v387_v43  ;;  %v385_v16 = vmul.f32 %v585_v21, %v811_v0 }
 0x122   :  { %v589_v32 = vpop.eup %588  ;;  %401 = vst [vmem:[%s1030_s3 + $0x60] sm:$0xff] %v369_v45  ;;  %v372_v28 = vmul.f32 %v587_v31, %v842_v27 }
 0x123   :  { %v591_v5 = vpop.eup %590  ;;  %417 = vst [vmem:[%s1030_s3 + $0xe0] sm:$0xff] %v385_v16  ;;  %v388_v62 = vmul.f32 %v589_v32, %v852_v29 }
 0x124   :  { %v593_v33 = vpop.eup %592  ;;  %404 = vst [vmem:[%s1030_s3 + $0x78] sm:$0xff] %v372_v28  ;;  %v370_v0 = vmul.f32 %v591_v5, %v806_v63 }
 0x125   :  { %420 = vst [vmem:[%s1030_s3 + $0xf8] sm:$0xff] %v388_v62  ;;  %v386_v27 = vmul.f32 %v593_v33, %v816_v1 }
 0x126   :  { %402 = vst [vmem:[%s1030_s3 + $0x68] sm:$0xff] %v370_v0 }
 0x127   :  { %418 = vst [vmem:[%s1030_s3 + $0xe8] sm:$0xff] %v386_v27 }

// kernel: forward.30
= control target key start
LH: loop header
LB: loop body
LE: loop exit
PB: predicated region body
PF: predicated region fallthrough
CT: control target
= control target key end

     0   :  { %s1274_s1 = inlined_call_operand.vmem [shape: bf16[256,128], index: 1, kind: input, shape index: {}]   ;;  %s1275_s0 = inlined_call_operand.vmem [shape: bf16[256,256], index: 0, kind: input, shape index: {}]   ;;  %s1276_s2 = inlined_call_operand.vmem [shape: f32[8,128], index: 2, kind: input, shape index: {}]   ;;  %s1277_s3 = inlined_call_operand.vmem [shape: f32[256,128], index: 3, kind: output, shape index: {}]  }
   0x1   :  { %v913_v0 = vld [vmem:[%s1274_s1 + $0x40] sm:$0xff]   ;;  %v915_v2 = vld [vmem:[%s1274_s1 + $0x48] sm:$0xff]   ;;  %v917_v4 = vld [vmem:[%s1274_s1 + $0x50] sm:$0xff]  }
   0x2   :  { %v914_v1 = vld [vmem:[%s1274_s1] sm:$0xff]   ;;  %785 = vmatprep.subr.bf16.mxu0 %v913_v0  ;;  %897 = vmatprep.subr.bf16.mxu1 %v913_v0  ;;  %v916_v3 = vld [vmem:[%s1274_s1 + $0x8] sm:$0xff]   ;;  %v918_v5 = vld [vmem:[%s1274_s1 + $0x10] sm:$0xff]  }
   0x3   :  { %786 = vmatpush3.bf16.msra.mxu0 %v914_v1  ;;  %905 = vmatpush3.bf16.msra.mxu1 %v914_v1  ;;  %v919_v6 = vld [vmem:[%s1274_s1 + $0x58] sm:$0xff]   ;;  %v921_v8 = vld [vmem:[%s1274_s1 + $0x60] sm:$0xff]   ;;  %v923_v10 = vld [vmem:[%s1274_s1 + $0x68] sm:$0xff]  }
   0x4   :  { %787 = vmatprep.subr.bf16.mxu0 %v915_v2  ;;  %898 = vmatprep.subr.bf16.mxu1 %v915_v2  ;;  %v920_v7 = vld [vmem:[%s1274_s1 + $0x18] sm:$0xff]   ;;  %v922_v9 = vld [vmem:[%s1274_s1 + $0x20] sm:$0xff]   ;;  %v924_v13 = vld [vmem:[%s1274_s1 + $0x28] sm:$0xff]  }
   0x5   :  { %v931_v11 = vld [vmem:[%s1275_s0 + $0x4] ss:$8 sps:$4 sm:$0xff]   ;;  %v925_v14 = vld [vmem:[%s1274_s1 + $0x70] sm:$0xff]   ;;  %v927_v16 = vld [vmem:[%s1274_s1 + $0x78] sm:$0xff]  }
   0x6   :  { %v934_v12 = vld [vmem:[%s1275_s0 + $0x84] ss:$8 sps:$4 sm:$0xff]   ;;  %435 = vmatprep.mubr.bf16.mxu0 %v931_v11  ;;  %v926_v15 = vld [vmem:[%s1274_s1 + $0x30] sm:$0xff]   ;;  %v928_v17 = vld [vmem:[%s1274_s1 + $0x38] sm:$0xff]  }
   0x7   :  { %788 = vmatpush3.bf16.msra.mxu0 %v916_v3  ;;  %906 = vmatpush3.bf16.msra.mxu1 %v916_v3  ;;  %v929_v18 = vld [vmem:[%s1275_s0] ss:$8 sps:$4 sm:$0xff]   ;;  %v935_v20 = vld [vmem:[%s1275_s0 + $0x14] ss:$8 sps:$4 sm:$0xff]   ;;  %v939_v22 = vld [vmem:[%s1275_s0 + $0x10] ss:$8 sps:$4 sm:$0xff]  }
   0x8   :  { %789 = vmatprep.subr.bf16.mxu0 %v917_v4  ;;  %899 = vmatprep.subr.bf16.mxu1 %v917_v4  ;;  %v932_v19 = vld [vmem:[%s1275_s0 + $0x80] ss:$8 sps:$4 sm:$0xff]   ;;  %v937_v21 = vld [vmem:[%s1275_s0 + $0x94] ss:$8 sps:$4 sm:$0xff]   ;;  %v940_v23 = vld [vmem:[%s1275_s0 + $0x90] ss:$8 sps:$4 sm:$0xff]  }
   0x9   :  { %499 = vmatprep.mubr.bf16.mxu1 %v934_v12  ;;  %v941_v24 = vld [vmem:[%s1275_s0 + $0x24] ss:$8 sps:$4 sm:$0xff]   ;;  %v945_v26 = vld [vmem:[%s1275_s0 + $0x20] ss:$8 sps:$4 sm:$0xff]   ;;  %v947_v28 = vld [vmem:[%s1275_s0 + $0x34] ss:$8 sps:$4 sm:$0xff]  }
   0xa   :  { %v943_v25 = vld [vmem:[%s1275_s0 + $0xa4] ss:$8 sps:$4 sm:$0xff]   ;;  %v946_v27 = vld [vmem:[%s1275_s0 + $0xa0] ss:$8 sps:$4 sm:$0xff]   ;;  %v949_v29 = vld [vmem:[%s1275_s0 + $0xb4] ss:$8 sps:$4 sm:$0xff]  }
   0xb   :  { %790 = vmatpush3.bf16.msra.mxu0 %v918_v5  ;;  %907 = vmatpush3.bf16.msra.mxu1 %v918_v5  ;;  %v951_v30 = vld [vmem:[%s1275_s0 + $0x30] ss:$8 sps:$4 sm:$0xff]   ;;  %v953_v32 = vld [vmem:[%s1275_s0 + $0x44] ss:$8 sps:$4 sm:$0xff]   ;;  %v957_v34 = vld [vmem:[%s1275_s0 + $0x40] ss:$8 sps:$4 sm:$0xff]  }
   0xc   :  { %791 = vmatprep.subr.bf16.mxu0 %v919_v6  ;;  %900 = vmatprep.subr.bf16.mxu1 %v919_v6  ;;  %v952_v31 = vld [vmem:[%s1275_s0 + $0xb0] ss:$8 sps:$4 sm:$0xff]   ;;  %v955_v33 = vld [vmem:[%s1275_s0 + $0xc4] ss:$8 sps:$4 sm:$0xff]   ;;  %v958_v35 = vld [vmem:[%s1275_s0 + $0xc0] ss:$8 sps:$4 sm:$0xff]  }
   0xd   :  { %v959_v36 = vld [vmem:[%s1275_s0 + $0x54] ss:$8 sps:$4 sm:$0xff]   ;;  %v963_v38 = vld [vmem:[%s1275_s0 + $0x50] ss:$8 sps:$4 sm:$0xff]   ;;  %v965_v40 = vld [vmem:[%s1275_s0 + $0x64] ss:$8 sps:$4 sm:$0xff]  }
   0xe   :  { %v961_v37 = vld [vmem:[%s1275_s0 + $0xd4] ss:$8 sps:$4 sm:$0xff]   ;;  %v964_v39 = vld [vmem:[%s1275_s0 + $0xd0] ss:$8 sps:$4 sm:$0xff]   ;;  %v967_v41 = vld [vmem:[%s1275_s0 + $0xe4] ss:$8 sps:$4 sm:$0xff]  }
   0xf   :  { %792 = vmatpush3.bf16.msra.mxu0 %v920_v7  ;;  %908 = vmatpush3.bf16.msra.mxu1 %v920_v7  ;;  %v969_v42 = vld [vmem:[%s1275_s0 + $0x60] ss:$8 sps:$4 sm:$0xff]   ;;  %v971_v44 = vld [vmem:[%s1275_s0 + $0x74] ss:$8 sps:$4 sm:$0xff]   ;;  %v975_v46 = vld [vmem:[%s1275_s0 + $0x70] ss:$8 sps:$4 sm:$0xff]  }
  0x10   :  { %793 = vmatprep.subr.bf16.mxu0 %v921_v8  ;;  %901 = vmatprep.subr.bf16.mxu1 %v921_v8  ;;  %v970_v43 = vld [vmem:[%s1275_s0 + $0xe0] ss:$8 sps:$4 sm:$0xff]   ;;  %v973_v45 = vld [vmem:[%s1275_s0 + $0xf4] ss:$8 sps:$4 sm:$0xff]   ;;  %v976_v47 = vld [vmem:[%s1275_s0 + $0xf0] ss:$8 sps:$4 sm:$0xff]  }
  0x11   :  { %v1144_v51 = vld [vmem:[%s1276_s2] ss:$0 sm:$0xff] }
  0x13   :  { %794 = vmatpush3.bf16.msra.mxu0 %v922_v9  ;;  %909 = vmatpush3.bf16.msra.mxu1 %v922_v9 }
  0x14   :  { %795 = vmatprep.subr.bf16.mxu0 %v923_v10  ;;  %902 = vmatprep.subr.bf16.mxu1 %v923_v10 }
  0x17   :  { %796 = vmatpush3.bf16.msra.mxu0 %v924_v13  ;;  %910 = vmatpush3.bf16.msra.mxu1 %v924_v13 }
  0x18   :  { %797 = vmatprep.subr.bf16.mxu0 %v925_v14  ;;  %903 = vmatprep.subr.bf16.mxu1 %v925_v14 }
  0x1b   :  { %798 = vmatpush3.bf16.msra.mxu0 %v926_v15  ;;  %911 = vmatpush3.bf16.msra.mxu1 %v926_v15 }
  0x1c   :  { %799 = vmatprep.subr.bf16.mxu0 %v927_v16  ;;  %904 = vmatprep.subr.bf16.mxu1 %v927_v16 }
  0x1f   :  { %800 = vmatpush3.bf16.msra.mxu0 %v928_v17  ;;  %912 = vmatpush3.bf16.msra.mxu1 %v928_v17 }
  0x22   :  { %436 = vmatmul.mubr.bf16.vlgmr.msra.gmra.mrb[0].mxu0 %v929_v18  ;;  %500 = vmatmul.mubr.bf16.vlgmr.msra.gmra.mrb[0].mxu1 %v932_v19 }
  0x23   :  { %443 = vmatprep.mubr.bf16.mxu0 %v935_v20  ;;  %507 = vmatprep.mubr.bf16.mxu1 %v937_v21 }
  0x2a   :  { %444 = vmatmul.mubr.bf16.gmra.mrb[4].mxu0 %v939_v22  ;;  %508 = vmatmul.mubr.bf16.gmra.mrb[4].mxu1 %v940_v23 }
  0x2b   :  { %451 = vmatprep.mubr.bf16.mxu0 %v941_v24  ;;  %515 = vmatprep.mubr.bf16.mxu1 %v943_v25 }
  0x32   :  { %452 = vmatmul.mubr.bf16.gmra.mrb[8].mxu0 %v945_v26  ;;  %516 = vmatmul.mubr.bf16.gmra.mrb[8].mxu1 %v946_v27 }
  0x33   :  { %459 = vmatprep.mubr.bf16.mxu0 %v947_v28  ;;  %523 = vmatprep.mubr.bf16.mxu1 %v949_v29 }
  0x3a   :  { %460 = vmatmul.mubr.bf16.gmra.mrb[12].mxu0 %v951_v30  ;;  %524 = vmatmul.mubr.bf16.gmra.mrb[12].mxu1 %v952_v31 }
  0x3b   :  { %467 = vmatprep.mubr.bf16.mxu0 %v953_v32  ;;  %531 = vmatprep.mubr.bf16.mxu1 %v955_v33 }
  0x42   :  { %468 = vmatmul.mubr.bf16.gmra.mrb[16].mxu0 %v957_v34  ;;  %532 = vmatmul.mubr.bf16.gmra.mrb[16].mxu1 %v958_v35 }
  0x43   :  { %475 = vmatprep.mubr.bf16.mxu0 %v959_v36  ;;  %539 = vmatprep.mubr.bf16.mxu1 %v961_v37 }
  0x4a   :  { %476 = vmatmul.mubr.bf16.gmra.mrb[20].mxu0 %v963_v38  ;;  %540 = vmatmul.mubr.bf16.gmra.mrb[20].mxu1 %v964_v39 }
  0x4b   :  { %483 = vmatprep.mubr.bf16.mxu0 %v965_v40  ;;  %547 = vmatprep.mubr.bf16.mxu1 %v967_v41 }
  0x52   :  { %484 = vmatmul.mubr.bf16.gmra.mrb[24].mxu0 %v969_v42  ;;  %548 = vmatmul.mubr.bf16.gmra.mrb[24].mxu1 %v970_v43 }
  0x53   :  { %491 = vmatprep.mubr.bf16.mxu0 %v971_v44  ;;  %555 = vmatprep.mubr.bf16.mxu1 %v973_v45 }
  0x5a   :  { %492 = vmatmul.mubr.bf16.gmra.mrb[28].mxu0 %v975_v46  ;;  %556 = vmatmul.mubr.bf16.gmra.mrb[28].mxu1 %v976_v47 }
  0xf5   :  { %v801_v48 = vpop.f32.mrb[0].mxu0  ;;  %v849_v49 = vpop.f32.mrb[0].mxu1 }
  0xf6   :  { %v802_v50 = vpop.f32.mrb[1].mxu0  ;;  %v850_v52 = vpop.f32.mrb[1].mxu1 }
  0xf7   :  { %v803_v53 = vadd.f32 %v802_v50, %v801_v48  ;;  %v851_v54 = vadd.f32 %v850_v52, %v849_v49  ;;  %v804_v55 = vpop.f32.mrb[2].mxu0  ;;  %v852_v56 = vpop.f32.mrb[2].mxu1 }
  0xf8   :  { %v805_v57 = vpop.f32.mrb[3].mxu0  ;;  %v853_v58 = vpop.f32.mrb[3].mxu1 }
  0xf9   :  { %v668_v59 = vadd.f32 %v803_v53, %v1144_v51  ;;  %v684_v60 = vadd.f32 %v851_v54, %v1144_v51  ;;  %v806_v61 = vadd.f32 %v805_v57, %v804_v55  ;;  %v854_v62 = vadd.f32 %v853_v58, %v852_v56 }
  0xfb   :  { %700 = vst [vmem:[%s1277_s3] sm:$0xff] %v668_v59  ;;  %716 = vst [vmem:[%s1277_s3 + $0x80] sm:$0xff] %v684_v60  ;;  %v669_v63 = vadd.f32 %v806_v61, %v1144_v51  ;;  %v685_v0 = vadd.f32 %v854_v62, %v1144_v51 }
  0xfd   :  { %701 = vst [vmem:[%s1277_s3 + $0x8] sm:$0xff] %v669_v63  ;;  %717 = vst [vmem:[%s1277_s3 + $0x88] sm:$0xff] %v685_v0  ;;  %v807_v1 = vpop.f32.mrb[4].mxu0  ;;  %v855_v2 = vpop.f32.mrb[4].mxu1 }
  0xfe   :  { %v808_v3 = vpop.f32.mrb[5].mxu0  ;;  %v856_v4 = vpop.f32.mrb[5].mxu1 }
  0xff   :  { %v809_v5 = vadd.f32 %v808_v3, %v807_v1  ;;  %v857_v6 = vadd.f32 %v856_v4, %v855_v2  ;;  %v810_v7 = vpop.f32.mrb[6].mxu0  ;;  %v858_v8 = vpop.f32.mrb[6].mxu1 }
 0x100   :  { %v811_v9 = vpop.f32.mrb[7].mxu0  ;;  %v859_v10 = vpop.f32.mrb[7].mxu1 }
 0x101   :  { %v670_v11 = vadd.f32 %v809_v5, %v1144_v51  ;;  %v686_v12 = vadd.f32 %v857_v6, %v1144_v51  ;;  %v812_v13 = vadd.f32 %v811_v9, %v810_v7  ;;  %v860_v14 = vadd.f32 %v859_v10, %v858_v8 }
 0x103   :  { %702 = vst [vmem:[%s1277_s3 + $0x10] sm:$0xff] %v670_v11  ;;  %718 = vst [vmem:[%s1277_s3 + $0x90] sm:$0xff] %v686_v12  ;;  %v671_v15 = vadd.f32 %v812_v13, %v1144_v51  ;;  %v687_v16 = vadd.f32 %v860_v14, %v1144_v51 }
 0x105   :  { %703 = vst [vmem:[%s1277_s3 + $0x18] sm:$0xff] %v671_v15  ;;  %719 = vst [vmem:[%s1277_s3 + $0x98] sm:$0xff] %v687_v16  ;;  %v813_v17 = vpop.f32.mrb[8].mxu0  ;;  %v861_v18 = vpop.f32.mrb[8].mxu1 }
 0x106   :  { %v814_v19 = vpop.f32.mrb[9].mxu0  ;;  %v862_v20 = vpop.f32.mrb[9].mxu1 }
 0x107   :  { %v815_v21 = vadd.f32 %v814_v19, %v813_v17  ;;  %v863_v22 = vadd.f32 %v862_v20, %v861_v18  ;;  %v816_v23 = vpop.f32.mrb[10].mxu0  ;;  %v864_v24 = vpop.f32.mrb[10].mxu1 }
 0x108   :  { %v817_v25 = vpop.f32.mrb[11].mxu0  ;;  %v865_v26 = vpop.f32.mrb[11].mxu1 }
 0x109   :  { %v672_v27 = vadd.f32 %v815_v21, %v1144_v51  ;;  %v688_v28 = vadd.f32 %v863_v22, %v1144_v51  ;;  %v818_v29 = vadd.f32 %v817_v25, %v816_v23  ;;  %v866_v30 = vadd.f32 %v865_v26, %v864_v24 }
 0x10b   :  { %704 = vst [vmem:[%s1277_s3 + $0x20] sm:$0xff] %v672_v27  ;;  %720 = vst [vmem:[%s1277_s3 + $0xa0] sm:$0xff] %v688_v28  ;;  %v673_v31 = vadd.f32 %v818_v29, %v1144_v51  ;;  %v689_v32 = vadd.f32 %v866_v30, %v1144_v51 }
 0x10d   :  { %705 = vst [vmem:[%s1277_s3 + $0x28] sm:$0xff] %v673_v31  ;;  %721 = vst [vmem:[%s1277_s3 + $0xa8] sm:$0xff] %v689_v32  ;;  %v819_v33 = vpop.f32.mrb[12].mxu0  ;;  %v867_v34 = vpop.f32.mrb[12].mxu1 }
 0x10e   :  { %v820_v35 = vpop.f32.mrb[13].mxu0  ;;  %v868_v36 = vpop.f32.mrb[13].mxu1 }
 0x10f   :  { %v821_v37 = vadd.f32 %v820_v35, %v819_v33  ;;  %v869_v38 = vadd.f32 %v868_v36, %v867_v34  ;;  %v822_v39 = vpop.f32.mrb[14].mxu0  ;;  %v870_v40 = vpop.f32.mrb[14].mxu1 }
 0x110   :  { %v823_v41 = vpop.f32.mrb[15].mxu0  ;;  %v871_v42 = vpop.f32.mrb[15].mxu1 }
 0x111   :  { %v674_v43 = vadd.f32 %v821_v37, %v1144_v51  ;;  %v690_v44 = vadd.f32 %v869_v38, %v1144_v51  ;;  %v824_v45 = vadd.f32 %v823_v41, %v822_v39  ;;  %v872_v46 = vadd.f32 %v871_v42, %v870_v40 }
 0x113   :  { %706 = vst [vmem:[%s1277_s3 + $0x30] sm:$0xff] %v674_v43  ;;  %722 = vst [vmem:[%s1277_s3 + $0xb0] sm:$0xff] %v690_v44  ;;  %v675_v47 = vadd.f32 %v824_v45, %v1144_v51  ;;  %v691_v48 = vadd.f32 %v872_v46, %v1144_v51 }
 0x115   :  { %707 = vst [vmem:[%s1277_s3 + $0x38] sm:$0xff] %v675_v47  ;;  %723 = vst [vmem:[%s1277_s3 + $0xb8] sm:$0xff] %v691_v48  ;;  %v825_v49 = vpop.f32.mrb[16].mxu0  ;;  %v873_v50 = vpop.f32.mrb[16].mxu1 }
 0x116   :  { %v826_v52 = vpop.f32.mrb[17].mxu0  ;;  %v874_v53 = vpop.f32.mrb[17].mxu1 }
 0x117   :  { %v827_v54 = vadd.f32 %v826_v52, %v825_v49  ;;  %v875_v55 = vadd.f32 %v874_v53, %v873_v50  ;;  %v828_v56 = vpop.f32.mrb[18].mxu0  ;;  %v876_v57 = vpop.f32.mrb[18].mxu1 }
 0x118   :  { %v829_v58 = vpop.f32.mrb[19].mxu0  ;;  %v877_v59 = vpop.f32.mrb[19].mxu1 }
 0x119   :  { %v676_v60 = vadd.f32 %v827_v54, %v1144_v51  ;;  %v692_v61 = vadd.f32 %v875_v55, %v1144_v51  ;;  %v830_v62 = vadd.f32 %v829_v58, %v828_v56  ;;  %v878_v63 = vadd.f32 %v877_v59, %v876_v57 }
 0x11b   :  { %708 = vst [vmem:[%s1277_s3 + $0x40] sm:$0xff] %v676_v60  ;;  %724 = vst [vmem:[%s1277_s3 + $0xc0] sm:$0xff] %v692_v61  ;;  %v677_v0 = vadd.f32 %v830_v62, %v1144_v51  ;;  %v693_v1 = vadd.f32 %v878_v63, %v1144_v51 }
 0x11d   :  { %709 = vst [vmem:[%s1277_s3 + $0x48] sm:$0xff] %v677_v0  ;;  %725 = vst [vmem:[%s1277_s3 + $0xc8] sm:$0xff] %v693_v1  ;;  %v831_v2 = vpop.f32.mrb[20].mxu0  ;;  %v879_v3 = vpop.f32.mrb[20].mxu1 }
 0x11e   :  { %v832_v4 = vpop.f32.mrb[21].mxu0  ;;  %v880_v5 = vpop.f32.mrb[21].mxu1 }
 0x11f   :  { %v833_v6 = vadd.f32 %v832_v4, %v831_v2  ;;  %v881_v7 = vadd.f32 %v880_v5, %v879_v3  ;;  %v834_v8 = vpop.f32.mrb[22].mxu0  ;;  %v882_v9 = vpop.f32.mrb[22].mxu1 }
 0x120   :  { %v835_v10 = vpop.f32.mrb[23].mxu0  ;;  %v883_v11 = vpop.f32.mrb[23].mxu1 }
 0x121   :  { %v678_v12 = vadd.f32 %v833_v6, %v1144_v51  ;;  %v694_v13 = vadd.f32 %v881_v7, %v1144_v51  ;;  %v836_v14 = vadd.f32 %v835_v10, %v834_v8  ;;  %v884_v15 = vadd.f32 %v883_v11, %v882_v9 }
 0x123   :  { %710 = vst [vmem:[%s1277_s3 + $0x50] sm:$0xff] %v678_v12  ;;  %726 = vst [vmem:[%s1277_s3 + $0xd0] sm:$0xff] %v694_v13  ;;  %v679_v16 = vadd.f32 %v836_v14, %v1144_v51  ;;  %v695_v17 = vadd.f32 %v884_v15, %v1144_v51 }
 0x125   :  { %711 = vst [vmem:[%s1277_s3 + $0x58] sm:$0xff] %v679_v16  ;;  %727 = vst [vmem:[%s1277_s3 + $0xd8] sm:$0xff] %v695_v17  ;;  %v837_v18 = vpop.f32.mrb[24].mxu0  ;;  %v885_v19 = vpop.f32.mrb[24].mxu1 }
 0x126   :  { %v838_v20 = vpop.f32.mrb[25].mxu0  ;;  %v886_v21 = vpop.f32.mrb[25].mxu1 }
 0x127   :  { %v839_v22 = vadd.f32 %v838_v20, %v837_v18  ;;  %v887_v23 = vadd.f32 %v886_v21, %v885_v19  ;;  %v840_v24 = vpop.f32.mrb[26].mxu0  ;;  %v888_v25 = vpop.f32.mrb[26].mxu1 }
 0x128   :  { %v841_v26 = vpop.f32.mrb[27].mxu0  ;;  %v889_v27 = vpop.f32.mrb[27].mxu1 }
 0x129   :  { %v680_v28 = vadd.f32 %v839_v22, %v1144_v51  ;;  %v696_v29 = vadd.f32 %v887_v23, %v1144_v51  ;;  %v842_v30 = vadd.f32 %v841_v26, %v840_v24  ;;  %v890_v31 = vadd.f32 %v889_v27, %v888_v25 }
 0x12b   :  { %712 = vst [vmem:[%s1277_s3 + $0x60] sm:$0xff] %v680_v28  ;;  %728 = vst [vmem:[%s1277_s3 + $0xe0] sm:$0xff] %v696_v29  ;;  %v681_v32 = vadd.f32 %v842_v30, %v1144_v51  ;;  %v697_v33 = vadd.f32 %v890_v31, %v1144_v51 }
 0x12d   :  { %713 = vst [vmem:[%s1277_s3 + $0x68] sm:$0xff] %v681_v32  ;;  %729 = vst [vmem:[%s1277_s3 + $0xe8] sm:$0xff] %v697_v33  ;;  %v843_v34 = vpop.f32.mrb[28].mxu0  ;;  %v891_v35 = vpop.f32.mrb[28].mxu1 }
 0x12e   :  { %v844_v36 = vpop.f32.mrb[29].mxu0  ;;  %v892_v37 = vpop.f32.mrb[29].mxu1 }
 0x12f   :  { %v845_v38 = vadd.f32 %v844_v36, %v843_v34  ;;  %v893_v39 = vadd.f32 %v892_v37, %v891_v35  ;;  %v846_v40 = vpop.f32.mrb[30].mxu0  ;;  %v894_v41 = vpop.f32.mrb[30].mxu1 }
 0x130   :  { %v847_v42 = vpop.f32.mrb[31].mxu0  ;;  %v895_v43 = vpop.f32.mrb[31].mxu1 }
 0x131   :  { %v682_v44 = vadd.f32 %v845_v38, %v1144_v51  ;;  %v698_v45 = vadd.f32 %v893_v39, %v1144_v51  ;;  %v848_v46 = vadd.f32 %v847_v42, %v846_v40  ;;  %v896_v47 = vadd.f32 %v895_v43, %v894_v41 }
 0x133   :  { %714 = vst [vmem:[%s1277_s3 + $0x70] sm:$0xff] %v682_v44  ;;  %730 = vst [vmem:[%s1277_s3 + $0xf0] sm:$0xff] %v698_v45  ;;  %v683_v48 = vadd.f32 %v848_v46, %v1144_v51  ;;  %v699_v49 = vadd.f32 %v896_v47, %v1144_v51 }
 0x135   :  { %715 = vst [vmem:[%s1277_s3 + $0x78] sm:$0xff] %v683_v48  ;;  %731 = vst [vmem:[%s1277_s3 + $0xf8] sm:$0xff] %v699_v49 }

// kernel: forward.32
= control target key start
LH: loop header
LB: loop body
LE: loop exit
PB: predicated region body
PF: predicated region fallthrough
CT: control target
= control target key end

     0   :  { %s556_s1 = inlined_call_operand.vmem [shape: bf16[256,128], index: 1, kind: input, shape index: {}]   ;;  %s557_s0 = inlined_call_operand.vmem [shape: bf16[64,256], index: 0, kind: input, shape index: {}]   ;;  %s558_s2 = inlined_call_operand.vmem [shape: f32[8,128], index: 2, kind: input, shape index: {}]   ;;  %s559_s3 = inlined_call_operand.vmem [shape: f32[64,128], index: 3, kind: output, shape index: {}]  }
   0x1   :  { %v409_v0 = vld [vmem:[%s556_s1 + $0x40] sm:$0xff]   ;;  %v411_v2 = vld [vmem:[%s556_s1 + $0x48] sm:$0xff]   ;;  %v413_v4 = vld [vmem:[%s556_s1 + $0x50] sm:$0xff]  }
   0x2   :  { %v410_v1 = vld [vmem:[%s556_s1] sm:$0xff]   ;;  %353 = vmatprep.subr.bf16.mxu0 %v409_v0  ;;  %393 = vmatprep.subr.bf16.mxu1 %v409_v0  ;;  %v412_v3 = vld [vmem:[%s556_s1 + $0x8] sm:$0xff]   ;;  %v414_v5 = vld [vmem:[%s556_s1 + $0x10] sm:$0xff]  }
   0x3   :  { %354 = vmatpush3.bf16.msra.mxu0 %v410_v1  ;;  %401 = vmatpush3.bf16.msra.mxu1 %v410_v1  ;;  %v415_v6 = vld [vmem:[%s556_s1 + $0x58] sm:$0xff]   ;;  %v417_v8 = vld [vmem:[%s556_s1 + $0x60] sm:$0xff]   ;;  %v419_v10 = vld [vmem:[%s556_s1 + $0x68] sm:$0xff]  }
   0x4   :  { %355 = vmatprep.subr.bf16.mxu0 %v411_v2  ;;  %394 = vmatprep.subr.bf16.mxu1 %v411_v2  ;;  %v416_v7 = vld [vmem:[%s556_s1 + $0x18] sm:$0xff]   ;;  %v418_v9 = vld [vmem:[%s556_s1 + $0x20] sm:$0xff]   ;;  %v420_v13 = vld [vmem:[%s556_s1 + $0x28] sm:$0xff]  }
   0x5   :  { %v427_v11 = vld [vmem:[%s557_s0 + $0x4] ss:$8 sps:$4 sm:$0xff]   ;;  %v421_v14 = vld [vmem:[%s556_s1 + $0x70] sm:$0xff]   ;;  %v423_v16 = vld [vmem:[%s556_s1 + $0x78] sm:$0xff]  }
   0x6   :  { %v430_v12 = vld [vmem:[%s557_s0 + $0x24] ss:$8 sps:$4 sm:$0xff]   ;;  %243 = vmatprep.mubr.bf16.mxu0 %v427_v11  ;;  %v422_v15 = vld [vmem:[%s556_s1 + $0x30] sm:$0xff]   ;;  %v424_v17 = vld [vmem:[%s556_s1 + $0x38] sm:$0xff]  }
   0x7   :  { %356 = vmatpush3.bf16.msra.mxu0 %v412_v3  ;;  %402 = vmatpush3.bf16.msra.mxu1 %v412_v3  ;;  %v425_v18 = vld [vmem:[%s557_s0] ss:$8 sps:$4 sm:$0xff]   ;;  %v431_v20 = vld [vmem:[%s557_s0 + $0x14] ss:$8 sps:$4 sm:$0xff]   ;;  %v435_v22 = vld [vmem:[%s557_s0 + $0x10] ss:$8 sps:$4 sm:$0xff]  }
   0x8   :  { %357 = vmatprep.subr.bf16.mxu0 %v413_v4  ;;  %395 = vmatprep.subr.bf16.mxu1 %v413_v4  ;;  %v428_v19 = vld [vmem:[%s557_s0 + $0x20] ss:$8 sps:$4 sm:$0xff]   ;;  %v433_v21 = vld [vmem:[%s557_s0 + $0x34] ss:$8 sps:$4 sm:$0xff]   ;;  %v436_v23 = vld [vmem:[%s557_s0 + $0x30] ss:$8 sps:$4 sm:$0xff]  }
   0x9   :  { %259 = vmatprep.mubr.bf16.mxu1 %v430_v12  ;;  %v352_v27 = vld [vmem:[%s558_s2] ss:$0 sm:$0xff] }
   0xb   :  { %358 = vmatpush3.bf16.msra.mxu0 %v414_v5  ;;  %403 = vmatpush3.bf16.msra.mxu1 %v414_v5 }
   0xc   :  { %359 = vmatprep.subr.bf16.mxu0 %v415_v6  ;;  %396 = vmatprep.subr.bf16.mxu1 %v415_v6 }
   0xf   :  { %360 = vmatpush3.bf16.msra.mxu0 %v416_v7  ;;  %404 = vmatpush3.bf16.msra.mxu1 %v416_v7 }
  0x10   :  { %361 = vmatprep.subr.bf16.mxu0 %v417_v8  ;;  %397 = vmatprep.subr.bf16.mxu1 %v417_v8 }
  0x13   :  { %362 = vmatpush3.bf16.msra.mxu0 %v418_v9  ;;  %405 = vmatpush3.bf16.msra.mxu1 %v418_v9 }
  0x14   :  { %363 = vmatprep.subr.bf16.mxu0 %v419_v10  ;;  %398 = vmatprep.subr.bf16.mxu1 %v419_v10 }
  0x17   :  { %364 = vmatpush3.bf16.msra.mxu0 %v420_v13  ;;  %406 = vmatpush3.bf16.msra.mxu1 %v420_v13 }
  0x18   :  { %365 = vmatprep.subr.bf16.mxu0 %v421_v14  ;;  %399 = vmatprep.subr.bf16.mxu1 %v421_v14 }
  0x1b   :  { %366 = vmatpush3.bf16.msra.mxu0 %v422_v15  ;;  %407 = vmatpush3.bf16.msra.mxu1 %v422_v15 }
  0x1c   :  { %367 = vmatprep.subr.bf16.mxu0 %v423_v16  ;;  %400 = vmatprep.subr.bf16.mxu1 %v423_v16 }
  0x1f   :  { %368 = vmatpush3.bf16.msra.mxu0 %v424_v17  ;;  %408 = vmatpush3.bf16.msra.mxu1 %v424_v17 }
  0x22   :  { %244 = vmatmul.mubr.bf16.vlgmr.msra.gmra.mrb[0].mxu0 %v425_v18  ;;  %260 = vmatmul.mubr.bf16.vlgmr.msra.gmra.mrb[0].mxu1 %v428_v19 }
  0x23   :  { %251 = vmatprep.mubr.bf16.mxu0 %v431_v20  ;;  %267 = vmatprep.mubr.bf16.mxu1 %v433_v21 }
  0x2a   :  { %252 = vmatmul.mubr.bf16.gmra.mrb[4].mxu0 %v435_v22  ;;  %268 = vmatmul.mubr.bf16.gmra.mrb[4].mxu1 %v436_v23 }
  0xf5   :  { %v369_v24 = vpop.f32.mrb[0].mxu0  ;;  %v381_v25 = vpop.f32.mrb[0].mxu1 }
  0xf6   :  { %v370_v26 = vpop.f32.mrb[1].mxu0  ;;  %v382_v28 = vpop.f32.mrb[1].mxu1 }
  0xf7   :  { %v371_v29 = vadd.f32 %v370_v26, %v369_v24  ;;  %v383_v30 = vadd.f32 %v382_v28, %v381_v25  ;;  %v372_v31 = vpop.f32.mrb[2].mxu0  ;;  %v384_v32 = vpop.f32.mrb[2].mxu1 }
  0xf8   :  { %v373_v33 = vpop.f32.mrb[3].mxu0  ;;  %v385_v34 = vpop.f32.mrb[3].mxu1 }
  0xf9   :  { %v308_v35 = vadd.f32 %v371_v29, %v352_v27  ;;  %v312_v36 = vadd.f32 %v383_v30, %v352_v27  ;;  %v374_v37 = vadd.f32 %v373_v33, %v372_v31  ;;  %v386_v38 = vadd.f32 %v385_v34, %v384_v32 }
  0xfb   :  { %316 = vst [vmem:[%s559_s3] sm:$0xff] %v308_v35  ;;  %320 = vst [vmem:[%s559_s3 + $0x20] sm:$0xff] %v312_v36  ;;  %v309_v39 = vadd.f32 %v374_v37, %v352_v27  ;;  %v313_v40 = vadd.f32 %v386_v38, %v352_v27 }
  0xfd   :  { %317 = vst [vmem:[%s559_s3 + $0x8] sm:$0xff] %v309_v39  ;;  %321 = vst [vmem:[%s559_s3 + $0x28] sm:$0xff] %v313_v40  ;;  %v375_v41 = vpop.f32.mrb[4].mxu0  ;;  %v387_v42 = vpop.f32.mrb[4].mxu1 }
  0xfe   :  { %v376_v43 = vpop.f32.mrb[5].mxu0  ;;  %v388_v44 = vpop.f32.mrb[5].mxu1 }
  0xff   :  { %v377_v45 = vadd.f32 %v376_v43, %v375_v41  ;;  %v389_v46 = vadd.f32 %v388_v44, %v387_v42  ;;  %v378_v47 = vpop.f32.mrb[6].mxu0  ;;  %v390_v48 = vpop.f32.mrb[6].mxu1 }
 0x100   :  { %v379_v49 = vpop.f32.mrb[7].mxu0  ;;  %v391_v50 = vpop.f32.mrb[7].mxu1 }
 0x101   :  { %v310_v51 = vadd.f32 %v377_v45, %v352_v27  ;;  %v314_v52 = vadd.f32 %v389_v46, %v352_v27  ;;  %v380_v53 = vadd.f32 %v379_v49, %v378_v47  ;;  %v392_v54 = vadd.f32 %v391_v50, %v390_v48 }
 0x103   :  { %318 = vst [vmem:[%s559_s3 + $0x10] sm:$0xff] %v310_v51  ;;  %322 = vst [vmem:[%s559_s3 + $0x30] sm:$0xff] %v314_v52  ;;  %v311_v55 = vadd.f32 %v380_v53, %v352_v27  ;;  %v315_v56 = vadd.f32 %v392_v54, %v352_v27 }
 0x105   :  { %319 = vst [vmem:[%s559_s3 + $0x18] sm:$0xff] %v311_v55  ;;  %323 = vst [vmem:[%s559_s3 + $0x38] sm:$0xff] %v315_v56 }

// kernel: forward.33
= control target key start
LH: loop header
LB: loop body
LE: loop exit
PB: predicated region body
PF: predicated region fallthrough
CT: control target
= control target key end

     0   :  { %s397_s1 = inlined_call_operand.vmem [shape: bf16[128,128], index: 1, kind: input, shape index: {}]   ;;  %s398_s0 = inlined_call_operand.vmem [shape: f32[64,128], index: 0, kind: input, shape index: {}]   ;;  %s399_s2 = inlined_call_operand.vmem [shape: f32[8,128], index: 2, kind: input, shape index: {}]   ;;  %s400_s3 = inlined_call_operand.vmem [shape: f32[64,128], index: 3, kind: output, shape index: {}]  }
   0x1   :  { %v258_v0 = vld [vmem:[%s397_s1] sm:$0xff]   ;;  %v259_v1 = vld [vmem:[%s397_s1 + $0x8] sm:$0xff]   ;;  %v260_v2 = vld [vmem:[%s397_s1 + $0x10] sm:$0xff]  }
   0x2   :  { %218 = vmatprep.subr.bf16.mxu0 %v258_v0  ;;  %242 = vmatprep.subr.bf16.mxu1 %v258_v0  ;;  %v261_v3 = vld [vmem:[%s397_s1 + $0x18] sm:$0xff]   ;;  %v317_v4 = vld [vmem:[%s398_s0] sm:$0xff]  ;;  %v322_v5 = vld [vmem:[%s398_s0 + $0x8] sm:$0xff] }
   0x3   :  { %219 = vmatpush3.bf16.msra.mxu0 %v258_v0  ;;  %250 = vmatpush3.bf16.msra.mxu1 %v258_v0  ;;  %v327_v6 = vld [vmem:[%s398_s0 + $0x20] sm:$0xff]  ;;  %v23_v7 = vmul.f32 %v317_v4, %v317_v4  ;;  %v24_v8 = vmul.f32 %v322_v5, %v322_v5  ;;  %v336_v9 = vld [vmem:[%s398_s0 + $0x28] sm:$0xff]  ;;  %v264_v16 = vld [vmem:[%s397_s1 + $0x30] sm:$0xff]  }
   0x4   :  { %220 = vmatprep.subr.bf16.mxu0 %v259_v1  ;;  %243 = vmatprep.subr.bf16.mxu1 %v259_v1  ;;  %v27_v10 = vmul.f32 %v327_v6, %v327_v6  ;;  %v28_v11 = vmul.f32 %v336_v9, %v336_v9  ;;  %v262_v13 = vld [vmem:[%s397_s1 + $0x20] sm:$0xff]   ;;  %v263_v15 = vld [vmem:[%s397_s1 + $0x28] sm:$0xff]   ;;  %v17_v17 = vld [vmem:[%s398_s0 + $0x10] sm:$0xff] }
   0x5   :  { %v31_v12 = vpack.c.bf16 %v24_v8, %v23_v7  ;;  %v18_v18 = vld [vmem:[%s398_s0 + $0x18] sm:$0xff]  ;;  %v21_v19 = vld [vmem:[%s398_s0 + $0x30] sm:$0xff]  ;;  %v25_v22 = vmul.f32 %v17_v17, %v17_v17  ;;  %v197_v28 = vld [vmem:[%s399_s2] ss:$0 sm:$0xff] }
   0x6   :  { %v33_v14 = vpack.c.bf16 %v28_v11, %v27_v10  ;;  %v22_v20 = vld [vmem:[%s398_s0 + $0x38] sm:$0xff]  ;;  %v26_v23 = vmul.f32 %v18_v18, %v18_v18  ;;  %v29_v24 = vmul.f32 %v21_v19, %v21_v19 }
   0x7   :  { %221 = vmatpush3.bf16.msra.mxu0 %v259_v1  ;;  %251 = vmatpush3.bf16.msra.mxu1 %v259_v1  ;;  %v265_v21 = vld [vmem:[%s397_s1 + $0x38] sm:$0xff]   ;;  %v30_v25 = vmul.f32 %v22_v20, %v22_v20 }
   0x8   :  { %222 = vmatprep.subr.bf16.mxu0 %v260_v2  ;;  %244 = vmatprep.subr.bf16.mxu1 %v260_v2  ;;  %v32_v26 = vpack.c.bf16 %v26_v23, %v25_v22 }
   0x9   :  { %234 = vmatprep.mubr.bf16.mxu0 %v31_v12  ;;  %238 = vmatprep.mubr.bf16.mxu1 %v33_v14  ;;  %v34_v27 = vpack.c.bf16 %v30_v25, %v29_v24 }
   0xb   :  { %223 = vmatpush3.bf16.msra.mxu0 %v260_v2  ;;  %252 = vmatpush3.bf16.msra.mxu1 %v260_v2 }
   0xc   :  { %224 = vmatprep.subr.bf16.mxu0 %v261_v3  ;;  %245 = vmatprep.subr.bf16.mxu1 %v261_v3 }
   0xf   :  { %225 = vmatpush3.bf16.msra.mxu0 %v261_v3  ;;  %253 = vmatpush3.bf16.msra.mxu1 %v261_v3 }
  0x10   :  { %226 = vmatprep.subr.bf16.mxu0 %v262_v13  ;;  %246 = vmatprep.subr.bf16.mxu1 %v262_v13 }
  0x13   :  { %227 = vmatpush3.bf16.msra.mxu0 %v262_v13  ;;  %254 = vmatpush3.bf16.msra.mxu1 %v262_v13 }
  0x14   :  { %228 = vmatprep.subr.bf16.mxu0 %v263_v15  ;;  %247 = vmatprep.subr.bf16.mxu1 %v263_v15 }
  0x17   :  { %229 = vmatpush3.bf16.msra.mxu0 %v263_v15  ;;  %255 = vmatpush3.bf16.msra.mxu1 %v263_v15 }
  0x18   :  { %230 = vmatprep.subr.bf16.mxu0 %v264_v16  ;;  %248 = vmatprep.subr.bf16.mxu1 %v264_v16 }
  0x1b   :  { %231 = vmatpush3.bf16.msra.mxu0 %v264_v16  ;;  %256 = vmatpush3.bf16.msra.mxu1 %v264_v16 }
  0x1c   :  { %232 = vmatprep.subr.bf16.mxu0 %v265_v21  ;;  %249 = vmatprep.subr.bf16.mxu1 %v265_v21 }
  0x1f   :  { %233 = vmatpush3.bf16.msra.mxu0 %v265_v21  ;;  %257 = vmatpush3.bf16.msra.mxu1 %v265_v21 }
  0x22   :  { %235 = vmatmul.mubr.bf16.vlgmr.msra.gmra.mrb[0].mxu0 %v32_v26  ;;  %239 = vmatmul.mubr.bf16.vlgmr.msra.gmra.mrb[0].mxu1 %v34_v27 }
  0xf5   :  { %v236_v29 = vpop.f32.mrb[0].mxu0  ;;  %v240_v30 = vpop.f32.mrb[0].mxu1 }
  0xf6   :  { %v147_v31 = vadd.f32 %v236_v29, %v197_v28  ;;  %v163_v32 = vadd.f32 %v240_v30, %v197_v28  ;;  %v138_v33 = vpop.f32.mrb[1].mxu0  ;;  %v154_v34 = vpop.f32.mrb[1].mxu1 }
  0xf7   :  { %v139_v35 = vadd.f32 %v197_v28, %v138_v33  ;;  %v155_v36 = vadd.f32 %v197_v28, %v154_v34  ;;  %v237_v37 = vpop.f32.mrb[2].mxu0  ;;  %v241_v38 = vpop.f32.mrb[2].mxu1 }
  0xf8   :  { %266 = vrsqrt.f32 %v147_v31  ;;  %v150_v39 = vadd.f32 %v237_v37, %v197_v28  ;;  %v141_v40 = vpop.f32.mrb[3].mxu0  ;;  %v157_v41 = vpop.f32.mrb[3].mxu1  ;;  %v166_v42 = vadd.f32 %v241_v38, %v197_v28 }
  0xf9   :  { %268 = vrsqrt.f32 %v163_v32  ;;  %v142_v43 = vadd.f32 %v197_v28, %v141_v40  ;;  %v158_v44 = vadd.f32 %v197_v28, %v157_v41 }
  0xfa   :  { %270 = vrsqrt.f32 %v139_v35 }
  0xfb   :  { %272 = vrsqrt.f32 %v155_v36 }
  0xfc   :  { %274 = vrsqrt.f32 %v150_v39 }
  0xfd   :  { %276 = vrsqrt.f32 %v166_v42 }
  0xfe   :  { %278 = vrsqrt.f32 %v142_v43 }
  0xff   :  { %280 = vrsqrt.f32 %v158_v44 }
 0x102   :  { %v267_v45 = vpop.eup %266 }
 0x103   :  { %v269_v46 = vpop.eup %268  ;;  %v179_v47 = vmul.f32 %v267_v45, %v17_v17 }
 0x104   :  { %v271_v48 = vpop.eup %270  ;;  %v183_v49 = vmul.f32 %v269_v46, %v21_v19 }
 0x105   :  { %v273_v50 = vpop.eup %272  ;;  %187 = vst [vmem:[%s400_s3 + $0x10] sm:$0xff] %v179_v47  ;;  %v177_v51 = vmul.f32 %v271_v48, %v317_v4 }
 0x106   :  { %v275_v52 = vpop.eup %274  ;;  %191 = vst [vmem:[%s400_s3 + $0x30] sm:$0xff] %v183_v49  ;;  %v181_v53 = vmul.f32 %v273_v50, %v327_v6 }
 0x107   :  { %v277_v54 = vpop.eup %276  ;;  %185 = vst [vmem:[%s400_s3] sm:$0xff] %v177_v51  ;;  %v180_v55 = vmul.f32 %v275_v52, %v18_v18 }
 0x108   :  { %v279_v56 = vpop.eup %278  ;;  %189 = vst [vmem:[%s400_s3 + $0x20] sm:$0xff] %v181_v53  ;;  %v184_v57 = vmul.f32 %v277_v54, %v22_v20 }
 0x109   :  { %v281_v58 = vpop.eup %280  ;;  %188 = vst [vmem:[%s400_s3 + $0x18] sm:$0xff] %v180_v55  ;;  %v178_v59 = vmul.f32 %v279_v56, %v322_v5 }
 0x10a   :  { %192 = vst [vmem:[%s400_s3 + $0x38] sm:$0xff] %v184_v57  ;;  %v182_v60 = vmul.f32 %v281_v58, %v336_v9 }
 0x10b   :  { %186 = vst [vmem:[%s400_s3 + $0x8] sm:$0xff] %v178_v59 }
 0x10c   :  { %190 = vst [vmem:[%s400_s3 + $0x28] sm:$0xff] %v182_v60 }

// kernel: forward.34
= control target key start
LH: loop header
LB: loop body
LE: loop exit
PB: predicated region body
PF: predicated region fallthrough
CT: control target
= control target key end

     0   :  { %s369_s1 = inlined_call_operand.vmem [shape: bf16[256,128], index: 1, kind: input, shape index: {}]   ;;  %s370_s0 = inlined_call_operand.vmem [shape: bf16[16,256], index: 0, kind: input, shape index: {}]   ;;  %s371_s2 = inlined_call_operand.vmem [shape: f32[8,128], index: 2, kind: input, shape index: {}]   ;;  %s372_s3 = inlined_call_operand.vmem [shape: f32[16,128], index: 3, kind: output, shape index: {}]  }
   0x1   :  { %v267_v0 = vld [vmem:[%s369_s1 + $0x40] sm:$0xff]   ;;  %v269_v2 = vld [vmem:[%s369_s1 + $0x48] sm:$0xff]   ;;  %v271_v4 = vld [vmem:[%s369_s1 + $0x50] sm:$0xff]  }
   0x2   :  { %v268_v1 = vld [vmem:[%s369_s1] sm:$0xff]   ;;  %245 = vmatprep.subr.bf16.mxu0 %v267_v0  ;;  %v270_v3 = vld [vmem:[%s369_s1 + $0x8] sm:$0xff]   ;;  %v272_v5 = vld [vmem:[%s369_s1 + $0x10] sm:$0xff]  }
   0x3   :  { %246 = vmatpush3.bf16.msra.mxu0 %v268_v1  ;;  %v273_v6 = vld [vmem:[%s369_s1 + $0x58] sm:$0xff]   ;;  %v275_v8 = vld [vmem:[%s369_s1 + $0x60] sm:$0xff]   ;;  %v277_v10 = vld [vmem:[%s369_s1 + $0x68] sm:$0xff]  }
   0x4   :  { %247 = vmatprep.subr.bf16.mxu0 %v269_v2  ;;  %v274_v7 = vld [vmem:[%s369_s1 + $0x18] sm:$0xff]   ;;  %v276_v9 = vld [vmem:[%s369_s1 + $0x20] sm:$0xff]   ;;  %v278_v12 = vld [vmem:[%s369_s1 + $0x28] sm:$0xff]  }
   0x5   :  { %v285_v11 = vld [vmem:[%s370_s0 + $0x4] ss:$8 sps:$4 sm:$0xff]   ;;  %v279_v13 = vld [vmem:[%s369_s1 + $0x70] sm:$0xff]   ;;  %v281_v15 = vld [vmem:[%s369_s1 + $0x78] sm:$0xff]  }
   0x6   :  { %195 = vmatprep.mubr.bf16.mxu0 %v285_v11  ;;  %v280_v14 = vld [vmem:[%s369_s1 + $0x30] sm:$0xff]   ;;  %v282_v16 = vld [vmem:[%s369_s1 + $0x38] sm:$0xff]   ;;  %v283_v17 = vld [vmem:[%s370_s0] ss:$8 sps:$4 sm:$0xff]  }
   0x7   :  { %248 = vmatpush3.bf16.msra.mxu0 %v270_v3  ;;  %v244_v20 = vld [vmem:[%s371_s2] ss:$0 sm:$0xff] }
   0x8   :  { %249 = vmatprep.subr.bf16.mxu0 %v271_v4 }
   0xb   :  { %250 = vmatpush3.bf16.msra.mxu0 %v272_v5 }
   0xc   :  { %251 = vmatprep.subr.bf16.mxu0 %v273_v6 }
   0xf   :  { %252 = vmatpush3.bf16.msra.mxu0 %v274_v7 }
  0x10   :  { %253 = vmatprep.subr.bf16.mxu0 %v275_v8 }
  0x13   :  { %254 = vmatpush3.bf16.msra.mxu0 %v276_v9 }
  0x14   :  { %255 = vmatprep.subr.bf16.mxu0 %v277_v10 }
  0x17   :  { %256 = vmatpush3.bf16.msra.mxu0 %v278_v12 }
  0x18   :  { %257 = vmatprep.subr.bf16.mxu0 %v279_v13 }
  0x1b   :  { %258 = vmatpush3.bf16.msra.mxu0 %v280_v14 }
  0x1c   :  { %259 = vmatprep.subr.bf16.mxu0 %v281_v15 }
  0x1f   :  { %260 = vmatpush3.bf16.msra.mxu0 %v282_v16 }
  0x22   :  { %196 = vmatmul.mubr.bf16.vlgmr.msra.gmra.mrb[0].mxu0 %v283_v17 }
  0xf5   :  { %v261_v18 = vpop.f32.mrb[0].mxu0 }
  0xf6   :  { %v262_v19 = vpop.f32.mrb[1].mxu0 }
  0xf7   :  { %v263_v21 = vadd.f32 %v262_v19, %v261_v18  ;;  %v264_v22 = vpop.f32.mrb[2].mxu0 }
  0xf8   :  { %v265_v23 = vpop.f32.mrb[3].mxu0 }
  0xf9   :  { %v218_v24 = vadd.f32 %v263_v21, %v244_v20  ;;  %v266_v25 = vadd.f32 %v265_v23, %v264_v22 }
  0xfb   :  { %220 = vst [vmem:[%s372_s3] sm:$0xff] %v218_v24  ;;  %v219_v26 = vadd.f32 %v266_v25, %v244_v20 }
  0xfd   :  { %221 = vst [vmem:[%s372_s3 + $0x8] sm:$0xff] %v219_v26 }

// kernel: forward.35
= control target key start
LH: loop header
LB: loop body
LE: loop exit
PB: predicated region body
PF: predicated region fallthrough
CT: control target
= control target key end

     0   :  { %v214_v0 = vmov 0.0   ;;  %vm215_vm0 = vmmov 0   ;;  %s272_s1 = inlined_call_operand.vmem [shape: bf16[128,128], index: 1, kind: input, shape index: {}]   ;;  %s273_s0 = inlined_call_operand.vmem [shape: bf16[16,128], index: 0, kind: input, shape index: {}]   ;;  %s274_s2 = inlined_call_operand.vmem [shape: f32[8,128], index: 2, kind: input, shape index: {}]   ;;  %s275_s3 = inlined_call_operand.vmem [shape: f32[16,128], index: 3, kind: output, shape index: {}]  }
   0x1   :  { %183 = vmatprep.subr.bf16.mxu0 %v214_v0  ;;  %v205_v1 = vld [vmem:[%s272_s1] sm:$0xff]   ;;  %199 = vmatprep.mubr.msk.bf16.mxu0 %vm215_vm0, %v214_v0  ;;  %v206_v2 = vld [vmem:[%s272_s1 + $0x8] sm:$0xff]   ;;  %v207_v3 = vld [vmem:[%s272_s1 + $0x10] sm:$0xff]  }
   0x2   :  { %184 = vmatpush3.bf16.msra.mxu0 %v205_v1  ;;  %v208_v4 = vld [vmem:[%s272_s1 + $0x18] sm:$0xff]   ;;  %v209_v5 = vld [vmem:[%s272_s1 + $0x20] sm:$0xff]   ;;  %v210_v6 = vld [vmem:[%s272_s1 + $0x28] sm:$0xff]  }
   0x3   :  { %185 = vmatprep.subr.bf16.mxu0 %v214_v0  ;;  %v211_v7 = vld [vmem:[%s272_s1 + $0x30] sm:$0xff]   ;;  %v212_v8 = vld [vmem:[%s272_s1 + $0x38] sm:$0xff]   ;;  %v213_v9 = vld [vmem:[%s273_s0] sm:$0xff]  }
   0x4   :  { %v173_v10 = vld [vmem:[%s274_s2] ss:$0 sm:$0xff] }
   0x6   :  { %186 = vmatpush3.bf16.msra.mxu0 %v206_v2 }
   0x7   :  { %187 = vmatprep.subr.bf16.mxu0 %v214_v0 }
   0xa   :  { %188 = vmatpush3.bf16.msra.mxu0 %v207_v3 }
   0xb   :  { %189 = vmatprep.subr.bf16.mxu0 %v214_v0 }
   0xe   :  { %190 = vmatpush3.bf16.msra.mxu0 %v208_v4 }
   0xf   :  { %191 = vmatprep.subr.bf16.mxu0 %v214_v0 }
  0x12   :  { %192 = vmatpush3.bf16.msra.mxu0 %v209_v5 }
  0x13   :  { %193 = vmatprep.subr.bf16.mxu0 %v214_v0 }
  0x16   :  { %194 = vmatpush3.bf16.msra.mxu0 %v210_v6 }
  0x17   :  { %195 = vmatprep.subr.bf16.mxu0 %v214_v0 }
  0x1a   :  { %196 = vmatpush3.bf16.msra.mxu0 %v211_v7 }
  0x1b   :  { %197 = vmatprep.subr.bf16.mxu0 %v214_v0 }
  0x1e   :  { %198 = vmatpush3.bf16.msra.mxu0 %v212_v8 }
  0x21   :  { %200 = vmatmul.mubr.bf16.vlgmr.msra.gmra.mrb[0].mxu0 %v213_v9 }
  0xf4   :  { %v129_v11 = vpop.f32.mrb[0].mxu0 }
  0xf5   :  { %v150_v12 = vadd.f32 %v173_v10, %v129_v11  ;;  %v201_v13 = vpop.f32.mrb[1].mxu0 }
  0xf6   :  { %v132_v14 = vpop.f32.mrb[2].mxu0 }
  0xf7   :  { %vm152_vm1 = vcmp.ge.f32.partialorder %v150_v12, 0.0  ;;  %v154_v15 = vmul.f32 0.01, %v150_v12  ;;  %v151_v16 = vadd.f32 %v173_v10, %v132_v14  ;;  %v202_v17 = vpop.f32.mrb[3].mxu0 }
  0xf9   :  { %v156_v18 = vsel %vm152_vm1, %v150_v12, %v154_v15  ;;  %vm153_vm2 = vcmp.ge.f32.partialorder %v151_v16, 0.0  ;;  %v155_v19 = vmul.f32 0.01, %v151_v16 }
  0xfa   :  { %158 = vst [vmem:[%s275_s3] sm:$0xff] %v156_v18 }
  0xfb   :  { %v157_v20 = vsel %vm153_vm2, %v151_v16, %v155_v19 }
  0xfc   :  { %159 = vst [vmem:[%s275_s3 + $0x8] sm:$0xff] %v157_v20 }

// kernel: forward.36
= control target key start
LH: loop header
LB: loop body
LE: loop exit
PB: predicated region body
PF: predicated region fallthrough
CT: control target
= control target key end

     0   :  { %s353_s1 = inlined_call_operand.vmem [shape: bf16[256,128], index: 1, kind: input, shape index: {}]   ;;  %s354_s0 = inlined_call_operand.vmem [shape: bf16[8,256], index: 0, kind: input, shape index: {}]   ;;  %s355_s2 = inlined_call_operand.vmem [shape: f32[8,128], index: 2, kind: input, shape index: {}]   ;;  %s356_s3 = inlined_call_operand.vmem [shape: f32[8,128], index: 3, kind: output, shape index: {}]  }
   0x1   :  { %v258_v0 = vld [vmem:[%s353_s1 + $0x40] sm:$0xff]   ;;  %v260_v2 = vld [vmem:[%s353_s1 + $0x48] sm:$0xff]   ;;  %v262_v4 = vld [vmem:[%s353_s1 + $0x50] sm:$0xff]  }
   0x2   :  { %v259_v1 = vld [vmem:[%s353_s1] sm:$0xff]   ;;  %236 = vmatprep.subr.bf16.mxu0 %v258_v0  ;;  %v261_v3 = vld [vmem:[%s353_s1 + $0x8] sm:$0xff]   ;;  %v263_v5 = vld [vmem:[%s353_s1 + $0x10] sm:$0xff]  }
   0x3   :  { %237 = vmatpush3.bf16.msra.mxu0 %v259_v1  ;;  %v264_v6 = vld [vmem:[%s353_s1 + $0x58] sm:$0xff]   ;;  %v266_v8 = vld [vmem:[%s353_s1 + $0x60] sm:$0xff]   ;;  %v268_v10 = vld [vmem:[%s353_s1 + $0x68] sm:$0xff]  }
   0x4   :  { %238 = vmatprep.subr.bf16.mxu0 %v260_v2  ;;  %v265_v7 = vld [vmem:[%s353_s1 + $0x18] sm:$0xff]   ;;  %v267_v9 = vld [vmem:[%s353_s1 + $0x20] sm:$0xff]   ;;  %v269_v13 = vld [vmem:[%s353_s1 + $0x28] sm:$0xff]  }
   0x5   :  { %v21_v11 = vld [vmem:[%s354_s0] sm:$0xff]  ;;  %v270_v14 = vld [vmem:[%s353_s1 + $0x70] sm:$0xff]   ;;  %v272_v16 = vld [vmem:[%s353_s1 + $0x78] sm:$0xff]  }
   0x6   :  { %v218_v12 = vcombine.high %v21_v11, %v21_v11  ;;  %v271_v15 = vld [vmem:[%s353_s1 + $0x30] sm:$0xff]   ;;  %v273_v17 = vld [vmem:[%s353_s1 + $0x38] sm:$0xff]   ;;  %v217_v18 = vcombine.low %v21_v11, %v21_v11  ;;  %v235_v21 = vld [vmem:[%s355_s2] ss:$0 sm:$0xff] }
   0x7   :  { %239 = vmatpush3.bf16.msra.mxu0 %v261_v3 }
   0x8   :  { %240 = vmatprep.subr.bf16.mxu0 %v262_v4  ;;  %189 = vmatprep.mubr.bf16.mxu0 %v218_v12 }
   0xb   :  { %241 = vmatpush3.bf16.msra.mxu0 %v263_v5 }
   0xc   :  { %242 = vmatprep.subr.bf16.mxu0 %v264_v6 }
   0xf   :  { %243 = vmatpush3.bf16.msra.mxu0 %v265_v7 }
  0x10   :  { %244 = vmatprep.subr.bf16.mxu0 %v266_v8 }
  0x13   :  { %245 = vmatpush3.bf16.msra.mxu0 %v267_v9 }
  0x14   :  { %246 = vmatprep.subr.bf16.mxu0 %v268_v10 }
  0x17   :  { %247 = vmatpush3.bf16.msra.mxu0 %v269_v13 }
  0x18   :  { %248 = vmatprep.subr.bf16.mxu0 %v270_v14 }
  0x1b   :  { %249 = vmatpush3.bf16.msra.mxu0 %v271_v15 }
  0x1c   :  { %250 = vmatprep.subr.bf16.mxu0 %v272_v16 }
  0x1f   :  { %251 = vmatpush3.bf16.msra.mxu0 %v273_v17 }
  0x22   :  { %190 = vmatmul.mubr.bf16.vlgmr.msra.gmra.mrb[0].mxu0 %v217_v18 }
  0xf5   :  { %v252_v19 = vpop.f32.mrb[0].mxu0 }
  0xf6   :  { %v253_v20 = vpop.f32.mrb[1].mxu0 }
  0xf7   :  { %v254_v22 = vadd.f32 %v253_v20, %v252_v19  ;;  %v255_v23 = vpop.f32.mrb[2].mxu0 }
  0xf8   :  { %v256_v24 = vpop.f32.mrb[3].mxu0 }
  0xf9   :  { %v208_v25 = vadd.f32 %v254_v22, %v235_v21 }
  0xfb   :  { %vm209_vm0 = vcmp.ge.f32.partialorder %v208_v25, 0.0  ;;  %v210_v26 = vmul.f32 0.01, %v208_v25 }
  0xfd   :  { %v211_v27 = vsel %vm209_vm0, %v208_v25, %v210_v26 }
  0xfe   :  { %212 = vst [vmem:[%s356_s3] sm:$0xff] %v211_v27 }

// kernel: forward.37
= control target key start
LH: loop header
LB: loop body
LE: loop exit
PB: predicated region body
PF: predicated region fallthrough
CT: control target
= control target key end

     0   :  { %s350_s1 = inlined_call_operand.vmem [shape: bf16[256,128], index: 1, kind: input, shape index: {}]   ;;  %s351_s0 = inlined_call_operand.vmem [shape: bf16[8,256], index: 0, kind: input, shape index: {}]   ;;  %s352_s2 = inlined_call_operand.vmem [shape: f32[8,128], index: 2, kind: input, shape index: {}]   ;;  %s353_s3 = inlined_call_operand.vmem [shape: f32[8,128], index: 3, kind: output, shape index: {}]  }
   0x1   :  { %v255_v0 = vld [vmem:[%s350_s1 + $0x40] sm:$0xff]   ;;  %v257_v2 = vld [vmem:[%s350_s1 + $0x48] sm:$0xff]   ;;  %v259_v4 = vld [vmem:[%s350_s1 + $0x50] sm:$0xff]  }
   0x2   :  { %v256_v1 = vld [vmem:[%s350_s1] sm:$0xff]   ;;  %233 = vmatprep.subr.bf16.mxu0 %v255_v0  ;;  %v258_v3 = vld [vmem:[%s350_s1 + $0x8] sm:$0xff]   ;;  %v260_v5 = vld [vmem:[%s350_s1 + $0x10] sm:$0xff]  }
   0x3   :  { %234 = vmatpush3.bf16.msra.mxu0 %v256_v1  ;;  %v261_v6 = vld [vmem:[%s350_s1 + $0x58] sm:$0xff]   ;;  %v263_v8 = vld [vmem:[%s350_s1 + $0x60] sm:$0xff]   ;;  %v265_v10 = vld [vmem:[%s350_s1 + $0x68] sm:$0xff]  }
   0x4   :  { %235 = vmatprep.subr.bf16.mxu0 %v257_v2  ;;  %v262_v7 = vld [vmem:[%s350_s1 + $0x18] sm:$0xff]   ;;  %v264_v9 = vld [vmem:[%s350_s1 + $0x20] sm:$0xff]   ;;  %v266_v13 = vld [vmem:[%s350_s1 + $0x28] sm:$0xff]  }
   0x5   :  { %v21_v11 = vld [vmem:[%s351_s0] sm:$0xff]  ;;  %v267_v14 = vld [vmem:[%s350_s1 + $0x70] sm:$0xff]   ;;  %v269_v16 = vld [vmem:[%s350_s1 + $0x78] sm:$0xff]  }
   0x6   :  { %v215_v12 = vcombine.high %v21_v11, %v21_v11  ;;  %v268_v15 = vld [vmem:[%s350_s1 + $0x30] sm:$0xff]   ;;  %v270_v17 = vld [vmem:[%s350_s1 + $0x38] sm:$0xff]   ;;  %v214_v18 = vcombine.low %v21_v11, %v21_v11  ;;  %v232_v21 = vld [vmem:[%s352_s2] ss:$0 sm:$0xff] }
   0x7   :  { %236 = vmatpush3.bf16.msra.mxu0 %v258_v3 }
   0x8   :  { %237 = vmatprep.subr.bf16.mxu0 %v259_v4  ;;  %189 = vmatprep.mubr.bf16.mxu0 %v215_v12 }
   0xb   :  { %238 = vmatpush3.bf16.msra.mxu0 %v260_v5 }
   0xc   :  { %239 = vmatprep.subr.bf16.mxu0 %v261_v6 }
   0xf   :  { %240 = vmatpush3.bf16.msra.mxu0 %v262_v7 }
  0x10   :  { %241 = vmatprep.subr.bf16.mxu0 %v263_v8 }
  0x13   :  { %242 = vmatpush3.bf16.msra.mxu0 %v264_v9 }
  0x14   :  { %243 = vmatprep.subr.bf16.mxu0 %v265_v10 }
  0x17   :  { %244 = vmatpush3.bf16.msra.mxu0 %v266_v13 }
  0x18   :  { %245 = vmatprep.subr.bf16.mxu0 %v267_v14 }
  0x1b   :  { %246 = vmatpush3.bf16.msra.mxu0 %v268_v15 }
  0x1c   :  { %247 = vmatprep.subr.bf16.mxu0 %v269_v16 }
  0x1f   :  { %248 = vmatpush3.bf16.msra.mxu0 %v270_v17 }
  0x22   :  { %190 = vmatmul.mubr.bf16.vlgmr.msra.gmra.mrb[0].mxu0 %v214_v18 }
  0xf5   :  { %v249_v19 = vpop.f32.mrb[0].mxu0 }
  0xf6   :  { %v250_v20 = vpop.f32.mrb[1].mxu0 }
  0xf7   :  { %v251_v22 = vadd.f32 %v250_v20, %v249_v19  ;;  %v252_v23 = vpop.f32.mrb[2].mxu0 }
  0xf8   :  { %v253_v24 = vpop.f32.mrb[3].mxu0 }
  0xf9   :  { %v208_v25 = vadd.f32 %v251_v22, %v232_v21 }
  0xfb   :  { %209 = vst [vmem:[%s353_s3] sm:$0xff] %v208_v25 }

// kernel: forward.46
= control target key start
LH: loop header
LB: loop body
LE: loop exit
PB: predicated region body
PF: predicated region fallthrough
CT: control target
= control target key end

     0   :  { %v194_v0 = vmov 0.0   ;;  %vm195_vm0 = vmmov 0   ;;  %s249_s1 = inlined_call_operand.vmem [shape: bf16[128,128], index: 1, kind: input, shape index: {}]   ;;  %s250_s0 = inlined_call_operand.vmem [shape: bf16[8,128], index: 0, kind: input, shape index: {}]   ;;  %s251_s2 = inlined_call_operand.vmem [shape: f32[8,128], index: 2, kind: input, shape index: {}]   ;;  %s252_s3 = inlined_call_operand.vmem [shape: f32[8,128], index: 3, kind: output, shape index: {}]  }
   0x1   :  { %164 = vmatprep.subr.bf16.mxu0 %v194_v0  ;;  %v186_v1 = vld [vmem:[%s249_s1] sm:$0xff]   ;;  %180 = vmatprep.mubr.msk.bf16.mxu0 %vm195_vm0, %v194_v0  ;;  %v187_v2 = vld [vmem:[%s249_s1 + $0x8] sm:$0xff]   ;;  %v188_v3 = vld [vmem:[%s249_s1 + $0x10] sm:$0xff]  }
   0x2   :  { %165 = vmatpush3.bf16.msra.mxu0 %v186_v1  ;;  %v189_v4 = vld [vmem:[%s249_s1 + $0x18] sm:$0xff]   ;;  %v190_v5 = vld [vmem:[%s249_s1 + $0x20] sm:$0xff]   ;;  %v191_v6 = vld [vmem:[%s249_s1 + $0x28] sm:$0xff]  }
   0x3   :  { %166 = vmatprep.subr.bf16.mxu0 %v194_v0  ;;  %v192_v7 = vld [vmem:[%s249_s1 + $0x30] sm:$0xff]   ;;  %v193_v8 = vld [vmem:[%s249_s1 + $0x38] sm:$0xff]   ;;  %v21_v9 = vld [vmem:[%s250_s0] sm:$0xf] }
   0x4   :  { %v154_v10 = vld [vmem:[%s251_s2] ss:$0 sm:$0xff] }
   0x6   :  { %167 = vmatpush3.bf16.msra.mxu0 %v187_v2 }
   0x7   :  { %168 = vmatprep.subr.bf16.mxu0 %v194_v0 }
   0xa   :  { %169 = vmatpush3.bf16.msra.mxu0 %v188_v3 }
   0xb   :  { %170 = vmatprep.subr.bf16.mxu0 %v194_v0 }
   0xe   :  { %171 = vmatpush3.bf16.msra.mxu0 %v189_v4 }
   0xf   :  { %172 = vmatprep.subr.bf16.mxu0 %v194_v0 }
  0x12   :  { %173 = vmatpush3.bf16.msra.mxu0 %v190_v5 }
  0x13   :  { %174 = vmatprep.subr.bf16.mxu0 %v194_v0 }
  0x16   :  { %175 = vmatpush3.bf16.msra.mxu0 %v191_v6 }
  0x17   :  { %176 = vmatprep.subr.bf16.mxu0 %v194_v0 }
  0x1a   :  { %177 = vmatpush3.bf16.msra.mxu0 %v192_v7 }
  0x1b   :  { %178 = vmatprep.subr.bf16.mxu0 %v194_v0 }
  0x1e   :  { %179 = vmatpush3.bf16.msra.mxu0 %v193_v8 }
  0x21   :  { %181 = vmatmul.mubr.bf16.vlgmr.msra.gmra.mrb[0].mxu0 %v21_v9 }
  0xf4   :  { %v120_v11 = vpop.f32.mrb[0].mxu0 }
  0xf5   :  { %v137_v12 = vadd.f32 %v154_v10, %v120_v11  ;;  %v182_v13 = vpop.f32.mrb[1].mxu0 }
  0xf6   :  { %v123_v14 = vpop.f32.mrb[2].mxu0 }
  0xf7   :  { %vm138_vm1 = vcmp.ge.f32.partialorder %v137_v12, 0.0  ;;  %v139_v15 = vmul.f32 0.01, %v137_v12  ;;  %v183_v16 = vpop.f32.mrb[3].mxu0 }
  0xf9   :  { %v140_v17 = vsel %vm138_vm1, %v137_v12, %v139_v15 }
  0xfa   :  { %141 = vst [vmem:[%s252_s3] sm:$0xff] %v140_v17 }

// kernel: forward.40
= control target key start
LH: loop header
LB: loop body
LE: loop exit
PB: predicated region body
PF: predicated region fallthrough
CT: control target
= control target key end

     0   :  { %v208_v0 = vmov 0.0   ;;  %vm209_vm0 = vmmov 0   ;;  %s266_s1 = inlined_call_operand.vmem [shape: bf16[128,128], index: 1, kind: input, shape index: {}]   ;;  %s267_s0 = inlined_call_operand.vmem [shape: bf16[16,128], index: 0, kind: input, shape index: {}]   ;;  %s268_s2 = inlined_call_operand.vmem [shape: f32[8,128], index: 2, kind: input, shape index: {}]   ;;  %s269_s3 = inlined_call_operand.vmem [shape: f32[16,128], index: 3, kind: output, shape index: {}]  }
   0x1   :  { %177 = vmatprep.subr.bf16.mxu0 %v208_v0  ;;  %v199_v1 = vld [vmem:[%s266_s1] sm:$0xff]   ;;  %193 = vmatprep.mubr.msk.bf16.mxu0 %vm209_vm0, %v208_v0  ;;  %v200_v2 = vld [vmem:[%s266_s1 + $0x8] sm:$0xff]   ;;  %v201_v3 = vld [vmem:[%s266_s1 + $0x10] sm:$0xff]  }
   0x2   :  { %178 = vmatpush3.bf16.msra.mxu0 %v199_v1  ;;  %v202_v4 = vld [vmem:[%s266_s1 + $0x18] sm:$0xff]   ;;  %v203_v5 = vld [vmem:[%s266_s1 + $0x20] sm:$0xff]   ;;  %v204_v6 = vld [vmem:[%s266_s1 + $0x28] sm:$0xff]  }
   0x3   :  { %179 = vmatprep.subr.bf16.mxu0 %v208_v0  ;;  %v205_v7 = vld [vmem:[%s266_s1 + $0x30] sm:$0xff]   ;;  %v206_v8 = vld [vmem:[%s266_s1 + $0x38] sm:$0xff]   ;;  %v207_v9 = vld [vmem:[%s267_s0] sm:$0xff]  }
   0x4   :  { %v167_v10 = vld [vmem:[%s268_s2] ss:$0 sm:$0xff] }
   0x6   :  { %180 = vmatpush3.bf16.msra.mxu0 %v200_v2 }
   0x7   :  { %181 = vmatprep.subr.bf16.mxu0 %v208_v0 }
   0xa   :  { %182 = vmatpush3.bf16.msra.mxu0 %v201_v3 }
   0xb   :  { %183 = vmatprep.subr.bf16.mxu0 %v208_v0 }
   0xe   :  { %184 = vmatpush3.bf16.msra.mxu0 %v202_v4 }
   0xf   :  { %185 = vmatprep.subr.bf16.mxu0 %v208_v0 }
  0x12   :  { %186 = vmatpush3.bf16.msra.mxu0 %v203_v5 }
  0x13   :  { %187 = vmatprep.subr.bf16.mxu0 %v208_v0 }
  0x16   :  { %188 = vmatpush3.bf16.msra.mxu0 %v204_v6 }
  0x17   :  { %189 = vmatprep.subr.bf16.mxu0 %v208_v0 }
  0x1a   :  { %190 = vmatpush3.bf16.msra.mxu0 %v205_v7 }
  0x1b   :  { %191 = vmatprep.subr.bf16.mxu0 %v208_v0 }
  0x1e   :  { %192 = vmatpush3.bf16.msra.mxu0 %v206_v8 }
  0x21   :  { %194 = vmatmul.mubr.bf16.vlgmr.msra.gmra.mrb[0].mxu0 %v207_v9 }
  0xf4   :  { %v129_v11 = vpop.f32.mrb[0].mxu0 }
  0xf5   :  { %v150_v12 = vadd.f32 %v167_v10, %v129_v11  ;;  %v195_v13 = vpop.f32.mrb[1].mxu0 }
  0xf6   :  { %v132_v14 = vpop.f32.mrb[2].mxu0 }
  0xf7   :  { %152 = vst [vmem:[%s269_s3] sm:$0xff] %v150_v12  ;;  %v151_v15 = vadd.f32 %v167_v10, %v132_v14  ;;  %v196_v16 = vpop.f32.mrb[3].mxu0 }
  0xf9   :  { %153 = vst [vmem:[%s269_s3 + $0x8] sm:$0xff] %v151_v15 }

// kernel: forward.50
= control target key start
LH: loop header
LB: loop body
LE: loop exit
PB: predicated region body
PF: predicated region fallthrough
CT: control target
= control target key end

     0   :  { %s513_s1 = inlined_call_operand.vmem [shape: bf16[128,128], index: 1, kind: input, shape index: {}]   ;;  %s514_s0 = inlined_call_operand.vmem [shape: f32[64,128], index: 0, kind: input, shape index: {}]   ;;  %s515_s2 = inlined_call_operand.vmem [shape: f32[8,128], index: 2, kind: input, shape index: {}]   ;;  %s516_s3 = inlined_call_operand.vmem [shape: f32[64,128], index: 3, kind: output, shape index: {}]  }
   0x1   :  { %v306_v0 = vld [vmem:[%s513_s1] sm:$0xff]   ;;  %v307_v1 = vld [vmem:[%s513_s1 + $0x8] sm:$0xff]   ;;  %v308_v2 = vld [vmem:[%s513_s1 + $0x10] sm:$0xff]  }
   0x2   :  { %266 = vmatprep.subr.bf16.mxu0 %v306_v0  ;;  %290 = vmatprep.subr.bf16.mxu1 %v306_v0  ;;  %v309_v3 = vld [vmem:[%s513_s1 + $0x18] sm:$0xff]   ;;  %v365_v4 = vld [vmem:[%s514_s0] sm:$0xff]  ;;  %v370_v5 = vld [vmem:[%s514_s0 + $0x8] sm:$0xff] }
   0x3   :  { %267 = vmatpush3.bf16.msra.mxu0 %v306_v0  ;;  %298 = vmatpush3.bf16.msra.mxu1 %v306_v0  ;;  %v375_v6 = vld [vmem:[%s514_s0 + $0x20] sm:$0xff]  ;;  %v23_v7 = vmul.f32 %v365_v4, %v365_v4  ;;  %v24_v8 = vmul.f32 %v370_v5, %v370_v5  ;;  %v384_v9 = vld [vmem:[%s514_s0 + $0x28] sm:$0xff]  ;;  %v312_v16 = vld [vmem:[%s513_s1 + $0x30] sm:$0xff]  }
   0x4   :  { %268 = vmatprep.subr.bf16.mxu0 %v307_v1  ;;  %291 = vmatprep.subr.bf16.mxu1 %v307_v1  ;;  %v27_v10 = vmul.f32 %v375_v6, %v375_v6  ;;  %v28_v11 = vmul.f32 %v384_v9, %v384_v9  ;;  %v310_v13 = vld [vmem:[%s513_s1 + $0x20] sm:$0xff]   ;;  %v311_v15 = vld [vmem:[%s513_s1 + $0x28] sm:$0xff]   ;;  %v402_v17 = vld [vmem:[%s514_s0 + $0x10] sm:$0xff] }
   0x5   :  { %v31_v12 = vpack.c.bf16 %v24_v8, %v23_v7  ;;  %v407_v18 = vld [vmem:[%s514_s0 + $0x18] sm:$0xff]  ;;  %v412_v19 = vld [vmem:[%s514_s0 + $0x30] sm:$0xff]  ;;  %v25_v22 = vmul.f32 %v402_v17, %v402_v17  ;;  %v245_v28 = vld [vmem:[%s515_s2] ss:$0 sm:$0xff] }
   0x6   :  { %v33_v14 = vpack.c.bf16 %v28_v11, %v27_v10  ;;  %v417_v20 = vld [vmem:[%s514_s0 + $0x38] sm:$0xff]  ;;  %v26_v23 = vmul.f32 %v407_v18, %v407_v18  ;;  %v29_v24 = vmul.f32 %v412_v19, %v412_v19 }
   0x7   :  { %269 = vmatpush3.bf16.msra.mxu0 %v307_v1  ;;  %299 = vmatpush3.bf16.msra.mxu1 %v307_v1  ;;  %v313_v21 = vld [vmem:[%s513_s1 + $0x38] sm:$0xff]   ;;  %v30_v25 = vmul.f32 %v417_v20, %v417_v20 }
   0x8   :  { %270 = vmatprep.subr.bf16.mxu0 %v308_v2  ;;  %292 = vmatprep.subr.bf16.mxu1 %v308_v2  ;;  %v32_v26 = vpack.c.bf16 %v26_v23, %v25_v22 }
   0x9   :  { %282 = vmatprep.mubr.bf16.mxu0 %v31_v12  ;;  %286 = vmatprep.mubr.bf16.mxu1 %v33_v14  ;;  %v34_v27 = vpack.c.bf16 %v30_v25, %v29_v24 }
   0xb   :  { %271 = vmatpush3.bf16.msra.mxu0 %v308_v2  ;;  %300 = vmatpush3.bf16.msra.mxu1 %v308_v2 }
   0xc   :  { %272 = vmatprep.subr.bf16.mxu0 %v309_v3  ;;  %293 = vmatprep.subr.bf16.mxu1 %v309_v3 }
   0xf   :  { %273 = vmatpush3.bf16.msra.mxu0 %v309_v3  ;;  %301 = vmatpush3.bf16.msra.mxu1 %v309_v3 }
  0x10   :  { %274 = vmatprep.subr.bf16.mxu0 %v310_v13  ;;  %294 = vmatprep.subr.bf16.mxu1 %v310_v13 }
  0x13   :  { %275 = vmatpush3.bf16.msra.mxu0 %v310_v13  ;;  %302 = vmatpush3.bf16.msra.mxu1 %v310_v13 }
  0x14   :  { %276 = vmatprep.subr.bf16.mxu0 %v311_v15  ;;  %295 = vmatprep.subr.bf16.mxu1 %v311_v15 }
  0x17   :  { %277 = vmatpush3.bf16.msra.mxu0 %v311_v15  ;;  %303 = vmatpush3.bf16.msra.mxu1 %v311_v15 }
  0x18   :  { %278 = vmatprep.subr.bf16.mxu0 %v312_v16  ;;  %296 = vmatprep.subr.bf16.mxu1 %v312_v16 }
  0x1b   :  { %279 = vmatpush3.bf16.msra.mxu0 %v312_v16  ;;  %304 = vmatpush3.bf16.msra.mxu1 %v312_v16 }
  0x1c   :  { %280 = vmatprep.subr.bf16.mxu0 %v313_v21  ;;  %297 = vmatprep.subr.bf16.mxu1 %v313_v21 }
  0x1f   :  { %281 = vmatpush3.bf16.msra.mxu0 %v313_v21  ;;  %305 = vmatpush3.bf16.msra.mxu1 %v313_v21 }
  0x22   :  { %283 = vmatmul.mubr.bf16.vlgmr.msra.gmra.mrb[0].mxu0 %v32_v26  ;;  %287 = vmatmul.mubr.bf16.vlgmr.msra.gmra.mrb[0].mxu1 %v34_v27 }
  0xf5   :  { %v284_v29 = vpop.f32.mrb[0].mxu0  ;;  %v288_v30 = vpop.f32.mrb[0].mxu1 }
  0xf6   :  { %v147_v31 = vadd.f32 %v284_v29, %v245_v28  ;;  %v163_v32 = vadd.f32 %v288_v30, %v245_v28  ;;  %v138_v33 = vpop.f32.mrb[1].mxu0  ;;  %v154_v34 = vpop.f32.mrb[1].mxu1 }
  0xf7   :  { %v139_v35 = vadd.f32 %v245_v28, %v138_v33  ;;  %v155_v36 = vadd.f32 %v245_v28, %v154_v34  ;;  %v285_v37 = vpop.f32.mrb[2].mxu0  ;;  %v289_v38 = vpop.f32.mrb[2].mxu1 }
  0xf8   :  { %314 = vrsqrt.f32 %v147_v31  ;;  %v141_v39 = vpop.f32.mrb[3].mxu0  ;;  %v157_v40 = vpop.f32.mrb[3].mxu1  ;;  %v433_v41 = vadd.f32 %v285_v37, %v245_v28  ;;  %v435_v42 = vadd.f32 %v289_v38, %v245_v28  ;;  %vm185_vm0 = vcmp.eq.f32.partialorder %v147_v31, inf }
  0xf9   :  { %316 = vrsqrt.f32 %v163_v32  ;;  %v437_v43 = vadd.f32 %v245_v28, %v141_v39  ;;  %v439_v44 = vadd.f32 %v245_v28, %v157_v40  ;;  %vm187_vm1 = vcmp.eq.f32.partialorder %v147_v31, 0.0 }
  0xfa   :  { %318 = vrsqrt.f32 %v139_v35  ;;  %v188_v46 = vand.u32 2147483648, %v147_v31  ;;  %vm213_vm2 = vcmp.eq.f32.partialorder %v163_v32, inf  ;;  %vm215_vm3 = vcmp.eq.f32.partialorder %v163_v32, 0.0 }
  0xfb   :  { %320 = vrsqrt.f32 %v155_v36  ;;  %v216_v49 = vand.u32 2147483648, %v163_v32  ;;  %vm171_vm4 = vcmp.eq.f32.partialorder %v139_v35, inf  ;;  %vm173_vm5 = vcmp.eq.f32.partialorder %v139_v35, 0.0 }
  0xfc   :  { %322 = vrsqrt.f32 %v433_v41  ;;  %v174_v52 = vand.u32 2147483648, %v139_v35  ;;  %vm199_vm6 = vcmp.eq.f32.partialorder %v155_v36, inf  ;;  %vm201_vm7 = vcmp.eq.f32.partialorder %v155_v36, 0.0 }
  0xfd   :  { %324 = vrsqrt.f32 %v435_v42  ;;  %v202_v56 = vand.u32 2147483648, %v155_v36  ;;  %vm192_vm8 = vcmp.eq.f32.partialorder %v433_v41, inf  ;;  %vm194_vm9 = vcmp.eq.f32.partialorder %v433_v41, 0.0 }
  0xfe   :  { %326 = vrsqrt.f32 %v437_v43  ;;  %v195_v63 = vand.u32 2147483648, %v433_v41  ;;  %vm220_vm10 = vcmp.eq.f32.partialorder %v435_v42, inf  ;;  %vm222_vm11 = vcmp.eq.f32.partialorder %v435_v42, 0.0 }
  0xff   :  { %328 = vrsqrt.f32 %v439_v44  ;;  %v223_v15 = vand.u32 2147483648, %v435_v42  ;;  %vm178_vm12 = vcmp.eq.f32.partialorder %v437_v43, inf  ;;  %vm180_vm13 = vcmp.eq.f32.partialorder %v437_v43, 0.0 }
 0x100   :  { %vm206_vm14 = vcmp.eq.f32.partialorder %v439_v44, inf  ;;  %v209_v26 = vand.u32 2147483648, %v439_v44  ;;  %vm208_vm15 = vcmp.eq.f32.partialorder %v439_v44, 0.0 }
 0x102   :  { %v315_v45 = vpop.eup %314 }
 0x103   :  { %v317_v47 = vpop.eup %316  ;;  %v184_v48 = vmul.f32 %v315_v45, %v147_v31 }
 0x104   :  { %v319_v50 = vpop.eup %318  ;;  %v212_v51 = vmul.f32 %v317_v47, %v163_v32 }
 0x105   :  { %v321_v53 = vpop.eup %320  ;;  %v186_v54 = vsel %vm185_vm0, %v147_v31, %v184_v48  ;;  %v170_v55 = vmul.f32 %v319_v50, %v139_v35 }
 0x106   :  { %v189_v57 = vsel %vm187_vm1, %v188_v46, %v186_v54  ;;  %v214_v58 = vsel %vm213_vm2, %v163_v32, %v212_v51  ;;  %v198_v59 = vmul.f32 %v321_v53, %v155_v36  ;;  %v323_v0 = vpop.eup %322 }
 0x107   :  { %v227_v60 = vmul.f32 %v189_v57, %v402_v17  ;;  %v217_v61 = vsel %vm215_vm3, %v216_v49, %v214_v58  ;;  %v172_v62 = vsel %vm171_vm4, %v139_v35, %v170_v55  ;;  %v325_v7 = vpop.eup %324  ;;  %v191_v11 = vmul.f32 %v323_v0, %v433_v41 }
 0x108   :  { %v231_v1 = vmul.f32 %v217_v61, %v412_v19  ;;  %v175_v2 = vsel %vm173_vm5, %v174_v52, %v172_v62  ;;  %v200_v3 = vsel %vm199_vm6, %v155_v36, %v198_v59  ;;  %v327_v12 = vpop.eup %326  ;;  %v219_v14 = vmul.f32 %v325_v7, %v435_v42 }
 0x109   :  { %235 = vst [vmem:[%s516_s3 + $0x10] sm:$0xff] %v227_v60  ;;  %v225_v8 = vmul.f32 %v175_v2, %v365_v4  ;;  %v203_v10 = vsel %vm201_vm7, %v202_v56, %v200_v3  ;;  %v329_v4 = vpop.eup %328  ;;  %v193_v16 = vsel %vm192_vm8, %v433_v41, %v191_v11  ;;  %v177_v17 = vmul.f32 %v327_v12, %v437_v43 }
 0x10a   :  { %239 = vst [vmem:[%s516_s3 + $0x30] sm:$0xff] %v231_v1  ;;  %v229_v13 = vmul.f32 %v203_v10, %v375_v6  ;;  %v181_v6 = vand.u32 2147483648, %v437_v43  ;;  %v196_v19 = vsel %vm194_vm9, %v195_v63, %v193_v16  ;;  %v221_v21 = vsel %vm220_vm10, %v435_v42, %v219_v14 }
 0x10b   :  { %233 = vst [vmem:[%s516_s3] sm:$0xff] %v225_v8  ;;  %v205_v22 = vmul.f32 %v329_v4, %v439_v44  ;;  %v228_v23 = vmul.f32 %v196_v19, %v407_v18  ;;  %v224_v24 = vsel %vm222_vm11, %v223_v15, %v221_v21  ;;  %v179_v25 = vsel %vm178_vm12, %v437_v43, %v177_v17 }
 0x10c   :  { %237 = vst [vmem:[%s516_s3 + $0x20] sm:$0xff] %v229_v13  ;;  %v232_v27 = vmul.f32 %v224_v24, %v417_v20  ;;  %v182_v28 = vsel %vm180_vm13, %v181_v6, %v179_v25 }
 0x10d   :  { %v207_v29 = vsel %vm206_vm14, %v439_v44, %v205_v22  ;;  %236 = vst [vmem:[%s516_s3 + $0x18] sm:$0xff] %v228_v23  ;;  %v226_v18 = vmul.f32 %v182_v28, %v370_v5 }
 0x10e   :  { %v210_v30 = vsel %vm208_vm15, %v209_v26, %v207_v29  ;;  %240 = vst [vmem:[%s516_s3 + $0x38] sm:$0xff] %v232_v27 }
 0x10f   :  { %v230_v31 = vmul.f32 %v210_v30, %v384_v9  ;;  %234 = vst [vmem:[%s516_s3 + $0x8] sm:$0xff] %v226_v18 }
 0x111   :  { %238 = vst [vmem:[%s516_s3 + $0x28] sm:$0xff] %v230_v31 }

// kernel: forward.51
= control target key start
LH: loop header
LB: loop body
LE: loop exit
PB: predicated region body
PF: predicated region fallthrough
CT: control target
= control target key end

     0   :  { %s408_s1 = inlined_call_operand.vmem [shape: bf16[128,128], index: 1, kind: input, shape index: {}]   ;;  %s409_s0 = inlined_call_operand.vmem [shape: bf16[64,128], index: 0, kind: input, shape index: {}]   ;;  %s410_s2 = inlined_call_operand.vmem [shape: f32[8,128], index: 2, kind: input, shape index: {}]   ;;  %s411_s3 = inlined_call_operand.vmem [shape: f32[64,128], index: 3, kind: output, shape index: {}]  }
   0x1   :  { %v313_v0 = vld [vmem:[%s408_s1] sm:$0xff]   ;;  %v314_v1 = vld [vmem:[%s408_s1 + $0x8] sm:$0xff]   ;;  %v315_v2 = vld [vmem:[%s408_s1 + $0x10] sm:$0xff]  }
   0x2   :  { %273 = vmatprep.subr.bf16.mxu0 %v313_v0  ;;  %297 = vmatprep.subr.bf16.mxu1 %v313_v0  ;;  %v316_v3 = vld [vmem:[%s408_s1 + $0x18] sm:$0xff]   ;;  %v321_v4 = vld [vmem:[%s409_s0] sm:$0xff]   ;;  %v322_v5 = vld [vmem:[%s409_s0 + $0x10] sm:$0xff]  }
   0x3   :  { %274 = vmatpush3.bf16.msra.mxu0 %v313_v0  ;;  %305 = vmatpush3.bf16.msra.mxu1 %v313_v0  ;;  %v317_v6 = vld [vmem:[%s408_s1 + $0x20] sm:$0xff]   ;;  %v318_v7 = vld [vmem:[%s408_s1 + $0x28] sm:$0xff]   ;;  %v319_v8 = vld [vmem:[%s408_s1 + $0x30] sm:$0xff]  }
   0x4   :  { %275 = vmatprep.subr.bf16.mxu0 %v314_v1  ;;  %298 = vmatprep.subr.bf16.mxu1 %v314_v1  ;;  %v320_v9 = vld [vmem:[%s408_s1 + $0x38] sm:$0xff]   ;;  %v323_v10 = vld [vmem:[%s409_s0 + $0x8] sm:$0xff]   ;;  %v260_v12 = vld [vmem:[%s410_s2] ss:$0 sm:$0xff] }
   0x5   :  { %289 = vmatprep.mubr.bf16.mxu0 %v321_v4  ;;  %293 = vmatprep.mubr.bf16.mxu1 %v322_v5  ;;  %v324_v11 = vld [vmem:[%s409_s0 + $0x18] sm:$0xff]  }
   0x7   :  { %276 = vmatpush3.bf16.msra.mxu0 %v314_v1  ;;  %306 = vmatpush3.bf16.msra.mxu1 %v314_v1 }
   0x8   :  { %277 = vmatprep.subr.bf16.mxu0 %v315_v2  ;;  %299 = vmatprep.subr.bf16.mxu1 %v315_v2 }
   0xb   :  { %278 = vmatpush3.bf16.msra.mxu0 %v315_v2  ;;  %307 = vmatpush3.bf16.msra.mxu1 %v315_v2 }
   0xc   :  { %279 = vmatprep.subr.bf16.mxu0 %v316_v3  ;;  %300 = vmatprep.subr.bf16.mxu1 %v316_v3 }
   0xf   :  { %280 = vmatpush3.bf16.msra.mxu0 %v316_v3  ;;  %308 = vmatpush3.bf16.msra.mxu1 %v316_v3 }
  0x10   :  { %281 = vmatprep.subr.bf16.mxu0 %v317_v6  ;;  %301 = vmatprep.subr.bf16.mxu1 %v317_v6 }
  0x13   :  { %282 = vmatpush3.bf16.msra.mxu0 %v317_v6  ;;  %309 = vmatpush3.bf16.msra.mxu1 %v317_v6 }
  0x14   :  { %283 = vmatprep.subr.bf16.mxu0 %v318_v7  ;;  %302 = vmatprep.subr.bf16.mxu1 %v318_v7 }
  0x17   :  { %284 = vmatpush3.bf16.msra.mxu0 %v318_v7  ;;  %310 = vmatpush3.bf16.msra.mxu1 %v318_v7 }
  0x18   :  { %285 = vmatprep.subr.bf16.mxu0 %v319_v8  ;;  %303 = vmatprep.subr.bf16.mxu1 %v319_v8 }
  0x1b   :  { %286 = vmatpush3.bf16.msra.mxu0 %v319_v8  ;;  %311 = vmatpush3.bf16.msra.mxu1 %v319_v8 }
  0x1c   :  { %287 = vmatprep.subr.bf16.mxu0 %v320_v9  ;;  %304 = vmatprep.subr.bf16.mxu1 %v320_v9 }
  0x1f   :  { %288 = vmatpush3.bf16.msra.mxu0 %v320_v9  ;;  %312 = vmatpush3.bf16.msra.mxu1 %v320_v9 }
  0x22   :  { %290 = vmatmul.mubr.bf16.vlgmr.msra.gmra.mrb[0].mxu0 %v323_v10  ;;  %294 = vmatmul.mubr.bf16.vlgmr.msra.gmra.mrb[0].mxu1 %v324_v11 }
  0xf5   :  { %v291_v13 = vpop.f32.mrb[0].mxu0  ;;  %v295_v14 = vpop.f32.mrb[0].mxu1 }
  0xf6   :  { %v230_v15 = vadd.f32 %v291_v13, %v260_v12  ;;  %v234_v16 = vadd.f32 %v295_v14, %v260_v12  ;;  %v165_v17 = vpop.f32.mrb[1].mxu0  ;;  %v181_v18 = vpop.f32.mrb[1].mxu1 }
  0xf7   :  { %v228_v19 = vadd.f32 %v260_v12, %v165_v17  ;;  %v232_v20 = vadd.f32 %v260_v12, %v181_v18  ;;  %v292_v21 = vpop.f32.mrb[2].mxu0  ;;  %v296_v22 = vpop.f32.mrb[2].mxu1 }
  0xf8   :  { %238 = vst [vmem:[%s411_s3 + $0x10] sm:$0xff] %v230_v15  ;;  %242 = vst [vmem:[%s411_s3 + $0x30] sm:$0xff] %v234_v16  ;;  %v231_v23 = vadd.f32 %v292_v21, %v260_v12  ;;  %v235_v24 = vadd.f32 %v296_v22, %v260_v12  ;;  %v168_v25 = vpop.f32.mrb[3].mxu0  ;;  %v184_v26 = vpop.f32.mrb[3].mxu1 }
  0xf9   :  { %236 = vst [vmem:[%s411_s3] sm:$0xff] %v228_v19  ;;  %240 = vst [vmem:[%s411_s3 + $0x20] sm:$0xff] %v232_v20  ;;  %v229_v27 = vadd.f32 %v260_v12, %v168_v25  ;;  %v233_v28 = vadd.f32 %v260_v12, %v184_v26 }
  0xfa   :  { %239 = vst [vmem:[%s411_s3 + $0x18] sm:$0xff] %v231_v23  ;;  %243 = vst [vmem:[%s411_s3 + $0x38] sm:$0xff] %v235_v24 }
  0xfb   :  { %237 = vst [vmem:[%s411_s3 + $0x8] sm:$0xff] %v229_v27  ;;  %241 = vst [vmem:[%s411_s3 + $0x28] sm:$0xff] %v233_v28 }

// kernel: forward.52
= control target key start
LH: loop header
LB: loop body
LE: loop exit
PB: predicated region body
PF: predicated region fallthrough
CT: control target
= control target key end

     0   :  { %s1619_s1 = inlined_call_operand.vmem [shape: bf16[128,128], index: 1, kind: input, shape index: {}]   ;;  %s1620_s0 = inlined_call_operand.vmem [shape: f32[256,128], index: 0, kind: input, shape index: {}]   ;;  %s1621_s2 = inlined_call_operand.vmem [shape: f32[8,128], index: 2, kind: input, shape index: {}]   ;;  %s1622_s3 = inlined_call_operand.vmem [shape: f32[256,128], index: 3, kind: output, shape index: {}]  }
   0x1   :  { %v714_v0 = vld [vmem:[%s1619_s1] sm:$0xff]   ;;  %v715_v1 = vld [vmem:[%s1619_s1 + $0x8] sm:$0xff]   ;;  %v716_v2 = vld [vmem:[%s1619_s1 + $0x10] sm:$0xff]  }
   0x2   :  { %650 = vmatprep.subr.bf16.mxu0 %v714_v0  ;;  %698 = vmatprep.subr.bf16.mxu1 %v714_v0  ;;  %v717_v3 = vld [vmem:[%s1619_s1 + $0x18] sm:$0xff]   ;;  %v821_v4 = vld [vmem:[%s1620_s0] sm:$0xff]  ;;  %v826_v5 = vld [vmem:[%s1620_s0 + $0x8] sm:$0xff] }
   0x3   :  { %651 = vmatpush3.bf16.msra.mxu0 %v714_v0  ;;  %706 = vmatpush3.bf16.msra.mxu1 %v714_v0  ;;  %v831_v6 = vld [vmem:[%s1620_s0 + $0x80] sm:$0xff]  ;;  %v47_v7 = vmul.f32 %v821_v4, %v821_v4  ;;  %v48_v8 = vmul.f32 %v826_v5, %v826_v5  ;;  %v840_v9 = vld [vmem:[%s1620_s0 + $0x88] sm:$0xff]  ;;  %v720_v16 = vld [vmem:[%s1619_s1 + $0x30] sm:$0xff]  }
   0x4   :  { %652 = vmatprep.subr.bf16.mxu0 %v715_v1  ;;  %699 = vmatprep.subr.bf16.mxu1 %v715_v1  ;;  %v63_v10 = vmul.f32 %v831_v6, %v831_v6  ;;  %v64_v11 = vmul.f32 %v840_v9, %v840_v9  ;;  %v718_v13 = vld [vmem:[%s1619_s1 + $0x20] sm:$0xff]   ;;  %v719_v15 = vld [vmem:[%s1619_s1 + $0x28] sm:$0xff]   ;;  %v721_v17 = vld [vmem:[%s1619_s1 + $0x38] sm:$0xff]  }
   0x5   :  { %v79_v12 = vpack.c.bf16 %v48_v8, %v47_v7  ;;  %v861_v18 = vld [vmem:[%s1620_s0 + $0x10] sm:$0xff]  ;;  %v866_v19 = vld [vmem:[%s1620_s0 + $0x18] sm:$0xff]  ;;  %v881_v22 = vld [vmem:[%s1620_s0 + $0x20] sm:$0xff] }
   0x6   :  { %v87_v14 = vpack.c.bf16 %v64_v11, %v63_v10  ;;  %v871_v20 = vld [vmem:[%s1620_s0 + $0x90] sm:$0xff]  ;;  %v876_v21 = vld [vmem:[%s1620_s0 + $0x98] sm:$0xff]  ;;  %v886_v23 = vld [vmem:[%s1620_s0 + $0x28] sm:$0xff]  ;;  %v49_v26 = vmul.f32 %v861_v18, %v861_v18  ;;  %v50_v27 = vmul.f32 %v866_v19, %v866_v19  ;;  %v51_v30 = vmul.f32 %v881_v22, %v881_v22 }
   0x7   :  { %653 = vmatpush3.bf16.msra.mxu0 %v715_v1  ;;  %707 = vmatpush3.bf16.msra.mxu1 %v715_v1  ;;  %v891_v24 = vld [vmem:[%s1620_s0 + $0xa0] sm:$0xff]  ;;  %v896_v25 = vld [vmem:[%s1620_s0 + $0xa8] sm:$0xff]  ;;  %v65_v28 = vmul.f32 %v871_v20, %v871_v20  ;;  %v66_v29 = vmul.f32 %v876_v21, %v876_v21  ;;  %v52_v31 = vmul.f32 %v886_v23, %v886_v23  ;;  %v917_v36 = vld [vmem:[%s1620_s0 + $0x30] sm:$0xff] }
   0x8   :  { %654 = vmatprep.subr.bf16.mxu0 %v716_v2  ;;  %700 = vmatprep.subr.bf16.mxu1 %v716_v2  ;;  %v67_v32 = vmul.f32 %v891_v24, %v891_v24  ;;  %v68_v33 = vmul.f32 %v896_v25, %v896_v25  ;;  %v80_v34 = vpack.c.bf16 %v50_v27, %v49_v26  ;;  %v922_v37 = vld [vmem:[%s1620_s0 + $0x38] sm:$0xff]  ;;  %v927_v40 = vld [vmem:[%s1620_s0 + $0xb0] sm:$0xff]  ;;  %v937_v42 = vld [vmem:[%s1620_s0 + $0x40] sm:$0xff] }
   0x9   :  { %666 = vmatprep.mubr.bf16.mxu0 %v79_v12  ;;  %682 = vmatprep.mubr.bf16.mxu1 %v87_v14  ;;  %v88_v35 = vpack.c.bf16 %v66_v29, %v65_v28  ;;  %v81_v38 = vpack.c.bf16 %v52_v31, %v51_v30  ;;  %v932_v41 = vld [vmem:[%s1620_s0 + $0xb8] sm:$0xff]  ;;  %v942_v43 = vld [vmem:[%s1620_s0 + $0x48] sm:$0xff]  ;;  %v947_v44 = vld [vmem:[%s1620_s0 + $0xc0] sm:$0xff]  ;;  %v53_v46 = vmul.f32 %v917_v36, %v917_v36 }
   0xa   :  { %v89_v39 = vpack.c.bf16 %v68_v33, %v67_v32  ;;  %v952_v45 = vld [vmem:[%s1620_s0 + $0xc8] sm:$0xff]  ;;  %v54_v47 = vmul.f32 %v922_v37, %v922_v37  ;;  %v69_v48 = vmul.f32 %v927_v40, %v927_v40  ;;  %v70_v49 = vmul.f32 %v932_v41, %v932_v41  ;;  %v973_v56 = vld [vmem:[%s1620_s0 + $0x50] sm:$0xff]  ;;  %v978_v57 = vld [vmem:[%s1620_s0 + $0x58] sm:$0xff] }
   0xb   :  { %655 = vmatpush3.bf16.msra.mxu0 %v716_v2  ;;  %708 = vmatpush3.bf16.msra.mxu1 %v716_v2  ;;  %v55_v50 = vmul.f32 %v937_v42, %v937_v42  ;;  %v56_v51 = vmul.f32 %v942_v43, %v942_v43  ;;  %v71_v52 = vmul.f32 %v947_v44, %v947_v44  ;;  %v983_v60 = vld [vmem:[%s1620_s0 + $0xd0] sm:$0xff]  ;;  %v988_v61 = vld [vmem:[%s1620_s0 + $0xd8] sm:$0xff]  ;;  %v993_v62 = vld [vmem:[%s1620_s0 + $0x60] sm:$0xff] }
   0xc   :  { %656 = vmatprep.subr.bf16.mxu0 %v717_v3  ;;  %701 = vmatprep.subr.bf16.mxu1 %v717_v3  ;;  %v72_v53 = vmul.f32 %v952_v45, %v952_v45  ;;  %v82_v54 = vpack.c.bf16 %v54_v47, %v53_v46  ;;  %v90_v55 = vpack.c.bf16 %v70_v49, %v69_v48  ;;  %v998_v63 = vld [vmem:[%s1620_s0 + $0x68] sm:$0xff]  ;;  %v1003_v0 = vld [vmem:[%s1620_s0 + $0xe0] sm:$0xff]  ;;  %v1034_v27 = vld [vmem:[%s1620_s0 + $0x78] sm:$0xff] }
   0xd   :  { %v83_v58 = vpack.c.bf16 %v56_v51, %v55_v50  ;;  %1629 = vst [vmem:[#allocation2_spill] sm:$0xff] %v993_v62  ;;  %1630 = vst [vmem:[#allocation3_spill] sm:$0xff] %v998_v63  ;;  %v1008_v1 = vld [vmem:[%s1620_s0 + $0xe8] sm:$0xff]  ;;  %v57_v2 = vmul.f32 %v973_v56, %v973_v56  ;;  %v73_v7 = vmul.f32 %v983_v60, %v983_v60  ;;  %v1039_v28 = vld [vmem:[%s1620_s0 + $0xf0] sm:$0xff] }
   0xe   :  { %v91_v59 = vpack.c.bf16 %v72_v53, %v71_v52  ;;  %1631 = vst [vmem:[#allocation4_spill] sm:$0xff] %v1003_v0  ;;  %1632 = vst [vmem:[#allocation5_spill] sm:$0xff] %v1008_v1  ;;  %v74_v8 = vmul.f32 %v988_v61, %v988_v61  ;;  %v59_v10 = vmul.f32 %v993_v62, %v993_v62  ;;  %v1044_v29 = vld [vmem:[%s1620_s0 + $0xf8] sm:$0xff] }
   0xf   :  { %657 = vmatpush3.bf16.msra.mxu0 %v717_v3  ;;  %709 = vmatpush3.bf16.msra.mxu1 %v717_v3  ;;  %v58_v3 = vmul.f32 %v978_v57, %v978_v57  ;;  %v60_v11 = vmul.f32 %v998_v63, %v998_v63  ;;  %v75_v12 = vmul.f32 %v1003_v0, %v1003_v0 }
  0x10   :  { %658 = vmatprep.subr.bf16.mxu0 %v718_v13  ;;  %702 = vmatprep.subr.bf16.mxu1 %v718_v13  ;;  %1633 = vst [vmem:[#allocation6_spill] sm:$0xff] %v1034_v27  ;;  %1634 = vst [vmem:[#allocation7_spill] sm:$0xff] %v1044_v29  ;;  %v62_v31 = vmul.f32 %v1034_v27, %v1034_v27  ;;  %v77_v32 = vmul.f32 %v1039_v28, %v1039_v28 }
  0x11   :  { %v84_v14 = vpack.c.bf16 %v58_v3, %v57_v2  ;;  %v78_v33 = vmul.f32 %v1044_v29, %v1044_v29 }
  0x13   :  { %659 = vmatpush3.bf16.msra.mxu0 %v718_v13  ;;  %710 = vmatpush3.bf16.msra.mxu1 %v718_v13  ;;  %v76_v13 = vmul.f32 %v1008_v1, %v1008_v1 }
  0x14   :  { %660 = vmatprep.subr.bf16.mxu0 %v719_v15  ;;  %703 = vmatprep.subr.bf16.mxu1 %v719_v15 }
  0x15   :  { %v93_v26 = vpack.c.bf16 %v76_v13, %v75_v12 }
  0x17   :  { %661 = vmatpush3.bf16.msra.mxu0 %v719_v15  ;;  %711 = vmatpush3.bf16.msra.mxu1 %v719_v15  ;;  %v92_v15 = vpack.c.bf16 %v74_v8, %v73_v7 }
  0x18   :  { %662 = vmatprep.subr.bf16.mxu0 %v720_v16  ;;  %704 = vmatprep.subr.bf16.mxu1 %v720_v16 }
  0x1b   :  { %663 = vmatpush3.bf16.msra.mxu0 %v720_v16  ;;  %712 = vmatpush3.bf16.msra.mxu1 %v720_v16  ;;  %v1029_v16 = vld [vmem:[%s1620_s0 + $0x70] sm:$0xff] }
  0x1c   :  { %664 = vmatprep.subr.bf16.mxu0 %v721_v17  ;;  %705 = vmatprep.subr.bf16.mxu1 %v721_v17  ;;  %v61_v30 = vmul.f32 %v1029_v16, %v1029_v16 }
  0x1f   :  { %665 = vmatpush3.bf16.msra.mxu0 %v721_v17  ;;  %713 = vmatpush3.bf16.msra.mxu1 %v721_v17  ;;  %v85_v17 = vpack.c.bf16 %v60_v11, %v59_v10 }
  0x22   :  { %667 = vmatmul.mubr.bf16.vlgmr.msra.gmra.mrb[0].mxu0 %v80_v34  ;;  %683 = vmatmul.mubr.bf16.vlgmr.msra.gmra.mrb[0].mxu1 %v88_v35  ;;  %v86_v34 = vpack.c.bf16 %v62_v31, %v61_v30  ;;  %v94_v35 = vpack.c.bf16 %v78_v33, %v77_v32 }
  0x23   :  { %670 = vmatprep.mubr.bf16.mxu0 %v81_v38  ;;  %686 = vmatprep.mubr.bf16.mxu1 %v89_v39  ;;  %v1057_v38 = vld [vmem:[%s1621_s2] ss:$0 sm:$0xff] }
  0x2a   :  { %671 = vmatmul.mubr.bf16.gmra.mrb[4].mxu0 %v82_v54  ;;  %687 = vmatmul.mubr.bf16.gmra.mrb[4].mxu1 %v90_v55 }
  0x2b   :  { %674 = vmatprep.mubr.bf16.mxu0 %v83_v58  ;;  %690 = vmatprep.mubr.bf16.mxu1 %v91_v59 }
  0x32   :  { %675 = vmatmul.mubr.bf16.gmra.mrb[8].mxu0 %v84_v14  ;;  %691 = vmatmul.mubr.bf16.gmra.mrb[8].mxu1 %v92_v15 }
  0x33   :  { %678 = vmatprep.mubr.bf16.mxu0 %v85_v17  ;;  %694 = vmatprep.mubr.bf16.mxu1 %v93_v26 }
  0x3a   :  { %679 = vmatmul.mubr.bf16.gmra.mrb[12].mxu0 %v86_v34  ;;  %695 = vmatmul.mubr.bf16.gmra.mrb[12].mxu1 %v94_v35 }
  0xf5   :  { %v668_v39 = vpop.f32.mrb[0].mxu0  ;;  %v684_v46 = vpop.f32.mrb[0].mxu1 }
  0xf6   :  { %v1060_v47 = vadd.f32 %v668_v39, %v1057_v38  ;;  %v1063_v48 = vadd.f32 %v684_v46, %v1057_v38  ;;  %v198_v49 = vpop.f32.mrb[1].mxu0  ;;  %v262_v50 = vpop.f32.mrb[1].mxu1 }
  0xf7   :  { %v1066_v51 = vadd.f32 %v1057_v38, %v198_v49  ;;  %v1069_v52 = vadd.f32 %v1057_v38, %v262_v50  ;;  %v669_v53 = vpop.f32.mrb[2].mxu0  ;;  %v685_v54 = vpop.f32.mrb[2].mxu1 }
  0xf8   :  { %722 = vrsqrt.f32 %v1060_v47  ;;  %v201_v55 = vpop.f32.mrb[3].mxu0  ;;  %v265_v58 = vpop.f32.mrb[3].mxu1  ;;  %v1076_v59 = vadd.f32 %v669_v53, %v1057_v38  ;;  %v1079_v2 = vadd.f32 %v685_v54, %v1057_v38  ;;  %vm341_vm0 = vcmp.eq.f32.partialorder %v1060_v47, inf }
  0xf9   :  { %724 = vrsqrt.f32 %v1063_v48  ;;  %v1082_v3 = vadd.f32 %v1057_v38, %v201_v55  ;;  %v1085_v7 = vadd.f32 %v1057_v38, %v265_v58  ;;  %vm343_vm1 = vcmp.eq.f32.partialorder %v1060_v47, 0.0 }
  0xfa   :  { %726 = vrsqrt.f32 %v1066_v51  ;;  %v344_v13 = vand.u32 2147483648, %v1060_v47  ;;  %vm453_vm2 = vcmp.eq.f32.partialorder %v1063_v48, inf  ;;  %vm455_vm3 = vcmp.eq.f32.partialorder %v1063_v48, 0.0 }
  0xfb   :  { %728 = vrsqrt.f32 %v1069_v52  ;;  %v456_v17 = vand.u32 2147483648, %v1063_v48  ;;  %vm327_vm4 = vcmp.eq.f32.partialorder %v1066_v51, inf  ;;  %vm329_vm5 = vcmp.eq.f32.partialorder %v1066_v51, 0.0 }
  0xfc   :  { %730 = vrsqrt.f32 %v1076_v59  ;;  %v330_v31 = vand.u32 2147483648, %v1066_v51  ;;  %vm439_vm6 = vcmp.eq.f32.partialorder %v1069_v52, inf  ;;  %vm441_vm7 = vcmp.eq.f32.partialorder %v1069_v52, 0.0 }
  0xfd   :  { %v672_v8 = vpop.f32.mrb[4].mxu0  ;;  %v688_v10 = vpop.f32.mrb[4].mxu1  ;;  %732 = vrsqrt.f32 %v1079_v2  ;;  %v442_v33 = vand.u32 2147483648, %v1069_v52  ;;  %vm348_vm8 = vcmp.eq.f32.partialorder %v1076_v59, inf  ;;  %vm350_vm9 = vcmp.eq.f32.partialorder %v1076_v59, 0.0 }
  0xfe   :  { %v214_v11 = vpop.f32.mrb[5].mxu0  ;;  %v278_v12 = vpop.f32.mrb[5].mxu1  ;;  %734 = vrsqrt.f32 %v1082_v3  ;;  %v1113_v34 = vadd.f32 %v672_v8, %v1057_v38  ;;  %v1116_v35 = vadd.f32 %v688_v10, %v1057_v38  ;;  %v351_v49 = vand.u32 2147483648, %v1076_v59 }
  0xff   :  { %v1094_v14 = vpop.f32.mrb[6].mxu0  ;;  %v1096_v15 = vpop.f32.mrb[6].mxu1  ;;  %736 = vrsqrt.f32 %v1085_v7  ;;  %vm460_vm10 = vcmp.eq.f32.partialorder %v1079_v2, inf  ;;  %vm462_vm11 = vcmp.eq.f32.partialorder %v1079_v2, 0.0  ;;  %v463_v54 = vand.u32 2147483648, %v1079_v2 }
 0x100   :  { %v1102_v26 = vpop.f32.mrb[7].mxu0  ;;  %v1104_v30 = vpop.f32.mrb[7].mxu1  ;;  %vm334_vm12 = vcmp.eq.f32.partialorder %v1082_v3, inf  ;;  %738 = vrsqrt.f32 %v1113_v34  ;;  %vm336_vm13 = vcmp.eq.f32.partialorder %v1082_v3, 0.0  ;;  %v1134_v10 = vadd.f32 %v1057_v38, %v214_v11 }
 0x101   :  { %740 = vrsqrt.f32 %v1116_v35  ;;  %v337_v63 = vand.u32 2147483648, %v1082_v3  ;;  %vm446_vm14 = vcmp.eq.f32.partialorder %v1085_v7, inf  ;;  %vm448_vm15 = vcmp.eq.f32.partialorder %v1085_v7, 0.0 }
 0x102   :  { %v723_v32 = vpop.eup %722  ;;  %742 = vrsqrt.f32 %v1134_v10 }
 0x103   :  { %v725_v39 = vpop.eup %724  ;;  %v340_v46 = vmul.f32 %v723_v32, %v1060_v47 }
 0x104   :  { %v727_v50 = vpop.eup %726  ;;  %v452_v53 = vmul.f32 %v725_v39, %v1063_v48 }
 0x105   :  { %v729_v55 = vpop.eup %728  ;;  %v342_v58 = vsel %vm341_vm0, %v1060_v47, %v340_v46  ;;  %v326_v8 = vmul.f32 %v727_v50, %v1066_v51  ;;  %v1136_v32 = vpop.f32.mrb[8].mxu0  ;;  %vm369_vm0 = vcmp.eq.f32.partialorder %v1113_v34, inf }
 0x106   :  { %v1138_v39 = vpop.f32.mrb[8].mxu1  ;;  %v345_v1 = vsel %vm343_vm1, %v344_v13, %v342_v58  ;;  %v454_v46 = vsel %vm453_vm2, %v1063_v48, %v452_v53  ;;  %v438_v50 = vmul.f32 %v729_v55, %v1069_v52  ;;  %v1147_v29 = vpop.f32.mrb[9].mxu0  ;;  %v1158_v13 = vadd.f32 %v1057_v38, %v278_v12 }
 0x107   :  { %v1149_v27 = vpop.f32.mrb[9].mxu1  ;;  %v551_v11 = vmul.f32 %v345_v1, %v861_v18  ;;  %v457_v0 = vsel %vm455_vm3, %v456_v17, %v454_v46  ;;  %v328_v47 = vsel %vm327_vm4, %v1066_v51, %v326_v8  ;;  %v1160_v53 = vpop.f32.mrb[10].mxu0  ;;  %vm371_vm1 = vcmp.eq.f32.partialorder %v1113_v34, 0.0 }
 0x108   :  { %v1162_v55 = vpop.f32.mrb[10].mxu1  ;;  %v731_v58 = vpop.eup %730  ;;  %v567_v62 = vmul.f32 %v457_v0, %v871_v20  ;;  %v331_v18 = vsel %vm329_vm5, %v330_v31, %v328_v47  ;;  %v440_v1 = vsel %vm439_vm6, %v1069_v52, %v438_v50  ;;  %744 = vrsqrt.f32 %v1158_v13 }
 0x109   :  { %v1171_v48 = vpop.f32.mrb[11].mxu0  ;;  %v1173_v12 = vpop.f32.mrb[11].mxu1  ;;  %583 = vst [vmem:[%s1622_s3 + $0x10] sm:$0xff] %v551_v11  ;;  %v549_v20 = vmul.f32 %v331_v18, %v821_v4  ;;  %v443_v0 = vsel %vm441_vm7, %v442_v33, %v440_v1  ;;  %v347_v51 = vmul.f32 %v731_v58, %v1076_v59  ;;  %v449_v4 = vand.u32 2147483648, %v1085_v7 }
 0x10a   :  { %v733_v17 = vpop.eup %732  ;;  %599 = vst [vmem:[%s1622_s3 + $0x90] sm:$0xff] %v567_v62  ;;  %v565_v8 = vmul.f32 %v443_v0, %v831_v6  ;;  %v1200_v6 = vadd.f32 %v1094_v14, %v1057_v38  ;;  %v1213_v58 = vadd.f32 %v1096_v15, %v1057_v38  ;;  %vm481_vm2 = vcmp.eq.f32.partialorder %v1116_v35, inf }
 0x10b   :  { %v735_v31 = vpop.eup %734  ;;  %v459_v46 = vmul.f32 %v733_v17, %v1079_v2  ;;  %581 = vst [vmem:[%s1622_s3] sm:$0xff] %v549_v20  ;;  %v349_v52 = vsel %vm348_vm8, %v1076_v59, %v347_v51  ;;  %vm483_vm3 = vcmp.eq.f32.partialorder %v1116_v35, 0.0  ;;  %vm355_vm4 = vcmp.eq.f32.partialorder %v1134_v10, inf }
 0x10c   :  { %v737_v50 = vpop.eup %736  ;;  %v333_v33 = vmul.f32 %v735_v31, %v1082_v3  ;;  %597 = vst [vmem:[%s1622_s3 + $0x80] sm:$0xff] %v565_v8  ;;  %v352_v62 = vsel %vm350_vm9, %v351_v49, %v349_v52  ;;  %v1223_v49 = vadd.f32 %v1057_v38, %v1102_v26  ;;  %746 = vrsqrt.f32 %v1200_v6 }
 0x10d   :  { %v461_v11 = vsel %vm460_vm10, %v1079_v2, %v459_v46  ;;  %v445_v47 = vmul.f32 %v737_v50, %v1085_v7  ;;  %v552_v14 = vmul.f32 %v352_v62, %v866_v19  ;;  %v1225_v1 = vpop.f32.mrb[12].mxu0  ;;  %v1227_v17 = vpop.f32.mrb[12].mxu1  ;;  %748 = vrsqrt.f32 %v1213_v58 }
 0x10e   :  { %v464_v18 = vsel %vm462_vm11, %v463_v54, %v461_v11  ;;  %v335_v59 = vsel %vm334_vm12, %v1082_v3, %v333_v33  ;;  %v739_v20 = vpop.eup %738  ;;  %v1236_v54 = vpop.f32.mrb[13].mxu0  ;;  %vm357_vm5 = vcmp.eq.f32.partialorder %v1134_v10, 0.0  ;;  %750 = vrsqrt.f32 %v1223_v49 }
 0x10f   :  { %v568_v15 = vmul.f32 %v464_v18, %v876_v21  ;;  %v338_v19 = vsel %vm336_vm13, %v337_v63, %v335_v59  ;;  %v447_v2 = vsel %vm446_vm14, %v1085_v7, %v445_v47  ;;  %v1238_v26 = vpop.f32.mrb[13].mxu1  ;;  %v741_v0 = vpop.eup %740  ;;  %584 = vst [vmem:[%s1622_s3 + $0x18] sm:$0xff] %v552_v14  ;;  %v368_v3 = vmul.f32 %v739_v20, %v1113_v34 }
 0x110   :  { %v550_v21 = vmul.f32 %v338_v19, %v826_v5  ;;  %v450_v63 = vsel %vm448_vm15, %v449_v4, %v447_v2  ;;  %v1248_v51 = vpop.f32.mrb[14].mxu0  ;;  %v1250_v31 = vpop.f32.mrb[14].mxu1  ;;  %v372_v5 = vand.u32 2147483648, %v1113_v34  ;;  %v480_v7 = vmul.f32 %v741_v0, %v1116_v35 }
 0x111   :  { %600 = vst [vmem:[%s1622_s3 + $0x98] sm:$0xff] %v568_v15  ;;  %v566_v8 = vmul.f32 %v450_v63, %v840_v9  ;;  %v1259_v46 = vpop.f32.mrb[15].mxu0  ;;  %v1261_v4 = vpop.f32.mrb[15].mxu1  ;;  %v370_v50 = vsel %vm369_vm0, %v1113_v34, %v368_v3  ;;  %v484_v9 = vand.u32 2147483648, %v1116_v35  ;;  %v358_v18 = vand.u32 2147483648, %v1134_v10 }
 0x112   :  { %582 = vst [vmem:[%s1622_s3 + $0x8] sm:$0xff] %v550_v21  ;;  %v373_v52 = vsel %vm371_vm1, %v372_v5, %v370_v50  ;;  %v482_v33 = vsel %vm481_vm2, %v1116_v35, %v480_v7  ;;  %v743_v62 = vpop.eup %742  ;;  %vm467_vm6 = vcmp.eq.f32.partialorder %v1158_v13, inf  ;;  %vm469_vm7 = vcmp.eq.f32.partialorder %v1158_v13, 0.0 }
 0x113   :  { %598 = vst [vmem:[%s1622_s3 + $0x88] sm:$0xff] %v566_v8  ;;  %v555_v34 = vmul.f32 %v373_v52, %v917_v36  ;;  %v485_v11 = vsel %vm483_vm3, %v484_v9, %v482_v33  ;;  %v354_v14 = vmul.f32 %v743_v62, %v1134_v10  ;;  %v745_v59 = vpop.eup %744  ;;  %v470_v36 = vand.u32 2147483648, %v1158_v13 }
 0x114   :  { %v571_v47 = vmul.f32 %v485_v11, %v927_v40  ;;  %v1292_v35 = vadd.f32 %v1057_v38, %v1104_v30  ;;  %v1296_v40 = vadd.f32 %v1136_v32, %v1057_v38  ;;  %v466_v15 = vmul.f32 %v745_v59, %v1158_v13 }
 0x115   :  { %587 = vst [vmem:[%s1622_s3 + $0x30] sm:$0xff] %v555_v34  ;;  %v356_v20 = vsel %vm355_vm4, %v1134_v10, %v354_v14  ;;  %vm376_vm8 = vcmp.eq.f32.partialorder %v1200_v6, inf  ;;  %v1308_v30 = vadd.f32 %v1138_v39, %v1057_v38  ;;  %vm378_vm9 = vcmp.eq.f32.partialorder %v1200_v6, 0.0 }
 0x116   :  { %603 = vst [vmem:[%s1622_s3 + $0xb0] sm:$0xff] %v571_v47  ;;  %v359_v32 = vsel %vm357_vm5, %v358_v18, %v356_v20  ;;  %752 = vrsqrt.f32 %v1292_v35  ;;  %v1316_v19 = vadd.f32 %v1057_v38, %v1147_v29  ;;  %v468_v0 = vsel %vm467_vm6, %v1158_v13, %v466_v15  ;;  %v747_v10 = vpop.eup %746 }
 0x117   :  { %v553_v2 = vmul.f32 %v359_v32, %v881_v22  ;;  %v379_v39 = vand.u32 2147483648, %v1200_v6  ;;  %754 = vrsqrt.f32 %v1296_v40  ;;  %v471_v21 = vsel %vm469_vm7, %v470_v36, %v468_v0  ;;  %v749_v13 = vpop.eup %748 }
 0x118   :  { %vm488_vm10 = vcmp.eq.f32.partialorder %v1213_v58, inf  ;;  %vm490_vm11 = vcmp.eq.f32.partialorder %v1213_v58, 0.0  ;;  %v1330_v29 = vadd.f32 %v1057_v38, %v1149_v27  ;;  %v569_v22 = vmul.f32 %v471_v21, %v891_v24  ;;  %v751_v7 = vpop.eup %750 }
 0x119   :  { %585 = vst [vmem:[%s1622_s3 + $0x20] sm:$0xff] %v553_v2  ;;  %v375_v63 = vmul.f32 %v747_v10, %v1200_v6  ;;  %v491_v3 = vand.u32 2147483648, %v1213_v58  ;;  %756 = vrsqrt.f32 %v1308_v30  ;;  %vm362_vm12 = vcmp.eq.f32.partialorder %v1223_v49, inf }
 0x11a   :  { %vm364_vm13 = vcmp.eq.f32.partialorder %v1223_v49, 0.0  ;;  %758 = vrsqrt.f32 %v1316_v19  ;;  %v1344_v27 = vadd.f32 %v1160_v53, %v1057_v38  ;;  %601 = vst [vmem:[%s1622_s3 + $0xa0] sm:$0xff] %v569_v22  ;;  %v487_v8 = vmul.f32 %v749_v13, %v1213_v58 }
 0x11b   :  { %v377_v24 = vsel %vm376_vm8, %v1200_v6, %v375_v63  ;;  %v365_v5 = vand.u32 2147483648, %v1223_v49  ;;  %vm474_vm14 = vcmp.eq.f32.partialorder %v1292_v35, inf  ;;  %vm476_vm15 = vcmp.eq.f32.partialorder %v1292_v35, 0.0 }
 0x11c   :  { %v380_v50 = vsel %vm378_vm9, %v379_v39, %v377_v24  ;;  %v477_v53 = vand.u32 2147483648, %v1292_v35  ;;  %760 = vrsqrt.f32 %v1330_v29  ;;  %v489_v52 = vsel %vm488_vm10, %v1213_v58, %v487_v8 }
 0x11d   :  { %v556_v9 = vmul.f32 %v380_v50, %v922_v37  ;;  %v361_v33 = vmul.f32 %v751_v7, %v1223_v49  ;;  %vm397_vm0 = vcmp.eq.f32.partialorder %v1296_v40, inf  ;;  %v492_v6 = vsel %vm490_vm11, %v491_v3, %v489_v52 }
 0x11e   :  { %vm399_vm1 = vcmp.eq.f32.partialorder %v1296_v40, 0.0  ;;  %v400_v62 = vand.u32 2147483648, %v1296_v40  ;;  %762 = vrsqrt.f32 %v1344_v27  ;;  %v572_v37 = vmul.f32 %v492_v6, %v932_v41 }
 0x11f   :  { %588 = vst [vmem:[%s1622_s3 + $0x38] sm:$0xff] %v556_v9  ;;  %v363_v34 = vsel %vm362_vm12, %v1223_v49, %v361_v33  ;;  %vm509_vm2 = vcmp.eq.f32.partialorder %v1308_v30, inf  ;;  %v1381_v58 = vadd.f32 %v1162_v55, %v1057_v38  ;;  %vm511_vm3 = vcmp.eq.f32.partialorder %v1308_v30, 0.0 }
 0x120   :  { %v753_v11 = vpop.eup %752  ;;  %v366_v47 = vsel %vm364_vm13, %v365_v5, %v363_v34  ;;  %v1388_v14 = vadd.f32 %v1057_v38, %v1171_v48  ;;  %v1392_v41 = vadd.f32 %v1057_v38, %v1173_v12  ;;  %604 = vst [vmem:[%s1622_s3 + $0xb8] sm:$0xff] %v572_v37  ;;  %v512_v59 = vand.u32 2147483648, %v1308_v30 }
 0x121   :  { %v755_v18 = vpop.eup %754  ;;  %v554_v55 = vmul.f32 %v366_v47, %v886_v23  ;;  %v473_v49 = vmul.f32 %v753_v11, %v1292_v35  ;;  %764 = vrsqrt.f32 %v1381_v58  ;;  %vm383_vm4 = vcmp.eq.f32.partialorder %v1316_v19, inf }
 0x122   :  { %v396_v48 = vmul.f32 %v755_v18, %v1296_v40  ;;  %vm385_vm5 = vcmp.eq.f32.partialorder %v1316_v19, 0.0  ;;  %766 = vrsqrt.f32 %v1388_v14  ;;  %v386_v36 = vand.u32 2147483648, %v1316_v19 }
 0x123   :  { %v757_v12 = vpop.eup %756  ;;  %586 = vst [vmem:[%s1622_s3 + $0x28] sm:$0xff] %v554_v55  ;;  %v475_v23 = vsel %vm474_vm14, %v1292_v35, %v473_v49  ;;  %vm495_vm6 = vcmp.eq.f32.partialorder %v1330_v29, inf  ;;  %v1415_v20 = vadd.f32 %v1225_v1, %v1057_v38  ;;  %768 = vrsqrt.f32 %v1392_v41 }
 0x124   :  { %v759_v15 = vpop.eup %758  ;;  %v478_v32 = vsel %vm476_vm15, %v477_v53, %v475_v23  ;;  %v398_v2 = vsel %vm397_vm0, %v1296_v40, %v396_v48  ;;  %v508_v0 = vmul.f32 %v757_v12, %v1308_v30  ;;  %vm497_vm7 = vcmp.eq.f32.partialorder %v1330_v29, 0.0 }
 0x125   :  { %v570_v39 = vmul.f32 %v478_v32, %v896_v25  ;;  %v401_v10 = vsel %vm399_vm1, %v400_v62, %v398_v2  ;;  %v382_v1 = vmul.f32 %v759_v15, %v1316_v19  ;;  %v498_v63 = vand.u32 2147483648, %v1330_v29 }
 0x126   :  { %v761_v21 = vpop.eup %760  ;;  %v559_v35 = vmul.f32 %v401_v10, %v973_v56  ;;  %v510_v22 = vsel %vm509_vm2, %v1308_v30, %v508_v0  ;;  %vm404_vm8 = vcmp.eq.f32.partialorder %v1344_v27, inf  ;;  %770 = vrsqrt.f32 %v1415_v20 }
 0x127   :  { %602 = vst [vmem:[%s1622_s3 + $0xa8] sm:$0xff] %v570_v39  ;;  %v513_v25 = vsel %vm511_vm3, %v512_v59, %v510_v22  ;;  %v384_v40 = vsel %vm383_vm4, %v1316_v19, %v382_v1  ;;  %v494_v56 = vmul.f32 %v761_v21, %v1330_v29  ;;  %vm406_vm9 = vcmp.eq.f32.partialorder %v1344_v27, 0.0 }
 0x128   :  { %v763_v3 = vpop.eup %762  ;;  %591 = vst [vmem:[%s1622_s3 + $0x50] sm:$0xff] %v559_v35  ;;  %v575_v13 = vmul.f32 %v513_v25, %v983_v60  ;;  %v387_v24 = vsel %vm385_vm5, %v386_v36, %v384_v40  ;;  %v407_v30 = vand.u32 2147483648, %v1344_v27  ;;  %vm516_vm10 = vcmp.eq.f32.partialorder %v1381_v58, inf }
 0x129   :  { %v557_v8 = vmul.f32 %v387_v24, %v937_v42  ;;  %v496_v5 = vsel %vm495_vm6, %v1330_v29, %v494_v56  ;;  %v403_v7 = vmul.f32 %v763_v3, %v1344_v27  ;;  %vm518_vm11 = vcmp.eq.f32.partialorder %v1381_v58, 0.0  ;;  %v1636_v24 = vld [vmem:[#allocation4_spill] sm:$0xff] }
 0x12a   :  { %607 = vst [vmem:[%s1622_s3 + $0xd0] sm:$0xff] %v575_v13  ;;  %v499_v60 = vsel %vm497_vm7, %v498_v63, %v496_v5  ;;  %v1467_v42 = vadd.f32 %v1227_v17, %v1057_v38  ;;  %v1471_v19 = vadd.f32 %v1057_v38, %v1236_v54  ;;  %v519_v9 = vand.u32 2147483648, %v1381_v58 }
 0x12b   :  { %v765_v50 = vpop.eup %764  ;;  %589 = vst [vmem:[%s1622_s3 + $0x40] sm:$0xff] %v557_v8  ;;  %v573_v53 = vmul.f32 %v499_v60, %v947_v44  ;;  %v405_v29 = vsel %vm404_vm8, %v1344_v27, %v403_v7  ;;  %vm390_vm12 = vcmp.eq.f32.partialorder %v1388_v14, inf  ;;  %v1488_v33 = vadd.f32 %v1057_v38, %v1238_v26 }
 0x12c   :  { %v767_v17 = vpop.eup %766  ;;  %v408_v54 = vsel %vm406_vm9, %v407_v30, %v405_v29  ;;  %v515_v52 = vmul.f32 %v765_v50, %v1381_v58  ;;  %772 = vrsqrt.f32 %v1467_v42  ;;  %vm392_vm13 = vcmp.eq.f32.partialorder %v1388_v14, 0.0 }
 0x12d   :  { %605 = vst [vmem:[%s1622_s3 + $0xc0] sm:$0xff] %v573_v53  ;;  %v560_v44 = vmul.f32 %v408_v54, %v978_v57  ;;  %v389_v6 = vmul.f32 %v767_v17, %v1388_v14  ;;  %v393_v27 = vand.u32 2147483648, %v1388_v14  ;;  %v769_v62 = vpop.eup %768  ;;  %vm502_vm14 = vcmp.eq.f32.partialorder %v1392_v41, inf }
 0x12e   :  { %v517_v37 = vsel %vm516_vm10, %v1381_v58, %v515_v52  ;;  %774 = vrsqrt.f32 %v1471_v19  ;;  %v1504_v26 = vadd.f32 %v1248_v51, %v1057_v38  ;;  %v501_v11 = vmul.f32 %v769_v62, %v1392_v41 }
 0x12f   :  { %592 = vst [vmem:[%s1622_s3 + $0x58] sm:$0xff] %v560_v44  ;;  %v520_v57 = vsel %vm518_vm11, %v519_v9, %v517_v37  ;;  %v391_v34 = vsel %vm390_vm12, %v1388_v14, %v389_v6  ;;  %v1517_v47 = vadd.f32 %v1250_v31, %v1057_v38  ;;  %v505_v55 = vand.u32 2147483648, %v1392_v41  ;;  %v1638_v9 = vld [vmem:[#allocation7_spill] sm:$0xff] }
 0x130   :  { %v576_v51 = vmul.f32 %v520_v57, %v988_v61  ;;  %v394_v18 = vsel %vm392_vm13, %v393_v27, %v391_v34  ;;  %776 = vrsqrt.f32 %v1488_v33  ;;  %v771_v49 = vpop.eup %770  ;;  %v503_v59 = vsel %vm502_vm14, %v1392_v41, %v501_v11  ;;  %v1639_v37 = vld [vmem:[#allocation3_spill] sm:$0xff]  ;;  %v1640_v34 = vld [vmem:[#allocation5_spill] sm:$0xff] }
 0x131   :  { %v558_v58 = vmul.f32 %v394_v18, %v942_v43  ;;  %vm504_vm15 = vcmp.eq.f32.partialorder %v1392_v41, 0.0  ;;  %v424_v14 = vmul.f32 %v771_v49, %v1415_v20  ;;  %778 = vrsqrt.f32 %v1504_v26 }
 0x132   :  { %608 = vst [vmem:[%s1622_s3 + $0xd8] sm:$0xff] %v576_v51  ;;  %v506_v31 = vsel %vm504_vm15, %v505_v55, %v503_v59  ;;  %vm425_vm0 = vcmp.eq.f32.partialorder %v1415_v20, inf  ;;  %v428_v43 = vand.u32 2147483648, %v1415_v20  ;;  %780 = vrsqrt.f32 %v1517_v47 }
 0x133   :  { %590 = vst [vmem:[%s1622_s3 + $0x48] sm:$0xff] %v558_v58  ;;  %v574_v61 = vmul.f32 %v506_v31, %v952_v45  ;;  %v426_v41 = vsel %vm425_vm0, %v1415_v20, %v424_v14  ;;  %vm427_vm1 = vcmp.eq.f32.partialorder %v1415_v20, 0.0  ;;  %v1544_v12 = vadd.f32 %v1057_v38, %v1259_v46 }
 0x134   :  { %v429_v48 = vsel %vm427_vm1, %v428_v43, %v426_v41  ;;  %v1548_v45 = vadd.f32 %v1057_v38, %v1261_v4  ;;  %vm537_vm2 = vcmp.eq.f32.partialorder %v1467_v42, inf  ;;  %v540_v46 = vand.u32 2147483648, %v1467_v42 }
 0x135   :  { %606 = vst [vmem:[%s1622_s3 + $0xc8] sm:$0xff] %v574_v61  ;;  %v563_v36 = vmul.f32 %v429_v48, %v1029_v16  ;;  %782 = vrsqrt.f32 %v1544_v12  ;;  %vm539_vm3 = vcmp.eq.f32.partialorder %v1467_v42, 0.0  ;;  %vm411_vm4 = vcmp.eq.f32.partialorder %v1471_v19, inf }
 0x136   :  { %v773_v23 = vpop.eup %772  ;;  %784 = vrsqrt.f32 %v1548_v45  ;;  %v414_v2 = vand.u32 2147483648, %v1471_v19  ;;  %vm413_vm5 = vcmp.eq.f32.partialorder %v1471_v19, 0.0  ;;  %vm523_vm6 = vcmp.eq.f32.partialorder %v1488_v33, inf }
 0x137   :  { %v536_v15 = vmul.f32 %v773_v23, %v1467_v42  ;;  %595 = vst [vmem:[%s1622_s3 + $0x70] sm:$0xff] %v563_v36  ;;  %vm525_vm7 = vcmp.eq.f32.partialorder %v1488_v33, 0.0  ;;  %v526_v35 = vand.u32 2147483648, %v1488_v33  ;;  %vm432_vm8 = vcmp.eq.f32.partialorder %v1504_v26, inf }
 0x138   :  { %v775_v20 = vpop.eup %774  ;;  %vm434_vm9 = vcmp.eq.f32.partialorder %v1504_v26, 0.0  ;;  %v435_v3 = vand.u32 2147483648, %v1504_v26  ;;  %vm544_vm10 = vcmp.eq.f32.partialorder %v1517_v47, inf  ;;  %v547_v5 = vand.u32 2147483648, %v1517_v47 }
 0x139   :  { %v538_v38 = vsel %vm537_vm2, %v1467_v42, %v536_v15  ;;  %v410_v16 = vmul.f32 %v775_v20, %v1471_v19  ;;  %vm546_vm11 = vcmp.eq.f32.partialorder %v1517_v47, 0.0  ;;  %vm418_vm12 = vcmp.eq.f32.partialorder %v1544_v12, inf }
 0x13a   :  { %v777_v4 = vpop.eup %776  ;;  %v541_v32 = vsel %vm539_vm3, %v540_v46, %v538_v38  ;;  %v421_v52 = vand.u32 2147483648, %v1544_v12  ;;  %vm420_vm13 = vcmp.eq.f32.partialorder %v1544_v12, 0.0  ;;  %vm530_vm14 = vcmp.eq.f32.partialorder %v1548_v45, inf }
 0x13b   :  { %v579_v0 = vmul.f32 %v541_v32, %v1039_v28  ;;  %v412_v39 = vsel %vm411_vm4, %v1471_v19, %v410_v16  ;;  %v522_v10 = vmul.f32 %v777_v4, %v1488_v33  ;;  %v779_v1 = vpop.eup %778  ;;  %v1635_v28 = vld [vmem:[#allocation2_spill] sm:$0xff]  ;;  %v533_v6 = vand.u32 2147483648, %v1548_v45 }
 0x13c   :  { %v415_v21 = vsel %vm413_vm5, %v414_v2, %v412_v39  ;;  %v781_v22 = vpop.eup %780  ;;  %v431_v40 = vmul.f32 %v779_v1, %v1504_v26  ;;  %v1637_v19 = vld [vmem:[#allocation6_spill] sm:$0xff]  ;;  %vm532_vm15 = vcmp.eq.f32.partialorder %v1548_v45, 0.0 }
 0x13d   :  { %611 = vst [vmem:[%s1622_s3 + $0xf0] sm:$0xff] %v579_v0  ;;  %v561_v63 = vmul.f32 %v415_v21, %v1635_v28  ;;  %v524_v25 = vsel %vm523_vm6, %v1488_v33, %v522_v10  ;;  %v543_v13 = vmul.f32 %v781_v22, %v1517_v47 }
 0x13e   :  { %v527_v56 = vsel %vm525_vm7, %v526_v35, %v524_v25  ;;  %v433_v8 = vsel %vm432_vm8, %v1504_v26, %v431_v40 }
 0x13f   :  { %593 = vst [vmem:[%s1622_s3 + $0x60] sm:$0xff] %v561_v63  ;;  %v577_v30 = vmul.f32 %v527_v56, %v1636_v24  ;;  %v436_v7 = vsel %vm434_vm9, %v435_v3, %v433_v8  ;;  %v545_v60 = vsel %vm544_vm10, %v1517_v47, %v543_v13  ;;  %v783_v42 = vpop.eup %782 }
 0x140   :  { %v564_v50 = vmul.f32 %v436_v7, %v1637_v19  ;;  %v548_v53 = vsel %vm546_vm11, %v547_v5, %v545_v60  ;;  %v785_v29 = vpop.eup %784  ;;  %v417_v54 = vmul.f32 %v783_v42, %v1544_v12 }
 0x141   :  { %609 = vst [vmem:[%s1622_s3 + $0xe0] sm:$0xff] %v577_v30  ;;  %v580_v17 = vmul.f32 %v548_v53, %v1638_v9  ;;  %v529_v33 = vmul.f32 %v785_v29, %v1548_v45 }
 0x142   :  { %596 = vst [vmem:[%s1622_s3 + $0x78] sm:$0xff] %v564_v50  ;;  %v419_v44 = vsel %vm418_vm12, %v1544_v12, %v417_v54 }
 0x143   :  { %612 = vst [vmem:[%s1622_s3 + $0xf8] sm:$0xff] %v580_v17  ;;  %v422_v27 = vsel %vm420_vm13, %v421_v52, %v419_v44  ;;  %v531_v62 = vsel %vm530_vm14, %v1548_v45, %v529_v33 }
 0x144   :  { %v562_v26 = vmul.f32 %v422_v27, %v1639_v37  ;;  %v534_v57 = vsel %vm532_vm15, %v533_v6, %v531_v62 }
 0x145   :  { %v578_v11 = vmul.f32 %v534_v57, %v1640_v34 }
 0x146   :  { %594 = vst [vmem:[%s1622_s3 + $0x68] sm:$0xff] %v562_v26 }
 0x147   :  { %610 = vst [vmem:[%s1622_s3 + $0xe8] sm:$0xff] %v578_v11 }

// kernel: forward.53
= control target key start
LH: loop header
LB: loop body
LE: loop exit
PB: predicated region body
PF: predicated region fallthrough
CT: control target
= control target key end

     0   :  { %s970_s1 = inlined_call_operand.vmem [shape: bf16[128,128], index: 1, kind: input, shape index: {}]   ;;  %s971_s0 = inlined_call_operand.vmem [shape: bf16[256,128], index: 0, kind: input, shape index: {}]   ;;  %s972_s2 = inlined_call_operand.vmem [shape: f32[8,128], index: 2, kind: input, shape index: {}]   ;;  %s973_s3 = inlined_call_operand.vmem [shape: f32[256,128], index: 3, kind: output, shape index: {}]  }
   0x1   :  { %v721_v0 = vld [vmem:[%s970_s1] sm:$0xff]   ;;  %v722_v1 = vld [vmem:[%s970_s1 + $0x8] sm:$0xff]   ;;  %v723_v2 = vld [vmem:[%s970_s1 + $0x10] sm:$0xff]  }
   0x2   :  { %657 = vmatprep.subr.bf16.mxu0 %v721_v0  ;;  %705 = vmatprep.subr.bf16.mxu1 %v721_v0  ;;  %v724_v3 = vld [vmem:[%s970_s1 + $0x18] sm:$0xff]   ;;  %v729_v4 = vld [vmem:[%s971_s0] sm:$0xff]   ;;  %v726_v7 = vld [vmem:[%s970_s1 + $0x28] sm:$0xff]  }
   0x3   :  { %658 = vmatpush3.bf16.msra.mxu0 %v721_v0  ;;  %713 = vmatpush3.bf16.msra.mxu1 %v721_v0  ;;  %v730_v5 = vld [vmem:[%s971_s0 + $0x40] sm:$0xff]   ;;  %v727_v8 = vld [vmem:[%s970_s1 + $0x30] sm:$0xff]   ;;  %v728_v9 = vld [vmem:[%s970_s1 + $0x38] sm:$0xff]  }
   0x4   :  { %659 = vmatprep.subr.bf16.mxu0 %v722_v1  ;;  %706 = vmatprep.subr.bf16.mxu1 %v722_v1  ;;  %v725_v6 = vld [vmem:[%s970_s1 + $0x20] sm:$0xff]   ;;  %v731_v10 = vld [vmem:[%s971_s0 + $0x8] sm:$0xff]   ;;  %v733_v12 = vld [vmem:[%s971_s0 + $0x10] sm:$0xff]  }
   0x5   :  { %673 = vmatprep.mubr.bf16.mxu0 %v729_v4  ;;  %689 = vmatprep.mubr.bf16.mxu1 %v730_v5  ;;  %v732_v11 = vld [vmem:[%s971_s0 + $0x48] sm:$0xff]   ;;  %v734_v13 = vld [vmem:[%s971_s0 + $0x50] sm:$0xff]   ;;  %v735_v14 = vld [vmem:[%s971_s0 + $0x18] sm:$0xff]  }
   0x6   :  { %v736_v15 = vld [vmem:[%s971_s0 + $0x58] sm:$0xff]   ;;  %v737_v16 = vld [vmem:[%s971_s0 + $0x20] sm:$0xff]   ;;  %v739_v18 = vld [vmem:[%s971_s0 + $0x28] sm:$0xff]  }
   0x7   :  { %660 = vmatpush3.bf16.msra.mxu0 %v722_v1  ;;  %714 = vmatpush3.bf16.msra.mxu1 %v722_v1  ;;  %v738_v17 = vld [vmem:[%s971_s0 + $0x60] sm:$0xff]   ;;  %v740_v19 = vld [vmem:[%s971_s0 + $0x68] sm:$0xff]   ;;  %v741_v20 = vld [vmem:[%s971_s0 + $0x30] sm:$0xff]  }
   0x8   :  { %661 = vmatprep.subr.bf16.mxu0 %v723_v2  ;;  %707 = vmatprep.subr.bf16.mxu1 %v723_v2  ;;  %v742_v21 = vld [vmem:[%s971_s0 + $0x70] sm:$0xff]   ;;  %v743_v22 = vld [vmem:[%s971_s0 + $0x38] sm:$0xff]   ;;  %v840_v24 = vld [vmem:[%s972_s2] ss:$0 sm:$0xff] }
   0x9   :  { %v744_v23 = vld [vmem:[%s971_s0 + $0x78] sm:$0xff]  }
   0xb   :  { %662 = vmatpush3.bf16.msra.mxu0 %v723_v2  ;;  %715 = vmatpush3.bf16.msra.mxu1 %v723_v2 }
   0xc   :  { %663 = vmatprep.subr.bf16.mxu0 %v724_v3  ;;  %708 = vmatprep.subr.bf16.mxu1 %v724_v3 }
   0xf   :  { %664 = vmatpush3.bf16.msra.mxu0 %v724_v3  ;;  %716 = vmatpush3.bf16.msra.mxu1 %v724_v3 }
  0x10   :  { %665 = vmatprep.subr.bf16.mxu0 %v725_v6  ;;  %709 = vmatprep.subr.bf16.mxu1 %v725_v6 }
  0x13   :  { %666 = vmatpush3.bf16.msra.mxu0 %v725_v6  ;;  %717 = vmatpush3.bf16.msra.mxu1 %v725_v6 }
  0x14   :  { %667 = vmatprep.subr.bf16.mxu0 %v726_v7  ;;  %710 = vmatprep.subr.bf16.mxu1 %v726_v7 }
  0x17   :  { %668 = vmatpush3.bf16.msra.mxu0 %v726_v7  ;;  %718 = vmatpush3.bf16.msra.mxu1 %v726_v7 }
  0x18   :  { %669 = vmatprep.subr.bf16.mxu0 %v727_v8  ;;  %711 = vmatprep.subr.bf16.mxu1 %v727_v8 }
  0x1b   :  { %670 = vmatpush3.bf16.msra.mxu0 %v727_v8  ;;  %719 = vmatpush3.bf16.msra.mxu1 %v727_v8 }
  0x1c   :  { %671 = vmatprep.subr.bf16.mxu0 %v728_v9  ;;  %712 = vmatprep.subr.bf16.mxu1 %v728_v9 }
  0x1f   :  { %672 = vmatpush3.bf16.msra.mxu0 %v728_v9  ;;  %720 = vmatpush3.bf16.msra.mxu1 %v728_v9 }
  0x22   :  { %674 = vmatmul.mubr.bf16.vlgmr.msra.gmra.mrb[0].mxu0 %v731_v10  ;;  %690 = vmatmul.mubr.bf16.vlgmr.msra.gmra.mrb[0].mxu1 %v732_v11 }
  0x23   :  { %677 = vmatprep.mubr.bf16.mxu0 %v733_v12  ;;  %693 = vmatprep.mubr.bf16.mxu1 %v734_v13 }
  0x2a   :  { %678 = vmatmul.mubr.bf16.gmra.mrb[4].mxu0 %v735_v14  ;;  %694 = vmatmul.mubr.bf16.gmra.mrb[4].mxu1 %v736_v15 }
  0x2b   :  { %681 = vmatprep.mubr.bf16.mxu0 %v737_v16  ;;  %697 = vmatprep.mubr.bf16.mxu1 %v738_v17 }
  0x32   :  { %682 = vmatmul.mubr.bf16.gmra.mrb[8].mxu0 %v739_v18  ;;  %698 = vmatmul.mubr.bf16.gmra.mrb[8].mxu1 %v740_v19 }
  0x33   :  { %685 = vmatprep.mubr.bf16.mxu0 %v741_v20  ;;  %701 = vmatprep.mubr.bf16.mxu1 %v742_v21 }
  0x3a   :  { %686 = vmatmul.mubr.bf16.gmra.mrb[12].mxu0 %v743_v22  ;;  %702 = vmatmul.mubr.bf16.gmra.mrb[12].mxu1 %v744_v23 }
  0xf5   :  { %v675_v25 = vpop.f32.mrb[0].mxu0  ;;  %v691_v26 = vpop.f32.mrb[0].mxu1 }
  0xf6   :  { %v542_v27 = vadd.f32 %v675_v25, %v840_v24  ;;  %v558_v28 = vadd.f32 %v691_v26, %v840_v24  ;;  %v309_v29 = vpop.f32.mrb[1].mxu0  ;;  %v373_v30 = vpop.f32.mrb[1].mxu1 }
  0xf7   :  { %v540_v31 = vadd.f32 %v840_v24, %v309_v29  ;;  %v556_v32 = vadd.f32 %v840_v24, %v373_v30  ;;  %v676_v33 = vpop.f32.mrb[2].mxu0  ;;  %v692_v34 = vpop.f32.mrb[2].mxu1 }
  0xf8   :  { %574 = vst [vmem:[%s973_s3 + $0x10] sm:$0xff] %v542_v27  ;;  %590 = vst [vmem:[%s973_s3 + $0x90] sm:$0xff] %v558_v28  ;;  %v543_v35 = vadd.f32 %v676_v33, %v840_v24  ;;  %v559_v36 = vadd.f32 %v692_v34, %v840_v24  ;;  %v312_v37 = vpop.f32.mrb[3].mxu0  ;;  %v376_v38 = vpop.f32.mrb[3].mxu1 }
  0xf9   :  { %572 = vst [vmem:[%s973_s3] sm:$0xff] %v540_v31  ;;  %588 = vst [vmem:[%s973_s3 + $0x80] sm:$0xff] %v556_v32  ;;  %v541_v39 = vadd.f32 %v840_v24, %v312_v37  ;;  %v557_v40 = vadd.f32 %v840_v24, %v376_v38 }
  0xfa   :  { %575 = vst [vmem:[%s973_s3 + $0x18] sm:$0xff] %v543_v35  ;;  %591 = vst [vmem:[%s973_s3 + $0x98] sm:$0xff] %v559_v36 }
  0xfb   :  { %573 = vst [vmem:[%s973_s3 + $0x8] sm:$0xff] %v541_v39  ;;  %589 = vst [vmem:[%s973_s3 + $0x88] sm:$0xff] %v557_v40 }
  0xfd   :  { %v679_v41 = vpop.f32.mrb[4].mxu0  ;;  %v695_v42 = vpop.f32.mrb[4].mxu1 }
  0xfe   :  { %v546_v43 = vadd.f32 %v679_v41, %v840_v24  ;;  %v562_v44 = vadd.f32 %v695_v42, %v840_v24  ;;  %v325_v45 = vpop.f32.mrb[5].mxu0  ;;  %v389_v46 = vpop.f32.mrb[5].mxu1 }
  0xff   :  { %v544_v47 = vadd.f32 %v840_v24, %v325_v45  ;;  %v560_v48 = vadd.f32 %v840_v24, %v389_v46  ;;  %v680_v49 = vpop.f32.mrb[6].mxu0  ;;  %v696_v50 = vpop.f32.mrb[6].mxu1 }
 0x100   :  { %578 = vst [vmem:[%s973_s3 + $0x30] sm:$0xff] %v546_v43  ;;  %594 = vst [vmem:[%s973_s3 + $0xb0] sm:$0xff] %v562_v44  ;;  %v547_v51 = vadd.f32 %v680_v49, %v840_v24  ;;  %v563_v52 = vadd.f32 %v696_v50, %v840_v24  ;;  %v328_v53 = vpop.f32.mrb[7].mxu0  ;;  %v392_v54 = vpop.f32.mrb[7].mxu1 }
 0x101   :  { %576 = vst [vmem:[%s973_s3 + $0x20] sm:$0xff] %v544_v47  ;;  %592 = vst [vmem:[%s973_s3 + $0xa0] sm:$0xff] %v560_v48  ;;  %v545_v55 = vadd.f32 %v840_v24, %v328_v53  ;;  %v561_v56 = vadd.f32 %v840_v24, %v392_v54 }
 0x102   :  { %579 = vst [vmem:[%s973_s3 + $0x38] sm:$0xff] %v547_v51  ;;  %595 = vst [vmem:[%s973_s3 + $0xb8] sm:$0xff] %v563_v52 }
 0x103   :  { %577 = vst [vmem:[%s973_s3 + $0x28] sm:$0xff] %v545_v55  ;;  %593 = vst [vmem:[%s973_s3 + $0xa8] sm:$0xff] %v561_v56 }
 0x105   :  { %v683_v57 = vpop.f32.mrb[8].mxu0  ;;  %v699_v58 = vpop.f32.mrb[8].mxu1 }
 0x106   :  { %v550_v59 = vadd.f32 %v683_v57, %v840_v24  ;;  %v566_v60 = vadd.f32 %v699_v58, %v840_v24  ;;  %v341_v61 = vpop.f32.mrb[9].mxu0  ;;  %v405_v62 = vpop.f32.mrb[9].mxu1 }
 0x107   :  { %v548_v63 = vadd.f32 %v840_v24, %v341_v61  ;;  %v564_v0 = vadd.f32 %v840_v24, %v405_v62  ;;  %v684_v1 = vpop.f32.mrb[10].mxu0  ;;  %v700_v2 = vpop.f32.mrb[10].mxu1 }
 0x108   :  { %582 = vst [vmem:[%s973_s3 + $0x50] sm:$0xff] %v550_v59  ;;  %598 = vst [vmem:[%s973_s3 + $0xd0] sm:$0xff] %v566_v60  ;;  %v551_v3 = vadd.f32 %v684_v1, %v840_v24  ;;  %v567_v4 = vadd.f32 %v700_v2, %v840_v24  ;;  %v344_v5 = vpop.f32.mrb[11].mxu0  ;;  %v408_v6 = vpop.f32.mrb[11].mxu1 }
 0x109   :  { %580 = vst [vmem:[%s973_s3 + $0x40] sm:$0xff] %v548_v63  ;;  %596 = vst [vmem:[%s973_s3 + $0xc0] sm:$0xff] %v564_v0  ;;  %v549_v7 = vadd.f32 %v840_v24, %v344_v5  ;;  %v565_v8 = vadd.f32 %v840_v24, %v408_v6 }
 0x10a   :  { %583 = vst [vmem:[%s973_s3 + $0x58] sm:$0xff] %v551_v3  ;;  %599 = vst [vmem:[%s973_s3 + $0xd8] sm:$0xff] %v567_v4 }
 0x10b   :  { %581 = vst [vmem:[%s973_s3 + $0x48] sm:$0xff] %v549_v7  ;;  %597 = vst [vmem:[%s973_s3 + $0xc8] sm:$0xff] %v565_v8 }
 0x10d   :  { %v687_v9 = vpop.f32.mrb[12].mxu0  ;;  %v703_v10 = vpop.f32.mrb[12].mxu1 }
 0x10e   :  { %v554_v11 = vadd.f32 %v687_v9, %v840_v24  ;;  %v570_v12 = vadd.f32 %v703_v10, %v840_v24  ;;  %v357_v13 = vpop.f32.mrb[13].mxu0  ;;  %v421_v14 = vpop.f32.mrb[13].mxu1 }
 0x10f   :  { %v552_v15 = vadd.f32 %v840_v24, %v357_v13  ;;  %v568_v16 = vadd.f32 %v840_v24, %v421_v14  ;;  %v688_v17 = vpop.f32.mrb[14].mxu0  ;;  %v704_v18 = vpop.f32.mrb[14].mxu1 }
 0x110   :  { %586 = vst [vmem:[%s973_s3 + $0x70] sm:$0xff] %v554_v11  ;;  %602 = vst [vmem:[%s973_s3 + $0xf0] sm:$0xff] %v570_v12  ;;  %v555_v19 = vadd.f32 %v688_v17, %v840_v24  ;;  %v571_v20 = vadd.f32 %v704_v18, %v840_v24  ;;  %v360_v21 = vpop.f32.mrb[15].mxu0  ;;  %v424_v22 = vpop.f32.mrb[15].mxu1 }
 0x111   :  { %584 = vst [vmem:[%s973_s3 + $0x60] sm:$0xff] %v552_v15  ;;  %600 = vst [vmem:[%s973_s3 + $0xe0] sm:$0xff] %v568_v16  ;;  %v553_v23 = vadd.f32 %v840_v24, %v360_v21  ;;  %v569_v25 = vadd.f32 %v840_v24, %v424_v22 }
 0x112   :  { %587 = vst [vmem:[%s973_s3 + $0x78] sm:$0xff] %v555_v19  ;;  %603 = vst [vmem:[%s973_s3 + $0xf8] sm:$0xff] %v571_v20 }
 0x113   :  { %585 = vst [vmem:[%s973_s3 + $0x68] sm:$0xff] %v553_v23  ;;  %601 = vst [vmem:[%s973_s3 + $0xe8] sm:$0xff] %v569_v25 }

// kernel: forward.54
= control target key start
LH: loop header
LB: loop body
LE: loop exit
PB: predicated region body
PF: predicated region fallthrough
CT: control target
= control target key end

     0   :  { %s1692_s12 = smov 0   ;;  %s2958_s0 = inlined_call_operand.vmem [shape: f32[1024,128], index: 0, kind: input, shape index: {}]   ;;  %s2959_s1 = inlined_call_operand.vmem [shape: bf16[128,128], index: 1, kind: input, shape index: {}]   ;;  %s2960_s2 = inlined_call_operand.vmem [shape: f32[8,128], index: 2, kind: input, shape index: {}]   ;;  %s2961_s3 = inlined_call_operand.vmem [shape: f32[1024,128], index: 3, kind: output, shape index: {}]  }
   0x1 LB: > { %s1325_s13 = sadd.s32 4294967295, %s1670_s12   ;;  %p1329_p0 = scmp.ge.s32.totalorder %s1670_s12, 1  ;;  %s1670_s12 = sphi %s1692_s12, %s13_s12  }
   0x2   : > { %p138_p1 = scmp.lt.s32.totalorder %s1670_s12, 3 }
   0x4   : > { %p139_p2 = pnand %p1329_p0, %p138_p1 }
   0x5   : > { %v1489_v0 = vld [vmem:[%s2959_s1] sm:$0xff] (!%p139_p2)   ;;  %s1330_s16 = sshll.u32 (!%p139_p2), %s1325_s13, 6  ;;  %v1490_v1 = vld [vmem:[%s2959_s1 + $0x8] sm:$0xff] (!%p139_p2)   ;;  %v1491_v2 = vld [vmem:[%s2959_s1 + $0x10] sm:$0xff] (!%p139_p2)  }
   0x6   : > { %142 = sbr.rel (%p139_p2) target bundleno = 405 (0x195), region = 32  ;;  %p163_p3 = scmp.lt.s32.totalorder (!%p139_p2), %s1330_s16, 127  ;;  %1385 = vmatprep.subr.bf16.mxu0 (!%p139_p2), %v1489_v0  ;;  %1465 = vmatprep.subr.bf16.mxu1 (!%p139_p2), %v1489_v0  ;;  %v1492_v3 = vld [vmem:[%s2959_s1 + $0x18] sm:$0xff] (!%p139_p2)   ;;  %v1493_v13 = vld [vmem:[%s2959_s1 + $0x20] sm:$0xff] (!%p139_p2)   ;;  %v1494_v15 = vld [vmem:[%s2959_s1 + $0x28] sm:$0xff] (!%p139_p2)  }
   0x7   : > { %1386 = vmatpush3.bf16.msra.mxu0 (!%p139_p2), %v1489_v0  ;;  %1473 = vmatpush3.bf16.msra.mxu1 (!%p139_p2), %v1489_v0  ;;  %v1495_v16 = vld [vmem:[%s2959_s1 + $0x30] sm:$0xff] (!%p139_p2)   ;;  %v1496_v17 = vld [vmem:[%s2959_s1 + $0x38] sm:$0xff] (!%p139_p2)  }
   0x8   : > { %1387 = vmatprep.subr.bf16.mxu0 (!%p139_p2), %v1490_v1  ;;  %1466 = vmatprep.subr.bf16.mxu1 (!%p139_p2), %v1490_v1 }
   0xb   : > { %1388 = vmatpush3.bf16.msra.mxu0 (!%p139_p2), %v1490_v1  ;;  %1474 = vmatpush3.bf16.msra.mxu1 (!%p139_p2), %v1490_v1 }
   0xc   : > { %1389 = vmatprep.subr.bf16.mxu0 (!%p139_p2), %v1491_v2  ;;  %1467 = vmatprep.subr.bf16.mxu1 (!%p139_p2), %v1491_v2 }
   0xd   : > { %s2963_s16 = smov (!%p163_p3, %s1330_s16), 127 }
   0xe   : > { %s1331_s21 = sshll.u32 %s2963_s16, 3 }
   0xf   : > { %s1717_s24 = scalar_lea.vmem %s2958_s0, %s1331_s21  ;;  %1390 = vmatpush3.bf16.msra.mxu0 %v1491_v2  ;;  %1475 = vmatpush3.bf16.msra.mxu1 %v1491_v2  ;;  %s1993_s13 = scalar_lea.vmem %s2961_s3, %s1331_s21 }
  0x10   : > { %v1723_v4 = vld [vmem:[%s1717_s24] sm:$0xff]  ;;  %v1726_v5 = vld [vmem:[%s1717_s24 + $0x8] sm:$0xff]  ;;  %1391 = vmatprep.subr.bf16.mxu0 %v1492_v3  ;;  %1468 = vmatprep.subr.bf16.mxu1 %v1492_v3  ;;  %v1755_v18 = vld [vmem:[%s1717_s24 + $0x10] sm:$0xff] }
  0x11   : > { %v1729_v6 = vld [vmem:[%s1717_s24 + $0x100] sm:$0xff]  ;;  %v239_v7 = vmul.f32 %v1723_v4, %v1723_v4  ;;  %v240_v8 = vmul.f32 %v1726_v5, %v1726_v5  ;;  %v1736_v9 = vld [vmem:[%s1717_s24 + $0x108] sm:$0xff]  ;;  %v1758_v19 = vld [vmem:[%s1717_s24 + $0x18] sm:$0xff]  ;;  %v241_v26 = vmul.f32 %v1755_v18, %v1755_v18 }
  0x12   : > { %v271_v10 = vmul.f32 %v1729_v6, %v1729_v6  ;;  %v272_v11 = vmul.f32 %v1736_v9, %v1736_v9  ;;  %v1761_v20 = vld [vmem:[%s1717_s24 + $0x110] sm:$0xff]  ;;  %v1764_v21 = vld [vmem:[%s1717_s24 + $0x118] sm:$0xff]  ;;  %v1767_v22 = vld [vmem:[%s1717_s24 + $0x20] sm:$0xff]  ;;  %v242_v27 = vmul.f32 %v1758_v19, %v1758_v19 }
  0x13   : > { %v303_v12 = vpack.c.bf16 %v240_v8, %v239_v7  ;;  %1392 = vmatpush3.bf16.msra.mxu0 %v1492_v3  ;;  %1476 = vmatpush3.bf16.msra.mxu1 %v1492_v3  ;;  %v1770_v23 = vld [vmem:[%s1717_s24 + $0x28] sm:$0xff]  ;;  %v1773_v24 = vld [vmem:[%s1717_s24 + $0x120] sm:$0xff]  ;;  %v273_v28 = vmul.f32 %v1761_v20, %v1761_v20  ;;  %v274_v29 = vmul.f32 %v1764_v21, %v1764_v21  ;;  %v1795_v36 = vld [vmem:[%s1717_s24 + $0x30] sm:$0xff] }
  0x14   : > { %v319_v14 = vpack.c.bf16 %v272_v11, %v271_v10  ;;  %1393 = vmatprep.subr.bf16.mxu0 %v1493_v13  ;;  %1469 = vmatprep.subr.bf16.mxu1 %v1493_v13  ;;  %v1776_v25 = vld [vmem:[%s1717_s24 + $0x128] sm:$0xff]  ;;  %v243_v30 = vmul.f32 %v1767_v22, %v1767_v22  ;;  %v244_v31 = vmul.f32 %v1770_v23, %v1770_v23  ;;  %v1798_v37 = vld [vmem:[%s1717_s24 + $0x38] sm:$0xff]  ;;  %v1801_v40 = vld [vmem:[%s1717_s24 + $0x130] sm:$0xff] }
  0x15   : > { %1401 = vmatprep.mubr.bf16.mxu0 %v303_v12  ;;  %v275_v32 = vmul.f32 %v1773_v24, %v1773_v24  ;;  %v276_v33 = vmul.f32 %v1776_v25, %v1776_v25  ;;  %v304_v34 = vpack.c.bf16 %v242_v27, %v241_v26  ;;  %v320_v35 = vpack.c.bf16 %v274_v29, %v273_v28  ;;  %v1804_v41 = vld [vmem:[%s1717_s24 + $0x138] sm:$0xff]  ;;  %v1807_v42 = vld [vmem:[%s1717_s24 + $0x40] sm:$0xff]  ;;  %v1810_v43 = vld [vmem:[%s1717_s24 + $0x48] sm:$0xff] }
  0x16   : > { %1433 = vmatprep.mubr.bf16.mxu1 %v319_v14  ;;  %v305_v38 = vpack.c.bf16 %v244_v31, %v243_v30  ;;  %v1813_v44 = vld [vmem:[%s1717_s24 + $0x140] sm:$0xff]  ;;  %v1816_v45 = vld [vmem:[%s1717_s24 + $0x148] sm:$0xff]  ;;  %v245_v46 = vmul.f32 %v1795_v36, %v1795_v36  ;;  %v246_v47 = vmul.f32 %v1798_v37, %v1798_v37  ;;  %v277_v48 = vmul.f32 %v1801_v40, %v1801_v40  ;;  %v1835_v56 = vld [vmem:[%s1717_s24 + $0x50] sm:$0xff] }
  0x17   : > { %1394 = vmatpush3.bf16.msra.mxu0 %v1493_v13  ;;  %1477 = vmatpush3.bf16.msra.mxu1 %v1493_v13  ;;  %v321_v39 = vpack.c.bf16 %v276_v33, %v275_v32  ;;  %v278_v49 = vmul.f32 %v1804_v41, %v1804_v41  ;;  %v247_v50 = vmul.f32 %v1807_v42, %v1807_v42  ;;  %v1838_v57 = vld [vmem:[%s1717_s24 + $0x58] sm:$0xff]  ;;  %v1841_v60 = vld [vmem:[%s1717_s24 + $0x150] sm:$0xff]  ;;  %v187_v62 = vld [vmem:[%s1717_s24 + $0x60] sm:$0xff] }
  0x18   : > { %1395 = vmatprep.subr.bf16.mxu0 %v1494_v15  ;;  %1470 = vmatprep.subr.bf16.mxu1 %v1494_v15  ;;  %v248_v51 = vmul.f32 %v1810_v43, %v1810_v43  ;;  %v279_v52 = vmul.f32 %v1813_v44, %v1813_v44  ;;  %v280_v53 = vmul.f32 %v1816_v45, %v1816_v45  ;;  %v1844_v61 = vld [vmem:[%s1717_s24 + $0x158] sm:$0xff]  ;;  %v188_v63 = vld [vmem:[%s1717_s24 + $0x68] sm:$0xff]  ;;  %v219_v0 = vld [vmem:[%s1717_s24 + $0x160] sm:$0xff] }
  0x19   : > { %v306_v54 = vpack.c.bf16 %v246_v47, %v245_v46  ;;  %v322_v55 = vpack.c.bf16 %v278_v49, %v277_v48  ;;  %v220_v1 = vld [vmem:[%s1717_s24 + $0x168] sm:$0xff]  ;;  %v249_v2 = vmul.f32 %v1835_v56, %v1835_v56  ;;  %v250_v3 = vmul.f32 %v1838_v57, %v1838_v57  ;;  %v1863_v28 = vld [vmem:[%s1717_s24 + $0x170] sm:$0xff]  ;;  %v222_v29 = vld [vmem:[%s1717_s24 + $0x178] sm:$0xff] }
  0x1a   : > { %v307_v58 = vpack.c.bf16 %v248_v51, %v247_v50  ;;  %v323_v59 = vpack.c.bf16 %v280_v53, %v279_v52  ;;  %v281_v7 = vmul.f32 %v1841_v60, %v1841_v60  ;;  %v282_v8 = vmul.f32 %v1844_v61, %v1844_v61  ;;  %v191_v30 = vld [vmem:[%s1717_s24 + $0x80] sm:$0xff]  ;;  %v192_v31 = vld [vmem:[%s1717_s24 + $0x88] sm:$0xff]  ;;  %v193_v52 = vld [vmem:[%s1717_s24 + $0x90] sm:$0xff] }
  0x1b   : > { %1396 = vmatpush3.bf16.msra.mxu0 %v1494_v15  ;;  %1478 = vmatpush3.bf16.msra.mxu1 %v1494_v15  ;;  %v251_v10 = vmul.f32 %v187_v62, %v187_v62  ;;  %v252_v11 = vmul.f32 %v188_v63, %v188_v63  ;;  %v283_v12 = vmul.f32 %v219_v0, %v219_v0  ;;  %v223_v32 = vld [vmem:[%s1717_s24 + $0x180] sm:$0xff]  ;;  %v224_v33 = vld [vmem:[%s1717_s24 + $0x188] sm:$0xff]  ;;  %v194_v53 = vld [vmem:[%s1717_s24 + $0x98] sm:$0xff] }
  0x1c   : > { %1397 = vmatprep.subr.bf16.mxu0 %v1495_v16  ;;  %1471 = vmatprep.subr.bf16.mxu1 %v1495_v16  ;;  %v284_v13 = vmul.f32 %v220_v1, %v220_v1  ;;  %v308_v14 = vpack.c.bf16 %v250_v3, %v249_v2  ;;  %v324_v15 = vpack.c.bf16 %v282_v8, %v281_v7  ;;  %v195_v62 = vld [vmem:[%s1717_s24 + $0xa0] sm:$0xff]  ;;  %v196_v63 = vld [vmem:[%s1717_s24 + $0xa8] sm:$0xff] }
  0x1d   : > { %v309_v26 = vpack.c.bf16 %v252_v11, %v251_v10  ;;  %v255_v46 = vmul.f32 %v191_v30, %v191_v30  ;;  %v256_v47 = vmul.f32 %v192_v31, %v192_v31  ;;  %v287_v48 = vmul.f32 %v223_v32, %v223_v32  ;;  %v227_v0 = vld [vmem:[%s1717_s24 + $0x1a0] sm:$0xff]  ;;  %v228_v1 = vld [vmem:[%s1717_s24 + $0x1a8] sm:$0xff]  ;;  %v229_v30 = vld [vmem:[%s1717_s24 + $0x1b0] sm:$0xff] }
  0x1e   : > { %v325_v27 = vpack.c.bf16 %v284_v13, %v283_v12  ;;  %v288_v49 = vmul.f32 %v224_v33, %v224_v33  ;;  %v257_v2 = vmul.f32 %v193_v52, %v193_v52  ;;  %v258_v3 = vmul.f32 %v194_v53, %v194_v53  ;;  %v230_v31 = vld [vmem:[%s1717_s24 + $0x1b8] sm:$0xff]  ;;  %v199_v32 = vld [vmem:[%s1717_s24 + $0xc0] sm:$0xff]  ;;  %v200_v33 = vld [vmem:[%s1717_s24 + $0xc8] sm:$0xff] }
  0x1f   : > { %1398 = vmatpush3.bf16.msra.mxu0 %v1495_v16  ;;  %1479 = vmatpush3.bf16.msra.mxu1 %v1495_v16  ;;  %v1859_v16 = vld [vmem:[%s1717_s24 + $0x70] sm:$0xff]  ;;  %v259_v10 = vmul.f32 %v195_v62, %v195_v62  ;;  %v260_v11 = vmul.f32 %v196_v63, %v196_v63  ;;  %v291_v12 = vmul.f32 %v227_v0, %v227_v0  ;;  %v234_v63 = vld [vmem:[%s1717_s24 + $0x1d8] sm:$0xff]  ;;  %v203_v0 = vld [vmem:[%s1717_s24 + $0xe0] sm:$0xff] }
  0x20   : > { %1399 = vmatprep.subr.bf16.mxu0 %v1496_v17  ;;  %1472 = vmatprep.subr.bf16.mxu1 %v1496_v17  ;;  %v292_v13 = vmul.f32 %v228_v1, %v228_v1  ;;  %v233_v62 = vld [vmem:[%s1717_s24 + $0x1d0] sm:$0xff]  ;;  %v204_v1 = vld [vmem:[%s1717_s24 + $0xe8] sm:$0xff] }
  0x23   : > { %1400 = vmatpush3.bf16.msra.mxu0 %v1496_v17  ;;  %1480 = vmatpush3.bf16.msra.mxu1 %v1496_v17  ;;  %v190_v17 = vld [vmem:[%s1717_s24 + $0x78] sm:$0xff] }
  0x26   : > { %1402 = vmatmul.mubr.bf16.vlgmr.msra.gmra.mrb[0].mxu0 %v304_v34  ;;  %1434 = vmatmul.mubr.bf16.vlgmr.msra.gmra.mrb[0].mxu1 %v320_v35  ;;  %v253_v34 = vmul.f32 %v1859_v16, %v1859_v16  ;;  %v254_v35 = vmul.f32 %v190_v17, %v190_v17  ;;  %v197_v17 = vld [vmem:[%s1717_s24 + $0xb0] sm:$0xff] }
  0x27   : > { %1405 = vmatprep.mubr.bf16.mxu0 %v305_v38  ;;  %1437 = vmatprep.mubr.bf16.mxu1 %v321_v39  ;;  %v285_v38 = vmul.f32 %v1863_v28, %v1863_v28  ;;  %v286_v39 = vmul.f32 %v222_v29, %v222_v29  ;;  %v329_v29 = vpack.c.bf16 %v292_v13, %v291_v12 }
  0x28   : > { %v310_v50 = vpack.c.bf16 %v254_v35, %v253_v34  ;;  %v231_v34 = vld [vmem:[%s1717_s24 + $0x1c0] sm:$0xff]  ;;  %v232_v35 = vld [vmem:[%s1717_s24 + $0x1c8] sm:$0xff]  ;;  %v267_v12 = vmul.f32 %v203_v0, %v203_v0  ;;  %v268_v13 = vmul.f32 %v204_v1, %v204_v1 }
  0x29   : > { %v326_v51 = vpack.c.bf16 %v286_v39, %v285_v38  ;;  %v261_v38 = vmul.f32 %v197_v17, %v197_v17 }
  0x2e   : > { %1406 = vmatmul.mubr.bf16.gmra.mrb[4].mxu0 %v306_v54  ;;  %1438 = vmatmul.mubr.bf16.gmra.mrb[4].mxu1 %v322_v55  ;;  %v311_v54 = vpack.c.bf16 %v256_v47, %v255_v46  ;;  %v327_v55 = vpack.c.bf16 %v288_v49, %v287_v48  ;;  %v293_v46 = vmul.f32 %v229_v30, %v229_v30 }
  0x2f   : > { %1409 = vmatprep.mubr.bf16.mxu0 %v307_v58  ;;  %1441 = vmatprep.mubr.bf16.mxu1 %v323_v59  ;;  %v225_v58 = vld [vmem:[%s1717_s24 + $0x190] sm:$0xff]  ;;  %v226_v59 = vld [vmem:[%s1717_s24 + $0x198] sm:$0xff]  ;;  %v294_v47 = vmul.f32 %v230_v31, %v230_v31  ;;  %v263_v48 = vmul.f32 %v199_v32, %v199_v32  ;;  %v264_v49 = vmul.f32 %v200_v33, %v200_v33 }
  0x30   : > { %v289_v7 = vmul.f32 %v225_v58, %v225_v58  ;;  %v290_v8 = vmul.f32 %v226_v59, %v226_v59  ;;  %v206_v31 = vld [vmem:[%s1717_s24 + $0xf8] sm:$0xff]  ;;  %v237_v32 = vld [vmem:[%s1717_s24 + $0x1f0] sm:$0xff] }
  0x31   : > { %v330_v53 = vpack.c.bf16 %v294_v47, %v293_v46  ;;  %v315_v58 = vpack.c.bf16 %v264_v49, %v263_v48  ;;  %v238_v33 = vld [vmem:[%s1717_s24 + $0x1f8] sm:$0xff]  ;;  %v1905_v48 = vld [vmem:[%s2960_s2] ss:$0 sm:$0xff] }
  0x36   : > { %1410 = vmatmul.mubr.bf16.gmra.mrb[8].mxu0 %v308_v14  ;;  %1442 = vmatmul.mubr.bf16.gmra.mrb[8].mxu1 %v324_v15  ;;  %v312_v14 = vpack.c.bf16 %v258_v3, %v257_v2  ;;  %v328_v15 = vpack.c.bf16 %v290_v8, %v289_v7  ;;  %v235_v2 = vld [vmem:[%s1717_s24 + $0x1e0] sm:$0xff]  ;;  %v236_v3 = vld [vmem:[%s1717_s24 + $0x1e8] sm:$0xff] }
  0x37   : > { %1413 = vmatprep.mubr.bf16.mxu0 %v309_v26  ;;  %1445 = vmatprep.mubr.bf16.mxu1 %v325_v27  ;;  %v198_v26 = vld [vmem:[%s1717_s24 + $0xb8] sm:$0xff]  ;;  %v313_v27 = vpack.c.bf16 %v260_v11, %v259_v10  ;;  %v297_v10 = vmul.f32 %v233_v62, %v233_v62  ;;  %v298_v11 = vmul.f32 %v234_v63, %v234_v63 }
  0x38   : > { %v262_v39 = vmul.f32 %v198_v26, %v198_v26 }
  0x39   : > { %v332_v26 = vpack.c.bf16 %v298_v11, %v297_v10 }
  0x3a   : > { %v314_v52 = vpack.c.bf16 %v262_v39, %v261_v38  ;;  %v301_v38 = vmul.f32 %v237_v32, %v237_v32  ;;  %v302_v39 = vmul.f32 %v238_v33, %v238_v33 }
  0x3c   : > { %v334_v47 = vpack.c.bf16 %v302_v39, %v301_v38 }
  0x3e   : > { %1414 = vmatmul.mubr.bf16.gmra.mrb[12].mxu0 %v310_v50  ;;  %1446 = vmatmul.mubr.bf16.gmra.mrb[12].mxu1 %v326_v51  ;;  %v295_v50 = vmul.f32 %v231_v34, %v231_v34  ;;  %v296_v51 = vmul.f32 %v232_v35, %v232_v35  ;;  %v270_v35 = vmul.f32 %v206_v31, %v206_v31 }
  0x3f   : > { %1417 = vmatprep.mubr.bf16.mxu0 %v311_v54  ;;  %1449 = vmatprep.mubr.bf16.mxu1 %v327_v55  ;;  %v201_v54 = vld [vmem:[%s1717_s24 + $0xd0] sm:$0xff]  ;;  %v202_v55 = vld [vmem:[%s1717_s24 + $0xd8] sm:$0xff] }
  0x40   : > { %v331_v59 = vpack.c.bf16 %v296_v51, %v295_v50  ;;  %v265_v7 = vmul.f32 %v201_v54, %v201_v54  ;;  %v266_v8 = vmul.f32 %v202_v55, %v202_v55 }
  0x42   : > { %v316_v17 = vpack.c.bf16 %v266_v8, %v265_v7 }
  0x46   : > { %1418 = vmatmul.mubr.bf16.gmra.mrb[16].mxu0 %v312_v14  ;;  %1450 = vmatmul.mubr.bf16.gmra.mrb[16].mxu1 %v328_v15  ;;  %v299_v14 = vmul.f32 %v235_v2, %v235_v2  ;;  %v300_v15 = vmul.f32 %v236_v3, %v236_v3 }
  0x47   : > { %1421 = vmatprep.mubr.bf16.mxu0 %v313_v27  ;;  %1453 = vmatprep.mubr.bf16.mxu1 %v329_v29  ;;  %v205_v27 = vld [vmem:[%s1717_s24 + $0xf0] sm:$0xff]  ;;  %v317_v29 = vpack.c.bf16 %v268_v13, %v267_v12 }
  0x48   : > { %v333_v30 = vpack.c.bf16 %v300_v15, %v299_v14  ;;  %v269_v34 = vmul.f32 %v205_v27, %v205_v27 }
  0x4a   : > { %v318_v46 = vpack.c.bf16 %v270_v35, %v269_v34 }
  0x4e   : > { %1422 = vmatmul.mubr.bf16.gmra.mrb[20].mxu0 %v314_v52  ;;  %1454 = vmatmul.mubr.bf16.gmra.mrb[20].mxu1 %v330_v53 }
  0x4f   : > { %1425 = vmatprep.mubr.bf16.mxu0 %v315_v58  ;;  %1457 = vmatprep.mubr.bf16.mxu1 %v331_v59 }
  0x56   : > { %1426 = vmatmul.mubr.bf16.gmra.mrb[24].mxu0 %v316_v17  ;;  %1458 = vmatmul.mubr.bf16.gmra.mrb[24].mxu1 %v332_v26 }
  0x57   : > { %1429 = vmatprep.mubr.bf16.mxu0 %v317_v29  ;;  %1461 = vmatprep.mubr.bf16.mxu1 %v333_v30 }
  0x5e   : > { %1430 = vmatmul.mubr.bf16.gmra.mrb[28].mxu0 %v318_v46  ;;  %1462 = vmatmul.mubr.bf16.gmra.mrb[28].mxu1 %v334_v47 }
  0xf9   : > { %v1403_v49 = vpop.f32.mrb[0].mxu0  ;;  %v1435_v50 = vpop.f32.mrb[0].mxu1 }
  0xfa   : > { %v1908_v51 = vadd.f32 %v1403_v49, %v1905_v48  ;;  %v1911_v52 = vadd.f32 %v1435_v50, %v1905_v48  ;;  %v438_v53 = vpop.f32.mrb[1].mxu0  ;;  %v566_v54 = vpop.f32.mrb[1].mxu1 }
  0xfb   : > { %v1914_v55 = vadd.f32 %v1905_v48, %v438_v53  ;;  %v1917_v58 = vadd.f32 %v1905_v48, %v566_v54  ;;  %v1404_v59 = vpop.f32.mrb[2].mxu0  ;;  %v1436_v62 = vpop.f32.mrb[2].mxu1 }
  0xfc   : > { %1497 = vrsqrt.f32 %v1908_v51  ;;  %v441_v63 = vpop.f32.mrb[3].mxu0  ;;  %v569_v0 = vpop.f32.mrb[3].mxu1  ;;  %v1924_v1 = vadd.f32 %v1404_v59, %v1905_v48  ;;  %v1927_v2 = vadd.f32 %v1436_v62, %v1905_v48  ;;  %vm709_vm0 = vcmp.eq.f32.partialorder %v1908_v51, inf }
  0xfd   : > { %1499 = vrsqrt.f32 %v1911_v52  ;;  %v1930_v3 = vadd.f32 %v1905_v48, %v441_v63  ;;  %v1933_v7 = vadd.f32 %v1905_v48, %v569_v0  ;;  %vm711_vm1 = vcmp.eq.f32.partialorder %v1908_v51, 0.0 }
  0xfe   : > { %1501 = vrsqrt.f32 %v1914_v55  ;;  %v712_v13 = vand.u32 2147483648, %v1908_v51  ;;  %vm933_vm2 = vcmp.eq.f32.partialorder %v1911_v52, inf  ;;  %vm935_vm3 = vcmp.eq.f32.partialorder %v1911_v52, 0.0 }
  0xff   : > { %1503 = vrsqrt.f32 %v1917_v58  ;;  %v936_v17 = vand.u32 2147483648, %v1911_v52  ;;  %vm695_vm4 = vcmp.eq.f32.partialorder %v1914_v55, inf  ;;  %vm697_vm5 = vcmp.eq.f32.partialorder %v1914_v55, 0.0 }
 0x100   : > { %1505 = vrsqrt.f32 %v1924_v1  ;;  %v698_v29 = vand.u32 2147483648, %v1914_v55  ;;  %vm919_vm6 = vcmp.eq.f32.partialorder %v1917_v58, inf  ;;  %vm921_vm7 = vcmp.eq.f32.partialorder %v1917_v58, 0.0 }
 0x101   : > { %v1407_v8 = vpop.f32.mrb[4].mxu0  ;;  %v1439_v10 = vpop.f32.mrb[4].mxu1  ;;  %1507 = vrsqrt.f32 %v1927_v2  ;;  %v922_v31 = vand.u32 2147483648, %v1917_v58  ;;  %vm716_vm8 = vcmp.eq.f32.partialorder %v1924_v1, inf  ;;  %vm718_vm9 = vcmp.eq.f32.partialorder %v1924_v1, 0.0 }
 0x102   : > { %v454_v11 = vpop.f32.mrb[5].mxu0  ;;  %v582_v12 = vpop.f32.mrb[5].mxu1  ;;  %1509 = vrsqrt.f32 %v1930_v3  ;;  %v1961_v32 = vadd.f32 %v1407_v8, %v1905_v48  ;;  %v1964_v33 = vadd.f32 %v1439_v10, %v1905_v48  ;;  %v719_v38 = vand.u32 2147483648, %v1924_v1 }
 0x103   : > { %v1942_v14 = vpop.f32.mrb[6].mxu0  ;;  %v1944_v15 = vpop.f32.mrb[6].mxu1  ;;  %1511 = vrsqrt.f32 %v1933_v7  ;;  %vm940_vm10 = vcmp.eq.f32.partialorder %v1927_v2, inf  ;;  %vm942_vm11 = vcmp.eq.f32.partialorder %v1927_v2, 0.0  ;;  %v943_v47 = vand.u32 2147483648, %v1927_v2 }
 0x104   : > { %v1950_v26 = vpop.f32.mrb[7].mxu0  ;;  %v1952_v27 = vpop.f32.mrb[7].mxu1  ;;  %vm702_vm12 = vcmp.eq.f32.partialorder %v1930_v3, inf  ;;  %1513 = vrsqrt.f32 %v1961_v32  ;;  %vm704_vm13 = vcmp.eq.f32.partialorder %v1930_v3, 0.0  ;;  %v1982_v54 = vadd.f32 %v1905_v48, %v454_v11 }
 0x105   : > { %1515 = vrsqrt.f32 %v1964_v33  ;;  %v705_v10 = vand.u32 2147483648, %v1930_v3  ;;  %vm926_vm14 = vcmp.eq.f32.partialorder %v1933_v7, inf  ;;  %vm928_vm15 = vcmp.eq.f32.partialorder %v1933_v7, 0.0 }
 0x106   : > { %v1498_v30 = vpop.eup %1497  ;;  %1517 = vrsqrt.f32 %v1982_v54 }
 0x107   : > { %v1500_v34 = vpop.eup %1499  ;;  %v708_v35 = vmul.f32 %v1498_v30, %v1908_v51 }
 0x108   : > { %v1502_v39 = vpop.eup %1501  ;;  %v932_v46 = vmul.f32 %v1500_v34, %v1911_v52 }
 0x109   : > { %v1504_v49 = vpop.eup %1503  ;;  %v710_v50 = vsel %vm709_vm0, %v1908_v51, %v708_v35  ;;  %v694_v53 = vmul.f32 %v1502_v39, %v1914_v55  ;;  %v1984_v59 = vpop.f32.mrb[8].mxu0  ;;  %vm737_vm0 = vcmp.eq.f32.partialorder %v1961_v32, inf }
 0x10a   : > { %v1986_v62 = vpop.f32.mrb[8].mxu1  ;;  %v713_v63 = vsel %vm711_vm1, %v712_v13, %v710_v50  ;;  %v934_v0 = vsel %vm933_vm2, %v1911_v52, %v932_v46  ;;  %v918_v8 = vmul.f32 %v1504_v49, %v1917_v58  ;;  %v2002_v11 = vpop.f32.mrb[9].mxu0  ;;  %v2013_v13 = vadd.f32 %v1905_v48, %v582_v12 }
 0x10b   : > { %v2004_v30 = vpop.f32.mrb[9].mxu1  ;;  %v1143_v34 = vmul.f32 %v713_v63, %v1755_v18  ;;  %v937_v35 = vsel %vm935_vm3, %v936_v17, %v934_v0  ;;  %v696_v51 = vsel %vm695_vm4, %v1914_v55, %v694_v53  ;;  %v2015_v39 = vpop.f32.mrb[10].mxu0  ;;  %vm739_vm1 = vcmp.eq.f32.partialorder %v1961_v32, 0.0 }
 0x10c   : > { %v2017_v46 = vpop.f32.mrb[10].mxu1  ;;  %v1506_v49 = vpop.eup %1505  ;;  %v1175_v50 = vmul.f32 %v937_v35, %v1761_v20  ;;  %v699_v18 = vsel %vm697_vm5, %v698_v29, %v696_v51  ;;  %v920_v52 = vsel %vm919_vm6, %v1917_v58, %v918_v8  ;;  %1519 = vrsqrt.f32 %v2013_v13 }
 0x10d   : > { %v2026_v12 = vpop.f32.mrb[11].mxu0  ;;  %v2028_v17 = vpop.f32.mrb[11].mxu1  ;;  %1207 = vst [vmem:[%s1993_s13 + $0x10] sm:$0xff] %v1143_v34  ;;  %v1141_v63 = vmul.f32 %v699_v18, %v1723_v4  ;;  %v923_v20 = vsel %vm921_vm7, %v922_v31, %v920_v52  ;;  %v715_v55 = vmul.f32 %v1506_v49, %v1924_v1  ;;  %v929_v34 = vand.u32 2147483648, %v1933_v7 }
 0x10e   : > { %v1508_v53 = vpop.eup %1507  ;;  %1239 = vst [vmem:[%s1993_s13 + $0x110] sm:$0xff] %v1175_v50  ;;  %v1173_v0 = vmul.f32 %v923_v20, %v1729_v6  ;;  %v2049_v31 = vadd.f32 %v1942_v14, %v1905_v48  ;;  %v2060_v50 = vadd.f32 %v1944_v15, %v1905_v48  ;;  %vm961_vm2 = vcmp.eq.f32.partialorder %v1964_v33, inf }
 0x10f   : > { %v1510_v29 = vpop.eup %1509  ;;  %v939_v8 = vmul.f32 %v1508_v53, %v1927_v2  ;;  %1205 = vst [vmem:[%s1993_s13] sm:$0xff] %v1141_v63  ;;  %v717_v4 = vsel %vm716_vm8, %v1924_v1, %v715_v55  ;;  %vm963_vm3 = vcmp.eq.f32.partialorder %v1964_v33, 0.0  ;;  %vm723_vm4 = vcmp.eq.f32.partialorder %v1982_v54, inf }
 0x110   : > { %v1512_v35 = vpop.eup %1511  ;;  %v701_v58 = vmul.f32 %v1510_v29, %v1930_v3  ;;  %1237 = vst [vmem:[%s1993_s13 + $0x100] sm:$0xff] %v1173_v0  ;;  %v720_v6 = vsel %vm718_vm9, %v719_v38, %v717_v4  ;;  %v2070_v38 = vadd.f32 %v1905_v48, %v1950_v26  ;;  %1521 = vrsqrt.f32 %v2049_v31 }
 0x111   : > { %v941_v51 = vsel %vm940_vm10, %v1927_v2, %v939_v8  ;;  %v925_v49 = vmul.f32 %v1512_v35, %v1933_v7  ;;  %v1144_v18 = vmul.f32 %v720_v6, %v1758_v19  ;;  %v2072_v52 = vpop.f32.mrb[12].mxu0  ;;  %v2074_v53 = vpop.f32.mrb[12].mxu1  ;;  %v740_v8 = vand.u32 2147483648, %v1961_v32 }
 0x112   : > { %v944_v14 = vsel %vm942_vm11, %v943_v47, %v941_v51  ;;  %v703_v1 = vsel %vm702_vm12, %v1930_v3, %v701_v58  ;;  %v1514_v15 = vpop.eup %1513  ;;  %v2083_v47 = vpop.f32.mrb[13].mxu0  ;;  %v964_v4 = vand.u32 2147483648, %v1964_v33  ;;  %1523 = vrsqrt.f32 %v2060_v50 }
 0x113   : > { %v1176_v63 = vmul.f32 %v944_v14, %v1764_v21  ;;  %v706_v19 = vsel %vm704_vm13, %v705_v10, %v703_v1  ;;  %v927_v2 = vsel %vm926_vm14, %v1933_v7, %v925_v49  ;;  %v2085_v26 = vpop.f32.mrb[13].mxu1  ;;  %v1516_v20 = vpop.eup %1515  ;;  %1208 = vst [vmem:[%s1993_s13 + $0x18] sm:$0xff] %v1144_v18  ;;  %v736_v3 = vmul.f32 %v1514_v15, %v1961_v32 }
 0x114   : > { %v1142_v55 = vmul.f32 %v706_v19, %v1726_v5  ;;  %v930_v21 = vsel %vm928_vm15, %v929_v34, %v927_v2  ;;  %v2093_v10 = vpop.f32.mrb[14].mxu0  ;;  %v2095_v29 = vpop.f32.mrb[14].mxu1  ;;  %v960_v5 = vmul.f32 %v1516_v20, %v1964_v33  ;;  %vm725_vm5 = vcmp.eq.f32.partialorder %v1982_v54, 0.0 }
 0x115   : > { %1240 = vst [vmem:[%s1993_s13 + $0x118] sm:$0xff] %v1176_v63  ;;  %v1174_v0 = vmul.f32 %v930_v21, %v1736_v9  ;;  %v2102_v7 = vpop.f32.mrb[15].mxu0  ;;  %v2104_v34 = vpop.f32.mrb[15].mxu1  ;;  %v738_v35 = vsel %vm737_vm0, %v1961_v32, %v736_v3  ;;  %1525 = vrsqrt.f32 %v2070_v38  ;;  %v726_v14 = vand.u32 2147483648, %v1982_v54 }
 0x116   : > { %1206 = vst [vmem:[%s1993_s13 + $0x8] sm:$0xff] %v1142_v55  ;;  %v741_v9 = vsel %vm739_vm1, %v740_v8, %v738_v35  ;;  %v962_v58 = vsel %vm961_vm2, %v1964_v33, %v960_v5  ;;  %v1518_v6 = vpop.eup %1517  ;;  %vm947_vm6 = vcmp.eq.f32.partialorder %v2013_v13, inf  ;;  %vm949_vm7 = vcmp.eq.f32.partialorder %v2013_v13, 0.0 }
 0x117   : > { %1238 = vst [vmem:[%s1993_s13 + $0x108] sm:$0xff] %v1174_v0  ;;  %v1147_v51 = vmul.f32 %v741_v9, %v1795_v36  ;;  %v965_v32 = vsel %vm963_vm3, %v964_v4, %v962_v58  ;;  %v722_v18 = vmul.f32 %v1518_v6, %v1982_v54  ;;  %v1520_v33 = vpop.eup %1519  ;;  %v950_v36 = vand.u32 2147483648, %v2013_v13 }
 0x118   : > { %v1179_v49 = vmul.f32 %v965_v32, %v1801_v40  ;;  %v2129_v1 = vadd.f32 %v1905_v48, %v1952_v27  ;;  %v2133_v15 = vadd.f32 %v1984_v59, %v1905_v48  ;;  %v946_v2 = vmul.f32 %v1520_v33, %v2013_v13 }
 0x119   : > { %1211 = vst [vmem:[%s1993_s13 + $0x30] sm:$0xff] %v1147_v51  ;;  %v2135_v40 = vpop.f32.mrb[16].mxu0  ;;  %v2137_v63 = vpop.f32.mrb[16].mxu1  ;;  %v724_v19 = vsel %vm723_vm4, %v1982_v54, %v722_v18  ;;  %vm744_vm8 = vcmp.eq.f32.partialorder %v2049_v31, inf  ;;  %v2147_v27 = vadd.f32 %v1986_v62, %v1905_v48  ;;  %vm746_vm9 = vcmp.eq.f32.partialorder %v2049_v31, 0.0 }
 0x11a   : > { %1243 = vst [vmem:[%s1993_s13 + $0x130] sm:$0xff] %v1179_v49  ;;  %v2149_v20 = vpop.f32.mrb[17].mxu0  ;;  %v2151_v59 = vpop.f32.mrb[17].mxu1  ;;  %v727_v55 = vsel %vm725_vm5, %v726_v14, %v724_v19  ;;  %1527 = vrsqrt.f32 %v2129_v1  ;;  %v2159_v21 = vadd.f32 %v1905_v48, %v2002_v11  ;;  %v948_v54 = vsel %vm947_vm6, %v2013_v13, %v946_v2 }
 0x11b   : > { %v2161_v3 = vpop.f32.mrb[18].mxu0  ;;  %v2163_v62 = vpop.f32.mrb[18].mxu1  ;;  %v1145_v0 = vmul.f32 %v727_v55, %v1767_v22  ;;  %v747_v8 = vand.u32 2147483648, %v2049_v31  ;;  %1529 = vrsqrt.f32 %v2133_v15  ;;  %v951_v4 = vsel %vm949_vm7, %v950_v36, %v948_v54 }
 0x11c   : > { %v2171_v5 = vpop.f32.mrb[19].mxu0  ;;  %v2173_v35 = vpop.f32.mrb[19].mxu1  ;;  %vm968_vm10 = vcmp.eq.f32.partialorder %v2060_v50, inf  ;;  %vm970_vm11 = vcmp.eq.f32.partialorder %v2060_v50, 0.0  ;;  %v2181_v22 = vadd.f32 %v1905_v48, %v2004_v30  ;;  %v1177_v9 = vmul.f32 %v951_v4, %v1773_v24 }
 0x11d   : > { %v1522_v11 = vpop.eup %1521  ;;  %1209 = vst [vmem:[%s1993_s13 + $0x20] sm:$0xff] %v1145_v0  ;;  %v971_v6 = vand.u32 2147483648, %v2060_v50  ;;  %1531 = vrsqrt.f32 %v2147_v27  ;;  %vm730_vm12 = vcmp.eq.f32.partialorder %v2070_v38, inf  ;;  %vm732_vm13 = vcmp.eq.f32.partialorder %v2070_v38, 0.0 }
 0x11e   : > { %v743_v58 = vmul.f32 %v1522_v11, %v2049_v31  ;;  %v1524_v51 = vpop.eup %1523  ;;  %1533 = vrsqrt.f32 %v2159_v21  ;;  %v2193_v30 = vadd.f32 %v2015_v39, %v1905_v48  ;;  %1241 = vst [vmem:[%s1993_s13 + $0x120] sm:$0xff] %v1177_v9  ;;  %v733_v32 = vand.u32 2147483648, %v2070_v38 }
 0x11f   : > { %v967_v13 = vmul.f32 %v1524_v51, %v2060_v50  ;;  %vm954_vm14 = vcmp.eq.f32.partialorder %v2129_v1, inf  ;;  %v1526_v49 = vpop.eup %1525  ;;  %vm956_vm15 = vcmp.eq.f32.partialorder %v2129_v1, 0.0  ;;  %v957_v39 = vand.u32 2147483648, %v2129_v1 }
 0x120   : > { %v745_v24 = vsel %vm744_vm8, %v2049_v31, %v743_v58  ;;  %1535 = vrsqrt.f32 %v2181_v22  ;;  %v729_v31 = vmul.f32 %v1526_v49, %v2070_v38  ;;  %vm765_vm0 = vcmp.eq.f32.partialorder %v2133_v15, inf }
 0x121   : > { %v748_v18 = vsel %vm746_vm9, %v747_v8, %v745_v24  ;;  %v2207_v14 = vpop.f32.mrb[20].mxu0  ;;  %v2209_v33 = vpop.f32.mrb[20].mxu1  ;;  %v969_v19 = vsel %vm968_vm10, %v2060_v50, %v967_v13  ;;  %vm767_vm1 = vcmp.eq.f32.partialorder %v2133_v15, 0.0  ;;  %v768_v54 = vand.u32 2147483648, %v2133_v15 }
 0x122   : > { %v1148_v36 = vmul.f32 %v748_v18, %v1798_v37  ;;  %v2217_v2 = vpop.f32.mrb[21].mxu0  ;;  %v2219_v55 = vpop.f32.mrb[21].mxu1  ;;  %v972_v0 = vsel %vm970_vm11, %v971_v6, %v969_v19  ;;  %1537 = vrsqrt.f32 %v2193_v30  ;;  %v731_v4 = vsel %vm730_vm12, %v2070_v38, %v729_v31 }
 0x123   : > { %v2226_v37 = vpop.f32.mrb[22].mxu0  ;;  %v2228_v8 = vpop.f32.mrb[22].mxu1  ;;  %v1180_v11 = vmul.f32 %v972_v0, %v1804_v41  ;;  %vm989_vm2 = vcmp.eq.f32.partialorder %v2147_v27, inf  ;;  %v2238_v50 = vadd.f32 %v2017_v46, %v1905_v48  ;;  %v734_v51 = vsel %vm732_vm13, %v733_v32, %v731_v4 }
 0x124   : > { %1212 = vst [vmem:[%s1993_s13 + $0x38] sm:$0xff] %v1148_v36  ;;  %v2240_v9 = vpop.f32.mrb[23].mxu0  ;;  %v2242_v58 = vpop.f32.mrb[23].mxu1  ;;  %vm991_vm3 = vcmp.eq.f32.partialorder %v2147_v27, 0.0  ;;  %v2249_v41 = vadd.f32 %v1905_v48, %v2026_v12  ;;  %v2253_v24 = vadd.f32 %v1905_v48, %v2028_v17  ;;  %v1146_v13 = vmul.f32 %v734_v51, %v1770_v23 }
 0x125   : > { %v1528_v6 = vpop.eup %1527  ;;  %1244 = vst [vmem:[%s1993_s13 + $0x138] sm:$0xff] %v1180_v11  ;;  %v992_v38 = vand.u32 2147483648, %v2147_v27  ;;  %1539 = vrsqrt.f32 %v2238_v50  ;;  %vm751_vm4 = vcmp.eq.f32.partialorder %v2159_v21, inf  ;;  %vm753_vm5 = vcmp.eq.f32.partialorder %v2159_v21, 0.0 }
 0x126   : > { %v1530_v46 = vpop.eup %1529  ;;  %v953_v49 = vmul.f32 %v1528_v6, %v2129_v1  ;;  %1541 = vrsqrt.f32 %v2249_v41  ;;  %1210 = vst [vmem:[%s1993_s13 + $0x28] sm:$0xff] %v1146_v13  ;;  %v754_v17 = vand.u32 2147483648, %v2159_v21  ;;  %vm975_vm6 = vcmp.eq.f32.partialorder %v2181_v22, inf }
 0x127   : > { %v764_v32 = vmul.f32 %v1530_v46, %v2133_v15  ;;  %v1532_v12 = vpop.eup %1531  ;;  %v2272_v18 = vadd.f32 %v2072_v52, %v1905_v48  ;;  %1543 = vrsqrt.f32 %v2253_v24  ;;  %vm977_vm7 = vcmp.eq.f32.partialorder %v2181_v22, 0.0 }
 0x128   : > { %v955_v23 = vsel %vm954_vm14, %v2129_v1, %v953_v49  ;;  %v1534_v36 = vpop.eup %1533  ;;  %v988_v0 = vmul.f32 %v1532_v12, %v2147_v27  ;;  %vm772_vm8 = vcmp.eq.f32.partialorder %v2193_v30, inf  ;;  %vm774_vm9 = vcmp.eq.f32.partialorder %v2193_v30, 0.0 }
 0x129   : > { %v958_v19 = vsel %vm956_vm15, %v957_v39, %v955_v23  ;;  %v766_v31 = vsel %vm765_vm0, %v2133_v15, %v764_v32  ;;  %v2281_v11 = vpop.f32.mrb[24].mxu0  ;;  %v2283_v4 = vpop.f32.mrb[24].mxu1  ;;  %v750_v1 = vmul.f32 %v1534_v36, %v2159_v21  ;;  %1545 = vrsqrt.f32 %v2272_v18 }
 0x12a   : > { %v1178_v52 = vmul.f32 %v958_v19, %v1776_v25  ;;  %v769_v6 = vsel %vm767_vm1, %v768_v54, %v766_v31  ;;  %v2290_v39 = vpop.f32.mrb[25].mxu0  ;;  %v2292_v51 = vpop.f32.mrb[25].mxu1  ;;  %v990_v49 = vsel %vm989_vm2, %v2147_v27, %v988_v0  ;;  %v978_v25 = vand.u32 2147483648, %v2181_v22 }
 0x12b   : > { %v1536_v46 = vpop.eup %1535  ;;  %v1151_v13 = vmul.f32 %v769_v6, %v1835_v56  ;;  %v2300_v15 = vpop.f32.mrb[26].mxu0  ;;  %v993_v32 = vsel %vm991_vm3, %v992_v38, %v990_v49  ;;  %v752_v56 = vsel %vm751_vm4, %v2159_v21, %v750_v1  ;;  %v775_v38 = vand.u32 2147483648, %v2193_v30 }
 0x12c   : > { %v2302_v54 = vpop.f32.mrb[26].mxu1  ;;  %1242 = vst [vmem:[%s1993_s13 + $0x128] sm:$0xff] %v1178_v52  ;;  %v974_v12 = vmul.f32 %v1536_v46, %v2181_v22  ;;  %v2312_v23 = vpop.f32.mrb[27].mxu0  ;;  %v1183_v31 = vmul.f32 %v993_v32, %v1841_v60  ;;  %v755_v27 = vsel %vm753_vm5, %v754_v17, %v752_v56  ;;  %vm996_vm10 = vcmp.eq.f32.partialorder %v2238_v50, inf }
 0x12d   : > { %v2314_v36 = vpop.f32.mrb[27].mxu1  ;;  %v1538_v19 = vpop.eup %1537  ;;  %1215 = vst [vmem:[%s1993_s13 + $0x50] sm:$0xff] %v1151_v13  ;;  %v1149_v0 = vmul.f32 %v755_v27, %v1807_v42  ;;  %vm998_vm11 = vcmp.eq.f32.partialorder %v2238_v50, 0.0  ;;  %v2334_v21 = vadd.f32 %v2074_v53, %v1905_v48  ;;  %v2338_v42 = vadd.f32 %v1905_v48, %v2083_v47 }
 0x12e   : > { %v976_v52 = vsel %vm975_vm6, %v2181_v22, %v974_v12  ;;  %v771_v6 = vmul.f32 %v1538_v19, %v2193_v30  ;;  %1247 = vst [vmem:[%s1993_s13 + $0x150] sm:$0xff] %v1183_v31  ;;  %v999_v46 = vand.u32 2147483648, %v2238_v50  ;;  %vm758_vm12 = vcmp.eq.f32.partialorder %v2249_v41, inf }
 0x12f   : > { %v979_v60 = vsel %vm977_vm7, %v978_v25, %v976_v52  ;;  %v1540_v17 = vpop.eup %1539  ;;  %1213 = vst [vmem:[%s1993_s13 + $0x40] sm:$0xff] %v1149_v0  ;;  %1547 = vrsqrt.f32 %v2334_v21  ;;  %v2353_v47 = vadd.f32 %v1905_v48, %v2085_v26  ;;  %vm760_vm13 = vcmp.eq.f32.partialorder %v2249_v41, 0.0 }
 0x130   : > { %v1181_v1 = vmul.f32 %v979_v60, %v1813_v44  ;;  %v773_v22 = vsel %vm772_vm8, %v2193_v30, %v771_v6  ;;  %v1542_v13 = vpop.eup %1541  ;;  %v995_v49 = vmul.f32 %v1540_v17, %v2238_v50  ;;  %v761_v30 = vand.u32 2147483648, %v2249_v41 }
 0x131   : > { %v776_v53 = vsel %vm774_vm9, %v775_v38, %v773_v22  ;;  %v2355_v44 = vpop.f32.mrb[28].mxu0  ;;  %v2357_v25 = vpop.f32.mrb[28].mxu1  ;;  %v757_v56 = vmul.f32 %v1542_v13, %v2249_v41  ;;  %vm982_vm14 = vcmp.eq.f32.partialorder %v2253_v24, inf  ;;  %1549 = vrsqrt.f32 %v2338_v42 }
 0x132   : > { %1245 = vst [vmem:[%s1993_s13 + $0x140] sm:$0xff] %v1181_v1  ;;  %v1152_v32 = vmul.f32 %v776_v53, %v1838_v57  ;;  %v2364_v12 = vpop.f32.mrb[29].mxu0  ;;  %v2366_v19 = vpop.f32.mrb[29].mxu1  ;;  %v997_v31 = vsel %vm996_vm10, %v2238_v50, %v995_v49  ;;  %v2375_v57 = vadd.f32 %v2093_v10, %v1905_v48  ;;  %v2390_v60 = vadd.f32 %v2095_v29, %v1905_v48 }
 0x133   : > { %v1544_v26 = vpop.eup %1543  ;;  %v2377_v27 = vpop.f32.mrb[30].mxu0  ;;  %v1000_v0 = vsel %vm998_vm11, %v999_v46, %v997_v31  ;;  %v759_v52 = vsel %vm758_vm12, %v2249_v41, %v757_v56  ;;  %v985_v22 = vand.u32 2147483648, %v2253_v24  ;;  %1551 = vrsqrt.f32 %v2353_v47 }
 0x134   : > { %v2379_v38 = vpop.f32.mrb[30].mxu1  ;;  %1216 = vst [vmem:[%s1993_s13 + $0x58] sm:$0xff] %v1152_v32  ;;  %v981_v6 = vmul.f32 %v1544_v26, %v2253_v24  ;;  %v2392_v10 = vpop.f32.mrb[31].mxu0  ;;  %v1184_v1 = vmul.f32 %v1000_v0, %v1844_v61  ;;  %v762_v50 = vsel %vm760_vm13, %v761_v30, %v759_v52  ;;  %vm984_vm15 = vcmp.eq.f32.partialorder %v2253_v24, 0.0 }
 0x135   : > { %v2394_v17 = vpop.f32.mrb[31].mxu1  ;;  %v1546_v46 = vpop.eup %1545  ;;  %v1150_v13 = vmul.f32 %v762_v50, %v1810_v43  ;;  %vm793_vm0 = vcmp.eq.f32.partialorder %v2272_v18, inf  ;;  %1553 = vrsqrt.f32 %v2375_v57  ;;  %vm795_vm1 = vcmp.eq.f32.partialorder %v2272_v18, 0.0 }
 0x136   : > { %v983_v29 = vsel %vm982_vm14, %v2253_v24, %v981_v6  ;;  %1248 = vst [vmem:[%s1993_s13 + $0x158] sm:$0xff] %v1184_v1  ;;  %v792_v61 = vmul.f32 %v1546_v46, %v2272_v18  ;;  %v796_v43 = vand.u32 2147483648, %v2272_v18  ;;  %1555 = vrsqrt.f32 %v2390_v60 }
 0x137   : > { %v986_v53 = vsel %vm984_vm15, %v985_v22, %v983_v29  ;;  %1214 = vst [vmem:[%s1993_s13 + $0x48] sm:$0xff] %v1150_v13  ;;  %vm1017_vm2 = vcmp.eq.f32.partialorder %v2334_v21, inf  ;;  %vm1019_vm3 = vcmp.eq.f32.partialorder %v2334_v21, 0.0  ;;  %v1020_v24 = vand.u32 2147483648, %v2334_v21 }
 0x138   : > { %v1182_v41 = vmul.f32 %v986_v53, %v1816_v45  ;;  %v794_v49 = vsel %vm793_vm0, %v2272_v18, %v792_v61  ;;  %v2422_v45 = vadd.f32 %v1905_v48, %v2102_v7  ;;  %v2426_v56 = vadd.f32 %v1905_v48, %v2104_v34  ;;  %v1625_v53 = vld [vmem:[%s1717_s24 + $0x60] sm:$0xff] }
 0x139   : > { %v797_v32 = vsel %vm795_vm1, %v796_v43, %v794_v49  ;;  %v2430_v18 = vadd.f32 %v2135_v40, %v1905_v48  ;;  %v1548_v30 = vpop.eup %1547  ;;  %vm779_vm4 = vcmp.eq.f32.partialorder %v2338_v42, inf  ;;  %vm781_vm5 = vcmp.eq.f32.partialorder %v2338_v42, 0.0 }
 0x13a   : > { %1246 = vst [vmem:[%s1993_s13 + $0x148] sm:$0xff] %v1182_v41  ;;  %v1155_v26 = vmul.f32 %v797_v32, %v1859_v16  ;;  %v782_v31 = vand.u32 2147483648, %v2338_v42  ;;  %v1016_v7 = vmul.f32 %v1548_v30, %v2334_v21  ;;  %vm1003_vm6 = vcmp.eq.f32.partialorder %v2353_v47, inf }
 0x13b   : > { %1557 = vrsqrt.f32 %v2422_v45  ;;  %v2441_v34 = vadd.f32 %v2137_v63, %v1905_v48  ;;  %v1550_v40 = vpop.eup %1549  ;;  %vm1005_vm7 = vcmp.eq.f32.partialorder %v2353_v47, 0.0  ;;  %v1006_v16 = vand.u32 2147483648, %v2353_v47 }
 0x13c   : > { %1219 = vst [vmem:[%s1993_s13 + $0x70] sm:$0xff] %v1155_v26  ;;  %vm800_vm8 = vcmp.eq.f32.partialorder %v2375_v57, inf  ;;  %1559 = vrsqrt.f32 %v2426_v56  ;;  %v1018_v0 = vsel %vm1017_vm2, %v2334_v21, %v1016_v7  ;;  %v778_v52 = vmul.f32 %v1550_v40, %v2338_v42  ;;  %v1627_v40 = vld [vmem:[%s1717_s24 + $0x78] sm:$0xff] }
 0x13d   : > { %1561 = vrsqrt.f32 %v2430_v18  ;;  %v2455_v63 = vadd.f32 %v1905_v48, %v2149_v20  ;;  %v1552_v6 = vpop.eup %1551  ;;  %v1021_v1 = vsel %vm1019_vm3, %v1020_v24, %v1018_v0  ;;  %vm802_vm9 = vcmp.eq.f32.partialorder %v2375_v57, 0.0  ;;  %v1626_v24 = vld [vmem:[%s1717_s24 + $0x160] sm:$0xff] }
 0x13e   : > { %v803_v50 = vand.u32 2147483648, %v2375_v57  ;;  %v2463_v22 = vadd.f32 %v1905_v48, %v2151_v59  ;;  %v1187_v46 = vmul.f32 %v1021_v1, %v1863_v28  ;;  %v780_v20 = vsel %vm779_vm4, %v2338_v42, %v778_v52  ;;  %v1628_v1 = vld [vmem:[%s1717_s24 + $0x178] sm:$0xff] }
 0x13f   : > { %v1002_v13 = vmul.f32 %v1552_v6, %v2353_v47  ;;  %1563 = vrsqrt.f32 %v2441_v34  ;;  %v1554_v21 = vpop.eup %1553  ;;  %v783_v29 = vsel %vm781_vm5, %v782_v31, %v780_v20  ;;  %vm1024_vm10 = vcmp.eq.f32.partialorder %v2390_v60, inf }
 0x140   : > { %vm1026_vm11 = vcmp.eq.f32.partialorder %v2390_v60, 0.0  ;;  %v1027_v28 = vand.u32 2147483648, %v2390_v60  ;;  %v1556_v59 = vpop.eup %1555  ;;  %1251 = vst [vmem:[%s1993_s13 + $0x170] sm:$0xff] %v1187_v46  ;;  %v1153_v61 = vmul.f32 %v1625_v53, %v783_v29  ;;  %v799_v43 = vmul.f32 %v1554_v21, %v2375_v57  ;;  %v1629_v53 = vld [vmem:[%s1717_s24 + $0x68] sm:$0xff] }
 0x141   : > { %v1004_v41 = vsel %vm1003_vm6, %v2353_v47, %v1002_v13  ;;  %1565 = vrsqrt.f32 %v2455_v63  ;;  %v1023_v49 = vmul.f32 %v1556_v59, %v2390_v60  ;;  %vm786_vm12 = vcmp.eq.f32.partialorder %v2422_v45, inf }
 0x142   : > { %v1007_v42 = vsel %vm1005_vm7, %v1006_v16, %v1004_v41  ;;  %vm788_vm13 = vcmp.eq.f32.partialorder %v2422_v45, 0.0  ;;  %1217 = vst [vmem:[%s1993_s13 + $0x60] sm:$0xff] %v1153_v61  ;;  %v801_v30 = vsel %vm800_vm8, %v2375_v57, %v799_v43  ;;  %v789_v26 = vand.u32 2147483648, %v2422_v45 }
 0x143   : > { %v1185_v32 = vmul.f32 %v1626_v24, %v1007_v42  ;;  %1567 = vrsqrt.f32 %v2463_v22  ;;  %v804_v47 = vsel %vm802_vm9, %v803_v50, %v801_v30  ;;  %v1025_v31 = vsel %vm1024_vm10, %v2390_v60, %v1023_v49  ;;  %v1630_v49 = vld [vmem:[%s1717_s24 + $0x168] sm:$0xff] }
 0x144   : > { %vm1010_vm14 = vcmp.eq.f32.partialorder %v2426_v56, inf  ;;  %vm1012_vm15 = vcmp.eq.f32.partialorder %v2426_v56, 0.0  ;;  %v1156_v16 = vmul.f32 %v1627_v40, %v804_v47  ;;  %v1028_v0 = vsel %vm1026_vm11, %v1027_v28, %v1025_v31 }
 0x145   : > { %v1558_v7 = vpop.eup %1557  ;;  %1249 = vst [vmem:[%s1993_s13 + $0x160] sm:$0xff] %v1185_v32  ;;  %v1013_v57 = vand.u32 2147483648, %v2426_v56  ;;  %v2509_v52 = vadd.f32 %v2161_v3, %v1905_v48  ;;  %v1188_v50 = vmul.f32 %v1628_v1, %v1028_v0  ;;  %vm821_vm0 = vcmp.eq.f32.partialorder %v2430_v18, inf  ;;  %v1632_v0 = vld [vmem:[%s1717_s24 + $0x190] sm:$0xff] }
 0x146   : > { %v1560_v6 = vpop.eup %1559  ;;  %v785_v46 = vmul.f32 %v1558_v7, %v2422_v45  ;;  %v2516_v20 = vadd.f32 %v2163_v62, %v1905_v48  ;;  %1220 = vst [vmem:[%s1993_s13 + $0x78] sm:$0xff] %v1156_v16  ;;  %vm823_vm1 = vcmp.eq.f32.partialorder %v2430_v18, 0.0  ;;  %v2524_v3 = vadd.f32 %v1905_v48, %v2171_v5 }
 0x147   : > { %v1562_v60 = vpop.eup %1561  ;;  %v1009_v13 = vmul.f32 %v1560_v6, %v2426_v56  ;;  %1569 = vrsqrt.f32 %v2509_v52  ;;  %1252 = vst [vmem:[%s1993_s13 + $0x178] sm:$0xff] %v1188_v50  ;;  %v824_v29 = vand.u32 2147483648, %v2430_v18  ;;  %vm1045_vm2 = vcmp.eq.f32.partialorder %v2441_v34, inf }
 0x148   : > { %v787_v62 = vsel %vm786_vm12, %v2422_v45, %v785_v46  ;;  %v820_v21 = vmul.f32 %v1562_v60, %v2430_v18  ;;  %1571 = vrsqrt.f32 %v2516_v20  ;;  %vm1047_vm3 = vcmp.eq.f32.partialorder %v2441_v34, 0.0 }
 0x149   : > { %v1564_v28 = vpop.eup %1563  ;;  %v790_v59 = vsel %vm788_vm13, %v789_v26, %v787_v62  ;;  %v1011_v5 = vsel %vm1010_vm14, %v2426_v56, %v1009_v13  ;;  %v1048_v30 = vand.u32 2147483648, %v2441_v34  ;;  %1573 = vrsqrt.f32 %v2524_v3  ;;  %v1631_v56 = vld [vmem:[%s1717_s24 + $0x90] sm:$0xff] }
 0x14a   : > { %v1154_v61 = vmul.f32 %v1629_v53, %v790_v59  ;;  %v1014_v41 = vsel %vm1012_vm15, %v1013_v57, %v1011_v5  ;;  %v822_v45 = vsel %vm821_vm0, %v2430_v18, %v820_v21  ;;  %v1044_v43 = vmul.f32 %v1564_v28, %v2441_v34  ;;  %v1634_v21 = vld [vmem:[%s1717_s24 + $0x180] sm:$0xff] }
 0x14b   : > { %v1566_v42 = vpop.eup %1565  ;;  %v1186_v24 = vmul.f32 %v1630_v49, %v1014_v41  ;;  %v825_v32 = vsel %vm823_vm1, %v824_v29, %v822_v45  ;;  %vm807_vm4 = vcmp.eq.f32.partialorder %v2455_v63, inf  ;;  %vm809_vm5 = vcmp.eq.f32.partialorder %v2455_v63, 0.0 }
 0x14c   : > { %1218 = vst [vmem:[%s1993_s13 + $0x68] sm:$0xff] %v1154_v61  ;;  %v1159_v26 = vmul.f32 %v1631_v56, %v825_v32  ;;  %v1046_v47 = vsel %vm1045_vm2, %v2441_v34, %v1044_v43  ;;  %v806_v31 = vmul.f32 %v1566_v42, %v2455_v63  ;;  %v810_v40 = vand.u32 2147483648, %v2455_v63  ;;  %v1635_v42 = vld [vmem:[%s1717_s24 + $0x98] sm:$0xff] }
 0x14d   : > { %v1568_v7 = vpop.eup %1567  ;;  %1250 = vst [vmem:[%s1993_s13 + $0x168] sm:$0xff] %v1186_v24  ;;  %v1049_v18 = vsel %vm1047_vm3, %v1048_v30, %v1046_v47  ;;  %v2566_v16 = vadd.f32 %v1905_v48, %v2173_v35  ;;  %v2574_v34 = vadd.f32 %v2207_v14, %v1905_v48  ;;  %vm1031_vm6 = vcmp.eq.f32.partialorder %v2463_v22, inf  ;;  %v1633_v35 = vld [vmem:[%s1717_s24 + $0x80] sm:$0xff] }
 0x14e   : > { %1223 = vst [vmem:[%s1993_s13 + $0x90] sm:$0xff] %v1159_v26  ;;  %v1191_v57 = vmul.f32 %v1632_v0, %v1049_v18  ;;  %v808_v6 = vsel %vm807_vm4, %v2455_v63, %v806_v31  ;;  %v1030_v1 = vmul.f32 %v1568_v7, %v2463_v22  ;;  %v1034_v46 = vand.u32 2147483648, %v2463_v22  ;;  %v1637_v31 = vld [vmem:[%s1717_s24 + $0x88] sm:$0xff] }
 0x14f   : > { %v811_v50 = vsel %vm809_vm5, %v810_v40, %v808_v6  ;;  %1575 = vrsqrt.f32 %v2566_v16  ;;  %vm1033_vm7 = vcmp.eq.f32.partialorder %v2463_v22, 0.0  ;;  %vm828_vm8 = vcmp.eq.f32.partialorder %v2509_v52, inf  ;;  %v2652_v6 = vld [vmem:[%s2960_s2] ss:$0 sm:$0xff] }
 0x150   : > { %1255 = vst [vmem:[%s1993_s13 + $0x190] sm:$0xff] %v1191_v57  ;;  %v1157_v60 = vmul.f32 %v1633_v35, %v811_v50  ;;  %v1032_v63 = vsel %vm1031_vm6, %v2463_v22, %v1030_v1  ;;  %1577 = vrsqrt.f32 %v2574_v34  ;;  %vm830_vm9 = vcmp.eq.f32.partialorder %v2509_v52, 0.0 }
 0x151   : > { %v1570_v14 = vpop.eup %1569  ;;  %v1035_v13 = vsel %vm1033_vm7, %v1034_v46, %v1032_v63  ;;  %v2591_v59 = vadd.f32 %v2209_v33, %v1905_v48  ;;  %v2595_v22 = vadd.f32 %v1905_v48, %v2217_v2  ;;  %v831_v5 = vand.u32 2147483648, %v2509_v52  ;;  %v1639_v63 = vld [vmem:[%s1717_s24 + $0x188] sm:$0xff] }
 0x152   : > { %v1572_v62 = vpop.eup %1571  ;;  %1221 = vst [vmem:[%s1993_s13 + $0x80] sm:$0xff] %v1157_v60  ;;  %v1189_v29 = vmul.f32 %v1634_v21, %v1035_v13  ;;  %v827_v28 = vmul.f32 %v1570_v14, %v2509_v52  ;;  %vm1052_vm10 = vcmp.eq.f32.partialorder %v2516_v20, inf  ;;  %v2602_v61 = vadd.f32 %v1905_v48, %v2219_v55  ;;  %v1640_v13 = vld [vmem:[%s1717_s24 + $0xb0] sm:$0xff] }
 0x153   : > { %v1051_v53 = vmul.f32 %v1572_v62, %v2516_v20  ;;  %vm1054_vm11 = vcmp.eq.f32.partialorder %v2516_v20, 0.0  ;;  %v1055_v41 = vand.u32 2147483648, %v2516_v20  ;;  %1579 = vrsqrt.f32 %v2591_v59  ;;  %v1574_v2 = vpop.eup %1573 }
 0x154   : > { %1253 = vst [vmem:[%s1993_s13 + $0x180] sm:$0xff] %v1189_v29  ;;  %v829_v33 = vsel %vm828_vm8, %v2509_v52, %v827_v28  ;;  %1581 = vrsqrt.f32 %v2595_v22  ;;  %v2615_v55 = vadd.f32 %v2226_v37, %v1905_v48  ;;  %v813_v32 = vmul.f32 %v1574_v2, %v2524_v3  ;;  %v1636_v52 = vld [vmem:[%s1717_s24 + $0x198] sm:$0xff] }
 0x155   : > { %v832_v45 = vsel %vm830_vm9, %v831_v5, %v829_v33  ;;  %v1053_v43 = vsel %vm1052_vm10, %v2516_v20, %v1051_v53  ;;  %v2621_v30 = vadd.f32 %v2228_v8, %v1905_v48  ;;  %vm814_vm12 = vcmp.eq.f32.partialorder %v2524_v3, inf }
 0x156   : > { %v1160_v49 = vmul.f32 %v1635_v42, %v832_v45  ;;  %v1056_v24 = vsel %vm1054_vm11, %v1055_v41, %v1053_v43  ;;  %v817_v20 = vand.u32 2147483648, %v2524_v3  ;;  %1583 = vrsqrt.f32 %v2602_v61  ;;  %v1641_v43 = vld [vmem:[%s1717_s24 + $0x1b0] sm:$0xff] }
 0x157   : > { %v1192_v56 = vmul.f32 %v1636_v52, %v1056_v24  ;;  %v815_v37 = vsel %vm814_vm12, %v2524_v3, %v813_v32  ;;  %vm816_vm13 = vcmp.eq.f32.partialorder %v2524_v3, 0.0  ;;  %vm1038_vm14 = vcmp.eq.f32.partialorder %v2566_v16, inf  ;;  %v1642_v24 = vld [vmem:[%s1717_s24 + $0xa0] sm:$0xff] }
 0x158   : > { %1224 = vst [vmem:[%s1993_s13 + $0x98] sm:$0xff] %v1160_v49  ;;  %vm1040_vm15 = vcmp.eq.f32.partialorder %v2566_v16, 0.0  ;;  %v818_v8 = vsel %vm816_vm13, %v817_v20, %v815_v37  ;;  %v1041_v26 = vand.u32 2147483648, %v2566_v16  ;;  %vm849_vm0 = vcmp.eq.f32.partialorder %v2574_v34, inf  ;;  %v1643_v37 = vld [vmem:[%s1717_s24 + $0x1a0] sm:$0xff] }
 0x159   : > { %v1576_v48 = vpop.eup %1575  ;;  %1256 = vst [vmem:[%s1993_s13 + $0x198] sm:$0xff] %v1192_v56  ;;  %1585 = vrsqrt.f32 %v2615_v55  ;;  %v1158_v7 = vmul.f32 %v1637_v31, %v818_v8  ;;  %vm851_vm1 = vcmp.eq.f32.partialorder %v2574_v34, 0.0  ;;  %v852_v40 = vand.u32 2147483648, %v2574_v34 }
 0x15a   : > { %v1578_v47 = vpop.eup %1577  ;;  %v1037_v18 = vmul.f32 %v1576_v48, %v2566_v16  ;;  %1587 = vrsqrt.f32 %v2621_v30  ;;  %vm1073_vm2 = vcmp.eq.f32.partialorder %v2591_v59, inf  ;;  %vm1075_vm3 = vcmp.eq.f32.partialorder %v2591_v59, 0.0 }
 0x15b   : > { %v848_v3 = vmul.f32 %v1578_v47, %v2574_v34  ;;  %1222 = vst [vmem:[%s1993_s13 + $0x88] sm:$0xff] %v1158_v7  ;;  %v1076_v57 = vand.u32 2147483648, %v2591_v59  ;;  %v2656_v1 = vadd.f32 %v2652_v6, %v2240_v9  ;;  %v2660_v50 = vadd.f32 %v2652_v6, %v2242_v58  ;;  %v1644_v7 = vld [vmem:[%s1717_s24 + $0xb8] sm:$0xff] }
 0x15c   : > { %v1039_v0 = vsel %vm1038_vm14, %v2566_v16, %v1037_v18  ;;  %vm835_vm4 = vcmp.eq.f32.partialorder %v2595_v22, inf  ;;  %v2670_v60 = vadd.f32 %v2652_v6, %v2281_v11  ;;  %vm837_vm5 = vcmp.eq.f32.partialorder %v2595_v22, 0.0 }
 0x15d   : > { %v1042_v46 = vsel %vm1040_vm15, %v1041_v26, %v1039_v0  ;;  %v850_v35 = vsel %vm849_vm0, %v2574_v34, %v848_v3  ;;  %v1580_v9 = vpop.eup %1579  ;;  %1589 = vrsqrt.f32 %v2656_v1  ;;  %v838_v29 = vand.u32 2147483648, %v2595_v22 }
 0x15e   : > { %v1190_v14 = vmul.f32 %v1639_v63, %v1042_v46  ;;  %v853_v58 = vsel %vm851_vm1, %v852_v40, %v850_v35  ;;  %v1582_v16 = vpop.eup %1581  ;;  %v1072_v21 = vmul.f32 %v1580_v9, %v2591_v59  ;;  %v2682_v11 = vadd.f32 %v2652_v6, %v2283_v4 }
 0x15f   : > { %v1163_v62 = vmul.f32 %v1640_v13, %v853_v58  ;;  %v834_v34 = vmul.f32 %v1582_v16, %v2595_v22  ;;  %vm1059_vm6 = vcmp.eq.f32.partialorder %v2602_v61, inf  ;;  %vm1061_vm7 = vcmp.eq.f32.partialorder %v2602_v61, 0.0 }
 0x160   : > { %1254 = vst [vmem:[%s1993_s13 + $0x188] sm:$0xff] %v1190_v14  ;;  %1591 = vrsqrt.f32 %v2660_v50  ;;  %v1584_v28 = vpop.eup %1583  ;;  %v1074_v5 = vsel %vm1073_vm2, %v2591_v59, %v1072_v21  ;;  %v1062_v4 = vand.u32 2147483648, %v2602_v61  ;;  %vm856_vm8 = vcmp.eq.f32.partialorder %v2615_v55, inf }
 0x161   : > { %1227 = vst [vmem:[%s1993_s13 + $0xb0] sm:$0xff] %v1163_v62  ;;  %1593 = vrsqrt.f32 %v2670_v60  ;;  %v1077_v53 = vsel %vm1075_vm3, %v1076_v57, %v1074_v5  ;;  %v836_v33 = vsel %vm835_vm4, %v2595_v22, %v834_v34  ;;  %v1058_v41 = vmul.f32 %v1584_v28, %v2602_v61  ;;  %v1646_v62 = vld [vmem:[%s1717_s24 + $0xa8] sm:$0xff] }
 0x162   : > { %v2704_v2 = vadd.f32 %v2652_v6, %v2290_v39  ;;  %v1195_v42 = vmul.f32 %v1641_v43, %v1077_v53  ;;  %v839_v59 = vsel %vm837_vm5, %v838_v29, %v836_v33  ;;  %vm858_vm9 = vcmp.eq.f32.partialorder %v2615_v55, 0.0  ;;  %v1647_v5 = vld [vmem:[%s1717_s24 + $0x1a8] sm:$0xff] }
 0x163   : > { %v1586_v45 = vpop.eup %1585  ;;  %1595 = vrsqrt.f32 %v2682_v11  ;;  %v1161_v32 = vmul.f32 %v1642_v24, %v839_v59  ;;  %v1060_v39 = vsel %vm1059_vm6, %v2602_v61, %v1058_v41  ;;  %v859_v56 = vand.u32 2147483648, %v2615_v55 }
 0x164   : > { %v1588_v49 = vpop.eup %1587  ;;  %v855_v52 = vmul.f32 %v1586_v45, %v2615_v55  ;;  %1259 = vst [vmem:[%s1993_s13 + $0x1b0] sm:$0xff] %v1195_v42  ;;  %v1063_v22 = vsel %vm1061_vm7, %v1062_v4, %v1060_v39  ;;  %vm1080_vm10 = vcmp.eq.f32.partialorder %v2621_v30, inf  ;;  %vm1082_vm11 = vcmp.eq.f32.partialorder %v2621_v30, 0.0 }
 0x165   : > { %v1079_v20 = vmul.f32 %v1588_v49, %v2621_v30  ;;  %1225 = vst [vmem:[%s1993_s13 + $0xa0] sm:$0xff] %v1161_v32  ;;  %v1193_v48 = vmul.f32 %v1643_v37, %v1063_v22  ;;  %v1083_v26 = vand.u32 2147483648, %v2621_v30  ;;  %1597 = vrsqrt.f32 %v2704_v2  ;;  %v1649_v49 = vld [vmem:[%s1717_s24 + $0x1d0] sm:$0xff] }
 0x166   : > { %v857_v8 = vsel %vm856_vm8, %v2615_v55, %v855_v52  ;;  %vm842_vm12 = vcmp.eq.f32.partialorder %v2656_v1, inf  ;;  %vm844_vm13 = vcmp.eq.f32.partialorder %v2656_v1, 0.0  ;;  %v2739_v40 = vadd.f32 %v2652_v6, %v2292_v51 }
 0x167   : > { %v860_v61 = vsel %vm858_vm9, %v859_v56, %v857_v8  ;;  %v1081_v47 = vsel %vm1080_vm10, %v2621_v30, %v1079_v20  ;;  %v1590_v31 = vpop.eup %1589  ;;  %1257 = vst [vmem:[%s1993_s13 + $0x1a0] sm:$0xff] %v1193_v48  ;;  %v2743_v55 = vadd.f32 %v2652_v6, %v2300_v15  ;;  %v1645_v30 = vld [vmem:[%s1717_s24 + $0x1b8] sm:$0xff]  ;;  %v845_v46 = vand.u32 2147483648, %v2656_v1 }
 0x168   : > { %v1164_v18 = vmul.f32 %v1644_v7, %v860_v61  ;;  %v1084_v3 = vsel %vm1082_vm11, %v1083_v26, %v1081_v47  ;;  %v841_v57 = vmul.f32 %v1590_v31, %v2656_v1  ;;  %v2750_v35 = vadd.f32 %v2652_v6, %v2302_v54 }
 0x169   : > { %v1196_v0 = vmul.f32 %v1645_v30, %v1084_v3  ;;  %vm1066_vm14 = vcmp.eq.f32.partialorder %v2660_v50, inf  ;;  %vm1068_vm15 = vcmp.eq.f32.partialorder %v2660_v50, 0.0  ;;  %v1069_v51 = vand.u32 2147483648, %v2660_v50  ;;  %v1651_v3 = vld [vmem:[%s1717_s24 + $0x1c0] sm:$0xff] }
 0x16a   : > { %v1592_v9 = vpop.eup %1591  ;;  %1228 = vst [vmem:[%s1993_s13 + $0xb8] sm:$0xff] %v1164_v18  ;;  %1599 = vrsqrt.f32 %v2739_v40  ;;  %v843_v63 = vsel %vm842_vm12, %v2656_v1, %v841_v57  ;;  %v2765_v14 = vadd.f32 %v2652_v6, %v2312_v23  ;;  %vm877_vm0 = vcmp.eq.f32.partialorder %v2670_v60, inf  ;;  %v1652_v57 = vld [vmem:[%s1717_s24 + $0xd8] sm:$0xff] }
 0x16b   : > { %v1594_v15 = vpop.eup %1593  ;;  %1260 = vst [vmem:[%s1993_s13 + $0x1b8] sm:$0xff] %v1196_v0  ;;  %v1065_v54 = vmul.f32 %v1592_v9, %v2660_v50  ;;  %1601 = vrsqrt.f32 %v2743_v55  ;;  %v846_v58 = vsel %vm844_vm13, %v845_v46, %v843_v63  ;;  %vm879_vm1 = vcmp.eq.f32.partialorder %v2670_v60, 0.0  ;;  %v1653_v63 = vld [vmem:[%s1717_s24 + $0x1d8] sm:$0xff] }
 0x16c   : > { %v876_v16 = vmul.f32 %v1594_v15, %v2670_v60  ;;  %v1162_v21 = vmul.f32 %v1646_v62, %v846_v58  ;;  %v880_v23 = vand.u32 2147483648, %v2670_v60  ;;  %1603 = vrsqrt.f32 %v2750_v35  ;;  %v1654_v62 = vld [vmem:[%s1717_s24 + $0xc8] sm:$0xff] }
 0x16d   : > { %v1596_v13 = vpop.eup %1595  ;;  %v1067_v29 = vsel %vm1066_vm14, %v2660_v50, %v1065_v54  ;;  %vm1101_vm2 = vcmp.eq.f32.partialorder %v2682_v11, inf  ;;  %v1104_v33 = vand.u32 2147483648, %v2682_v11  ;;  %1605 = vrsqrt.f32 %v2765_v14  ;;  %v1648_v50 = vld [vmem:[%s1717_s24 + $0xd0] sm:$0xff] }
 0x16e   : > { %v1070_v1 = vsel %vm1068_vm15, %v1069_v51, %v1067_v29  ;;  %v878_v34 = vsel %vm877_vm0, %v2670_v60, %v876_v16  ;;  %v1100_v28 = vmul.f32 %v1596_v13, %v2682_v11  ;;  %1226 = vst [vmem:[%s1993_s13 + $0xa8] sm:$0xff] %v1162_v21  ;;  %vm1103_vm3 = vcmp.eq.f32.partialorder %v2682_v11, 0.0 }
 0x16f   : > { %v1194_v4 = vmul.f32 %v1647_v5, %v1070_v1  ;;  %v881_v53 = vsel %vm879_vm1, %v880_v23, %v878_v34  ;;  %v1598_v41 = vpop.eup %1597  ;;  %vm863_vm4 = vcmp.eq.f32.partialorder %v2704_v2, inf  ;;  %v2795_v59 = vadd.f32 %v2652_v6, %v2314_v36 }
 0x170   : > { %v1167_v45 = vmul.f32 %v1648_v50, %v881_v53  ;;  %v1102_v43 = vsel %vm1101_vm2, %v2682_v11, %v1100_v28  ;;  %v862_v42 = vmul.f32 %v1598_v41, %v2704_v2  ;;  %v866_v32 = vand.u32 2147483648, %v2704_v2  ;;  %v1655_v50 = vld [vmem:[%s1717_s24 + $0x1c8] sm:$0xff] }
 0x171   : > { %1258 = vst [vmem:[%s1993_s13 + $0x1a8] sm:$0xff] %v1194_v4  ;;  %v1105_v60 = vsel %vm1103_vm3, %v1104_v33, %v1102_v43  ;;  %v2802_v11 = vadd.f32 %v2652_v6, %v2355_v44  ;;  %v2806_v39 = vadd.f32 %v2652_v6, %v2357_v25  ;;  %vm865_vm5 = vcmp.eq.f32.partialorder %v2704_v2, 0.0  ;;  %v1650_v25 = vld [vmem:[%s1717_s24 + $0xc0] sm:$0xff]  ;;  %v1656_v43 = vld [vmem:[%s1717_s24 + $0xf0] sm:$0xff] }
 0x172   : > { %1231 = vst [vmem:[%s1993_s13 + $0xd0] sm:$0xff] %v1167_v45  ;;  %v1199_v24 = vmul.f32 %v1649_v49, %v1105_v60  ;;  %v864_v52 = vsel %vm863_vm4, %v2704_v2, %v862_v42  ;;  %1607 = vrsqrt.f32 %v2795_v59  ;;  %v2813_v36 = vadd.f32 %v2652_v6, %v2364_v12 }
 0x173   : > { %v867_v22 = vsel %vm865_vm5, %v866_v32, %v864_v52  ;;  %vm1087_vm6 = vcmp.eq.f32.partialorder %v2739_v40, inf  ;;  %vm1089_vm7 = vcmp.eq.f32.partialorder %v2739_v40, 0.0  ;;  %1609 = vrsqrt.f32 %v2802_v11 }
 0x174   : > { %v1600_v56 = vpop.eup %1599  ;;  %1263 = vst [vmem:[%s1993_s13 + $0x1d0] sm:$0xff] %v1199_v24  ;;  %v1165_v20 = vmul.f32 %v1650_v25, %v867_v22  ;;  %v1090_v37 = vand.u32 2147483648, %v2739_v40  ;;  %vm884_vm8 = vcmp.eq.f32.partialorder %v2743_v55, inf  ;;  %vm886_vm9 = vcmp.eq.f32.partialorder %v2743_v55, 0.0 }
 0x175   : > { %v1602_v44 = vpop.eup %1601  ;;  %v1086_v2 = vmul.f32 %v1600_v56, %v2739_v40  ;;  %v887_v48 = vand.u32 2147483648, %v2743_v55  ;;  %1611 = vrsqrt.f32 %v2806_v39  ;;  %vm1108_vm10 = vcmp.eq.f32.partialorder %v2750_v35, inf }
 0x176   : > { %v883_v12 = vmul.f32 %v1602_v44, %v2743_v55  ;;  %v1604_v8 = vpop.eup %1603  ;;  %1229 = vst [vmem:[%s1993_s13 + $0xc0] sm:$0xff] %v1165_v20  ;;  %vm1110_vm11 = vcmp.eq.f32.partialorder %v2750_v35, 0.0  ;;  %1613 = vrsqrt.f32 %v2813_v36  ;;  %v1111_v7 = vand.u32 2147483648, %v2750_v35  ;;  %v1658_v44 = vld [vmem:[%s1717_s24 + $0xe0] sm:$0xff] }
 0x177   : > { %v1088_v26 = vsel %vm1087_vm6, %v2739_v40, %v1086_v2  ;;  %v1107_v31 = vmul.f32 %v1604_v8, %v2750_v35  ;;  %v1606_v18 = vpop.eup %1605  ;;  %vm870_vm12 = vcmp.eq.f32.partialorder %v2765_v14, inf  ;;  %v2843_v40 = vadd.f32 %v2652_v6, %v2366_v19 }
 0x178   : > { %v1091_v61 = vsel %vm1089_vm7, %v1090_v37, %v1088_v26  ;;  %v885_v47 = vsel %vm884_vm8, %v2743_v55, %v883_v12  ;;  %v869_v51 = vmul.f32 %v1606_v18, %v2765_v14  ;;  %v2850_v15 = vadd.f32 %v2652_v6, %v2377_v27  ;;  %v1659_v26 = vld [vmem:[%s1717_s24 + $0x1e0] sm:$0xff] }
 0x179   : > { %v1197_v30 = vmul.f32 %v1651_v3, %v1091_v61  ;;  %v888_v0 = vsel %vm886_vm9, %v887_v48, %v885_v47  ;;  %v1109_v9 = vsel %vm1108_vm10, %v2750_v35, %v1107_v31  ;;  %vm872_vm13 = vcmp.eq.f32.partialorder %v2765_v14, 0.0  ;;  %v1660_v31 = vld [vmem:[%s1717_s24 + $0xf8] sm:$0xff] }
 0x17a   : > { %v1168_v46 = vmul.f32 %v1652_v57, %v888_v0  ;;  %v1112_v55 = vsel %vm1110_vm11, %v1111_v7, %v1109_v9  ;;  %v873_v19 = vand.u32 2147483648, %v2765_v14  ;;  %1615 = vrsqrt.f32 %v2843_v40 }
 0x17b   : > { %1261 = vst [vmem:[%s1993_s13 + $0x1c0] sm:$0xff] %v1197_v30  ;;  %v1200_v54 = vmul.f32 %v1653_v63, %v1112_v55  ;;  %v871_v58 = vsel %vm870_vm12, %v2765_v14, %v869_v51  ;;  %vm1094_vm14 = vcmp.eq.f32.partialorder %v2795_v59, inf  ;;  %1617 = vrsqrt.f32 %v2850_v15  ;;  %v1661_v51 = vld [vmem:[%s1717_s24 + $0x1f8] sm:$0xff] }
 0x17c   : > { %1232 = vst [vmem:[%s1993_s13 + $0xd8] sm:$0xff] %v1168_v46  ;;  %v1608_v27 = vpop.eup %1607  ;;  %v874_v35 = vsel %vm872_vm13, %v873_v19, %v871_v58  ;;  %vm1096_vm15 = vcmp.eq.f32.partialorder %v2795_v59, 0.0  ;;  %v1097_v16 = vand.u32 2147483648, %v2795_v59  ;;  %vm905_vm0 = vcmp.eq.f32.partialorder %v2802_v11, inf  ;;  %v1662_v58 = vld [vmem:[%s1717_s24 + $0xe8] sm:$0xff] }
 0x17d   : > { %v1610_v13 = vpop.eup %1609  ;;  %1264 = vst [vmem:[%s1993_s13 + $0x1d8] sm:$0xff] %v1200_v54  ;;  %v1166_v21 = vmul.f32 %v1654_v62, %v874_v35  ;;  %v1093_v29 = vmul.f32 %v1608_v27, %v2795_v59  ;;  %v2871_v14 = vadd.f32 %v2652_v6, %v2379_v38  ;;  %v2875_v23 = vadd.f32 %v2652_v6, %v2392_v10 }
 0x17e   : > { %v904_v1 = vmul.f32 %v1610_v13, %v2802_v11  ;;  %vm907_vm1 = vcmp.eq.f32.partialorder %v2802_v11, 0.0  ;;  %v908_v34 = vand.u32 2147483648, %v2802_v11  ;;  %vm1129_vm2 = vcmp.eq.f32.partialorder %v2806_v39, inf  ;;  %v1663_v13 = vld [vmem:[%s1717_s24 + $0x1e8] sm:$0xff] }
 0x17f   : > { %v1612_v28 = vpop.eup %1611  ;;  %1230 = vst [vmem:[%s1993_s13 + $0xc8] sm:$0xff] %v1166_v21  ;;  %v1095_v38 = vsel %vm1094_vm14, %v2795_v59, %v1093_v29  ;;  %vm1131_vm3 = vcmp.eq.f32.partialorder %v2806_v39, 0.0  ;;  %1619 = vrsqrt.f32 %v2871_v14  ;;  %v2889_v10 = vadd.f32 %v2652_v6, %v2394_v17 }
 0x180   : > { %v1614_v5 = vpop.eup %1613  ;;  %v1098_v4 = vsel %vm1096_vm15, %v1097_v16, %v1095_v38  ;;  %v906_v53 = vsel %vm905_vm0, %v2802_v11, %v904_v1  ;;  %v1128_v33 = vmul.f32 %v1612_v28, %v2806_v39  ;;  %v1132_v41 = vand.u32 2147483648, %v2806_v39  ;;  %v1657_v11 = vld [vmem:[%s1717_s24 + $0x1f0] sm:$0xff] }
 0x181   : > { %v1198_v45 = vmul.f32 %v1655_v50, %v1098_v4  ;;  %v909_v17 = vsel %vm907_vm1, %v908_v34, %v906_v53  ;;  %v890_v6 = vmul.f32 %v1614_v5, %v2813_v36  ;;  %1621 = vrsqrt.f32 %v2875_v23 }
 0x182   : > { %v1171_v60 = vmul.f32 %v1656_v43, %v909_v17  ;;  %v1130_v42 = vsel %vm1129_vm2, %v2806_v39, %v1128_v33  ;;  %vm891_vm4 = vcmp.eq.f32.partialorder %v2813_v36, inf  ;;  %v894_v59 = vand.u32 2147483648, %v2813_v36 }
 0x183   : > { %1262 = vst [vmem:[%s1993_s13 + $0x1c8] sm:$0xff] %v1198_v45  ;;  %v1133_v49 = vsel %vm1131_vm3, %v1132_v41, %v1130_v42  ;;  %v892_v24 = vsel %vm891_vm4, %v2813_v36, %v890_v6  ;;  %vm893_vm5 = vcmp.eq.f32.partialorder %v2813_v36, 0.0  ;;  %1623 = vrsqrt.f32 %v2889_v10 }
 0x184   : > { %v1616_v32 = vpop.eup %1615  ;;  %1235 = vst [vmem:[%s1993_s13 + $0xf0] sm:$0xff] %v1171_v60  ;;  %v1203_v52 = vmul.f32 %v1657_v11, %v1133_v49  ;;  %v895_v56 = vsel %vm893_vm5, %v894_v59, %v892_v24  ;;  %vm1115_vm6 = vcmp.eq.f32.partialorder %v2843_v40, inf  ;;  %v1118_v39 = vand.u32 2147483648, %v2843_v40 }
 0x185   : > { %v1618_v22 = vpop.eup %1617  ;;  %v1169_v25 = vmul.f32 %v1658_v44, %v895_v56  ;;  %v1114_v20 = vmul.f32 %v1616_v32, %v2843_v40  ;;  %vm1117_vm7 = vcmp.eq.f32.partialorder %v2843_v40, 0.0  ;;  %vm912_vm8 = vcmp.eq.f32.partialorder %v2850_v15, inf }
 0x186   : > { %1267 = vst [vmem:[%s1993_s13 + $0x1f0] sm:$0xff] %v1203_v52  ;;  %v911_v36 = vmul.f32 %v1618_v22, %v2850_v15  ;;  %v915_v37 = vand.u32 2147483648, %v2850_v15  ;;  %vm914_vm9 = vcmp.eq.f32.partialorder %v2850_v15, 0.0  ;;  %vm1136_vm10 = vcmp.eq.f32.partialorder %v2871_v14, inf }
 0x187   : > { %1233 = vst [vmem:[%s1993_s13 + $0xe0] sm:$0xff] %v1169_v25  ;;  %v1116_v2 = vsel %vm1115_vm6, %v2843_v40, %v1114_v20  ;;  %v1139_v30 = vand.u32 2147483648, %v2871_v14  ;;  %vm1138_vm11 = vcmp.eq.f32.partialorder %v2871_v14, 0.0  ;;  %vm898_vm12 = vcmp.eq.f32.partialorder %v2875_v23, inf }
 0x188   : > { %v1119_v12 = vsel %vm1117_vm7, %v1118_v39, %v1116_v2  ;;  %v913_v48 = vsel %vm912_vm8, %v2850_v15, %v911_v36  ;;  %v901_v9 = vand.u32 2147483648, %v2875_v23  ;;  %vm900_vm13 = vcmp.eq.f32.partialorder %v2875_v23, 0.0 }
 0x189   : > { %v1620_v8 = vpop.eup %1619  ;;  %v1201_v61 = vmul.f32 %v1659_v26, %v1119_v12  ;;  %v916_v47 = vsel %vm914_vm9, %v915_v37, %v913_v48  ;;  %vm1122_vm14 = vcmp.eq.f32.partialorder %v2889_v10, inf  ;;  %v1125_v54 = vand.u32 2147483648, %v2889_v10 }
 0x18a   : > { %v1172_v7 = vmul.f32 %v1660_v31, %v916_v47  ;;  %v1135_v18 = vmul.f32 %v1620_v8, %v2871_v14  ;;  %vm1124_vm15 = vcmp.eq.f32.partialorder %v2889_v10, 0.0 }
 0x18b   : > { %v1622_v3 = vpop.eup %1621  ;;  %1265 = vst [vmem:[%s1993_s13 + $0x1e0] sm:$0xff] %v1201_v61 }
 0x18c   : > { %1236 = vst [vmem:[%s1993_s13 + $0xf8] sm:$0xff] %v1172_v7  ;;  %v1137_v0 = vsel %vm1136_vm10, %v2871_v14, %v1135_v18  ;;  %v897_v40 = vmul.f32 %v1622_v3, %v2875_v23 }
 0x18d   : > { %v1624_v57 = vpop.eup %1623  ;;  %v1140_v46 = vsel %vm1138_vm11, %v1139_v30, %v1137_v0 }
 0x18e   : > { %v1204_v15 = vmul.f32 %v1661_v51, %v1140_v46  ;;  %v899_v55 = vsel %vm898_vm12, %v2875_v23, %v897_v40  ;;  %v1121_v19 = vmul.f32 %v1624_v57, %v2889_v10 }
 0x18f   : > { %v902_v63 = vsel %vm900_vm13, %v901_v9, %v899_v55 }
 0x190   : > { %1268 = vst [vmem:[%s1993_s13 + $0x1f8] sm:$0xff] %v1204_v15  ;;  %v1170_v27 = vmul.f32 %v1662_v58, %v902_v63  ;;  %v1123_v35 = vsel %vm1122_vm14, %v2889_v10, %v1121_v19 }
 0x191   : > { %v1126_v16 = vsel %vm1124_vm15, %v1125_v54, %v1123_v35 }
 0x192   : > { %1234 = vst [vmem:[%s1993_s13 + $0xe8] sm:$0xff] %v1170_v27  ;;  %v1202_v62 = vmul.f32 %v1663_v13, %v1126_v16 }
 0x194   : > { %1266 = vst [vmem:[%s1993_s13 + $0x1e8] sm:$0xff] %v1202_v62 }
 0x195 PF: > { %s13_s12 = sadd.s32 1, %s1670_s12  }
 0x196   : > { %p10_p4 = scmp.ge.s32.totalorder %s13_s12, 4  }
 0x198   :  { %12 = sbr.rel (!%p10_p4) target bundleno = 1 (0x1), region = 62 }

// kernel: forward.41
= control target key start
LH: loop header
LB: loop body
LE: loop exit
PB: predicated region body
PF: predicated region fallthrough
CT: control target
= control target key end

     0   :  { %v12_v0 = vlaneseq  ;;  %v91_v9 = vmov 0.0   ;;  %v92_v15 = vmov 1966171168   ;;  %s132_s0 = inlined_call_operand.vmem [shape: f32[8,512], index: 0, kind: input, shape index: {}]   ;;  %s133_s1 = inlined_call_operand.vmem [shape: f32[1,512], index: 1, kind: output, shape index: {}]  }
   0x1   :  { %v17_v1 = vld [vmem:[%s132_s0] sm:$0xff]  ;;  %v18_v2 = vld [vmem:[%s132_s0 + $0x8] sm:$0xff]  ;;  %v19_v3 = vld [vmem:[%s132_s0 + $0x10] sm:$0xff]  ;;  %v57_v16 = vunpack.c.l.s4 %v92_v15 }
   0x2   :  { %vm112_vm0 = vcmp.lt.s32.totalorder %v12_v0, 512  ;;  %v20_v5 = vld [vmem:[%s132_s0 + $0x18] sm:$0xff]  ;;  %v22_v6 = vmul.f32 %v17_v1, %v17_v1  ;;  %v23_v7 = vmul.f32 %v18_v2, %v18_v2  ;;  %v24_v8 = vmul.f32 %v19_v3, %v19_v3 }
   0x3   :  { %16 = vst.msk [vmem:[%s133_s1] sm:$0xf] %vm112_vm0, %v91_v9  ;;  %v25_v10 = vmul.f32 %v20_v5, %v20_v5  ;;  %v58_v25 = vunpack.c.0.s8 %v57_v16  ;;  %v60_v29 = vshrl.u32 %v12_v0, 7 }
   0x4   :  { %v26_v11 = vrot.slane %v22_v6, 4  ;;  %v32_v12 = vrot.slane %v23_v7, 4  ;;  %v38_v13 = vrot.slane %v24_v8, 4 }
   0x5   :  { %v44_v14 = vrot.slane %v25_v10, 4  ;;  %v61_v38 = vsub.s32 %v58_v25, %v60_v29 }
   0x6   :  { %v27_v17 = vadd.f32 %v26_v11, %v22_v6  ;;  %v33_v18 = vadd.f32 %v32_v12, %v23_v7  ;;  %v39_v19 = vadd.f32 %v38_v13, %v24_v8 }
   0x7   :  { %v45_v20 = vadd.f32 %v44_v14, %v25_v10 }
   0x8   :  { %v28_v21 = vrot.slane %v27_v17, 2  ;;  %v34_v22 = vrot.slane %v33_v18, 2  ;;  %v40_v23 = vrot.slane %v39_v19, 2 }
   0x9   :  { %v46_v24 = vrot.slane %v45_v20, 2 }
   0xa   :  { %v29_v26 = vadd.f32 %v28_v21, %v27_v17  ;;  %v35_v27 = vadd.f32 %v34_v22, %v33_v18  ;;  %v41_v28 = vadd.f32 %v40_v23, %v39_v19  ;;  %v21_v45 = vld [vmem:[%s133_s1] sm:$0xf] }
   0xb   :  { %v47_v30 = vadd.f32 %v46_v24, %v45_v20 }
   0xc   :  { %v30_v31 = vrot.slane %v29_v26, 1  ;;  %v36_v32 = vrot.slane %v35_v27, 1  ;;  %v42_v33 = vrot.slane %v41_v28, 1 }
   0xd   :  { %v48_v34 = vrot.slane %v47_v30, 1 }
   0xe   :  { %v31_v35 = vadd.f32 %v30_v31, %v29_v26  ;;  %v37_v36 = vadd.f32 %v36_v32, %v35_v27  ;;  %v43_v37 = vadd.f32 %v42_v33, %v41_v28 }
   0xf   :  { %v49_v39 = vadd.f32 %v48_v34, %v47_v30 }
  0x10   :  { %v54_v40 = vcombine.low %v31_v35, %v37_v36 }
  0x11   :  { %v55_v41 = vcombine.low %v43_v37, %v49_v39 }
  0x12   :  { %v62_v42 = vrot.slane %v54_v40, %v61_v38 }
  0x13   :  { %v69_v43 = vrot.slane %v55_v41, %v61_v38 }
  0x15   :  { %v70_v44 = vcombine.low %v62_v42, %v69_v43 }
  0x17   :  { %v77_v46 = vrot.slane %v70_v44, %v61_v38 }
  0x19   :  { %v79_v47 = vadd.f32 %v77_v46, %v21_v45 }
  0x1b   :  { %84 = vst.msk [vmem:[%s133_s1] sm:$0xf] %vm112_vm0, %v79_v47 }

// kernel: forward.45
= control target key start
LH: loop header
LB: loop body
LE: loop exit
PB: predicated region body
PF: predicated region fallthrough
CT: control target
= control target key end

     0   :  { %v21_v0 = vlaneseq  ;;  %s804_s1 = inlined_call_operand.vmem [shape: f32[64,128], index: 1, kind: input, shape index: {}]   ;;  %s805_s0 = inlined_call_operand.vmem [shape: f32[16,128], index: 0, kind: input, shape index: {}]   ;;  %s806_s2 = inlined_call_operand.vmem [shape: f32[8,128], index: 2, kind: output, shape index: {}]  }
   0x1   :  { %v13_v2 = vld [vmem:[%s804_s1] sm:$0xff]  ;;  %v12_v8 = vld [vmem:[%s805_s0 + $0x8] sm:$0xff]  ;;  %v635_v34 = vld [vmem:[%s804_s1 + $0x10] sm:$0xff] }
   0x2   :  { %v22_v1 = vshrl.u32 %v21_v0, 7  ;;  %v11_v7 = vld [vmem:[%s805_s0] sm:$0xff]  ;;  %v14_v31 = vld [vmem:[%s804_s1 + $0x8] sm:$0xff]  ;;  %v19_v35 = vld [vmem:[%s804_s1 + $0x30] sm:$0xff] }
   0x3   :  { %v628_v32 = vld [vmem:[%s804_s1 + $0x28] sm:$0xff]  ;;  %v20_v53 = vld [vmem:[%s804_s1 + $0x38] sm:$0xff] }
   0x4   :  { %v586_v3 = vsub.s32 0, %v22_v1  ;;  %v588_v4 = vsub.s32 3, %v22_v1  ;;  %v590_v5 = vsub.s32 1, %v22_v1  ;;  %v592_v6 = vsub.s32 4, %v22_v1 }
   0x5   :  { %v600_v9 = vsub.s32 2, %v22_v1  ;;  %v602_v10 = vsub.s32 5, %v22_v1  ;;  %v616_v29 = vsub.s32 6, %v22_v1  ;;  %v618_v30 = vsub.s32 7, %v22_v1 }
   0x6   :  { %v24_v11 = vrot.slane %v13_v2, %v586_v3  ;;  %v32_v12 = vrot.slane %v13_v2, %v588_v4  ;;  %v38_v13 = vrot.slane %v13_v2, %v590_v5  ;;  %v46_v14 = vrot.slane %v13_v2, %v592_v6 }
   0x7   :  { %v52_v15 = vrot.slane %v13_v2, %v600_v9  ;;  %v60_v16 = vrot.slane %v13_v2, %v602_v10  ;;  %v68_v33 = vrot.slane %v13_v2, %v616_v29  ;;  %v78_v36 = vrot.slane %v13_v2, %v618_v30 }
   0x8   :  { %v25_v17 = vmul.f32 %v24_v11, %v11_v7  ;;  %v26_v18 = vmul.f32 %v24_v11, %v12_v8  ;;  %v39_v19 = vmul.f32 %v38_v13, %v11_v7  ;;  %v40_v20 = vmul.f32 %v38_v13, %v12_v8 }
   0x9   :  { %v53_v21 = vmul.f32 %v52_v15, %v11_v7  ;;  %v54_v22 = vmul.f32 %v52_v15, %v12_v8  ;;  %v88_v37 = vrot.slane %v14_v31, %v586_v3  ;;  %v96_v38 = vrot.slane %v14_v31, %v590_v5 }
   0xa   :  { %v33_v23 = vadd.f32 %v32_v12, %v25_v17  ;;  %v34_v24 = vadd.f32 %v32_v12, %v26_v18  ;;  %v47_v25 = vadd.f32 %v46_v14, %v39_v19  ;;  %v610_v26 = vadd.f32 %v46_v14, %v40_v20 }
   0xb   :  { %v612_v27 = vadd.f32 %v60_v16, %v53_v21  ;;  %v614_v28 = vadd.f32 %v60_v16, %v54_v22  ;;  %v104_v39 = vrot.slane %v14_v31, %v600_v9  ;;  %v112_v40 = vrot.slane %v14_v31, %v588_v4 }
   0xc   :  { %511 = vtanh.f32 %v33_v23  ;;  %v647_v41 = vrot.slane %v635_v34, %v600_v9  ;;  %v126_v42 = vrot.slane %v14_v31, %v592_v6  ;;  %v134_v43 = vrot.slane %v14_v31, %v602_v10 }
   0xd   :  { %513 = vtanh.f32 %v34_v24  ;;  %v142_v44 = vrot.slane %v14_v31, %v616_v29  ;;  %v654_v45 = vrot.slane %v635_v34, %v588_v4  ;;  %v658_v46 = vrot.slane %v628_v32, %v586_v3 }
   0xe   :  { %515 = vtanh.f32 %v47_v25  ;;  %v662_v47 = vrot.slane %v628_v32, %v590_v5  ;;  %v665_v48 = vrot.slane %v19_v35, %v586_v3  ;;  %v669_v49 = vrot.slane %v628_v32, %v600_v9 }
   0xf   :  { %517 = vtanh.f32 %v610_v26  ;;  %v673_v50 = vrot.slane %v628_v32, %v588_v4  ;;  %v677_v51 = vrot.slane %v628_v32, %v592_v6  ;;  %v156_v54 = vrot.slane %v14_v31, %v618_v30 }
  0x10   :  { %519 = vtanh.f32 %v612_v27  ;;  %v164_v55 = vrot.slane %v635_v34, %v586_v3  ;;  %v686_v56 = vrot.slane %v19_v35, %v590_v5  ;;  %v690_v57 = vrot.slane %v628_v32, %v602_v10 }
  0x11   :  { %521 = vtanh.f32 %v614_v28  ;;  %v693_v60 = vrot.slane %v19_v35, %v600_v9  ;;  %v696_v61 = vrot.slane %v19_v35, %v588_v4  ;;  %v699_v62 = vrot.slane %v19_v35, %v592_v6 }
  0x12   :  { %v702_v1 = vrot.slane %v19_v35, %v602_v10  ;;  %v705_v2 = vrot.slane %v19_v35, %v616_v29  ;;  %v708_v7 = vrot.slane %v19_v35, %v618_v30  ;;  %v711_v13 = vrot.slane %v20_v53, %v586_v3 }
  0x13   :  { %v714_v14 = vrot.slane %v20_v53, %v590_v5  ;;  %v172_v18 = vrot.slane %v635_v34, %v590_v5  ;;  %v180_v19 = vrot.slane %v635_v34, %v592_v6 }
  0x14   :  { %812 = vst [vmem:[#allocation2_spill] sm:$0xff] %v702_v1  ;;  %813 = vst [vmem:[#allocation3_spill] sm:$0xff] %v705_v2 }
  0x15   :  { %814 = vst [vmem:[#allocation4_spill] sm:$0xff] %v708_v7  ;;  %815 = vst [vmem:[#allocation5_spill] sm:$0xff] %v711_v13 }
  0x16   :  { %v512_v52 = vpop.eup %511  ;;  %816 = vst [vmem:[#allocation6_spill] sm:$0xff] %v714_v14 }
  0x17   :  { %v514_v58 = vpop.eup %513  ;;  %v69_v59 = vmul.f32 %v512_v52, %v68_v33 }
  0x18   :  { %v516_v63 = vpop.eup %515  ;;  %v70_v0 = vmul.f32 %v514_v58, %v68_v33 }
  0x19   :  { %v518_v8 = vpop.eup %517  ;;  %v71_v11 = vadd.f32 %v69_v59, %v33_v23  ;;  %v79_v12 = vmul.f32 %v516_v63, %v78_v36 }
  0x1a   :  { %v520_v15 = vpop.eup %519  ;;  %v72_v16 = vadd.f32 %v70_v0, %v34_v24  ;;  %v80_v17 = vmul.f32 %v518_v8, %v78_v36 }
  0x1b   :  { %v522_v20 = vpop.eup %521  ;;  %v81_v21 = vadd.f32 %v79_v12, %v47_v25  ;;  %v89_v22 = vmul.f32 %v520_v15, %v88_v37  ;;  %v97_v23 = vmul.f32 %v96_v38, %v71_v11  ;;  %v127_v31 = vmul.f32 %v126_v42, %v71_v11 }
  0x1c   :  { %v82_v33 = vadd.f32 %v80_v17, %v610_v26  ;;  %v90_v35 = vmul.f32 %v522_v20, %v88_v37  ;;  %v98_v52 = vmul.f32 %v96_v38, %v72_v16  ;;  %v128_v53 = vmul.f32 %v126_v42, %v72_v16 }
  0x1d   :  { %v91_v58 = vadd.f32 %v89_v22, %v612_v27  ;;  %v105_v24 = vmul.f32 %v104_v39, %v81_v21  ;;  %v135_v36 = vmul.f32 %v134_v43, %v81_v21  ;;  %v157_v59 = vmul.f32 %v156_v54, %v71_v11 }
  0x1e   :  { %v92_v63 = vadd.f32 %v90_v35, %v614_v28  ;;  %v106_v0 = vmul.f32 %v104_v39, %v82_v33  ;;  %v136_v8 = vmul.f32 %v134_v43, %v82_v33  ;;  %v158_v14 = vmul.f32 %v156_v54, %v72_v16 }
  0x1f   :  { %v107_v13 = vadd.f32 %v105_v24, %v97_v23  ;;  %v113_v25 = vmul.f32 %v112_v40, %v91_v58  ;;  %v137_v12 = vadd.f32 %v135_v36, %v127_v31  ;;  %v143_v15 = vmul.f32 %v142_v44, %v91_v58 }
  0x20   :  { %v108_v7 = vadd.f32 %v106_v0, %v98_v52  ;;  %v114_v2 = vmul.f32 %v112_v40, %v92_v63  ;;  %v138_v26 = vadd.f32 %v136_v8, %v128_v53  ;;  %v144_v37 = vmul.f32 %v142_v44, %v92_v63 }
  0x21   :  { %v115_v38 = vadd.f32 %v113_v25, %v107_v13  ;;  %v145_v42 = vadd.f32 %v143_v15, %v137_v12  ;;  %v165_v17 = vmul.f32 %v164_v55, %v81_v21  ;;  %v166_v27 = vmul.f32 %v164_v55, %v82_v33 }
  0x22   :  { %v116_v20 = vadd.f32 %v114_v2, %v108_v7  ;;  %v146_v22 = vadd.f32 %v144_v37, %v138_v26  ;;  %v173_v11 = vmul.f32 %v172_v18, %v91_v58  ;;  %v174_v1 = vmul.f32 %v172_v18, %v92_v63  ;;  %v16_v2 = vld [vmem:[%s804_s1 + $0x18] sm:$0xff] }
  0x23   :  { %v121_v28 = vadd.f32 %v647_v41, %v115_v38  ;;  %v151_v39 = vadd.f32 %v654_v45, %v145_v42  ;;  %v167_v43 = vadd.f32 %v165_v17, %v157_v59  ;;  %v168_v54 = vadd.f32 %v166_v27, %v158_v14 }
  0x24   :  { %v122_v16 = vadd.f32 %v647_v41, %v116_v20  ;;  %v152_v40 = vadd.f32 %v654_v45, %v146_v22  ;;  %v188_v7 = vrot.slane %v635_v34, %v602_v10  ;;  %v198_v41 = vrot.slane %v635_v34, %v616_v29 }
  0x25   :  { %v175_v23 = vadd.f32 %v173_v11, %v167_v43  ;;  %v176_v44 = vadd.f32 %v174_v1, %v168_v54  ;;  %523 = vtanh.f32 %v121_v28  ;;  %v737_v1 = vld [vmem:[%s804_s1 + $0x20] sm:$0xff]  ;;  %v208_v14 = vrot.slane %v635_v34, %v618_v30 }
  0x26   :  { %525 = vtanh.f32 %v122_v16  ;;  %v216_v18 = vrot.slane %v16_v2, %v586_v3  ;;  %v232_v33 = vrot.slane %v16_v2, %v600_v9  ;;  %v240_v35 = vrot.slane %v737_v1, %v590_v5 }
  0x27   :  { %v181_v13 = vadd.f32 %v180_v19, %v175_v23  ;;  %v182_v55 = vadd.f32 %v180_v19, %v176_v44  ;;  %527 = vtanh.f32 %v151_v39  ;;  %v224_v19 = vrot.slane %v16_v2, %v590_v5 }
  0x28   :  { %529 = vtanh.f32 %v152_v40  ;;  %v246_v52 = vrot.slane %v16_v2, %v588_v4  ;;  %v254_v24 = vrot.slane %v16_v2, %v592_v6  ;;  %v262_v36 = vrot.slane %v16_v2, %v602_v10 }
  0x29   :  { %531 = vtanh.f32 %v181_v13  ;;  %v270_v34 = vrot.slane %v737_v1, %v600_v9  ;;  %v276_v8 = vrot.slane %v16_v2, %v616_v29  ;;  %v284_v25 = vrot.slane %v16_v2, %v618_v30 }
  0x2a   :  { %533 = vtanh.f32 %v182_v55  ;;  %v292_v26 = vrot.slane %v737_v1, %v586_v3  ;;  %v300_v37 = vrot.slane %v737_v1, %v588_v4 }
  0x2f   :  { %v524_v45 = vpop.eup %523 }
  0x30   :  { %v526_v21 = vpop.eup %525  ;;  %v189_v31 = vmul.f32 %v524_v45, %v188_v7 }
  0x31   :  { %v528_v53 = vpop.eup %527  ;;  %v190_v58 = vmul.f32 %v526_v21, %v188_v7 }
  0x32   :  { %v530_v59 = vpop.eup %529  ;;  %v191_v63 = vadd.f32 %v189_v31, %v121_v28  ;;  %v199_v0 = vmul.f32 %v528_v53, %v198_v41 }
  0x33   :  { %v532_v12 = vpop.eup %531  ;;  %v192_v5 = vadd.f32 %v190_v58, %v122_v16  ;;  %v200_v15 = vmul.f32 %v530_v59, %v198_v41 }
  0x34   :  { %v534_v38 = vpop.eup %533  ;;  %v201_v42 = vadd.f32 %v199_v0, %v151_v39  ;;  %v209_v17 = vmul.f32 %v532_v12, %v208_v14  ;;  %v217_v9 = vmul.f32 %v216_v18, %v191_v63  ;;  %v247_v27 = vmul.f32 %v246_v52, %v191_v63 }
  0x35   :  { %v202_v20 = vadd.f32 %v200_v15, %v152_v40  ;;  %v210_v22 = vmul.f32 %v534_v38, %v208_v14  ;;  %v218_v11 = vmul.f32 %v216_v18, %v192_v5  ;;  %v248_v28 = vmul.f32 %v246_v52, %v192_v5 }
  0x36   :  { %v211_v43 = vadd.f32 %v209_v17, %v181_v13  ;;  %v225_v54 = vmul.f32 %v224_v19, %v201_v42  ;;  %v255_v23 = vmul.f32 %v254_v24, %v201_v42  ;;  %v277_v16 = vmul.f32 %v276_v8, %v191_v63 }
  0x37   :  { %v212_v44 = vadd.f32 %v210_v22, %v182_v55  ;;  %v226_v2 = vmul.f32 %v224_v19, %v202_v20  ;;  %v256_v7 = vmul.f32 %v254_v24, %v202_v20  ;;  %v278_v3 = vmul.f32 %v276_v8, %v192_v5 }
  0x38   :  { %v227_v41 = vadd.f32 %v225_v54, %v217_v9  ;;  %v233_v45 = vmul.f32 %v232_v33, %v211_v43  ;;  %v257_v4 = vadd.f32 %v255_v23, %v247_v27  ;;  %v263_v21 = vmul.f32 %v262_v36, %v211_v43 }
  0x39   :  { %v228_v39 = vadd.f32 %v226_v2, %v218_v11  ;;  %v234_v31 = vmul.f32 %v232_v33, %v212_v44  ;;  %v258_v53 = vadd.f32 %v256_v7, %v248_v28  ;;  %v264_v58 = vmul.f32 %v262_v36, %v212_v44 }
  0x3a   :  { %v235_v40 = vadd.f32 %v233_v45, %v227_v41  ;;  %v265_v14 = vadd.f32 %v263_v21, %v257_v4  ;;  %v285_v18 = vmul.f32 %v284_v25, %v201_v42  ;;  %v286_v52 = vmul.f32 %v284_v25, %v202_v20 }
  0x3b   :  { %v236_v13 = vadd.f32 %v234_v31, %v228_v39  ;;  %v266_v59 = vadd.f32 %v264_v58, %v258_v53  ;;  %v293_v0 = vmul.f32 %v292_v26, %v211_v43  ;;  %v294_v63 = vmul.f32 %v292_v26, %v212_v44 }
  0x3c   :  { %v241_v55 = vadd.f32 %v240_v35, %v235_v40  ;;  %v271_v19 = vadd.f32 %v270_v34, %v265_v14  ;;  %v287_v24 = vadd.f32 %v285_v18, %v277_v16  ;;  %v288_v8 = vadd.f32 %v286_v52, %v278_v3 }
  0x3d   :  { %v242_v12 = vadd.f32 %v240_v35, %v236_v13  ;;  %v272_v5 = vadd.f32 %v270_v34, %v266_v59  ;;  %v308_v25 = vrot.slane %v737_v1, %v592_v6  ;;  %v318_v26 = vrot.slane %v737_v1, %v602_v10 }
  0x3e   :  { %v295_v15 = vadd.f32 %v293_v0, %v287_v24  ;;  %v296_v38 = vadd.f32 %v294_v63, %v288_v8  ;;  %535 = vtanh.f32 %v241_v55  ;;  %v328_v34 = vrot.slane %v737_v1, %v616_v29 }
  0x3f   :  { %537 = vtanh.f32 %v242_v12  ;;  %v336_v9 = vrot.slane %v737_v1, %v618_v30  ;;  %v404_v10 = vrot.slane %v628_v32, %v616_v29  ;;  %v412_v54 = vrot.slane %v628_v32, %v618_v30 }
  0x40   :  { %v301_v33 = vadd.f32 %v300_v37, %v295_v15  ;;  %v302_v36 = vadd.f32 %v300_v37, %v296_v38  ;;  %539 = vtanh.f32 %v271_v19 }
  0x41   :  { %541 = vtanh.f32 %v272_v5 }
  0x42   :  { %543 = vtanh.f32 %v301_v33 }
  0x43   :  { %545 = vtanh.f32 %v302_v36 }
  0x48   :  { %v536_v42 = vpop.eup %535 }
  0x49   :  { %v538_v17 = vpop.eup %537  ;;  %v309_v35 = vmul.f32 %v536_v42, %v308_v25 }
  0x4a   :  { %v540_v37 = vpop.eup %539  ;;  %v310_v27 = vmul.f32 %v538_v17, %v308_v25 }
  0x4b   :  { %v542_v20 = vpop.eup %541  ;;  %v311_v22 = vadd.f32 %v309_v35, %v241_v55  ;;  %v319_v11 = vmul.f32 %v540_v37, %v318_v26 }
  0x4c   :  { %v544_v28 = vpop.eup %543  ;;  %v312_v43 = vadd.f32 %v310_v27, %v242_v12  ;;  %v320_v6 = vmul.f32 %v542_v20, %v318_v26 }
  0x4d   :  { %v546_v23 = vpop.eup %545  ;;  %v321_v16 = vadd.f32 %v319_v11, %v271_v19  ;;  %v329_v44 = vmul.f32 %v544_v28, %v328_v34  ;;  %v337_v2 = vmul.f32 %v336_v9, %v311_v22  ;;  %v367_v1 = vmul.f32 %v669_v49, %v311_v22  ;;  %v817_v11 = vld [vmem:[#allocation2_spill] sm:$0xff] }
  0x4e   :  { %v322_v7 = vadd.f32 %v320_v6, %v272_v5  ;;  %v330_v3 = vmul.f32 %v546_v23, %v328_v34  ;;  %v338_v41 = vmul.f32 %v336_v9, %v312_v43  ;;  %v368_v45 = vmul.f32 %v669_v49, %v312_v43 }
  0x4f   :  { %v331_v4 = vadd.f32 %v329_v44, %v301_v33  ;;  %v345_v21 = vmul.f32 %v658_v46, %v321_v16  ;;  %v375_v39 = vmul.f32 %v673_v50, %v321_v16  ;;  %v397_v29 = vmul.f32 %v690_v57, %v311_v22 }
  0x50   :  { %v332_v31 = vadd.f32 %v330_v3, %v302_v36  ;;  %v346_v30 = vmul.f32 %v658_v46, %v322_v7  ;;  %v376_v32 = vmul.f32 %v673_v50, %v322_v7  ;;  %v398_v53 = vmul.f32 %v690_v57, %v312_v43  ;;  %v818_v43 = vld [vmem:[#allocation3_spill] sm:$0xff]  ;;  %v820_v3 = vld [vmem:[#allocation5_spill] sm:$0xff] }
  0x51   :  { %v347_v58 = vadd.f32 %v345_v21, %v337_v2  ;;  %v353_v40 = vmul.f32 %v662_v47, %v331_v4  ;;  %v377_v14 = vadd.f32 %v375_v39, %v367_v1  ;;  %v383_v49 = vmul.f32 %v677_v51, %v331_v4  ;;  %v821_v39 = vld [vmem:[#allocation6_spill] sm:$0xff] }
  0x52   :  { %v348_v18 = vadd.f32 %v346_v30, %v338_v41  ;;  %v354_v52 = vmul.f32 %v662_v47, %v332_v31  ;;  %v378_v13 = vadd.f32 %v376_v32, %v368_v45  ;;  %v384_v59 = vmul.f32 %v677_v51, %v332_v31 }
  0x53   :  { %v355_v0 = vadd.f32 %v353_v40, %v347_v58  ;;  %v385_v63 = vadd.f32 %v383_v49, %v377_v14  ;;  %v405_v55 = vmul.f32 %v404_v10, %v321_v16  ;;  %v406_v46 = vmul.f32 %v404_v10, %v322_v7  ;;  %v819_v16 = vld [vmem:[#allocation4_spill] sm:$0xff] }
  0x54   :  { %v356_v19 = vadd.f32 %v354_v52, %v348_v18  ;;  %v386_v50 = vadd.f32 %v384_v59, %v378_v13  ;;  %v413_v24 = vmul.f32 %v412_v54, %v331_v4  ;;  %v414_v57 = vmul.f32 %v412_v54, %v332_v31 }
  0x55   :  { %v361_v8 = vadd.f32 %v665_v48, %v355_v0  ;;  %v391_v12 = vadd.f32 %v686_v56, %v385_v63  ;;  %v407_v5 = vadd.f32 %v405_v55, %v397_v29  ;;  %v408_v15 = vadd.f32 %v406_v46, %v398_v53 }
  0x56   :  { %v362_v38 = vadd.f32 %v665_v48, %v356_v19  ;;  %v392_v47 = vadd.f32 %v686_v56, %v386_v50  ;;  %v567_v32 = vmov 0.0  }
  0x57   :  { %v415_v33 = vadd.f32 %v413_v24, %v407_v5  ;;  %v416_v51 = vadd.f32 %v414_v57, %v408_v15  ;;  %547 = vtanh.f32 %v361_v8 }
  0x58   :  { %549 = vtanh.f32 %v362_v38 }
  0x59   :  { %v421_v36 = vadd.f32 %v693_v60, %v415_v33  ;;  %v422_v25 = vadd.f32 %v693_v60, %v416_v51  ;;  %551 = vtanh.f32 %v391_v12 }
  0x5a   :  { %553 = vtanh.f32 %v392_v47 }
  0x5b   :  { %555 = vtanh.f32 %v421_v36 }
  0x5c   :  { %557 = vtanh.f32 %v422_v25 }
  0x61   :  { %v548_v26 = vpop.eup %547 }
  0x62   :  { %v550_v42 = vpop.eup %549  ;;  %v429_v17 = vmul.f32 %v548_v26, %v696_v61 }
  0x63   :  { %v552_v35 = vpop.eup %551  ;;  %v430_v48 = vmul.f32 %v550_v42, %v696_v61 }
  0x64   :  { %v554_v56 = vpop.eup %553  ;;  %v431_v34 = vadd.f32 %v429_v17, %v361_v8  ;;  %v439_v9 = vmul.f32 %v552_v35, %v699_v62 }
  0x65   :  { %v556_v37 = vpop.eup %555  ;;  %v432_v27 = vadd.f32 %v430_v48, %v362_v38  ;;  %v440_v20 = vmul.f32 %v554_v56, %v699_v62 }
  0x66   :  { %v558_v60 = vpop.eup %557  ;;  %v441_v22 = vadd.f32 %v439_v9, %v391_v12  ;;  %v449_v28 = vmul.f32 %v556_v37, %v817_v11  ;;  %v457_v6 = vmul.f32 %v818_v43, %v431_v34 }
  0x67   :  { %v442_v10 = vadd.f32 %v440_v20, %v392_v47  ;;  %v450_v54 = vmul.f32 %v558_v60, %v817_v11  ;;  %v458_v23 = vmul.f32 %v818_v43, %v432_v27 }
  0x68   :  { %v451_v61 = vadd.f32 %v449_v28, %v421_v36  ;;  %v465_v44 = vmul.f32 %v819_v16, %v441_v22 }
  0x69   :  { %v452_v2 = vadd.f32 %v450_v54, %v422_v25  ;;  %v466_v1 = vmul.f32 %v819_v16, %v442_v10 }
  0x6a   :  { %v467_v7 = vadd.f32 %v465_v44, %v457_v6  ;;  %v473_v62 = vmul.f32 %v820_v3, %v451_v61 }
  0x6b   :  { %v468_v41 = vadd.f32 %v466_v1, %v458_v23  ;;  %v474_v45 = vmul.f32 %v820_v3, %v452_v2 }
  0x6c   :  { %v475_v4 = vadd.f32 %v473_v62, %v467_v7 }
  0x6d   :  { %v476_v21 = vadd.f32 %v474_v45, %v468_v41 }
  0x6e   :  { %v481_v29 = vadd.f32 %v821_v39, %v475_v4 }
  0x6f   :  { %v482_v31 = vadd.f32 %v821_v39, %v476_v21 }
  0x71   :  { %v483_v30 = vadd.f32 %v482_v31, %v481_v29 }
  0x73   :  { %vm484_vm0 = vcmp.gt.f32.partialorder %v483_v30, 0.0  ;;  %vm485_vm1 = vcmp.lt.f32.partialorder %v483_v30, 0.0 }
  0x74   :  { %v486_v53 = vsel %vm485_vm1, 1.0, %v567_v32 }
  0x75   :  { %v487_v58 = vsel %vm484_vm0, -1.0, %v486_v53 }
  0x76   :  { %v488_v40 = vmul.f32 %v487_v58, %v482_v31  ;;  %v495_v14 = vmul.f32 %v487_v58, %v481_v29 }
  0x78   :  { %v489_v49 = vsub.f32 0.0, %v488_v40  ;;  %v496_v18 = vsub.f32 0.0, %v495_v14 }
  0x7a   :  { %v490_v52 = vmul.f32 1.442695, %v489_v49  ;;  %v497_v13 = vmul.f32 1.442695, %v496_v18 }
  0x7c   :  { %559 = vpow2.f32 %v490_v52 }
  0x7d   :  { %561 = vpow2.f32 %v497_v13 }
  0x86   :  { %v560_v59 = vpop.eup %559 }
  0x87   :  { %v562_v0 = vpop.eup %561  ;;  %v492_v63 = vadd.f32 1.0, %v560_v59 }
  0x88   :  { %v499_v55 = vadd.f32 1.0, %v562_v0 }
  0x89   :  { %563 = vrcp.f32 %v492_v63 }
  0x8a   :  { %565 = vrcp.f32 %v499_v55 }
  0x93   :  { %v564_v46 = vpop.eup %563 }
  0x94   :  { %v566_v19 = vpop.eup %565 }
  0x95   :  { %v502_v50 = vsub.f32 %v564_v46, %v566_v19 }
  0x97   :  { %v503_v24 = vand.u32 2147483647, %v502_v50 }
  0x99   :  { %v504_v57 = vmax.f32 %v503_v24, 1e-09 }
  0x9b   :  { %505 = vst [vmem:[%s806_s2] sm:$0xff] %v504_v57 }

</bundles_post_ra>
